<compile_context>
chip_gen: v5e
topology: v5e:2x2
jax: 0.10.0
libtpu: 0.0.40
codegen_flags: <defaults>
</compile_context>

<pallas_src>
import functools

import jax
import jax.numpy as jnp
from jax import lax
from jax.experimental import pallas as pl
from jax.experimental.pallas import tpu as pltpu

_PADL = 8  # left halo offset in the conv scratch (keeps interior stores sublane-aligned)


# ----------------------------------------------------------------------------
# Kernels
# ----------------------------------------------------------------------------
def _fused_s1_kernel(x_ref, w1_ref, b1_ref, w2c_ref, b2_ref, w3s_ref, b3s_ref,
                     p1_ref, o_ref, scr_ref, *, H, W, bf, nb, cd):
    C = 2 * bf
    M = H * W

    # Zero only the halo strips (interior is fully overwritten every image).
    # Done every grid step so it stays correct if the "parallel" axis is split
    # across TensorCores (each core has its own scratch instance).
    zrow = jnp.zeros((1, scr_ref.shape[1], bf), scr_ref.dtype)
    zcol = jnp.zeros((H, 1, bf), scr_ref.dtype)
    scr_ref[0:1, :, :] = zrow
    scr_ref[H + 1:H + 2, :, :] = zrow
    scr_ref[1:H + 1, _PADL - 1:_PADL, :] = zcol
    scr_ref[1:H + 1, _PADL + W:_PADL + W + 1, :] = zcol

    for b in range(nb):  # small static unroll: amortizes per-grid-step overhead
        x = x_ref[b].reshape(M, C)
        x1 = x[:, :bf]                 # passthrough half (kept exact in input dtype)
        x2 = x[:, bf:].astype(cd)

        # branch2 stage 1: 1x1 conv (+BN folded) + ReLU
        y1 = jnp.maximum(
            jnp.dot(x2, w1_ref[...], preferred_element_type=jnp.float32)
            + b1_ref[...], 0.0)

        # branch2 stage 2: 3x3 conv (+BN) via a single im2col matmul (K = 9*bf)
        scr_ref[1:1 + H, _PADL:_PADL + W, :] = y1.reshape(H, W, bf).astype(scr_ref.dtype)
        taps = [scr_ref[dy:dy + H, _PADL - 1 + dx:_PADL - 1 + dx + W, :]
                for dy in range(3) for dx in range(3)]
        col = jnp.concatenate(taps, axis=-1).reshape(M, 9 * bf).astype(cd)
        y2 = jnp.dot(col, w2c_ref[...], preferred_element_type=jnp.float32) + b2_ref[...]

        # branch2 stage 3: 1x1 conv (+BN) + ReLU; channel_shuffle (odd columns)
        # already folded into w3s / b3s in the wrapper.
        y3 = jnp.maximum(
            jnp.dot(y2.astype(cd), w3s_ref[...], preferred_element_type=jnp.float32)
            + b3s_ref[...], 0.0)

        # shuffled concat: even output channels <- x1 (one-hot scatter matmul, K=bf)
        out = y3 + jnp.dot(x1, p1_ref[...], preferred_element_type=jnp.float32)
        o_ref[b] = out.reshape(H, W, C).astype(o_ref.dtype)


def _fused_s2_kernel(x_ref, wk3_ref, bk3_ref, w1_ref, b1_ref, w2c_ref, b2_ref,
                     wc1_ref, wc2_ref, bc_ref, o_ref, scr_ref,
                     *, Ho, Wo, cin, bf, nb, cd):
    C4 = 4 * cin
    Mo = Ho * Wo

    # halo strips of the branch2 conv scratch (only top row / left column needed
    # for the 2x2 space-to-depth conv); interior is overwritten every image.
    zrow = jnp.zeros((1, scr_ref.shape[1], 4 * bf), scr_ref.dtype)
    zcol = jnp.zeros((Ho + 1, 1, 4 * bf), scr_ref.dtype)
    scr_ref[0:1, :, :] = zrow
    scr_ref[:, _PADL - 1:_PADL, :] = zcol

    for b in range(nb):
        # x_ref holds the space-to-depth input, already zero-padded on top/left
        # by the wrapper: xpad[i+1, j+1, (p,q,c)] = x[2i+p, 2j+q, c]
        xpad = x_ref[b]                                             # (Ho+1, Wo+1, 4*cin)
        xs = xpad[1:1 + Ho, 1:1 + Wo, :].reshape(Mo, C4).astype(cd)

        # ---- branch1: 3x3 stride-2 conv (+BN) == 2x2 conv over the s2d input ----
        taps1 = [xpad[di:di + Ho, dj:dj + Wo, :]
                 for di in range(2) for dj in range(2)]
        col1 = jnp.concatenate(taps1, axis=-1).reshape(Mo, 4 * C4).astype(cd)
        c1 = jnp.dot(col1, wk3_ref[...], preferred_element_type=jnp.float32) + bk3_ref[...]

        # ---- branch2: 1x1 (+BN) + ReLU (block-diag over the 4 s2d position blocks)
        y1 = jnp.maximum(
            jnp.dot(xs, w1_ref[...], preferred_element_type=jnp.float32)
            + b1_ref[...], 0.0)

        # 3x3 stride-2 conv (+BN) == 2x2 conv over the s2d activations (im2col, K=16*bf)
        scr_ref[1:1 + Ho, _PADL:_PADL + Wo, :] = y1.reshape(Ho, Wo, 4 * bf).astype(scr_ref.dtype)
        taps2 = [scr_ref[di:di + Ho, _PADL - 1 + dj:_PADL - 1 + dj + Wo, :]
                 for di in range(2) for dj in range(2)]
        col2 = jnp.concatenate(taps2, axis=-1).reshape(Mo, 16 * bf).astype(cd)
        c2 = jnp.dot(col2, w2c_ref[...], preferred_element_type=jnp.float32) + b2_ref[...]

        # ---- final 1x1s of both branches + ReLU + concat + channel_shuffle,
        #      folded into matmuls whose output columns are already interleaved ----
        out = jnp.maximum(
            jnp.dot(c1.astype(cd), wc1_ref[...], preferred_element_type=jnp.float32)
            + jnp.dot(c2.astype(cd), wc2_ref[...], preferred_element_type=jnp.float32)
            + bc_ref[...], 0.0)
        o_ref[b] = out.reshape(Ho, Wo, 2 * bf).astype(o_ref.dtype)


# ----------------------------------------------------------------------------
# Wrappers
# ----------------------------------------------------------------------------
def _full_spec(a):
    nd = a.ndim
    return pl.BlockSpec(a.shape, lambda n, nd=nd: (0,) * nd)


def _pick_batch_block(N, H, W):
    if H * W > 1024:
        return 1
    for nb in (8, 4, 2):
        if N % nb == 0:
            return nb
    return 1


def _s2d_conv_weight(w9, cin, cout):
    """Rewrite a 3x3 stride-2 conv (tap-major (9, cin, cout) weights) as a 2x2 conv
    over the space-to-depth input (channel layout (p, q, c), p/q in {0,1})."""
    w4 = jnp.zeros((4, 4, cin, cout), w9.dtype)
    for dy in (-1, 0, 1):
        di, p = ((-1, 1) if dy == -1 else (0, dy))
        for dx in (-1, 0, 1):
            dj, q = ((-1, 1) if dx == -1 else (0, dx))
            t4 = (di + 1) * 2 + (dj + 1)
            w4 = w4.at[t4, 2 * p + q].set(w9[(dy + 1) * 3 + (dx + 1)])
    return w4.reshape(16 * cin, cout)


def fused_block_s1(x_nhwc, bp, compute_dtype):
    N, H, W, C = x_nhwc.shape
    bf = bp["w1"].shape[1]
    assert C == 2 * bf
    nb = _pick_batch_block(N, H, W)
    cd = compute_dtype

    w1 = bp["w1"].astype(cd)
    w2c = bp["w2"].reshape(9 * bf, bf).astype(cd)
    # fold channel_shuffle's odd-column scatter into the final 1x1 (+ its bias)
    w3s = jnp.zeros((bf, 2 * bf), jnp.float32).at[:, 1::2].set(bp["w3"]).astype(cd)
    b3s = jnp.zeros((1, 2 * bf), jnp.float32).at[:, 1::2].set(bp["b3"])
    # even output channels <- x1 passthrough (one-hot scatter, kept in input dtype)
    k = jnp.arange(bf)
    p1 = jnp.zeros((bf, 2 * bf), x_nhwc.dtype).at[k, 2 * k].set(1.0)

    args = (x_nhwc, w1, bp["b1"], w2c, bp["b2"], w3s, b3s, p1)
    in_specs = [pl.BlockSpec((nb, H, W, C), lambda n: (n, 0, 0, 0))]
    in_specs += [_full_spec(a) for a in args[1:]]
    return pl.pallas_call(
        functools.partial(_fused_s1_kernel, H=H, W=W, bf=bf, nb=nb, cd=cd),
        out_shape=jax.ShapeDtypeStruct((N, H, W, C), x_nhwc.dtype),
        grid=(N // nb,),
        in_specs=in_specs,
        out_specs=pl.BlockSpec((nb, H, W, C), lambda n: (n, 0, 0, 0)),
        scratch_shapes=[pltpu.VMEM((H + 2, W + _PADL + 1, bf), jnp.float32)],
        compiler_params=pltpu.CompilerParams(dimension_semantics=("parallel",)),
    )(*args)


def fused_block_s2(x_nchw, params, compute_dtype):
    N, Cin, H, W = x_nchw.shape
    assert H % 2 == 0 and W % 2 == 0
    Ho, Wo = H // 2, W // 2
    b1p, b2p = params["branch1"], params["branch2"]
    outc = b1p["w_k3"].shape[-1]
    bf = outc // 2
    nb = _pick_batch_block(N, Ho, Wo)
    cd = compute_dtype

    # space-to-depth (one XLA copy, fused with the NCHW->NHWC layout change)
    # + zero halo on top/left only (that's all a pad-1 stride-2 3x3 conv needs).
    xs = (x_nchw.reshape(N, Cin, Ho, 2, Wo, 2)
          .transpose(0, 2, 4, 3, 5, 1).reshape(N, Ho, Wo, 4 * Cin))
    xpad = jnp.pad(xs, ((0, 0), (1, 0), (1, 0), (0, 0)))

    wk3 = _s2d_conv_weight(b1p["w_k3"], Cin, outc).astype(cd)              # (16*Cin, outc)
    w2c = _s2d_conv_weight(b2p["w2"], bf, bf).astype(cd)                   # (16*bf, bf)
    w1bd = jnp.kron(jnp.eye(4, dtype=jnp.float32), b2p["w1"]).astype(cd)   # (4*Cin, 4*bf)
    b1t = jnp.tile(b2p["b1"], (1, 4))                                      # (1, 4*bf)
    # final 1x1s with channel_shuffle folded in: even cols <- branch1, odd <- branch2
    wc1 = jnp.zeros((outc, 2 * bf), jnp.float32).at[:, 0::2].set(b1p["w_pw"]).astype(cd)
    wc2 = jnp.zeros((bf, 2 * bf), jnp.float32).at[:, 1::2].set(b2p["w3"]).astype(cd)
    bc = jnp.zeros((1, 2 * bf), jnp.float32).at[:, 1::2].set(b2p["b3"])

    args = (xpad, wk3, b1p["b_k3"], w1bd, b1t, w2c, b2p["b2"], wc1, wc2, bc)
    in_specs = [pl.BlockSpec((nb, Ho + 1, Wo + 1, 4 * Cin), lambda n: (n, 0, 0, 0))]
    in_specs += [_full_spec(a) for a in args[1:]]
    return pl.pallas_call(
        functools.partial(_fused_s2_kernel, Ho=Ho, Wo=Wo, cin=Cin, bf=bf, nb=nb, cd=cd),
        out_shape=jax.ShapeDtypeStruct((N, Ho, Wo, 2 * bf), x_nchw.dtype),
        grid=(N // nb,),
        in_specs=in_specs,
        out_specs=pl.BlockSpec((nb, Ho, Wo, 2 * bf), lambda n: (n, 0, 0, 0)),
        scratch_shapes=[pltpu.VMEM((Ho + 1, Wo + _PADL, 4 * bf), jnp.float32)],
        compiler_params=pltpu.CompilerParams(dimension_semantics=("parallel",)),
    )(*args)


# ----------------------------------------------------------------------------
# Module forward
# ----------------------------------------------------------------------------
@functools.partial(jax.jit, static_argnames=("stride", "compute_dtype"))
def inverted_residual(params, x_nchw, *, stride, compute_dtype=jnp.bfloat16):
    if stride == 1:
        x = jnp.transpose(x_nchw, (0, 2, 3, 1))                   # NCHW -> NHWC
        out = fused_block_s1(x, params["branch2"], compute_dtype)
    else:
        out = fused_block_s2(x_nchw, params, compute_dtype)
    return jnp.transpose(out, (0, 3, 1, 2))                       # NHWC -> NCHW


# ----------------------------------------------------------------------------
# Plain-JAX reference (independent math path, for correctness check)
# ----------------------------------------------------------------------------
def _conv3x3_ref(x, w9, b, stride):
    k = w9.reshape(3, 3, w9.shape[1], w9.shape[2])
    y = lax.conv_general_dilated(
        x, k, window_strides=(stride, stride), padding=((1, 1), (1, 1)),
        dimension_numbers=("NHWC", "HWIO", "NHWC"), precision=lax.Precision.HIGHEST)
    return y + b.reshape(1, 1, 1, -1)


def _pw_ref(x, w, b, relu):
    y = jnp.einsum("nhwc,cd->nhwd", x, w, precision=lax.Precision.HIGHEST)
    y = y + b.reshape(1, 1, 1, -1)
    return jnp.maximum(y, 0.0) if relu else y


def reference_block(params, x_nchw, stride):
    x = jnp.transpose(x_nchw, (0, 2, 3, 1))
    b2p = params["branch2"]
    bf = b2p["w1"].shape[1]
    if stride == 1:
        x1, x2 = x[..., :bf], x[..., bf:]
        y = _pw_ref(x2, b2p["w1"], b2p["b1"], True)
        y = _conv3x3_ref(y, b2p["w2"], b2p["b2"], 1)
        y = _pw_ref(y, b2p["w3"], b2p["b3"], True)
        out = jnp.concatenate([x1, y], axis=-1)
    else:
        b1p = params["branch1"]
        z = _conv3x3_ref(x, b1p["w_k3"], b1p["b_k3"], 2)
        z = _pw_ref(z, b1p["w_pw"], jnp.zeros((1, bf), jnp.float32), True)
        y = _pw_ref(x, b2p["w1"], b2p["b1"], True)
        y = _conv3x3_ref(y, b2p["w2"], b2p["b2"], 2)
        y = _pw_ref(y, b2p["w3"], b2p["b3"], True)
        out = jnp.concatenate([z, y], axis=-1)
    N, H, W, C = out.shape
    out = out.reshape(N, H, W, 2, C // 2).transpose(0, 1, 2, 4, 3).reshape(N, H, W, C)
    return jnp.transpose(out, (0, 3, 1, 2))


# ----------------------------------------------------------------------------
# Deterministic parameter init (BN folded into conv weights, inference mode)
# ----------------------------------------------------------------------------
def _init_bn(key, c):
    kg, kb, km, kv = jax.random.split(key, 4)
    gamma = 1.0 + 0.1 * jax.random.normal(kg, (c,), jnp.float32)
    beta = 0.1 * jax.random.normal(kb, (c,), jnp.float32)
    mean = 0.1 * jax.random.normal(km, (c,), jnp.float32)
    var = 1.0 + 0.1 * jax.random.uniform(kv, (c,), jnp.float32)
    return gamma, beta, mean, var


def _fold_bn(w, bn, eps=1e-5):
    gamma, beta, mean, var = bn
    scale = gamma / jnp.sqrt(var + eps)
    return (w * scale).astype(jnp.float32), (beta - mean * scale).reshape(1, -1).astype(jnp.float32)


def init_params(key, input_c, out_c, stride):
    assert out_c % 2 == 0
    if stride == 1:
        assert input_c == out_c
    bf = out_c // 2
    ks = jax.random.split(key, 9)
    params = {}
    if stride == 2:
        # NOTE: matches the given module: 3x3+BN, then a 1x1 with NO BatchNorm, then ReLU.
        w_k3 = 0.1 * jax.random.normal(ks[0], (9, input_c, out_c), jnp.float32)
        w_k3, b_k3 = _fold_bn(w_k3, _init_bn(ks[1], out_c))
        w_pw = 0.1 * jax.random.normal(ks[2], (out_c, bf), jnp.float32)
        params["branch1"] = {"w_k3": w_k3, "b_k3": b_k3, "w_pw": w_pw}
    c_in2 = input_c if stride > 1 else bf
    w1, b1 = _fold_bn(0.1 * jax.random.normal(ks[3], (c_in2, bf), jnp.float32), _init_bn(ks[4], bf))
    w2, b2 = _fold_bn(0.1 * jax.random.normal(ks[5], (9, bf, bf), jnp.float32), _init_bn(ks[6], bf))
    w3, b3 = _fold_bn(0.1 * jax.random.normal(ks[7], (bf, bf), jnp.float32), _init_bn(ks[8], bf))
    params["branch2"] = {"w1": w1, "b1": b1, "w2": w2, "b2": b2, "w3": w3, "b3": b3}
    return params


# ----------------------------------------------------------------------------
if __name__ == "__main__":
    key = jax.random.PRNGKey(0)
    kx1, kp1, kx2, kp2 = jax.random.split(key, 4)

    # stride=1 block (input_c == out_c so the channel split feeds branch2)
    params_s1 = init_params(kp1, input_c=16, out_c=16, stride=1)
    x_s1 = jax.random.normal(kx1, (2, 16, 16, 16), jnp.float32)
    ref_s1 = reference_block(params_s1, x_s1, 1)

    # stride=2 block (both branches active, spatial downsampling)
    params_s2 = init_params(kp2, input_c=16, out_c=32, stride=2)
    x_s2 = jax.random.normal(kx2, (2, 16, 16, 16), jnp.float32)
    ref_s2 = reference_block(params_s2, x_s2, 2)

    # f32 MXU path: tight structural check against the independent reference
    out = jax.block_until_ready(
        inverted_residual(params_s1, x_s1, stride=1, compute_dtype=jnp.float32))
    assert out.shape == (2, 16, 16, 16)
    assert jnp.allclose(out, ref_s1, atol=2e-3, rtol=2e-3), \
        float(jnp.max(jnp.abs(out - ref_s1)))
    out = jax.block_until_ready(
        inverted_residual(params_s2, x_s2, stride=2, compute_dtype=jnp.float32))
    assert out.shape == (2, 32, 8, 8)
    assert jnp.allclose(out, ref_s2, atol=2e-3, rtol=2e-3), \
        float(jnp.max(jnp.abs(out - ref_s2)))

    # default bf16 MXU path (v6e/v7x native; f32 accumulation) - looser tolerance
    out = jax.block_until_ready(inverted_residual(params_s1, x_s1, stride=1))
    assert jnp.allclose(out, ref_s1, atol=4e-2, rtol=4e-2), \
        float(jnp.max(jnp.abs(out - ref_s1)))
    out = jax.block_until_ready(inverted_residual(params_s2, x_s2, stride=2))
    assert jnp.allclose(out, ref_s2, atol=4e-2, rtol=4e-2), \
        float(jnp.max(jnp.abs(out - ref_s2)))

    print("KERNEL_OK")
</pallas_src>

<mosaic_0001>
module attributes {stable_mosaic.version = 11 : i64} {
  func.func @_fused_s1_kernel(%arg0: i32, %arg1: memref<2x16x16x16xf32, #tpu.memory_space<vmem>>, %arg2: memref<8x8xf32, #tpu.memory_space<vmem>>, %arg3: memref<1x8xf32, #tpu.memory_space<vmem>>, %arg4: memref<72x8xf32, #tpu.memory_space<vmem>>, %arg5: memref<1x8xf32, #tpu.memory_space<vmem>>, %arg6: memref<8x16xf32, #tpu.memory_space<vmem>>, %arg7: memref<1x16xf32, #tpu.memory_space<vmem>>, %arg8: memref<8x16xf32, #tpu.memory_space<vmem>>, %arg9: memref<2x16x16x16xf32, #tpu.memory_space<vmem>>, %arg10: memref<18x25x8xf32, #tpu.memory_space<vmem>>) attributes {dimension_semantics = [#tpu.dimension_semantics<parallel>], iteration_bounds = array<i64: 1>, scalar_prefetch = 0 : i64, scratch_operands = 1 : i64, tpu.core_type = #tpu.core_type<tc>, window_params = [{transform_indices = @transform_0, window_bounds = array<i64: 2, 16, 16, 16>}, {pipeline_mode = #tpu.pipeline_mode<synchronous>, transform_indices = @transform_1, window_bounds = array<i64: 8, 8>}, {pipeline_mode = #tpu.pipeline_mode<synchronous>, transform_indices = @transform_2, window_bounds = array<i64: 1, 8>}, {pipeline_mode = #tpu.pipeline_mode<synchronous>, transform_indices = @transform_3, window_bounds = array<i64: 72, 8>}, {pipeline_mode = #tpu.pipeline_mode<synchronous>, transform_indices = @transform_4, window_bounds = array<i64: 1, 8>}, {pipeline_mode = #tpu.pipeline_mode<synchronous>, transform_indices = @transform_5, window_bounds = array<i64: 8, 16>}, {pipeline_mode = #tpu.pipeline_mode<synchronous>, transform_indices = @transform_6, window_bounds = array<i64: 1, 16>}, {pipeline_mode = #tpu.pipeline_mode<synchronous>, transform_indices = @transform_7, window_bounds = array<i64: 8, 16>}, {transform_indices = @transform_8, window_bounds = array<i64: 2, 16, 16, 16>}]} {
    %cst = arith.constant 0.000000e+00 : f32
    %0 = vector.broadcast %cst : f32 to vector<1x25x8xf32>
    %cst_0 = arith.constant 0.000000e+00 : f32
    %1 = vector.broadcast %cst_0 : f32 to vector<16x1x8xf32>
    %c0 = arith.constant 0 : index
    %c0_1 = arith.constant 0 : index
    %c0_2 = arith.constant 0 : index
    %2 = vector.load %arg10[%c0, %c0_1, %c0_2] : memref<18x25x8xf32, #tpu.memory_space<vmem>>, vector<1x25x8xf32>
    tpu.vector_store %arg10[%c0, %c0_1, %c0_2], %0 {strides = array<i32>} : memref<18x25x8xf32, #tpu.memory_space<vmem>>, vector<1x25x8xf32>,
    %c17 = arith.constant 17 : index
    %c0_3 = arith.constant 0 : index
    %c0_4 = arith.constant 0 : index
    %3 = vector.load %arg10[%c17, %c0_3, %c0_4] : memref<18x25x8xf32, #tpu.memory_space<vmem>>, vector<1x25x8xf32>
    tpu.vector_store %arg10[%c17, %c0_3, %c0_4], %0 {strides = array<i32>} : memref<18x25x8xf32, #tpu.memory_space<vmem>>, vector<1x25x8xf32>,
    %c1 = arith.constant 1 : index
    %c7 = arith.constant 7 : index
    %c0_5 = arith.constant 0 : index
    %4 = vector.load %arg10[%c1, %c7, %c0_5] : memref<18x25x8xf32, #tpu.memory_space<vmem>>, vector<16x1x8xf32>
    tpu.vector_store %arg10[%c1, %c7, %c0_5], %1 {strides = array<i32>} : memref<18x25x8xf32, #tpu.memory_space<vmem>>, vector<16x1x8xf32>,
    %c1_6 = arith.constant 1 : index
    %c24 = arith.constant 24 : index
    %c0_7 = arith.constant 0 : index
    %5 = vector.load %arg10[%c1_6, %c24, %c0_7] : memref<18x25x8xf32, #tpu.memory_space<vmem>>, vector<16x1x8xf32>
    tpu.vector_store %arg10[%c1_6, %c24, %c0_7], %1 {strides = array<i32>} : memref<18x25x8xf32, #tpu.memory_space<vmem>>, vector<16x1x8xf32>,
    %c0_8 = arith.constant 0 : index
    %c0_9 = arith.constant 0 : index
    %c0_10 = arith.constant 0 : index
    %c0_11 = arith.constant 0 : index
    %6 = vector.load %arg1[%c0_8, %c0_9, %c0_10, %c0_11] : memref<2x16x16x16xf32, #tpu.memory_space<vmem>>, vector<1x16x16x16xf32>
    %7 = vector.shape_cast %6 : vector<1x16x16x16xf32> to vector<16x16x16xf32>
    %8 = vector.shape_cast %7 : vector<16x16x16xf32> to vector<256x16xf32>
    %9 = vector.extract_strided_slice %8 {offsets = [0, 0], sizes = [256, 8], strides = [1, 1]} : vector<256x16xf32> to vector<256x8xf32>
    %10 = vector.extract_strided_slice %8 {offsets = [0, 8], sizes = [256, 8], strides = [1, 1]} : vector<256x16xf32> to vector<256x8xf32>
    %c0_12 = arith.constant 0 : index
    %c0_13 = arith.constant 0 : index
    %11 = vector.load %arg2[%c0_12, %c0_13] : memref<8x8xf32, #tpu.memory_space<vmem>>, vector<8x8xf32>
    %cst_14 = arith.constant dense<0.000000e+00> : vector<256x8xf32>
    %12 = tpu.matmul %10, %11, %cst_14 {dimension_numbers = #tpu.dot_dimension_numbers<[1], [0], [0], [1], [0, 0, 1, 1], [], []>} : vector<256x8xf32>, vector<8x8xf32>, vector<256x8xf32> -> vector<256x8xf32>
    %c0_15 = arith.constant 0 : index
    %c0_16 = arith.constant 0 : index
    %13 = vector.load %arg3[%c0_15, %c0_16] : memref<1x8xf32, #tpu.memory_space<vmem>>, vector<1x8xf32>
    %14 = vector.broadcast %13 : vector<1x8xf32> to vector<256x8xf32>
    %15 = arith.addf %12, %14 : vector<256x8xf32>
    %cst_17 = arith.constant 0.000000e+00 : f32
    %16 = vector.broadcast %cst_17 : f32 to vector<256x8xf32>
    %17 = arith.maximumf %15, %16 : vector<256x8xf32>
    %18 = vector.shape_cast %17 : vector<256x8xf32> to vector<16x16x8xf32>
    %c1_18 = arith.constant 1 : index
    %c8 = arith.constant 8 : index
    %c0_19 = arith.constant 0 : index
    %19 = vector.load %arg10[%c1_18, %c8, %c0_19] : memref<18x25x8xf32, #tpu.memory_space<vmem>>, vector<16x16x8xf32>
    tpu.vector_store %arg10[%c1_18, %c8, %c0_19], %18 {strides = array<i32>} : memref<18x25x8xf32, #tpu.memory_space<vmem>>, vector<16x16x8xf32>,
    %c0_20 = arith.constant 0 : index
    %c7_21 = arith.constant 7 : index
    %c0_22 = arith.constant 0 : index
    %20 = vector.load %arg10[%c0_20, %c7_21, %c0_22] : memref<18x25x8xf32, #tpu.memory_space<vmem>>, vector<16x16x8xf32>
    %c0_23 = arith.constant 0 : index
    %c8_24 = arith.constant 8 : index
    %c0_25 = arith.constant 0 : index
    %21 = vector.load %arg10[%c0_23, %c8_24, %c0_25] : memref<18x25x8xf32, #tpu.memory_space<vmem>>, vector<16x16x8xf32>
    %c0_26 = arith.constant 0 : index
    %c9 = arith.constant 9 : index
    %c0_27 = arith.constant 0 : index
    %22 = vector.load %arg10[%c0_26, %c9, %c0_27] : memref<18x25x8xf32, #tpu.memory_space<vmem>>, vector<16x16x8xf32>
    %c1_28 = arith.constant 1 : index
    %c7_29 = arith.constant 7 : index
    %c0_30 = arith.constant 0 : index
    %23 = vector.load %arg10[%c1_28, %c7_29, %c0_30] : memref<18x25x8xf32, #tpu.memory_space<vmem>>, vector<16x16x8xf32>
    %c1_31 = arith.constant 1 : index
    %c8_32 = arith.constant 8 : index
    %c0_33 = arith.constant 0 : index
    %24 = vector.load %arg10[%c1_31, %c8_32, %c0_33] : memref<18x25x8xf32, #tpu.memory_space<vmem>>, vector<16x16x8xf32>
    %c1_34 = arith.constant 1 : index
    %c9_35 = arith.constant 9 : index
    %c0_36 = arith.constant 0 : index
    %25 = vector.load %arg10[%c1_34, %c9_35, %c0_36] : memref<18x25x8xf32, #tpu.memory_space<vmem>>, vector<16x16x8xf32>
    %c2 = arith.constant 2 : index
    %c7_37 = arith.constant 7 : index
    %c0_38 = arith.constant 0 : index
    %26 = vector.load %arg10[%c2, %c7_37, %c0_38] : memref<18x25x8xf32, #tpu.memory_space<vmem>>, vector<16x16x8xf32>
    %c2_39 = arith.constant 2 : index
    %c8_40 = arith.constant 8 : index
    %c0_41 = arith.constant 0 : index
    %27 = vector.load %arg10[%c2_39, %c8_40, %c0_41] : memref<18x25x8xf32, #tpu.memory_space<vmem>>, vector<16x16x8xf32>
    %c2_42 = arith.constant 2 : index
    %c9_43 = arith.constant 9 : index
    %c0_44 = arith.constant 0 : index
    %28 = vector.load %arg10[%c2_42, %c9_43, %c0_44] : memref<18x25x8xf32, #tpu.memory_space<vmem>>, vector<16x16x8xf32>
    %29 = tpu.concatenate %20, %21, %22, %23, %24, %25, %26, %27, %28 in 2 : vector<16x16x8xf32>, vector<16x16x8xf32>, vector<16x16x8xf32>, vector<16x16x8xf32>, vector<16x16x8xf32>, vector<16x16x8xf32>, vector<16x16x8xf32>, vector<16x16x8xf32>, vector<16x16x8xf32> -> vector<16x16x72xf32>
    %30 = vector.shape_cast %29 : vector<16x16x72xf32> to vector<256x72xf32>
    %c0_45 = arith.constant 0 : index
    %c0_46 = arith.constant 0 : index
    %31 = vector.load %arg4[%c0_45, %c0_46] : memref<72x8xf32, #tpu.memory_space<vmem>>, vector<72x8xf32>
    %cst_47 = arith.constant dense<0.000000e+00> : vector<256x8xf32>
    %32 = tpu.matmul %30, %31, %cst_47 {dimension_numbers = #tpu.dot_dimension_numbers<[1], [0], [0], [1], [0, 0, 1, 1], [], []>} : vector<256x72xf32>, vector<72x8xf32>, vector<256x8xf32> -> vector<256x8xf32>
    %c0_48 = arith.constant 0 : index
    %c0_49 = arith.constant 0 : index
    %33 = vector.load %arg5[%c0_48, %c0_49] : memref<1x8xf32, #tpu.memory_space<vmem>>, vector<1x8xf32>
    %34 = vector.broadcast %33 : vector<1x8xf32> to vector<256x8xf32>
    %35 = arith.addf %32, %34 : vector<256x8xf32>
    %c0_50 = arith.constant 0 : index
    %c0_51 = arith.constant 0 : index
    %36 = vector.load %arg6[%c0_50, %c0_51] : memref<8x16xf32, #tpu.memory_space<vmem>>, vector<8x16xf32>
    %cst_52 = arith.constant dense<0.000000e+00> : vector<256x16xf32>
    %37 = tpu.matmul %35, %36, %cst_52 {dimension_numbers = #tpu.dot_dimension_numbers<[1], [0], [0], [1], [0, 0, 1, 1], [], []>} : vector<256x8xf32>, vector<8x16xf32>, vector<256x16xf32> -> vector<256x16xf32>
    %c0_53 = arith.constant 0 : index
    %c0_54 = arith.constant 0 : index
    %38 = vector.load %arg7[%c0_53, %c0_54] : memref<1x16xf32, #tpu.memory_space<vmem>>, vector<1x16xf32>
    %39 = vector.broadcast %38 : vector<1x16xf32> to vector<256x16xf32>
    %40 = arith.addf %37, %39 : vector<256x16xf32>
    %cst_55 = arith.constant 0.000000e+00 : f32
    %41 = vector.broadcast %cst_55 : f32 to vector<256x16xf32>
    %42 = arith.maximumf %40, %41 : vector<256x16xf32>
    %c0_56 = arith.constant 0 : index
    %c0_57 = arith.constant 0 : index
    %43 = vector.load %arg8[%c0_56, %c0_57] : memref<8x16xf32, #tpu.memory_space<vmem>>, vector<8x16xf32>
    %cst_58 = arith.constant dense<0.000000e+00> : vector<256x16xf32>
    %44 = tpu.matmul %9, %43, %cst_58 {dimension_numbers = #tpu.dot_dimension_numbers<[1], [0], [0], [1], [0, 0, 1, 1], [], []>} : vector<256x8xf32>, vector<8x16xf32>, vector<256x16xf32> -> vector<256x16xf32>
    %45 = arith.addf %42, %44 : vector<256x16xf32>
    %46 = vector.shape_cast %45 : vector<256x16xf32> to vector<16x16x16xf32>
    %c0_59 = arith.constant 0 : index
    %c0_60 = arith.constant 0 : index
    %c0_61 = arith.constant 0 : index
    %c0_62 = arith.constant 0 : index
    %47 = vector.load %arg9[%c0_59, %c0_60, %c0_61, %c0_62] : memref<2x16x16x16xf32, #tpu.memory_space<vmem>>, vector<1x16x16x16xf32>
    %48 = vector.shape_cast %47 : vector<1x16x16x16xf32> to vector<16x16x16xf32>
    %49 = vector.shape_cast %46 : vector<16x16x16xf32> to vector<1x16x16x16xf32>
    tpu.vector_store %arg9[%c0_59, %c0_60, %c0_61, %c0_62], %49 {strides = array<i32>} : memref<2x16x16x16xf32, #tpu.memory_space<vmem>>, vector<1x16x16x16xf32>,
    %c1_63 = arith.constant 1 : index
    %c0_64 = arith.constant 0 : index
    %c0_65 = arith.constant 0 : index
    %c0_66 = arith.constant 0 : index
    %50 = vector.load %arg1[%c1_63, %c0_64, %c0_65, %c0_66] : memref<2x16x16x16xf32, #tpu.memory_space<vmem>>, vector<1x16x16x16xf32>
    %51 = vector.shape_cast %50 : vector<1x16x16x16xf32> to vector<16x16x16xf32>
    %52 = vector.shape_cast %51 : vector<16x16x16xf32> to vector<256x16xf32>
    %53 = vector.extract_strided_slice %52 {offsets = [0, 0], sizes = [256, 8], strides = [1, 1]} : vector<256x16xf32> to vector<256x8xf32>
    %54 = vector.extract_strided_slice %52 {offsets = [0, 8], sizes = [256, 8], strides = [1, 1]} : vector<256x16xf32> to vector<256x8xf32>
    %c0_67 = arith.constant 0 : index
    %c0_68 = arith.constant 0 : index
    %55 = vector.load %arg2[%c0_67, %c0_68] : memref<8x8xf32, #tpu.memory_space<vmem>>, vector<8x8xf32>
    %cst_69 = arith.constant dense<0.000000e+00> : vector<256x8xf32>
    %56 = tpu.matmul %54, %55, %cst_69 {dimension_numbers = #tpu.dot_dimension_numbers<[1], [0], [0], [1], [0, 0, 1, 1], [], []>} : vector<256x8xf32>, vector<8x8xf32>, vector<256x8xf32> -> vector<256x8xf32>
    %c0_70 = arith.constant 0 : index
    %c0_71 = arith.constant 0 : index
    %57 = vector.load %arg3[%c0_70, %c0_71] : memref<1x8xf32, #tpu.memory_space<vmem>>, vector<1x8xf32>
    %58 = vector.broadcast %57 : vector<1x8xf32> to vector<256x8xf32>
    %59 = arith.addf %56, %58 : vector<256x8xf32>
    %cst_72 = arith.constant 0.000000e+00 : f32
    %60 = vector.broadcast %cst_72 : f32 to vector<256x8xf32>
    %61 = arith.maximumf %59, %60 : vector<256x8xf32>
    %62 = vector.shape_cast %61 : vector<256x8xf32> to vector<16x16x8xf32>
    %c1_73 = arith.constant 1 : index
    %c8_74 = arith.constant 8 : index
    %c0_75 = arith.constant 0 : index
    %63 = vector.load %arg10[%c1_73, %c8_74, %c0_75] : memref<18x25x8xf32, #tpu.memory_space<vmem>>, vector<16x16x8xf32>
    tpu.vector_store %arg10[%c1_73, %c8_74, %c0_75], %62 {strides = array<i32>} : memref<18x25x8xf32, #tpu.memory_space<vmem>>, vector<16x16x8xf32>,
    %c0_76 = arith.constant 0 : index
    %c7_77 = arith.constant 7 : index
    %c0_78 = arith.constant 0 : index
    %64 = vector.load %arg10[%c0_76, %c7_77, %c0_78] : memref<18x25x8xf32, #tpu.memory_space<vmem>>, vector<16x16x8xf32>
    %c0_79 = arith.constant 0 : index
    %c8_80 = arith.constant 8 : index
    %c0_81 = arith.constant 0 : index
    %65 = vector.load %arg10[%c0_79, %c8_80, %c0_81] : memref<18x25x8xf32, #tpu.memory_space<vmem>>, vector<16x16x8xf32>
    %c0_82 = arith.constant 0 : index
    %c9_83 = arith.constant 9 : index
    %c0_84 = arith.constant 0 : index
    %66 = vector.load %arg10[%c0_82, %c9_83, %c0_84] : memref<18x25x8xf32, #tpu.memory_space<vmem>>, vector<16x16x8xf32>
    %c1_85 = arith.constant 1 : index
    %c7_86 = arith.constant 7 : index
    %c0_87 = arith.constant 0 : index
    %67 = vector.load %arg10[%c1_85, %c7_86, %c0_87] : memref<18x25x8xf32, #tpu.memory_space<vmem>>, vector<16x16x8xf32>
    %c1_88 = arith.constant 1 : index
    %c8_89 = arith.constant 8 : index
    %c0_90 = arith.constant 0 : index
    %68 = vector.load %arg10[%c1_88, %c8_89, %c0_90] : memref<18x25x8xf32, #tpu.memory_space<vmem>>, vector<16x16x8xf32>
    %c1_91 = arith.constant 1 : index
    %c9_92 = arith.constant 9 : index
    %c0_93 = arith.constant 0 : index
    %69 = vector.load %arg10[%c1_91, %c9_92, %c0_93] : memref<18x25x8xf32, #tpu.memory_space<vmem>>, vector<16x16x8xf32>
    %c2_94 = arith.constant 2 : index
    %c7_95 = arith.constant 7 : index
    %c0_96 = arith.constant 0 : index
    %70 = vector.load %arg10[%c2_94, %c7_95, %c0_96] : memref<18x25x8xf32, #tpu.memory_space<vmem>>, vector<16x16x8xf32>
    %c2_97 = arith.constant 2 : index
    %c8_98 = arith.constant 8 : index
    %c0_99 = arith.constant 0 : index
    %71 = vector.load %arg10[%c2_97, %c8_98, %c0_99] : memref<18x25x8xf32, #tpu.memory_space<vmem>>, vector<16x16x8xf32>
    %c2_100 = arith.constant 2 : index
    %c9_101 = arith.constant 9 : index
    %c0_102 = arith.constant 0 : index
    %72 = vector.load %arg10[%c2_100, %c9_101, %c0_102] : memref<18x25x8xf32, #tpu.memory_space<vmem>>, vector<16x16x8xf32>
    %73 = tpu.concatenate %64, %65, %66, %67, %68, %69, %70, %71, %72 in 2 : vector<16x16x8xf32>, vector<16x16x8xf32>, vector<16x16x8xf32>, vector<16x16x8xf32>, vector<16x16x8xf32>, vector<16x16x8xf32>, vector<16x16x8xf32>, vector<16x16x8xf32>, vector<16x16x8xf32> -> vector<16x16x72xf32>
    %74 = vector.shape_cast %73 : vector<16x16x72xf32> to vector<256x72xf32>
    %c0_103 = arith.constant 0 : index
    %c0_104 = arith.constant 0 : index
    %75 = vector.load %arg4[%c0_103, %c0_104] : memref<72x8xf32, #tpu.memory_space<vmem>>, vector<72x8xf32>
    %cst_105 = arith.constant dense<0.000000e+00> : vector<256x8xf32>
    %76 = tpu.matmul %74, %75, %cst_105 {dimension_numbers = #tpu.dot_dimension_numbers<[1], [0], [0], [1], [0, 0, 1, 1], [], []>} : vector<256x72xf32>, vector<72x8xf32>, vector<256x8xf32> -> vector<256x8xf32>
    %c0_106 = arith.constant 0 : index
    %c0_107 = arith.constant 0 : index
    %77 = vector.load %arg5[%c0_106, %c0_107] : memref<1x8xf32, #tpu.memory_space<vmem>>, vector<1x8xf32>
    %78 = vector.broadcast %77 : vector<1x8xf32> to vector<256x8xf32>
    %79 = arith.addf %76, %78 : vector<256x8xf32>
    %c0_108 = arith.constant 0 : index
    %c0_109 = arith.constant 0 : index
    %80 = vector.load %arg6[%c0_108, %c0_109] : memref<8x16xf32, #tpu.memory_space<vmem>>, vector<8x16xf32>
    %cst_110 = arith.constant dense<0.000000e+00> : vector<256x16xf32>
    %81 = tpu.matmul %79, %80, %cst_110 {dimension_numbers = #tpu.dot_dimension_numbers<[1], [0], [0], [1], [0, 0, 1, 1], [], []>} : vector<256x8xf32>, vector<8x16xf32>, vector<256x16xf32> -> vector<256x16xf32>
    %c0_111 = arith.constant 0 : index
    %c0_112 = arith.constant 0 : index
    %82 = vector.load %arg7[%c0_111, %c0_112] : memref<1x16xf32, #tpu.memory_space<vmem>>, vector<1x16xf32>
    %83 = vector.broadcast %82 : vector<1x16xf32> to vector<256x16xf32>
    %84 = arith.addf %81, %83 : vector<256x16xf32>
    %cst_113 = arith.constant 0.000000e+00 : f32
    %85 = vector.broadcast %cst_113 : f32 to vector<256x16xf32>
    %86 = arith.maximumf %84, %85 : vector<256x16xf32>
    %c0_114 = arith.constant 0 : index
    %c0_115 = arith.constant 0 : index
    %87 = vector.load %arg8[%c0_114, %c0_115] : memref<8x16xf32, #tpu.memory_space<vmem>>, vector<8x16xf32>
    %cst_116 = arith.constant dense<0.000000e+00> : vector<256x16xf32>
    %88 = tpu.matmul %53, %87, %cst_116 {dimension_numbers = #tpu.dot_dimension_numbers<[1], [0], [0], [1], [0, 0, 1, 1], [], []>} : vector<256x8xf32>, vector<8x16xf32>, vector<256x16xf32> -> vector<256x16xf32>
    %89 = arith.addf %86, %88 : vector<256x16xf32>
    %90 = vector.shape_cast %89 : vector<256x16xf32> to vector<16x16x16xf32>
    %c1_117 = arith.constant 1 : index
    %c0_118 = arith.constant 0 : index
    %c0_119 = arith.constant 0 : index
    %c0_120 = arith.constant 0 : index
    %91 = vector.load %arg9[%c1_117, %c0_118, %c0_119, %c0_120] : memref<2x16x16x16xf32, #tpu.memory_space<vmem>>, vector<1x16x16x16xf32>
    %92 = vector.shape_cast %91 : vector<1x16x16x16xf32> to vector<16x16x16xf32>
    %93 = vector.shape_cast %90 : vector<16x16x16xf32> to vector<1x16x16x16xf32>
    tpu.vector_store %arg9[%c1_117, %c0_118, %c0_119, %c0_120], %93 {strides = array<i32>} : memref<2x16x16x16xf32, #tpu.memory_space<vmem>>, vector<1x16x16x16xf32>,
    return
  }
  func.func @transform_0(%arg0: i32) -> (i32, i32, i32, i32) {
    %c0_i32 = arith.constant 0 : i32
    %c0_i32_0 = arith.constant 0 : i32
    %c0_i32_1 = arith.constant 0 : i32
    %c0_i32_2 = arith.constant 0 : i32
    return %arg0, %c0_i32, %c0_i32_0, %c0_i32_1 : i32, i32, i32, i32
  }
  func.func @transform_1(%arg0: i32) -> (i32, i32) {
    %c0_i32 = arith.constant 0 : i32
    %c0_i32_0 = arith.constant 0 : i32
    %c0_i32_1 = arith.constant 0 : i32
    return %c0_i32, %c0_i32_0 : i32, i32
  }
  func.func @transform_2(%arg0: i32) -> (i32, i32) {
    %c0_i32 = arith.constant 0 : i32
    %c0_i32_0 = arith.constant 0 : i32
    %c0_i32_1 = arith.constant 0 : i32
    return %c0_i32, %c0_i32_0 : i32, i32
  }
  func.func @transform_3(%arg0: i32) -> (i32, i32) {
    %c0_i32 = arith.constant 0 : i32
    %c0_i32_0 = arith.constant 0 : i32
    %c0_i32_1 = arith.constant 0 : i32
    return %c0_i32, %c0_i32_0 : i32, i32
  }
  func.func @transform_4(%arg0: i32) -> (i32, i32) {
    %c0_i32 = arith.constant 0 : i32
    %c0_i32_0 = arith.constant 0 : i32
    %c0_i32_1 = arith.constant 0 : i32
    return %c0_i32, %c0_i32_0 : i32, i32
  }
  func.func @transform_5(%arg0: i32) -> (i32, i32) {
    %c0_i32 = arith.constant 0 : i32
    %c0_i32_0 = arith.constant 0 : i32
    %c0_i32_1 = arith.constant 0 : i32
    return %c0_i32, %c0_i32_0 : i32, i32
  }
  func.func @transform_6(%arg0: i32) -> (i32, i32) {
    %c0_i32 = arith.constant 0 : i32
    %c0_i32_0 = arith.constant 0 : i32
    %c0_i32_1 = arith.constant 0 : i32
    return %c0_i32, %c0_i32_0 : i32, i32
  }
  func.func @transform_7(%arg0: i32) -> (i32, i32) {
    %c0_i32 = arith.constant 0 : i32
    %c0_i32_0 = arith.constant 0 : i32
    %c0_i32_1 = arith.constant 0 : i32
    return %c0_i32, %c0_i32_0 : i32, i32
  }
  func.func @transform_8(%arg0: i32) -> (i32, i32, i32, i32) {
    %c0_i32 = arith.constant 0 : i32
    %c0_i32_0 = arith.constant 0 : i32
    %c0_i32_1 = arith.constant 0 : i32
    %c0_i32_2 = arith.constant 0 : i32
    return %arg0, %c0_i32, %c0_i32_0, %c0_i32_1 : i32, i32, i32, i32
  }
}

</mosaic_0001>

<bundles_post_ra>
// kernel: inverted_residual.1
= control target key start
LH: loop header
LB: loop body
LE: loop exit
PB: predicated region body
PF: predicated region fallthrough
CT: control target
= control target key end

     0   :  { %s5832_s9 = smov 120   ;;  %vm29_vm0 = vcmask 64512   ;;  %v5833_v42 = vmov 0.0   ;;  %vm33_vm1 = vcmask 57344   ;;  %s5834_s30 = smov 8   ;;  %vm1792_vm2 = vcmask 130048   ;;  %s9715_s0 = inlined_call_operand.vmem [shape: f32[2,16,16,16], index: 0, kind: input, shape index: {}]   ;;  %s9716_s1 = inlined_call_operand.vmem [shape: f32[8,8], index: 1, kind: input, shape index: {}]   ;;  %s9717_s2 = inlined_call_operand.vmem [shape: f32[1,8], index: 2, kind: input, shape index: {}]   ;;  %s9718_s3 = inlined_call_operand.vmem [shape: f32[72,8], index: 3, kind: input, shape index: {}]   ;;  %s9719_s4 = inlined_call_operand.vmem [shape: f32[1,8], index: 4, kind: input, shape index: {}]   ;;  %s9720_s5 = inlined_call_operand.vmem [shape: f32[8,16], index: 5, kind: input, shape index: {}]   ;;  %s9721_s7 = inlined_call_operand.vmem [shape: f32[8,16], index: 7, kind: input, shape index: {}]   ;;  %s9722_s6 = inlined_call_operand.vmem [shape: f32[1,16], index: 6, kind: input, shape index: {}]   ;;  %s9723_s8 = inlined_call_operand.vmem [shape: f32[2,16,16,16], index: 8, kind: output, shape index: {}]  }
   0x1   :  { %v73_v0 = vld [vmem:[%s9715_s0] sm:$0xff]  ;;  %v75_v1 = vld [vmem:[%s9715_s0 + $0x10] sm:$0xff]  ;;  %v74_v4 = vld [vmem:[%s9715_s0 + $0x8] sm:$0xff]  ;;  %31 = vst.msk [vmem:[#allocation2 + $0x8] sm:$0xff] %vm29_vm0, %v5833_v42  ;;  %s5835_s10 = smov 16   ;;  %s5836_s13 = smov 32  }
   0x2   :  { %142 = vrot.lane.b32.xlu0 %v73_v0, %s5832_s9  ;;  %146 = vrot.lane.b32.xlu1 %v75_v1, %s5832_s9  ;;  %v77_v2 = vld [vmem:[%s9715_s0 + $0x20] sm:$0xff]  ;;  %v76_v5 = vld [vmem:[%s9715_s0 + $0x18] sm:$0xff]  ;;  %30 = vst.msk [vmem:[#allocation2] sm:$0xff] %vm29_vm0, %v5833_v42  ;;  %s5837_s14 = smov 24   ;;  %s5838_s15 = smov 40   ;;  %vm1825_vm3 = vcmask 195584  }
   0x3   :  { %150 = vrot.lane.b32.xlu2 %v77_v2, %s5832_s9  ;;  %v105_v3 = vld [vmem:[%s9716_s1] sm:$0xff]  ;;  %v78_v6 = vld [vmem:[%s9715_s0 + $0x28] sm:$0xff]  ;;  %v79_v7 = vld [vmem:[%s9715_s0 + $0x30] sm:$0xff]  ;;  %32 = vst.msk [vmem:[#allocation2 + $0x10] sm:$0xff] %vm29_vm0, %v5833_v42  ;;  %s5839_s16 = smov 48   ;;  %s5840_s19 = smov 56  }
   0x4   :  { %285 = vmatpush.msra.mxu0 %v105_v3  ;;  %v80_v8 = vld [vmem:[%s9715_s0 + $0x38] sm:$0xff]  ;;  %v81_v9 = vld [vmem:[%s9715_s0 + $0x40] sm:$0xff]  ;;  %v82_v10 = vld [vmem:[%s9715_s0 + $0x48] sm:$0xff]  ;;  %36 = vst.msk [vmem:[#allocation2 + $0x220] sm:$0xff] %vm29_vm0, %v5833_v42  ;;  %s5841_s26 = smov 64   ;;  %vm1858_vm4 = vcmask 261120  }
   0x5   :  { %v83_v11 = vld [vmem:[%s9715_s0 + $0x50] sm:$0xff]  ;;  %v84_v12 = vld [vmem:[%s9715_s0 + $0x58] sm:$0xff]  ;;  %v85_v13 = vld [vmem:[%s9715_s0 + $0x60] sm:$0xff]  ;;  %37 = vst.msk [vmem:[#allocation2 + $0x228] sm:$0xff] %vm29_vm0, %v5833_v42  ;;  %vm1891_vm5 = vcmask 326656   ;;  %vm1924_vm6 = vcmask 392192  }
   0x6   :  { %v86_v14 = vld [vmem:[%s9715_s0 + $0x68] sm:$0xff]  ;;  %v88_v15 = vld [vmem:[%s9715_s0 + $0x78] sm:$0xff]  ;;  %v89_v16 = vld [vmem:[%s9715_s0 + $0x80] sm:$0xff]  ;;  %38 = vst.msk [vmem:[#allocation2 + $0x230] sm:$0xff] %vm29_vm0, %v5833_v42  ;;  %vm1990_vm7 = vcmask 523264   ;;  %vm1957_vm8 = vcmask 457728  }
   0x7   :  { %v87_v17 = vld [vmem:[%s9715_s0 + $0x70] sm:$0xff]  ;;  %v92_v20 = vld [vmem:[%s9715_s0 + $0x98] sm:$0xff]  ;;  %v90_v22 = vld [vmem:[%s9715_s0 + $0x88] sm:$0xff]  ;;  %34 = vst.msk [vmem:[#allocation2 + $0x18] sm:$0x1] %vm33_vm1, %v5833_v42  ;;  %vm2036_vm9 = vcmask 588800  }
   0x8   :  { %v91_v18 = vld [vmem:[%s9715_s0 + $0x90] sm:$0xff]  ;;  %v94_v24 = vld [vmem:[%s9715_s0 + $0xa8] sm:$0xff]  ;;  %v93_v28 = vld [vmem:[%s9715_s0 + $0xa0] sm:$0xff]  ;;  %39 = vst.msk [vmem:[#allocation2 + $0x238] sm:$0x1] %vm33_vm1, %v5833_v42 }
   0x9   :  { %v95_v26 = vld [vmem:[%s9715_s0 + $0xb0] sm:$0xff]  ;;  %v97_v30 = vld [vmem:[%s9715_s0 + $0xc0] sm:$0xff]  ;;  %v98_v32 = vld [vmem:[%s9715_s0 + $0xc8] sm:$0xff]  ;;  %41 = vst.msk [vmem:[#allocation2 + $0x27] sm:$0x1] %vm33_vm1, %v5833_v42 }
   0xa   :  { %144 = vrot.lane.b32.xlu0 %v74_v4, %s5832_s9  ;;  %148 = vrot.lane.b32.xlu1 %v76_v5, %s5832_s9  ;;  %v96_v34 = vld [vmem:[%s9715_s0 + $0xb8] sm:$0xff]  ;;  %v99_v38 = vld [vmem:[%s9715_s0 + $0xd0] sm:$0xff]  ;;  %v479_v46 = vld [vmem:[#allocation2 + $0x8] sm:$0xff]  ;;  %42 = vst.msk [vmem:[#allocation2 + $0x47] sm:$0x1] %vm33_vm1, %v5833_v42 }
   0xb   :  { %152 = vrot.lane.b32.xlu2 %v78_v6, %s5832_s9  ;;  %v100_v36 = vld [vmem:[%s9715_s0 + $0xd8] sm:$0xff]  ;;  %v101_v39 = vld [vmem:[%s9715_s0 + $0xe0] sm:$0xff]  ;;  %v102_v41 = vld [vmem:[%s9715_s0 + $0xe8] sm:$0xff]  ;;  %43 = vst.msk [vmem:[#allocation2 + $0x67] sm:$0x1] %vm33_vm1, %v5833_v42 }
   0xc   :  { %v104_v44 = vld [vmem:[%s9715_s0 + $0xf8] sm:$0xff]  ;;  %v103_v45 = vld [vmem:[%s9715_s0 + $0xf0] sm:$0xff]  ;;  %44 = vst.msk [vmem:[#allocation2 + $0x87] sm:$0x1] %vm33_vm1, %v5833_v42  ;;  %v6117_v54 = vld [vmem:[%s9717_s2] ss:$0 sm:$0xff] }
   0xd   :  { %45 = vst.msk [vmem:[#allocation2 + $0xa7] sm:$0x1] %vm33_vm1, %v5833_v42  ;;  %v511_v49 = vld [vmem:[#allocation2 + $0x9] sm:$0xff] }
   0xe   :  { %v512_v48 = vld [vmem:[#allocation2 + $0x11] sm:$0xff]  ;;  %46 = vst.msk [vmem:[#allocation2 + $0xc7] sm:$0x1] %vm33_vm1, %v5833_v42 }
   0xf   :  { %v480_v50 = vld [vmem:[#allocation2 + $0x10] sm:$0xff]  ;;  %47 = vst.msk [vmem:[#allocation2 + $0xe7] sm:$0x1] %vm33_vm1, %v5833_v42 }
  0x10   :  { %48 = vst.msk [vmem:[#allocation2 + $0x107] sm:$0x1] %vm33_vm1, %v5833_v42 }
  0x11   :  { %49 = vst.msk [vmem:[#allocation2 + $0x127] sm:$0x1] %vm33_vm1, %v5833_v42 }
  0x12   :  { %154 = vrot.lane.b32.xlu0 %v79_v7, %s5832_s9  ;;  %156 = vrot.lane.b32.xlu1 %v80_v8, %s5832_s9  ;;  %50 = vst.msk [vmem:[#allocation2 + $0x147] sm:$0x1] %vm33_vm1, %v5833_v42 }
  0x13   :  { %158 = vrot.lane.b32.xlu2 %v81_v9, %s5832_s9  ;;  %51 = vst.msk [vmem:[#allocation2 + $0x167] sm:$0x1] %vm33_vm1, %v5833_v42 }
  0x14   :  { %52 = vst.msk [vmem:[#allocation2 + $0x187] sm:$0x1] %vm33_vm1, %v5833_v42 }
  0x15   :  { %53 = vst.msk [vmem:[#allocation2 + $0x1a7] sm:$0x1] %vm33_vm1, %v5833_v42 }
  0x16   :  { %54 = vst.msk [vmem:[#allocation2 + $0x1c7] sm:$0x1] %vm33_vm1, %v5833_v42 }
  0x17   :  { %55 = vst.msk [vmem:[#allocation2 + $0x1e7] sm:$0x1] %vm33_vm1, %v5833_v42 }
  0x18   :  { %56 = vst.msk [vmem:[#allocation2 + $0x207] sm:$0x1] %vm33_vm1, %v5833_v42 }
  0x19   :  { %57 = vst.msk [vmem:[#allocation2 + $0x38] sm:$0x1] %vm33_vm1, %v5833_v42 }
  0x1a   :  { %160 = vrot.lane.b32.xlu0 %v82_v10, %s5832_s9  ;;  %162 = vrot.lane.b32.xlu1 %v83_v11, %s5832_s9  ;;  %58 = vst.msk [vmem:[#allocation2 + $0x58] sm:$0x1] %vm33_vm1, %v5833_v42 }
  0x1b   :  { %164 = vrot.lane.b32.xlu2 %v84_v12, %s5832_s9  ;;  %59 = vst.msk [vmem:[#allocation2 + $0x78] sm:$0x1] %vm33_vm1, %v5833_v42 }
  0x1c   :  { %60 = vst.msk [vmem:[#allocation2 + $0x98] sm:$0x1] %vm33_vm1, %v5833_v42 }
  0x1d   :  { %61 = vst.msk [vmem:[#allocation2 + $0xb8] sm:$0x1] %vm33_vm1, %v5833_v42 }
  0x1e   :  { %62 = vst.msk [vmem:[#allocation2 + $0xd8] sm:$0x1] %vm33_vm1, %v5833_v42 }
  0x1f   :  { %63 = vst.msk [vmem:[#allocation2 + $0xf8] sm:$0x1] %vm33_vm1, %v5833_v42 }
  0x20   :  { %64 = vst.msk [vmem:[#allocation2 + $0x118] sm:$0x1] %vm33_vm1, %v5833_v42 }
  0x21   :  { %65 = vst.msk [vmem:[#allocation2 + $0x138] sm:$0x1] %vm33_vm1, %v5833_v42 }
  0x22   :  { %166 = vrot.lane.b32.xlu0 %v85_v13, %s5832_s9  ;;  %168 = vrot.lane.b32.xlu1 %v86_v14, %s5832_s9  ;;  %66 = vst.msk [vmem:[#allocation2 + $0x158] sm:$0x1] %vm33_vm1, %v5833_v42 }
  0x23   :  { %170 = vrot.lane.b32.xlu2 %v87_v17, %s5832_s9  ;;  %67 = vst.msk [vmem:[#allocation2 + $0x178] sm:$0x1] %vm33_vm1, %v5833_v42 }
  0x24   :  { %68 = vst.msk [vmem:[#allocation2 + $0x198] sm:$0x1] %vm33_vm1, %v5833_v42 }
  0x25   :  { %69 = vst.msk [vmem:[#allocation2 + $0x1b8] sm:$0x1] %vm33_vm1, %v5833_v42 }
  0x26   :  { %70 = vst.msk [vmem:[#allocation2 + $0x1d8] sm:$0x1] %vm33_vm1, %v5833_v42 }
  0x27   :  { %71 = vst.msk [vmem:[#allocation2 + $0x1f8] sm:$0x1] %vm33_vm1, %v5833_v42 }
  0x28   :  { %72 = vst.msk [vmem:[#allocation2 + $0x218] sm:$0x1] %vm33_vm1, %v5833_v42 }
  0x2a   :  { %172 = vrot.lane.b32.xlu0 %v88_v15, %s5832_s9  ;;  %174 = vrot.lane.b32.xlu1 %v89_v16, %s5832_s9 }
  0x2b   :  { %176 = vrot.lane.b32.xlu2 %v90_v22, %s5832_s9 }
  0x32   :  { %178 = vrot.lane.b32.xlu0 %v91_v18, %s5832_s9  ;;  %180 = vrot.lane.b32.xlu1 %v92_v20, %s5832_s9 }
  0x33   :  { %182 = vrot.lane.b32.xlu2 %v93_v28, %s5832_s9 }
  0x3a   :  { %184 = vrot.lane.b32.xlu0 %v94_v24, %s5832_s9  ;;  %186 = vrot.lane.b32.xlu1 %v95_v26, %s5832_s9 }
  0x3b   :  { %188 = vrot.lane.b32.xlu2 %v96_v34, %s5832_s9 }
  0x42   :  { %190 = vrot.lane.b32.xlu0 %v97_v30, %s5832_s9  ;;  %192 = vrot.lane.b32.xlu1 %v98_v32, %s5832_s9 }
  0x43   :  { %194 = vrot.lane.b32.xlu2 %v99_v38, %s5832_s9 }
  0x4a   :  { %196 = vrot.lane.b32.xlu0 %v100_v36, %s5832_s9  ;;  %198 = vrot.lane.b32.xlu1 %v101_v39, %s5832_s9 }
  0x4b   :  { %200 = vrot.lane.b32.xlu2 %v102_v41, %s5832_s9 }
  0x52   :  { %204 = vrot.lane.b32.xlu1 %v104_v44, %s5832_s9  ;;  %202 = vrot.lane.b32.xlu0 %v103_v45, %s5832_s9 }
  0x53   :  { %768 = vrot.lane.b32.xlu2 %v479_v46, %s5834_s30 }
  0x5a   :  { %896 = vrot.lane.b32.xlu1 %v511_v49, %s5835_s10  ;;  %770 = vrot.lane.b32.xlu0 %v480_v50, %s5834_s30 }
  0x5b   :  { %898 = vrot.lane.b32.xlu2 %v512_v48, %s5835_s10 }
  0x5d   :  { %v151_v27 = vpop.permute.xlu2 %150 }
  0x65   :  { %v153_v29 = vpop.permute.xlu2 %152 }
  0x6d   :  { %v159_v35 = vpop.permute.xlu2 %158 }
  0x74   :  { %v143_v19 = vpop.permute.xlu0 %142  ;;  %v147_v23 = vpop.permute.xlu1 %146 }
  0x75   :  { %5392 = vmatmul.msk.f32.vlgmr.msra.gmra.mxu0 %vm29_vm0, %v143_v19  ;;  %v165_v43 = vpop.permute.xlu2 %164 }
  0x7c   :  { %v145_v21 = vpop.permute.xlu0 %144  ;;  %v149_v25 = vpop.permute.xlu1 %148 }
  0x7d   :  { %5393 = vmatmul.msk.f32.gmra.mxu0 %vm29_vm0, %v145_v21  ;;  %v171_v52 = vpop.permute.xlu2 %170 }
  0x84   :  { %v155_v31 = vpop.permute.xlu0 %154  ;;  %v157_v33 = vpop.permute.xlu1 %156 }
  0x85   :  { %5394 = vmatmul.msk.f32.gmra.mxu0 %vm29_vm0, %v147_v23  ;;  %v177_v60 = vpop.permute.xlu2 %176 }
  0x8c   :  { %v161_v37 = vpop.permute.xlu0 %160  ;;  %v163_v40 = vpop.permute.xlu1 %162 }
  0x8d   :  { %5395 = vmatmul.msk.f32.gmra.mxu0 %vm29_vm0, %v149_v25  ;;  %v183_v14 = vpop.permute.xlu2 %182 }
  0x94   :  { %v167_v47 = vpop.permute.xlu0 %166  ;;  %v169_v51 = vpop.permute.xlu1 %168 }
  0x95   :  { %5396 = vmatmul.msk.f32.gmra.mxu0 %vm29_vm0, %v151_v27 }
  0x9c   :  { %v173_v53 = vpop.permute.xlu0 %172  ;;  %v175_v56 = vpop.permute.xlu1 %174 }
  0x9d   :  { %5397 = vmatmul.msk.f32.gmra.mxu0 %vm29_vm0, %v153_v29 }
  0xa4   :  { %v179_v2 = vpop.permute.xlu0 %178  ;;  %v181_v9 = vpop.permute.xlu1 %180 }
  0xa5   :  { %5398 = vmatmul.msk.f32.gmra.mxu0 %vm29_vm0, %v155_v31  ;;  %v189_v31 = vpop.permute.xlu2 %188 }
  0xac   :  { %v185_v20 = vpop.permute.xlu0 %184  ;;  %v187_v26 = vpop.permute.xlu1 %186 }
  0xad   :  { %5399 = vmatmul.msk.f32.gmra.mxu0 %vm29_vm0, %v157_v33  ;;  %v195_v36 = vpop.permute.xlu2 %194 }
  0xb4   :  { %v191_v38 = vpop.permute.xlu0 %190  ;;  %v193_v44 = vpop.permute.xlu1 %192 }
  0xb5   :  { %5400 = vmatmul.msk.f32.gmra.mxu0 %vm29_vm0, %v159_v35  ;;  %v201_v46 = vpop.permute.xlu2 %200 }
  0xbd   :  { %5401 = vmatmul.msk.f32.gmra.mxu0 %vm29_vm0, %v161_v37 }
  0xc5   :  { %5402 = vmatmul.msk.f32.gmra.mxu0 %vm29_vm0, %v163_v40 }
  0xcd   :  { %5403 = vmatmul.msk.f32.gmra.mxu0 %vm29_vm0, %v165_v43 }
  0xd5   :  { %5404 = vmatmul.msk.f32.gmra.mxu0 %vm29_vm0, %v167_v47 }
  0xdd   :  { %5405 = vmatmul.msk.f32.gmra.mxu0 %vm29_vm0, %v169_v51 }
  0xe5   :  { %5406 = vmatmul.msk.f32.gmra.mxu0 %vm29_vm0, %v171_v52 }
  0xed   :  { %5407 = vmatmul.msk.f32.gmra.mxu0 %vm29_vm0, %v173_v53 }
  0xf2   :  { %v287_v55 = vpop.f32.mrf.mxu0 }
  0xf3   :  { %v288_v57 = vadd.f32 %v6117_v54, %v287_v55  ;;  %v6182_v55 = vpop.permute.xlu2 %768 }
  0xf5   :  { %v383_v58 = vmax.f32 %v288_v57, 0.0  ;;  %5408 = vmatmul.msk.f32.gmra.mxu0 %vm29_vm0, %v175_v56  ;;  %v197_v57 = vpop.permute.xlu0 %196 }
  0xf7   :  { %415 = vst.msk [vmem:[#allocation2 + $0x28] sm:$0xff] %vm29_vm0, %v383_v58 }
  0xfa   :  { %v290_v59 = vpop.f32.mrf.mxu0 }
  0xfb   :  { %v291_v61 = vadd.f32 %v6117_v54, %v290_v59 }
  0xfd   :  { %v384_v62 = vmax.f32 %v291_v61, 0.0  ;;  %5409 = vmatmul.msk.f32.gmra.mxu0 %vm29_vm0, %v177_v60 }
  0xfe   :  { %v575_v63 = vld [vmem:[#allocation2 + $0x28] sm:$0xff] }
  0xff   :  { %v543_v0 = vld [vmem:[#allocation2 + $0x27] sm:$0xff]  ;;  %416 = vst.msk [vmem:[#allocation2 + $0x30] sm:$0xff] %vm29_vm0, %v384_v62  ;;  %1152 = vrot.lane.b32.xlu2 %v575_v63, %s5836_s13  ;;  %772 = vrot.lane.b32.xlu1 %v575_v63, %s5834_s30  ;;  %v6193_v62 = vpop.permute.xlu2 %898 }
 0x100   :  { %1024 = vrot.lane.b32.xlu0 %v543_v0, %s5837_s14  ;;  %v199_v0 = vpop.permute.xlu1 %198 }
 0x102   :  { %v293_v1 = vpop.f32.mrf.mxu0 }
 0x103   :  { %v294_v3 = vadd.f32 %v6117_v54, %v293_v1 }
 0x105   :  { %v385_v4 = vmax.f32 %v294_v3, 0.0  ;;  %5410 = vmatmul.msk.f32.gmra.mxu0 %vm29_vm0, %v179_v2 }
 0x106   :  { %v514_v5 = vld [vmem:[#allocation2 + $0x31] sm:$0xff]  ;;  %v513_v6 = vld [vmem:[#allocation2 + $0x29] sm:$0xff] }
 0x107   :  { %v482_v7 = vld [vmem:[#allocation2 + $0x30] sm:$0xff]  ;;  %417 = vst.msk [vmem:[#allocation2 + $0x48] sm:$0xff] %vm29_vm0, %v385_v4  ;;  %902 = vrot.lane.b32.xlu1 %v514_v5, %s5835_s10 }
 0x108   :  { %900 = vrot.lane.b32.xlu0 %v513_v6, %s5835_s10  ;;  %774 = vrot.lane.b32.xlu2 %v482_v7, %s5834_s30  ;;  %v544_v12 = vld [vmem:[#allocation2 + $0x2f] sm:$0xff] }
 0x10a   :  { %v296_v8 = vpop.f32.mrf.mxu0 }
 0x10b   :  { %v297_v10 = vadd.f32 %v6117_v54, %v296_v8 }
 0x10d   :  { %v386_v11 = vmax.f32 %v297_v10, 0.0  ;;  %5411 = vmatmul.msk.f32.gmra.mxu0 %vm29_vm0, %v181_v9  ;;  %v203_v10 = vpop.permute.xlu0 %202 }
 0x10e   :  { %v483_v16 = vld [vmem:[#allocation2 + $0x48] sm:$0xff] }
 0x10f   :  { %418 = vst.msk [vmem:[#allocation2 + $0x50] sm:$0xff] %vm29_vm0, %v386_v11  ;;  %1026 = vrot.lane.b32.xlu1 %v544_v12, %s5837_s14  ;;  %v545_v17 = vld [vmem:[#allocation2 + $0x47] sm:$0xff]  ;;  %v205_v11 = vpop.permute.xlu1 %204 }
 0x110   :  { %1154 = vrot.lane.b32.xlu0 %v482_v7, %s5836_s13  ;;  %1282 = vrot.lane.b32.xlu2 %v514_v5, %s5838_s15 }
 0x112   :  { %v299_v13 = vpop.f32.mrf.mxu0 }
 0x113   :  { %v300_v15 = vadd.f32 %v6117_v54, %v299_v13 }
 0x115   :  { %v387_v18 = vmax.f32 %v300_v15, 0.0  ;;  %5412 = vmatmul.msk.f32.gmra.mxu0 %vm29_vm0, %v183_v14 }
 0x116   :  { %v516_v22 = vld [vmem:[#allocation2 + $0x51] sm:$0xff]  ;;  %v515_v24 = vld [vmem:[#allocation2 + $0x49] sm:$0xff] }
 0x117   :  { %419 = vst.msk [vmem:[#allocation2 + $0x68] sm:$0xff] %vm29_vm0, %v387_v18  ;;  %1280 = vrot.lane.b32.xlu1 %v513_v6, %s5838_s15  ;;  %v484_v29 = vld [vmem:[#allocation2 + $0x50] sm:$0xff] }
 0x118   :  { %776 = vrot.lane.b32.xlu0 %v483_v16, %s5834_s30  ;;  %1028 = vrot.lane.b32.xlu2 %v545_v17, %s5837_s14  ;;  %v546_v30 = vld [vmem:[#allocation2 + $0x4f] sm:$0xff] }
 0x11a   :  { %v302_v19 = vpop.f32.mrf.mxu0 }
 0x11b   :  { %v303_v21 = vadd.f32 %v6117_v54, %v302_v19  ;;  %v6217_v19 = vpop.permute.xlu0 %770 }
 0x11d   :  { %v388_v23 = vmax.f32 %v303_v21, 0.0  ;;  %5413 = vmatmul.msk.f32.gmra.mxu0 %vm29_vm0, %v185_v20  ;;  %v6220_v20 = vpop.permute.xlu1 %896 }
 0x11e   :  { %v485_v34 = vld [vmem:[#allocation2 + $0x68] sm:$0xff] }
 0x11f   :  { %420 = vst.msk [vmem:[#allocation2 + $0x70] sm:$0xff] %vm29_vm0, %v388_v23  ;;  %1156 = vrot.lane.b32.xlu1 %v483_v16, %s5836_s13  ;;  %v547_v42 = vld [vmem:[#allocation2 + $0x67] sm:$0xff] }
 0x120   :  { %906 = vrot.lane.b32.xlu0 %v516_v22, %s5835_s10  ;;  %904 = vrot.lane.b32.xlu2 %v515_v24, %s5835_s10 }
 0x122   :  { %v305_v25 = vpop.f32.mrf.mxu0 }
 0x123   :  { %v306_v27 = vadd.f32 %v6117_v54, %v305_v25 }
 0x125   :  { %v389_v28 = vmax.f32 %v306_v27, 0.0  ;;  %5414 = vmatmul.msk.f32.gmra.mxu0 %vm29_vm0, %v187_v26 }
 0x126   :  { %v518_v40 = vld [vmem:[#allocation2 + $0x71] sm:$0xff]  ;;  %v517_v50 = vld [vmem:[#allocation2 + $0x69] sm:$0xff] }
 0x127   :  { %421 = vst.msk [vmem:[#allocation2 + $0x88] sm:$0xff] %vm29_vm0, %v389_v28  ;;  %778 = vrot.lane.b32.xlu1 %v484_v29, %s5834_s30  ;;  %v486_v47 = vld [vmem:[#allocation2 + $0x70] sm:$0xff] }
 0x128   :  { %1030 = vrot.lane.b32.xlu0 %v546_v30, %s5837_s14  ;;  %1158 = vrot.lane.b32.xlu2 %v484_v29, %s5836_s13  ;;  %v548_v49 = vld [vmem:[#allocation2 + $0x6f] sm:$0xff] }
 0x12a   :  { %v308_v32 = vpop.f32.mrf.mxu0 }
 0x12b   :  { %v309_v33 = vadd.f32 %v6117_v54, %v308_v32 }
 0x12d   :  { %v390_v35 = vmax.f32 %v309_v33, 0.0  ;;  %5415 = vmatmul.msk.f32.gmra.mxu0 %vm29_vm0, %v189_v31 }
 0x12e   :  { %v581_v59 = vld [vmem:[#allocation2 + $0x88] sm:$0xff] }
 0x12f   :  { %422 = vst.msk [vmem:[#allocation2 + $0x90] sm:$0xff] %vm29_vm0, %v390_v35  ;;  %1286 = vrot.lane.b32.xlu1 %v516_v22, %s5838_s15  ;;  %v549_v60 = vld [vmem:[#allocation2 + $0x87] sm:$0xff] }
 0x130   :  { %1284 = vrot.lane.b32.xlu0 %v515_v24, %s5838_s15  ;;  %780 = vrot.lane.b32.xlu2 %v485_v34, %s5834_s30 }
 0x132   :  { %v311_v37 = vpop.f32.mrf.mxu0 }
 0x133   :  { %v312_v39 = vadd.f32 %v6117_v54, %v311_v37 }
 0x135   :  { %v391_v41 = vmax.f32 %v312_v39, 0.0  ;;  %5416 = vmatmul.msk.f32.gmra.mxu0 %vm29_vm0, %v191_v38 }
 0x136   :  { %v488_v2 = vld [vmem:[#allocation2 + $0x90] sm:$0xff] }
 0x137   :  { %423 = vst.msk [vmem:[#allocation2 + $0xa8] sm:$0xff] %vm29_vm0, %v391_v41  ;;  %1032 = vrot.lane.b32.xlu1 %v547_v42, %s5837_s14  ;;  %v520_v4 = vld [vmem:[#allocation2 + $0x91] sm:$0xff]  ;;  %v519_v5 = vld [vmem:[#allocation2 + $0x89] sm:$0xff] }
 0x138   :  { %1160 = vrot.lane.b32.xlu0 %v485_v34, %s5836_s13  ;;  %910 = vrot.lane.b32.xlu2 %v518_v40, %s5835_s10  ;;  %v550_v12 = vld [vmem:[#allocation2 + $0x8f] sm:$0xff] }
 0x13a   :  { %v314_v43 = vpop.f32.mrf.mxu0 }
 0x13b   :  { %v315_v45 = vadd.f32 %v6117_v54, %v314_v43 }
 0x13d   :  { %v392_v48 = vmax.f32 %v315_v45, 0.0  ;;  %5417 = vmatmul.msk.f32.gmra.mxu0 %vm29_vm0, %v193_v44 }
 0x13e   :  { %v551_v16 = vld [vmem:[#allocation2 + $0xa7] sm:$0xff] }
 0x13f   :  { %424 = vst.msk [vmem:[#allocation2 + $0xb0] sm:$0xff] %vm29_vm0, %v392_v48  ;;  %908 = vrot.lane.b32.xlu1 %v517_v50, %s5835_s10  ;;  %v489_v17 = vld [vmem:[#allocation2 + $0xa8] sm:$0xff] }
 0x140   :  { %782 = vrot.lane.b32.xlu0 %v486_v47, %s5834_s30  ;;  %1034 = vrot.lane.b32.xlu2 %v548_v49, %s5837_s14 }
 0x142   :  { %v317_v51 = vpop.f32.mrf.mxu0 }
 0x143   :  { %v318_v52 = vadd.f32 %v6117_v54, %v317_v51 }
 0x145   :  { %v393_v53 = vmax.f32 %v318_v52, 0.0  ;;  %5418 = vmatmul.msk.f32.gmra.mxu0 %vm29_vm0, %v195_v36 }
 0x146   :  { %v522_v24 = vld [vmem:[#allocation2 + $0xb1] sm:$0xff]  ;;  %v521_v26 = vld [vmem:[#allocation2 + $0xa9] sm:$0xff] }
 0x147   :  { %425 = vst.msk [vmem:[#allocation2 + $0xc8] sm:$0xff] %vm29_vm0, %v393_v53  ;;  %1162 = vrot.lane.b32.xlu1 %v486_v47, %s5836_s13  ;;  %v552_v33 = vld [vmem:[#allocation2 + $0xaf] sm:$0xff] }
 0x148   :  { %1290 = vrot.lane.b32.xlu0 %v518_v40, %s5838_s15  ;;  %1288 = vrot.lane.b32.xlu2 %v517_v50, %s5838_s15  ;;  %v584_v34 = vld [vmem:[#allocation2 + $0xb0] sm:$0xff] }
 0x14a   :  { %v320_v56 = vpop.f32.mrf.mxu0 }
 0x14b   :  { %v321_v58 = vadd.f32 %v6117_v54, %v320_v56 }
 0x14d   :  { %v394_v61 = vmax.f32 %v321_v58, 0.0  ;;  %5419 = vmatmul.msk.f32.gmra.mxu0 %vm29_vm0, %v197_v57 }
 0x14e   :  { %v491_v40 = vld [vmem:[#allocation2 + $0xc8] sm:$0xff] }
 0x14f   :  { %426 = vst.msk [vmem:[#allocation2 + $0xd0] sm:$0xff] %vm29_vm0, %v394_v61  ;;  %784 = vrot.lane.b32.xlu1 %v581_v59, %s5834_s30  ;;  %v6259_v49 = vld [vmem:[#allocation2 + $0xc7] sm:$0xff] }
 0x150   :  { %1164 = vrot.lane.b32.xlu2 %v581_v59, %s5836_s13  ;;  %1036 = vrot.lane.b32.xlu0 %v549_v60, %s5837_s14 }
 0x152   :  { %v323_v63 = vpop.f32.mrf.mxu0 }
 0x153   :  { %v324_v1 = vadd.f32 %v6117_v54, %v323_v63 }
 0x155   :  { %v395_v3 = vmax.f32 %v324_v1, 0.0  ;;  %5420 = vmatmul.msk.f32.gmra.mxu0 %vm29_vm0, %v199_v0 }
 0x156   :  { %v524_v47 = vld [vmem:[#allocation2 + $0xd1] sm:$0xff]  ;;  %v523_v60 = vld [vmem:[#allocation2 + $0xc9] sm:$0xff] }
 0x157   :  { %427 = vst.msk [vmem:[#allocation2 + $0xe8] sm:$0xff] %vm29_vm0, %v395_v3  ;;  %914 = vrot.lane.b32.xlu1 %v520_v4, %s5835_s10  ;;  %v492_v57 = vld [vmem:[#allocation2 + $0xd0] sm:$0xff] }
 0x158   :  { %786 = vrot.lane.b32.xlu2 %v488_v2, %s5834_s30  ;;  %912 = vrot.lane.b32.xlu0 %v519_v5, %s5835_s10  ;;  %v6273_v59 = vld [vmem:[#allocation2 + $0xcf] sm:$0xff] }
 0x159   :  { %v6202_v6 = vpop.permute.xlu2 %1152 }
 0x15a   :  { %v326_v7 = vpop.f32.mrf.mxu0 }
 0x15b   :  { %v327_v8 = vadd.f32 %v6117_v54, %v326_v7 }
 0x15d   :  { %v396_v9 = vmax.f32 %v327_v8, 0.0  ;;  %5421 = vmatmul.msk.f32.gmra.mxu0 %vm29_vm0, %v201_v46 }
 0x15f   :  { %428 = vst.msk [vmem:[#allocation2 + $0xf0] sm:$0xff] %vm29_vm0, %v396_v9  ;;  %1038 = vrot.lane.b32.xlu1 %v550_v12, %s5837_s14 }
 0x160   :  { %1294 = vrot.lane.b32.xlu2 %v520_v4, %s5838_s15  ;;  %1166 = vrot.lane.b32.xlu0 %v488_v2, %s5836_s13 }
 0x162   :  { %v6210_v13 = vpop.permute.xlu2 %774  ;;  %v329_v14 = vpop.f32.mrf.mxu0 }
 0x163   :  { %9724 = vst [vmem:[#allocation3_spill] sm:$0xff] %v6210_v13  ;;  %v330_v15 = vadd.f32 %v6117_v54, %v329_v14  ;;  %v640_v13 = vld [vmem:[#allocation2 + $0x47] sm:$0xff] }
 0x165   :  { %v397_v18 = vmax.f32 %v330_v15, 0.0  ;;  %5422 = vmatmul.msk.f32.gmra.mxu0 %vm29_vm0, %v203_v10  ;;  %v587_v10 = vld [vmem:[#allocation2 + $0xe8] sm:$0xff] }
 0x167   :  { %429 = vst.msk [vmem:[#allocation2 + $0x108] sm:$0xff] %vm29_vm0, %v397_v18  ;;  %1292 = vrot.lane.b32.xlu1 %v519_v5, %s5838_s15 }
 0x168   :  { %1040 = vrot.lane.b32.xlu2 %v551_v16, %s5837_s14  ;;  %788 = vrot.lane.b32.xlu0 %v489_v17, %s5834_s30 }
 0x16a   :  { %v6222_v21 = vpop.permute.xlu2 %1282  ;;  %v332_v22 = vpop.f32.mrf.mxu0 }
 0x16b   :  { %v333_v23 = vadd.f32 %v6117_v54, %v332_v22  ;;  %v494_v22 = vld [vmem:[#allocation2 + $0xf0] sm:$0xff] }
 0x16d   :  { %v398_v25 = vmax.f32 %v333_v23, 0.0  ;;  %5423 = vmatmul.msk.f32.gmra.mxu0 %vm29_vm0, %v205_v11  ;;  %v6298_v11 = vld [vmem:[#allocation2 + $0xe7] sm:$0xff] }
 0x16f   :  { %430 = vst.msk [vmem:[#allocation2 + $0x110] sm:$0xff] %vm29_vm0, %v398_v25  ;;  %1168 = vrot.lane.b32.xlu1 %v489_v17, %s5836_s13  ;;  %v525_v25 = vld [vmem:[#allocation2 + $0xe9] sm:$0xff] }
 0x170   :  { %918 = vrot.lane.b32.xlu0 %v522_v24, %s5835_s10  ;;  %916 = vrot.lane.b32.xlu2 %v521_v26, %s5835_s10 }
 0x171   :  { %v6234_v29 = vpop.permute.xlu1 %772 }
 0x172   :  { %v6230_v27 = vpop.permute.xlu2 %1028  ;;  %v6232_v28 = vpop.permute.xlu0 %1024 }
 0x173   :  { %9725 = vst [vmem:[#allocation4_spill] sm:$0xff] %v6230_v27  ;;  %v335_v30 = vpop.f32.mrf.mxu0 }
 0x174   :  { %v336_v31 = vadd.f32 %v6117_v54, %v335_v30 }
 0x176   :  { %v399_v32 = vmax.f32 %v336_v31, 0.0 }
 0x177   :  { %790 = vrot.lane.b32.xlu1 %v584_v34, %s5834_s30 }
 0x178   :  { %431 = vst.msk [vmem:[#allocation2 + $0x128] sm:$0xff] %vm29_vm0, %v399_v32  ;;  %1042 = vrot.lane.b32.xlu0 %v552_v33, %s5837_s14  ;;  %1170 = vrot.lane.b32.xlu2 %v584_v34, %s5836_s13 }
 0x179   :  { %v6245_v37 = vpop.permute.xlu1 %902 }
 0x17a   :  { %v6241_v35 = vpop.permute.xlu2 %904  ;;  %v6243_v36 = vpop.permute.xlu0 %900  ;;  %9728 = vst [vmem:[#allocation7_spill] sm:$0xff] %v6245_v37 }
 0x17b   :  { %9726 = vst [vmem:[#allocation5_spill] sm:$0xff] %v6241_v35  ;;  %v338_v38 = vpop.f32.mrf.mxu0 }
 0x17c   :  { %9727 = vst [vmem:[#allocation6_spill] sm:$0xff] %v6243_v36  ;;  %v339_v39 = vadd.f32 %v6117_v54, %v338_v38  ;;  %v6326_v38 = vld [vmem:[#allocation2 + $0xef] sm:$0xff] }
 0x17e   :  { %v400_v41 = vmax.f32 %v339_v39, 0.0 }
 0x17f   :  { %1298 = vrot.lane.b32.xlu1 %v522_v24, %s5838_s15  ;;  %v526_v24 = vld [vmem:[#allocation2 + $0xf1] sm:$0xff] }
 0x180   :  { %432 = vst.msk [vmem:[#allocation2 + $0x130] sm:$0xff] %vm29_vm0, %v400_v41  ;;  %1296 = vrot.lane.b32.xlu0 %v521_v26, %s5838_s15  ;;  %792 = vrot.lane.b32.xlu2 %v491_v40, %s5834_s30 }
 0x181   :  { %v6256_v44 = vpop.permute.xlu1 %1026 }
 0x182   :  { %v6252_v42 = vpop.permute.xlu2 %1158  ;;  %v6254_v43 = vpop.permute.xlu0 %1154 }
 0x183   :  { %9729 = vst [vmem:[#allocation8_spill] sm:$0xff] %v6252_v42  ;;  %v341_v45 = vpop.f32.mrf.mxu0 }
 0x184   :  { %v342_v46 = vadd.f32 %v6117_v54, %v341_v45 }
 0x186   :  { %v401_v48 = vmax.f32 %v342_v46, 0.0 }
 0x187   :  { %1044 = vrot.lane.b32.xlu1 %v6259_v49, %s5837_s14 }
 0x188   :  { %433 = vst.msk [vmem:[#allocation2 + $0x148] sm:$0xff] %vm29_vm0, %v401_v48  ;;  %1172 = vrot.lane.b32.xlu0 %v491_v40, %s5836_s13  ;;  %922 = vrot.lane.b32.xlu2 %v524_v47, %s5835_s10  ;;  %v495_v48 = vld [vmem:[#allocation2 + $0x108] sm:$0xff] }
 0x189   :  { %v6270_v52 = vpop.permute.xlu1 %1280 }
 0x18a   :  { %v6266_v50 = vpop.permute.xlu2 %780  ;;  %v6268_v51 = vpop.permute.xlu0 %776 }
 0x18b   :  { %9730 = vst [vmem:[#allocation9_spill] sm:$0xff] %v6266_v50  ;;  %v344_v53 = vpop.f32.mrf.mxu0 }
 0x18c   :  { %9731 = vst [vmem:[#allocation10_spill] sm:$0xff] %v6268_v51  ;;  %v345_v56 = vadd.f32 %v6117_v54, %v344_v53 }
 0x18e   :  { %v402_v58 = vmax.f32 %v345_v56, 0.0 }
 0x18f   :  { %920 = vrot.lane.b32.xlu1 %v523_v60, %s5835_s10 }
 0x190   :  { %434 = vst.msk [vmem:[#allocation2 + $0x150] sm:$0xff] %vm29_vm0, %v402_v58  ;;  %794 = vrot.lane.b32.xlu0 %v492_v57, %s5834_s30  ;;  %1046 = vrot.lane.b32.xlu2 %v6273_v59, %s5837_s14 }
 0x191   :  { %v6284_v0 = vpop.permute.xlu1 %1156 }
 0x192   :  { %v6280_v61 = vpop.permute.xlu2 %910  ;;  %v6282_v63 = vpop.permute.xlu0 %906  ;;  %9734 = vst [vmem:[#allocation13_spill] sm:$0xff] %v6284_v0 }
 0x193   :  { %9732 = vst [vmem:[#allocation11_spill] sm:$0xff] %v6280_v61  ;;  %v347_v1 = vpop.f32.mrf.mxu0 }
 0x194   :  { %9733 = vst [vmem:[#allocation12_spill] sm:$0xff] %v6282_v63  ;;  %v348_v2 = vadd.f32 %v6117_v54, %v347_v1 }
 0x196   :  { %v403_v3 = vmax.f32 %v348_v2, 0.0  ;;  %v528_v2 = vld [vmem:[#allocation2 + $0x111] sm:$0xff] }
 0x197   :  { %1174 = vrot.lane.b32.xlu1 %v492_v57, %s5836_s13 }
 0x198   :  { %435 = vst.msk [vmem:[#allocation2 + $0x168] sm:$0xff] %vm29_vm0, %v403_v3  ;;  %1302 = vrot.lane.b32.xlu0 %v524_v47, %s5838_s15  ;;  %1300 = vrot.lane.b32.xlu2 %v523_v60, %s5838_s15  ;;  %v6337_v47 = vld [vmem:[#allocation2 + $0x107] sm:$0xff] }
 0x199   :  { %v6295_v7 = vpop.permute.xlu1 %778 }
 0x19a   :  { %v6291_v4 = vpop.permute.xlu2 %1034  ;;  %v6293_v5 = vpop.permute.xlu0 %1030  ;;  %9737 = vst [vmem:[#allocation16_spill] sm:$0xff] %v6295_v7 }
 0x19b   :  { %9735 = vst [vmem:[#allocation14_spill] sm:$0xff] %v6291_v4  ;;  %v350_v8 = vpop.f32.mrf.mxu0 }
 0x19c   :  { %9736 = vst [vmem:[#allocation15_spill] sm:$0xff] %v6293_v5  ;;  %v351_v9 = vadd.f32 %v6117_v54, %v350_v8  ;;  %v527_v8 = vld [vmem:[#allocation2 + $0x109] sm:$0xff] }
 0x19e   :  { %v404_v12 = vmax.f32 %v351_v9, 0.0 }
 0x19f   :  { %796 = vrot.lane.b32.xlu1 %v587_v10, %s5834_s30 }
 0x1a0   :  { %436 = vst.msk [vmem:[#allocation2 + $0x170] sm:$0xff] %vm29_vm0, %v404_v12  ;;  %1176 = vrot.lane.b32.xlu2 %v587_v10, %s5836_s13  ;;  %1048 = vrot.lane.b32.xlu0 %v6298_v11, %s5837_s14 }
 0x1a1   :  { %v6309_v16 = vpop.permute.xlu1 %1286 }
 0x1a2   :  { %v6305_v14 = vpop.permute.xlu2 %1288  ;;  %v6307_v15 = vpop.permute.xlu0 %1284  ;;  %9740 = vst [vmem:[#allocation19_spill] sm:$0xff] %v6309_v16 }
 0x1a3   :  { %9738 = vst [vmem:[#allocation17_spill] sm:$0xff] %v6305_v14  ;;  %v353_v17 = vpop.f32.mrf.mxu0 }
 0x1a4   :  { %9739 = vst [vmem:[#allocation18_spill] sm:$0xff] %v6307_v15  ;;  %v354_v18 = vadd.f32 %v6117_v54, %v353_v17  ;;  %v641_v15 = vld [vmem:[#allocation2 + $0x4f] sm:$0xff] }
 0x1a6   :  { %v405_v23 = vmax.f32 %v354_v18, 0.0 }
 0x1a7   :  { %926 = vrot.lane.b32.xlu1 %v526_v24, %s5835_s10 }
 0x1a8   :  { %437 = vst.msk [vmem:[#allocation2 + $0x188] sm:$0xff] %vm29_vm0, %v405_v23  ;;  %798 = vrot.lane.b32.xlu2 %v494_v22, %s5834_s30  ;;  %924 = vrot.lane.b32.xlu0 %v525_v25, %s5835_s10  ;;  %v6362_v23 = vld [vmem:[#allocation2 + $0x10f] sm:$0xff] }
 0x1a9   :  { %v6320_v31 = vpop.permute.xlu1 %1032 }
 0x1aa   :  { %v6316_v26 = vpop.permute.xlu2 %1164  ;;  %v6318_v30 = vpop.permute.xlu0 %1160  ;;  %9743 = vst [vmem:[#allocation22_spill] sm:$0xff] %v6320_v31 }
 0x1ab   :  { %9741 = vst [vmem:[#allocation20_spill] sm:$0xff] %v6316_v26  ;;  %v356_v32 = vpop.f32.mrf.mxu0 }
 0x1ac   :  { %9742 = vst [vmem:[#allocation21_spill] sm:$0xff] %v6318_v30  ;;  %v357_v33 = vadd.f32 %v6117_v54, %v356_v32 }
 0x1ae   :  { %v406_v34 = vmax.f32 %v357_v33, 0.0 }
 0x1af   :  { %1050 = vrot.lane.b32.xlu1 %v6326_v38, %s5837_s14 }
 0x1b0   :  { %438 = vst.msk [vmem:[#allocation2 + $0x190] sm:$0xff] %vm29_vm0, %v406_v34  ;;  %1306 = vrot.lane.b32.xlu2 %v526_v24, %s5838_s15  ;;  %1178 = vrot.lane.b32.xlu0 %v494_v22, %s5836_s13  ;;  %v590_v24 = vld [vmem:[#allocation2 + $0x110] sm:$0xff] }
 0x1b1   :  { %v6334_v41 = vpop.permute.xlu1 %908 }
 0x1b2   :  { %v6330_v39 = vpop.permute.xlu2 %786  ;;  %v6332_v40 = vpop.permute.xlu0 %782  ;;  %9746 = vst [vmem:[#allocation25_spill] sm:$0xff] %v6334_v41 }
 0x1b3   :  { %9744 = vst [vmem:[#allocation23_spill] sm:$0xff] %v6330_v39  ;;  %v359_v45 = vpop.f32.mrf.mxu0 }
 0x1b4   :  { %9745 = vst [vmem:[#allocation24_spill] sm:$0xff] %v6332_v40  ;;  %v360_v46 = vadd.f32 %v6117_v54, %v359_v45 }
 0x1b6   :  { %v407_v53 = vmax.f32 %v360_v46, 0.0 }
 0x1b7   :  { %1304 = vrot.lane.b32.xlu1 %v525_v25, %s5838_s15 }
 0x1b8   :  { %439 = vst.msk [vmem:[#allocation2 + $0x1a8] sm:$0xff] %vm29_vm0, %v407_v53  ;;  %1052 = vrot.lane.b32.xlu2 %v6337_v47, %s5837_s14  ;;  %800 = vrot.lane.b32.xlu0 %v495_v48, %s5834_s30 }
 0x1b9   :  { %v6348_v58 = vpop.permute.xlu1 %1162 }
 0x1ba   :  { %v6344_v56 = vpop.permute.xlu2 %1294  ;;  %v6346_v57 = vpop.permute.xlu0 %1290  ;;  %9749 = vst [vmem:[#allocation28_spill] sm:$0xff] %v6348_v58 }
 0x1bb   :  { %9747 = vst [vmem:[#allocation26_spill] sm:$0xff] %v6344_v56  ;;  %v362_v60 = vpop.f32.mrf.mxu0 }
 0x1bc   :  { %9748 = vst [vmem:[#allocation27_spill] sm:$0xff] %v6346_v57  ;;  %v363_v1 = vadd.f32 %v6117_v54, %v362_v60 }
 0x1be   :  { %v408_v3 = vmax.f32 %v363_v1, 0.0 }
 0x1bf   :  { %1180 = vrot.lane.b32.xlu1 %v495_v48, %s5836_s13  ;;  %v497_v48 = vld [vmem:[#allocation2 + $0x128] sm:$0xff] }
 0x1c0   :  { %440 = vst.msk [vmem:[#allocation2 + $0x1b0] sm:$0xff] %vm29_vm0, %v408_v3  ;;  %930 = vrot.lane.b32.xlu0 %v528_v2, %s5835_s10  ;;  %928 = vrot.lane.b32.xlu2 %v527_v8, %s5835_s10  ;;  %v6563_v26 = vld [vmem:[#allocation2 + $0x1a8] sm:$0xff] }
 0x1c1   :  { %v6359_v12 = vpop.permute.xlu1 %784 }
 0x1c2   :  { %v6355_v9 = vpop.permute.xlu2 %1040  ;;  %v6357_v10 = vpop.permute.xlu0 %1036  ;;  %9752 = vst [vmem:[#allocation31_spill] sm:$0xff] %v6359_v12 }
 0x1c3   :  { %9750 = vst [vmem:[#allocation29_spill] sm:$0xff] %v6355_v9  ;;  %v365_v17 = vpop.f32.mrf.mxu0 }
 0x1c4   :  { %9751 = vst [vmem:[#allocation30_spill] sm:$0xff] %v6357_v10  ;;  %v366_v18 = vadd.f32 %v6117_v54, %v365_v17 }
 0x1c6   :  { %v409_v22 = vmax.f32 %v366_v18, 0.0 }
 0x1c7   :  { %802 = vrot.lane.b32.xlu1 %v590_v24, %s5834_s30 }
 0x1c8   :  { %441 = vst.msk [vmem:[#allocation2 + $0x1c8] sm:$0xff] %vm29_vm0, %v409_v22  ;;  %1054 = vrot.lane.b32.xlu0 %v6362_v23, %s5837_s14  ;;  %1182 = vrot.lane.b32.xlu2 %v590_v24, %s5836_s13  ;;  %v530_v22 = vld [vmem:[#allocation2 + $0x131] sm:$0xff] }
 0x1c9   :  { %v6373_v33 = vpop.permute.xlu1 %914 }
 0x1ca   :  { %v6369_v25 = vpop.permute.xlu2 %916  ;;  %v6371_v32 = vpop.permute.xlu0 %912  ;;  %9755 = vst [vmem:[#allocation34_spill] sm:$0xff] %v6373_v33 }
 0x1cb   :  { %9753 = vst [vmem:[#allocation32_spill] sm:$0xff] %v6369_v25  ;;  %v368_v34 = vpop.f32.mrf.mxu0 }
 0x1cc   :  { %9754 = vst [vmem:[#allocation33_spill] sm:$0xff] %v6371_v32  ;;  %v369_v45 = vadd.f32 %v6117_v54, %v368_v34 }
 0x1ce   :  { %v410_v46 = vmax.f32 %v369_v45, 0.0 }
 0x1cf   :  { %1310 = vrot.lane.b32.xlu1 %v528_v2, %s5838_s15 }
 0x1d0   :  { %442 = vst.msk [vmem:[#allocation2 + $0x1d0] sm:$0xff] %vm29_vm0, %v410_v46  ;;  %1308 = vrot.lane.b32.xlu0 %v527_v8, %s5838_s15  ;;  %804 = vrot.lane.b32.xlu2 %v497_v48, %s5834_s30  ;;  %v6390_v8 = vld [vmem:[#allocation2 + $0x127] sm:$0xff] }
 0x1d1   :  { %v6384_v1 = vpop.permute.xlu1 %1038 }
 0x1d2   :  { %v6380_v53 = vpop.permute.xlu2 %1170  ;;  %v6382_v60 = vpop.permute.xlu0 %1166  ;;  %9758 = vst [vmem:[#allocation37_spill] sm:$0xff] %v6384_v1 }
 0x1d3   :  { %9756 = vst [vmem:[#allocation35_spill] sm:$0xff] %v6380_v53  ;;  %v371_v3 = vpop.f32.mrf.mxu0 }
 0x1d4   :  { %9757 = vst [vmem:[#allocation36_spill] sm:$0xff] %v6382_v60  ;;  %v372_v17 = vadd.f32 %v6117_v54, %v371_v3 }
 0x1d6   :  { %v411_v18 = vmax.f32 %v372_v17, 0.0  ;;  %v6401_v17 = vld [vmem:[#allocation2 + $0x130] sm:$0xff] }
 0x1d7   :  { %1056 = vrot.lane.b32.xlu1 %v6390_v8, %s5837_s14  ;;  %v6641_v57 = vld [vmem:[#allocation2 + $0x1d0] sm:$0xff] }
 0x1d8   :  { %443 = vst.msk [vmem:[#allocation2 + $0x1e8] sm:$0xff] %vm29_vm0, %v411_v18  ;;  %1184 = vrot.lane.b32.xlu0 %v497_v48, %s5836_s13  ;;  %934 = vrot.lane.b32.xlu2 %v530_v22, %s5835_s10  ;;  %v6403_v48 = vld [vmem:[#allocation2 + $0x12f] sm:$0xff] }
 0x1d9   :  { %v6398_v34 = vpop.permute.xlu1 %1292  ;;  %v529_v18 = vld [vmem:[#allocation2 + $0x129] sm:$0xff] }
 0x1da   :  { %v6394_v2 = vpop.permute.xlu2 %792  ;;  %v6396_v24 = vpop.permute.xlu0 %788  ;;  %9761 = vst [vmem:[#allocation40_spill] sm:$0xff] %v6398_v34 }
 0x1db   :  { %9759 = vst [vmem:[#allocation38_spill] sm:$0xff] %v6394_v2  ;;  %v374_v45 = vpop.f32.mrf.mxu0 }
 0x1dc   :  { %9760 = vst [vmem:[#allocation39_spill] sm:$0xff] %v6396_v24  ;;  %v375_v46 = vadd.f32 %v6117_v54, %v374_v45 }
 0x1de   :  { %v412_v3 = vmax.f32 %v375_v46, 0.0 }
 0x1df   :  { %932 = vrot.lane.b32.xlu1 %v529_v18, %s5835_s10  ;;  %v6661_v4 = vld [vmem:[#allocation2 + $0x1e7] sm:$0xff] }
 0x1e0   :  { %444 = vst.msk [vmem:[#allocation2 + $0x1f0] sm:$0xff] %vm29_vm0, %v412_v3  ;;  %806 = vrot.lane.b32.xlu0 %v6401_v17, %s5834_s30  ;;  %1058 = vrot.lane.b32.xlu2 %v6403_v48, %s5837_s14 }
 0x1e1   :  { %v6415_v45 = vpop.permute.xlu1 %1168 }
 0x1e2   :  { %v6411_v2 = vpop.permute.xlu2 %922  ;;  %v6413_v25 = vpop.permute.xlu0 %918  ;;  %9764 = vst [vmem:[#allocation43_spill] sm:$0xff] %v6415_v45 }
 0x1e3   :  { %9762 = vst [vmem:[#allocation41_spill] sm:$0xff] %v6411_v2  ;;  %v377_v46 = vpop.f32.mrf.mxu0 }
 0x1e4   :  { %9763 = vst [vmem:[#allocation42_spill] sm:$0xff] %v6413_v25  ;;  %v378_v53 = vadd.f32 %v6117_v54, %v377_v46 }
 0x1e6   :  { %v413_v24 = vmax.f32 %v378_v53, 0.0  ;;  %v6430_v53 = vld [vmem:[#allocation2 + $0x148] sm:$0xff] }
 0x1e7   :  { %1186 = vrot.lane.b32.xlu1 %v6401_v17, %s5836_s13  ;;  %v6675_v14 = vld [vmem:[#allocation2 + $0x1e9] sm:$0xff] }
 0x1e8   :  { %445 = vst.msk [vmem:[#allocation2 + $0x208] sm:$0xff] %vm29_vm0, %v413_v24  ;;  %1314 = vrot.lane.b32.xlu0 %v530_v22, %s5838_s15  ;;  %1312 = vrot.lane.b32.xlu2 %v529_v18, %s5838_s15  ;;  %v6432_v24 = vld [vmem:[#allocation2 + $0x147] sm:$0xff]  ;;  %v6689_v30 = vld [vmem:[#allocation2 + $0x1f0] sm:$0xff] }
 0x1e9   :  { %v6427_v25 = vpop.permute.xlu1 %790 }
 0x1ea   :  { %v6423_v3 = vpop.permute.xlu2 %1046  ;;  %v6425_v2 = vpop.permute.xlu0 %1042  ;;  %9767 = vst [vmem:[#allocation46_spill] sm:$0xff] %v6427_v25 }
 0x1eb   :  { %9765 = vst [vmem:[#allocation44_spill] sm:$0xff] %v6423_v3  ;;  %v380_v33 = vpop.f32.mrf.mxu0 }
 0x1ec   :  { %9766 = vst [vmem:[#allocation45_spill] sm:$0xff] %v6425_v2  ;;  %v381_v39 = vadd.f32 %v6117_v54, %v380_v33  ;;  %v531_v33 = vld [vmem:[#allocation2 + $0x149] sm:$0xff] }
 0x1ee   :  { %v414_v46 = vmax.f32 %v381_v39, 0.0  ;;  %v6447_v39 = vld [vmem:[#allocation2 + $0x150] sm:$0xff] }
 0x1ef   :  { %808 = vrot.lane.b32.xlu1 %v6430_v53, %s5834_s30  ;;  %v6705_v35 = vld [vmem:[#allocation2 + $0x207] sm:$0xff] }
 0x1f0   :  { %446 = vst.msk [vmem:[#allocation2 + $0x210] sm:$0xff] %vm29_vm0, %v414_v46  ;;  %1188 = vrot.lane.b32.xlu2 %v6430_v53, %s5836_s13  ;;  %1060 = vrot.lane.b32.xlu0 %v6432_v24, %s5837_s14  ;;  %v532_v46 = vld [vmem:[#allocation2 + $0x151] sm:$0xff] }
 0x1f1   :  { %v6445_v54 = vpop.permute.xlu1 %1298 }
 0x1f2   :  { %v6441_v22 = vpop.permute.xlu2 %1300  ;;  %v6443_v18 = vpop.permute.xlu0 %1296  ;;  %9770 = vst [vmem:[#allocation49_spill] sm:$0xff] %v6445_v54  ;;  %v6462_v54 = vld [vmem:[#allocation2 + $0x14f] sm:$0xff] }
 0x1f3   :  { %9768 = vst [vmem:[#allocation47_spill] sm:$0xff] %v6441_v22 }
 0x1f4   :  { %9769 = vst [vmem:[#allocation48_spill] sm:$0xff] %v6443_v18 }
 0x1f7   :  { %938 = vrot.lane.b32.xlu1 %v532_v46, %s5835_s10  ;;  %v6723_v42 = vld [vmem:[#allocation2 + $0x20f] sm:$0xff] }
 0x1f8   :  { %810 = vrot.lane.b32.xlu2 %v6447_v39, %s5834_s30  ;;  %936 = vrot.lane.b32.xlu0 %v531_v33, %s5835_s10  ;;  %v6739_v5 = vld [vmem:[#allocation2 + $0x209] sm:$0xff] }
 0x1f9   :  { %v6457_v22 = vpop.permute.xlu1 %1044 }
 0x1fa   :  { %v6453_v3 = vpop.permute.xlu2 %1176  ;;  %v6455_v25 = vpop.permute.xlu0 %1172  ;;  %9773 = vst [vmem:[#allocation52_spill] sm:$0xff] %v6457_v22 }
 0x1fb   :  { %9771 = vst [vmem:[#allocation50_spill] sm:$0xff] %v6453_v3  ;;  %v6472_v3 = vld [vmem:[#allocation2 + $0x167] sm:$0xff] }
 0x1fc   :  { %9772 = vst [vmem:[#allocation51_spill] sm:$0xff] %v6455_v25  ;;  %v6474_v25 = vld [vmem:[#allocation2 + $0x168] sm:$0xff] }
 0x1ff   :  { %1062 = vrot.lane.b32.xlu1 %v6462_v54, %s5837_s14 }
 0x200   :  { %1318 = vrot.lane.b32.xlu2 %v532_v46, %s5838_s15  ;;  %1190 = vrot.lane.b32.xlu0 %v6447_v39, %s5836_s13 }
 0x201   :  { %v6470_v45 = vpop.permute.xlu1 %920 }
 0x202   :  { %v6466_v2 = vpop.permute.xlu2 %798  ;;  %v6468_v18 = vpop.permute.xlu0 %794  ;;  %9776 = vst [vmem:[#allocation55_spill] sm:$0xff] %v6470_v45  ;;  %v533_v45 = vld [vmem:[#allocation2 + $0x169] sm:$0xff] }
 0x203   :  { %9774 = vst [vmem:[#allocation53_spill] sm:$0xff] %v6466_v2 }
 0x204   :  { %9775 = vst [vmem:[#allocation54_spill] sm:$0xff] %v6468_v18  ;;  %v534_v18 = vld [vmem:[#allocation2 + $0x171] sm:$0xff] }
 0x207   :  { %1316 = vrot.lane.b32.xlu1 %v531_v33, %s5838_s15 }
 0x208   :  { %1064 = vrot.lane.b32.xlu2 %v6472_v3, %s5837_s14  ;;  %812 = vrot.lane.b32.xlu0 %v6474_v25, %s5834_s30 }
 0x209   :  { %v6485_v2 = vpop.permute.xlu1 %1174 }
 0x20a   :  { %v6481_v46 = vpop.permute.xlu2 %1306  ;;  %v6483_v22 = vpop.permute.xlu0 %1302  ;;  %9779 = vst [vmem:[#allocation58_spill] sm:$0xff] %v6485_v2 }
 0x20b   :  { %9777 = vst [vmem:[#allocation56_spill] sm:$0xff] %v6481_v46  ;;  %v6497_v46 = vld [vmem:[#allocation2 + $0x16f] sm:$0xff] }
 0x20c   :  { %9778 = vst [vmem:[#allocation57_spill] sm:$0xff] %v6483_v22  ;;  %v6499_v22 = vld [vmem:[#allocation2 + $0x170] sm:$0xff] }
 0x20f   :  { %1192 = vrot.lane.b32.xlu1 %v6474_v25, %s5836_s13 }
 0x210   :  { %942 = vrot.lane.b32.xlu0 %v534_v18, %s5835_s10  ;;  %940 = vrot.lane.b32.xlu2 %v533_v45, %s5835_s10 }
 0x211   :  { %v6495_v33 = vpop.permute.xlu1 %796 }
 0x212   :  { %v6491_v9 = vpop.permute.xlu2 %1052  ;;  %v6493_v32 = vpop.permute.xlu0 %1048  ;;  %9782 = vst [vmem:[#allocation61_spill] sm:$0xff] %v6495_v33  ;;  %v6513_v33 = vld [vmem:[#allocation2 + $0x188] sm:$0xff] }
 0x213   :  { %9780 = vst [vmem:[#allocation59_spill] sm:$0xff] %v6491_v9 }
 0x214   :  { %9781 = vst [vmem:[#allocation60_spill] sm:$0xff] %v6493_v32 }
 0x217   :  { %814 = vrot.lane.b32.xlu1 %v6499_v22, %s5834_s30 }
 0x218   :  { %1066 = vrot.lane.b32.xlu0 %v6497_v46, %s5837_s14  ;;  %1194 = vrot.lane.b32.xlu2 %v6499_v22, %s5836_s13 }
 0x219   :  { %v6511_v32 = vpop.permute.xlu1 %926 }
 0x21a   :  { %v6507_v2 = vpop.permute.xlu2 %928  ;;  %v6509_v9 = vpop.permute.xlu0 %924  ;;  %9785 = vst [vmem:[#allocation64_spill] sm:$0xff] %v6511_v32  ;;  %v6528_v32 = vld [vmem:[#allocation2 + $0x187] sm:$0xff] }
 0x21b   :  { %9783 = vst [vmem:[#allocation62_spill] sm:$0xff] %v6507_v2  ;;  %v536_v2 = vld [vmem:[#allocation2 + $0x191] sm:$0xff] }
 0x21c   :  { %9784 = vst [vmem:[#allocation63_spill] sm:$0xff] %v6509_v9  ;;  %v6538_v9 = vld [vmem:[#allocation2 + $0x190] sm:$0xff] }
 0x21f   :  { %1322 = vrot.lane.b32.xlu1 %v534_v18, %s5838_s15 }
 0x220   :  { %1320 = vrot.lane.b32.xlu0 %v533_v45, %s5838_s15  ;;  %816 = vrot.lane.b32.xlu2 %v6513_v33, %s5834_s30 }
 0x221   :  { %v6523_v60 = vpop.permute.xlu1 %1050 }
 0x222   :  { %v6519_v12 = vpop.permute.xlu2 %1182  ;;  %v6521_v56 = vpop.permute.xlu0 %1178  ;;  %9788 = vst [vmem:[#allocation67_spill] sm:$0xff] %v6523_v60  ;;  %v535_v60 = vld [vmem:[#allocation2 + $0x189] sm:$0xff] }
 0x223   :  { %9786 = vst [vmem:[#allocation65_spill] sm:$0xff] %v6519_v12 }
 0x224   :  { %9787 = vst [vmem:[#allocation66_spill] sm:$0xff] %v6521_v56  ;;  %v6540_v56 = vld [vmem:[#allocation2 + $0x18f] sm:$0xff] }
 0x227   :  { %1068 = vrot.lane.b32.xlu1 %v6528_v32, %s5837_s14 }
 0x228   :  { %1196 = vrot.lane.b32.xlu0 %v6513_v33, %s5836_s13  ;;  %946 = vrot.lane.b32.xlu2 %v536_v2, %s5835_s10 }
 0x229   :  { %v6536_v12 = vpop.permute.xlu1 %1304 }
 0x22a   :  { %v6532_v45 = vpop.permute.xlu2 %804  ;;  %v6534_v18 = vpop.permute.xlu0 %800  ;;  %9791 = vst [vmem:[#allocation70_spill] sm:$0xff] %v6536_v12 }
 0x22b   :  { %9789 = vst [vmem:[#allocation68_spill] sm:$0xff] %v6532_v45 }
 0x22c   :  { %9790 = vst [vmem:[#allocation69_spill] sm:$0xff] %v6534_v18 }
 0x22f   :  { %944 = vrot.lane.b32.xlu1 %v535_v60, %s5835_s10 }
 0x230   :  { %818 = vrot.lane.b32.xlu0 %v6538_v9, %s5834_s30  ;;  %1070 = vrot.lane.b32.xlu2 %v6540_v56, %s5837_s14 }
 0x231   :  { %v6551_v18 = vpop.permute.xlu1 %1180 }
 0x232   :  { %v6547_v1 = vpop.permute.xlu2 %934  ;;  %v6549_v45 = vpop.permute.xlu0 %930  ;;  %9794 = vst [vmem:[#allocation73_spill] sm:$0xff] %v6551_v18 }
 0x233   :  { %9792 = vst [vmem:[#allocation71_spill] sm:$0xff] %v6547_v1  ;;  %v6565_v1 = vld [vmem:[#allocation2 + $0x1a7] sm:$0xff] }
 0x234   :  { %9793 = vst [vmem:[#allocation72_spill] sm:$0xff] %v6549_v45  ;;  %v6579_v45 = vld [vmem:[#allocation2 + $0x1b0] sm:$0xff] }
 0x237   :  { %1198 = vrot.lane.b32.xlu1 %v6538_v9, %s5836_s13 }
 0x238   :  { %1326 = vrot.lane.b32.xlu0 %v536_v2, %s5838_s15  ;;  %1324 = vrot.lane.b32.xlu2 %v535_v60, %s5838_s15 }
 0x239   :  { %v6561_v34 = vpop.permute.xlu1 %802 }
 0x23a   :  { %v6557_v12 = vpop.permute.xlu2 %1058  ;;  %v6559_v61 = vpop.permute.xlu0 %1054  ;;  %9797 = vst [vmem:[#allocation76_spill] sm:$0xff] %v6561_v34  ;;  %v6581_v34 = vld [vmem:[#allocation2 + $0x1a9] sm:$0xff] }
 0x23b   :  { %9795 = vst [vmem:[#allocation74_spill] sm:$0xff] %v6557_v12 }
 0x23c   :  { %9796 = vst [vmem:[#allocation75_spill] sm:$0xff] %v6559_v61  ;;  %v538_v61 = vld [vmem:[#allocation2 + $0x1b1] sm:$0xff] }
 0x23f   :  { %820 = vrot.lane.b32.xlu1 %v6563_v26, %s5834_s30 }
 0x240   :  { %1200 = vrot.lane.b32.xlu2 %v6563_v26, %s5836_s13  ;;  %1072 = vrot.lane.b32.xlu0 %v6565_v1, %s5837_s14 }
 0x241   :  { %v6577_v12 = vpop.permute.xlu1 %1310 }
 0x242   :  { %v6573_v60 = vpop.permute.xlu2 %1312  ;;  %v6575_v2 = vpop.permute.xlu0 %1308  ;;  %9800 = vst [vmem:[#allocation79_spill] sm:$0xff] %v6577_v12  ;;  %v6597_v12 = vld [vmem:[#allocation2 + $0x1af] sm:$0xff] }
 0x243   :  { %9798 = vst [vmem:[#allocation77_spill] sm:$0xff] %v6573_v60 }
 0x244   :  { %9799 = vst [vmem:[#allocation78_spill] sm:$0xff] %v6575_v2 }
 0x247   :  { %950 = vrot.lane.b32.xlu1 %v538_v61, %s5835_s10 }
 0x248   :  { %822 = vrot.lane.b32.xlu2 %v6579_v45, %s5834_s30  ;;  %948 = vrot.lane.b32.xlu0 %v6581_v34, %s5835_s10 }
 0x249   :  { %v6592_v2 = vpop.permute.xlu1 %1056 }
 0x24a   :  { %v6588_v18 = vpop.permute.xlu2 %1188  ;;  %v6590_v60 = vpop.permute.xlu0 %1184  ;;  %9803 = vst [vmem:[#allocation82_spill] sm:$0xff] %v6592_v2  ;;  %v6625_v2 = vld [vmem:[#allocation2 + $0x1c9] sm:$0xff] }
 0x24b   :  { %9801 = vst [vmem:[#allocation80_spill] sm:$0xff] %v6588_v18  ;;  %v6607_v18 = vld [vmem:[#allocation2 + $0x1c7] sm:$0xff] }
 0x24c   :  { %9802 = vst [vmem:[#allocation81_spill] sm:$0xff] %v6590_v60  ;;  %v6609_v60 = vld [vmem:[#allocation2 + $0x1c8] sm:$0xff] }
 0x24f   :  { %1074 = vrot.lane.b32.xlu1 %v6597_v12, %s5837_s14 }
 0x250   :  { %1330 = vrot.lane.b32.xlu2 %v538_v61, %s5838_s15  ;;  %1202 = vrot.lane.b32.xlu0 %v6579_v45, %s5836_s13 }
 0x251   :  { %v6605_v41 = vpop.permute.xlu1 %932 }
 0x252   :  { %v6601_v40 = vpop.permute.xlu2 %810  ;;  %v6603_v10 = vpop.permute.xlu0 %806  ;;  %9806 = vst [vmem:[#allocation85_spill] sm:$0xff] %v6605_v41  ;;  %v6623_v41 = vld [vmem:[#allocation2 + $0x1d1] sm:$0xff] }
 0x253   :  { %9804 = vst [vmem:[#allocation83_spill] sm:$0xff] %v6601_v40 }
 0x254   :  { %9805 = vst [vmem:[#allocation84_spill] sm:$0xff] %v6603_v10 }
 0x257   :  { %1328 = vrot.lane.b32.xlu1 %v6581_v34, %s5838_s15 }
 0x258   :  { %1076 = vrot.lane.b32.xlu2 %v6607_v18, %s5837_s14  ;;  %824 = vrot.lane.b32.xlu0 %v6609_v60, %s5834_s30 }
 0x259   :  { %v6621_v10 = vpop.permute.xlu1 %1186 }
 0x25a   :  { %v6617_v61 = vpop.permute.xlu2 %1318  ;;  %v6619_v40 = vpop.permute.xlu0 %1314  ;;  %9809 = vst [vmem:[#allocation88_spill] sm:$0xff] %v6621_v10  ;;  %v6639_v10 = vld [vmem:[#allocation2 + $0x1cf] sm:$0xff] }
 0x25b   :  { %9807 = vst [vmem:[#allocation86_spill] sm:$0xff] %v6617_v61 }
 0x25c   :  { %9808 = vst [vmem:[#allocation87_spill] sm:$0xff] %v6619_v40 }
 0x25f   :  { %1204 = vrot.lane.b32.xlu1 %v6609_v60, %s5836_s13 }
 0x260   :  { %954 = vrot.lane.b32.xlu0 %v6623_v41, %s5835_s10  ;;  %952 = vrot.lane.b32.xlu2 %v6625_v2, %s5835_s10 }
 0x261   :  { %v6637_v40 = vpop.permute.xlu1 %808 }
 0x262   :  { %v6633_v50 = vpop.permute.xlu2 %1064  ;;  %v6635_v61 = vpop.permute.xlu0 %1060  ;;  %9812 = vst [vmem:[#allocation91_spill] sm:$0xff] %v6637_v40  ;;  %v6655_v40 = vld [vmem:[#allocation2 + $0x1e8] sm:$0xff] }
 0x263   :  { %9810 = vst [vmem:[#allocation89_spill] sm:$0xff] %v6633_v50 }
 0x264   :  { %9811 = vst [vmem:[#allocation90_spill] sm:$0xff] %v6635_v61 }
 0x267   :  { %826 = vrot.lane.b32.xlu1 %v6641_v57, %s5834_s30 }
 0x268   :  { %1078 = vrot.lane.b32.xlu0 %v6639_v10, %s5837_s14  ;;  %1206 = vrot.lane.b32.xlu2 %v6641_v57, %s5836_s13 }
 0x269   :  { %v6653_v61 = vpop.permute.xlu1 %938 }
 0x26a   :  { %v6649_v58 = vpop.permute.xlu2 %940  ;;  %v6651_v50 = vpop.permute.xlu0 %936  ;;  %9815 = vst [vmem:[#allocation94_spill] sm:$0xff] %v6653_v61  ;;  %v6671_v61 = vld [vmem:[#allocation2 + $0x1f1] sm:$0xff] }
 0x26b   :  { %9813 = vst [vmem:[#allocation92_spill] sm:$0xff] %v6649_v58 }
 0x26c   :  { %9814 = vst [vmem:[#allocation93_spill] sm:$0xff] %v6651_v50 }
 0x26f   :  { %1080 = vrot.lane.b32.xlu1 %v6661_v4, %s5837_s14 }
 0x270   :  { %1332 = vrot.lane.b32.xlu0 %v6625_v2, %s5838_s15  ;;  %828 = vrot.lane.b32.xlu2 %v6655_v40, %s5834_s30 }
 0x271   :  { %v6669_v50 = vpop.permute.xlu1 %1062 }
 0x272   :  { %v6665_v63 = vpop.permute.xlu2 %1194  ;;  %v6667_v58 = vpop.permute.xlu0 %1190  ;;  %9818 = vst [vmem:[#allocation97_spill] sm:$0xff] %v6669_v50  ;;  %v6687_v50 = vld [vmem:[#allocation2 + $0x1ef] sm:$0xff] }
 0x273   :  { %9816 = vst [vmem:[#allocation95_spill] sm:$0xff] %v6665_v63 }
 0x274   :  { %9817 = vst [vmem:[#allocation96_spill] sm:$0xff] %v6667_v58 }
 0x277   :  { %956 = vrot.lane.b32.xlu1 %v6675_v14, %s5835_s10 }
 0x278   :  { %958 = vrot.lane.b32.xlu2 %v6671_v61, %s5835_s10  ;;  %1208 = vrot.lane.b32.xlu0 %v6655_v40, %s5836_s13 }
 0x279   :  { %v6685_v58 = vpop.permute.xlu1 %1316 }
 0x27a   :  { %v6681_v7 = vpop.permute.xlu2 %816  ;;  %v6683_v63 = vpop.permute.xlu0 %812  ;;  %9821 = vst [vmem:[#allocation100_spill] sm:$0xff] %v6685_v58  ;;  %v6703_v58 = vld [vmem:[#allocation2 + $0x208] sm:$0xff] }
 0x27b   :  { %9819 = vst [vmem:[#allocation98_spill] sm:$0xff] %v6681_v7 }
 0x27c   :  { %9820 = vst [vmem:[#allocation99_spill] sm:$0xff] %v6683_v63 }
 0x27f   :  { %1210 = vrot.lane.b32.xlu1 %v6689_v30, %s5836_s13 }
 0x280   :  { %1082 = vrot.lane.b32.xlu2 %v6687_v50, %s5837_s14  ;;  %830 = vrot.lane.b32.xlu0 %v6689_v30, %s5834_s30 }
 0x281   :  { %v6701_v63 = vpop.permute.xlu1 %1192 }
 0x282   :  { %v6697_v31 = vpop.permute.xlu2 %946  ;;  %v6699_v7 = vpop.permute.xlu0 %942  ;;  %9824 = vst [vmem:[#allocation103_spill] sm:$0xff] %v6701_v63  ;;  %v6719_v63 = vld [vmem:[#allocation2 + $0x210] sm:$0xff] }
 0x283   :  { %9822 = vst [vmem:[#allocation101_spill] sm:$0xff] %v6697_v31 }
 0x284   :  { %9823 = vst [vmem:[#allocation102_spill] sm:$0xff] %v6699_v7 }
 0x287   :  { %1334 = vrot.lane.b32.xlu1 %v6623_v41, %s5838_s15 }
 0x288   :  { %1212 = vrot.lane.b32.xlu2 %v6703_v58, %s5836_s13  ;;  %1084 = vrot.lane.b32.xlu0 %v6705_v35, %s5837_s14 }
 0x289   :  { %v6717_v7 = vpop.permute.xlu1 %814 }
 0x28a   :  { %v6713_v16 = vpop.permute.xlu2 %1070  ;;  %v6715_v31 = vpop.permute.xlu0 %1066  ;;  %9827 = vst [vmem:[#allocation106_spill] sm:$0xff] %v6717_v7  ;;  %v6735_v7 = vld [vmem:[#allocation2 + $0x211] sm:$0xff] }
 0x28b   :  { %9825 = vst [vmem:[#allocation104_spill] sm:$0xff] %v6713_v16 }
 0x28c   :  { %9826 = vst [vmem:[#allocation105_spill] sm:$0xff] %v6715_v31 }
 0x28f   :  { %1086 = vrot.lane.b32.xlu1 %v6723_v42, %s5837_s14 }
 0x290   :  { %1336 = vrot.lane.b32.xlu2 %v6675_v14, %s5838_s15  ;;  %1214 = vrot.lane.b32.xlu0 %v6719_v63, %s5836_s13 }
 0x291   :  { %v6733_v31 = vpop.permute.xlu1 %1322 }
 0x292   :  { %v6729_v51 = vpop.permute.xlu2 %1324  ;;  %v6731_v16 = vpop.permute.xlu0 %1320  ;;  %9830 = vst [vmem:[#allocation109_spill] sm:$0xff] %v6733_v31  ;;  %v642_v31 = vld [vmem:[#allocation2 + $0x67] sm:$0xff] }
 0x293   :  { %9828 = vst [vmem:[#allocation107_spill] sm:$0xff] %v6729_v51 }
 0x294   :  { %9829 = vst [vmem:[#allocation108_spill] sm:$0xff] %v6731_v16 }
 0x297   :  { %1340 = vrot.lane.b32.xlu1 %v6739_v5, %s5838_s15 }
 0x298   :  { %1342 = vrot.lane.b32.xlu2 %v6735_v7, %s5838_s15  ;;  %1338 = vrot.lane.b32.xlu0 %v6671_v61, %s5838_s15 }
 0x299   :  { %v6749_v16 = vpop.permute.xlu1 %1068 }
 0x29a   :  { %v6745_v37 = vpop.permute.xlu2 %1200  ;;  %v6747_v51 = vpop.permute.xlu0 %1196  ;;  %9833 = vst [vmem:[#allocation112_spill] sm:$0xff] %v6749_v16  ;;  %v644_v16 = vld [vmem:[#allocation2 + $0x87] sm:$0xff] }
 0x29b   :  { %9831 = vst [vmem:[#allocation110_spill] sm:$0xff] %v6745_v37  ;;  %v645_v37 = vld [vmem:[#allocation2 + $0x8f] sm:$0xff] }
 0x29c   :  { %9832 = vst [vmem:[#allocation111_spill] sm:$0xff] %v6747_v51  ;;  %v643_v51 = vld [vmem:[#allocation2 + $0x6f] sm:$0xff] }
 0x29f   :  { %1410 = vrot.lane.b32.xlu1 %v641_v15, %s5839_s16 }
 0x2a0   :  { %1412 = vrot.lane.b32.xlu2 %v642_v31, %s5839_s16  ;;  %1408 = vrot.lane.b32.xlu0 %v640_v13, %s5839_s16 }
 0x2a1   :  { %v6758_v36 = vpop.permute.xlu1 %944 }
 0x2a2   :  { %v6754_v0 = vpop.permute.xlu2 %822  ;;  %v6756_v27 = vpop.permute.xlu0 %818  ;;  %9836 = vst [vmem:[#allocation115_spill] sm:$0xff] %v6758_v36 }
 0x2a3   :  { %9834 = vst [vmem:[#allocation113_spill] sm:$0xff] %v6754_v0  ;;  %v646_v0 = vld [vmem:[#allocation2 + $0xa7] sm:$0xff] }
 0x2a4   :  { %9835 = vst [vmem:[#allocation114_spill] sm:$0xff] %v6756_v27  ;;  %v647_v27 = vld [vmem:[#allocation2 + $0xaf] sm:$0xff] }
 0x2a7   :  { %1416 = vrot.lane.b32.xlu1 %v644_v16, %s5839_s16 }
 0x2a8   :  { %1418 = vrot.lane.b32.xlu2 %v645_v37, %s5839_s16  ;;  %1414 = vrot.lane.b32.xlu0 %v643_v51, %s5839_s16 }
 0x2a9   :  { %v6767_v15 = vpop.permute.xlu1 %1198 }
 0x2aa   :  { %v6763_v31 = vpop.permute.xlu2 %1330  ;;  %v6765_v13 = vpop.permute.xlu0 %1326 }
 0x2ab   :  { %9837 = vst [vmem:[#allocation116_spill] sm:$0xff] %v6763_v31  ;;  %v718_v31 = vld [vmem:[#allocation2 + $0x129] sm:$0xff] }
 0x2ac   :  { %9838 = vst [vmem:[#allocation117_spill] sm:$0xff] %v6765_v13  ;;  %v734_v13 = vld [vmem:[#allocation2 + $0x229] sm:$0xff] }
 0x2af   :  { %1422 = vrot.lane.b32.xlu1 %v647_v27, %s5839_s16 }
 0x2b0   :  { %1424 = vrot.lane.b32.xlu2 %v6259_v49, %s5839_s16  ;;  %1420 = vrot.lane.b32.xlu0 %v646_v0, %s5839_s16 }
 0x2b1   :  { %v6777_v16 = vpop.permute.xlu1 %820 }
 0x2b2   :  { %v6773_v37 = vpop.permute.xlu2 %1076  ;;  %v6775_v51 = vpop.permute.xlu0 %1072  ;;  %9841 = vst [vmem:[#allocation120_spill] sm:$0xff] %v6777_v16  ;;  %v715_v16 = vld [vmem:[#allocation2 + $0xf1] sm:$0xff] }
 0x2b3   :  { %9839 = vst [vmem:[#allocation118_spill] sm:$0xff] %v6773_v37  ;;  %v714_v37 = vld [vmem:[#allocation2 + $0xe9] sm:$0xff] }
 0x2b4   :  { %9840 = vst [vmem:[#allocation119_spill] sm:$0xff] %v6775_v51 }
 0x2b7   :  { %1428 = vrot.lane.b32.xlu1 %v6298_v11, %s5839_s16 }
 0x2b8   :  { %1430 = vrot.lane.b32.xlu2 %v6326_v38, %s5839_s16  ;;  %1426 = vrot.lane.b32.xlu0 %v6273_v59, %s5839_s16 }
 0x2b9   :  { %v6789_v27 = vpop.permute.xlu1 %950 }
 0x2ba   :  { %v6785_v49 = vpop.permute.xlu2 %952  ;;  %v6787_v0 = vpop.permute.xlu0 %948  ;;  %9844 = vst [vmem:[#allocation123_spill] sm:$0xff] %v6789_v27  ;;  %v711_v27 = vld [vmem:[#allocation2 + $0xb1] sm:$0xff] }
 0x2bb   :  { %9842 = vst [vmem:[#allocation121_spill] sm:$0xff] %v6785_v49 }
 0x2bc   :  { %9843 = vst [vmem:[#allocation122_spill] sm:$0xff] %v6787_v0  ;;  %v712_v0 = vld [vmem:[#allocation2 + $0xc9] sm:$0xff] }
 0x2bf   :  { %1434 = vrot.lane.b32.xlu1 %v6362_v23, %s5839_s16 }
 0x2c0   :  { %1436 = vrot.lane.b32.xlu2 %v6390_v8, %s5839_s16  ;;  %1432 = vrot.lane.b32.xlu0 %v6337_v47, %s5839_s16 }
 0x2c1   :  { %v6801_v11 = vpop.permute.xlu1 %1074 }
 0x2c2   :  { %v6797_v38 = vpop.permute.xlu2 %1206  ;;  %v6799_v59 = vpop.permute.xlu0 %1202  ;;  %9847 = vst [vmem:[#allocation126_spill] sm:$0xff] %v6801_v11  ;;  %v722_v11 = vld [vmem:[#allocation2 + $0x169] sm:$0xff] }
 0x2c3   :  { %9845 = vst [vmem:[#allocation124_spill] sm:$0xff] %v6797_v38  ;;  %v708_v38 = vld [vmem:[#allocation2 + $0x89] sm:$0xff] }
 0x2c4   :  { %9846 = vst [vmem:[#allocation125_spill] sm:$0xff] %v6799_v59  ;;  %v721_v59 = vld [vmem:[#allocation2 + $0x151] sm:$0xff] }
 0x2c7   :  { %1440 = vrot.lane.b32.xlu1 %v6432_v24, %s5839_s16 }
 0x2c8   :  { %1442 = vrot.lane.b32.xlu2 %v6462_v54, %s5839_s16  ;;  %1438 = vrot.lane.b32.xlu0 %v6403_v48, %s5839_s16 }
 0x2c9   :  { %v6813_v23 = vpop.permute.xlu1 %1328 }
 0x2ca   :  { %v6809_v8 = vpop.permute.xlu2 %828  ;;  %v6811_v47 = vpop.permute.xlu0 %824  ;;  %9850 = vst [vmem:[#allocation129_spill] sm:$0xff] %v6813_v23  ;;  %v2024_v23 = vld [vmem:[%s9718_s3 + $0x8] sm:$0xff] }
 0x2cb   :  { %9848 = vst [vmem:[#allocation127_spill] sm:$0xff] %v6809_v8  ;;  %v672_v8 = vld [vmem:[#allocation2 + $0x48] sm:$0xff] }
 0x2cc   :  { %9849 = vst [vmem:[#allocation128_spill] sm:$0xff] %v6811_v47 }
 0x2cf   :  { %1446 = vrot.lane.b32.xlu1 %v6497_v46, %s5839_s16 }
 0x2d0   :  { %1448 = vrot.lane.b32.xlu2 %v6528_v32, %s5839_s16  ;;  %1444 = vrot.lane.b32.xlu0 %v6472_v3, %s5839_s16 }
 0x2d1   :  { %v6825_v24 = vpop.permute.xlu1 %1204 }
 0x2d2   :  { %v6821_v54 = vpop.permute.xlu2 %958  ;;  %v6823_v48 = vpop.permute.xlu0 %954  ;;  %9853 = vst [vmem:[#allocation132_spill] sm:$0xff] %v6825_v24  ;;  %v2027_v24 = vld [vmem:[%s9718_s3 + $0x20] sm:$0xff] }
 0x2d3   :  { %9851 = vst [vmem:[#allocation130_spill] sm:$0xff] %v6821_v54  ;;  %v2031_v54 = vld [vmem:[%s9718_s3 + $0x40] sm:$0xff] }
 0x2d4   :  { %9852 = vst [vmem:[#allocation131_spill] sm:$0xff] %v6823_v48  ;;  %2140 = vmatpush.msrb.mxu0 %v2031_v54  ;;  %5712 = vmatpush.msra.mxu1 %v2031_v54  ;;  %v673_v48 = vld [vmem:[#allocation2 + $0x50] sm:$0xff]  ;;  %v674_v54 = vld [vmem:[#allocation2 + $0x68] sm:$0xff] }
 0x2d7   :  { %1452 = vrot.lane.b32.xlu1 %v6565_v1, %s5839_s16 }
 0x2d8   :  { %1454 = vrot.lane.b32.xlu2 %v6597_v12, %s5839_s16  ;;  %1450 = vrot.lane.b32.xlu0 %v6540_v56, %s5839_s16 }
 0x2d9   :  { %v6837_v46 = vpop.permute.xlu1 %826 }
 0x2da   :  { %v6833_v32 = vpop.permute.xlu2 %1082  ;;  %v6835_v3 = vpop.permute.xlu0 %1078  ;;  %9856 = vst [vmem:[#allocation135_spill] sm:$0xff] %v6837_v46  ;;  %v679_v46 = vld [vmem:[#allocation2 + $0xb0] sm:$0xff] }
 0x2db   :  { %9854 = vst [vmem:[#allocation133_spill] sm:$0xff] %v6833_v32  ;;  %v675_v32 = vld [vmem:[#allocation2 + $0x70] sm:$0xff] }
 0x2dc   :  { %9855 = vst [vmem:[#allocation134_spill] sm:$0xff] %v6835_v3  ;;  %v707_v3 = vld [vmem:[#allocation2 + $0x71] sm:$0xff] }
 0x2df   :  { %1458 = vrot.lane.b32.xlu1 %v6639_v10, %s5839_s16 }
 0x2e0   :  { %1460 = vrot.lane.b32.xlu2 %v6661_v4, %s5839_s16  ;;  %1456 = vrot.lane.b32.xlu0 %v6607_v18, %s5839_s16 }
 0x2e1   :  { %v6849_v1 = vpop.permute.xlu1 %1080 }
 0x2e2   :  { %v6845_v12 = vpop.permute.xlu2 %1212  ;;  %v6847_v56 = vpop.permute.xlu0 %1332  ;;  %9859 = vst [vmem:[#allocation138_spill] sm:$0xff] %v6849_v1  ;;  %v685_v1 = vld [vmem:[#allocation2 + $0x110] sm:$0xff] }
 0x2e3   :  { %9857 = vst [vmem:[#allocation136_spill] sm:$0xff] %v6845_v12  ;;  %v670_v12 = vld [vmem:[#allocation2 + $0x227] sm:$0xff] }
 0x2e4   :  { %9858 = vst [vmem:[#allocation137_spill] sm:$0xff] %v6847_v56  ;;  %v710_v56 = vld [vmem:[#allocation2 + $0xa9] sm:$0xff] }
 0x2e7   :  { %1464 = vrot.lane.b32.xlu1 %v6705_v35, %s5839_s16 }
 0x2e8   :  { %1466 = vrot.lane.b32.xlu2 %v6723_v42, %s5839_s16  ;;  %1462 = vrot.lane.b32.xlu0 %v6687_v50, %s5839_s16  ;;  %v671_v42 = vld [vmem:[#allocation2 + $0x22f] sm:$0xff] }
 0x2e9   :  { %v6861_v10 = vpop.permute.xlu1 %956 }
 0x2ea   :  { %v6857_v4 = vpop.permute.xlu2 %1336  ;;  %v6859_v18 = vpop.permute.xlu0 %1208  ;;  %9862 = vst [vmem:[#allocation141_spill] sm:$0xff] %v6861_v10 }
 0x2eb   :  { %9860 = vst [vmem:[#allocation139_spill] sm:$0xff] %v6857_v4  ;;  %v676_v4 = vld [vmem:[#allocation2 + $0x88] sm:$0xff] }
 0x2ec   :  { %9861 = vst [vmem:[#allocation140_spill] sm:$0xff] %v6859_v18  ;;  %v682_v18 = vld [vmem:[#allocation2 + $0xe8] sm:$0xff] }
 0x2ef   :  { %1470 = vrot.lane.b32.xlu1 %v671_v42, %s5839_s16 }
 0x2f0   :  { %1536 = vrot.lane.b32.xlu2 %v672_v8, %s5840_s19  ;;  %1468 = vrot.lane.b32.xlu0 %v670_v12, %s5839_s16 }
 0x2f1   :  { %v6873_v10 = vpop.permute.xlu1 %1210 }
 0x2f2   :  { %v6869_v35 = vpop.permute.xlu2 %1342  ;;  %v6871_v50 = vpop.permute.xlu0 %830  ;;  %9865 = vst [vmem:[#allocation144_spill] sm:$0xff] %v6873_v10  ;;  %v681_v10 = vld [vmem:[#allocation2 + $0xd0] sm:$0xff] }
 0x2f3   :  { %9863 = vst [vmem:[#allocation142_spill] sm:$0xff] %v6869_v35  ;;  %v678_v35 = vld [vmem:[#allocation2 + $0xa8] sm:$0xff] }
 0x2f4   :  { %9864 = vst [vmem:[#allocation143_spill] sm:$0xff] %v6871_v50  ;;  %v677_v50 = vld [vmem:[#allocation2 + $0x90] sm:$0xff] }
 0x2f7   :  { %1540 = vrot.lane.b32.xlu1 %v674_v54, %s5840_s19 }
 0x2f8   :  { %1542 = vrot.lane.b32.xlu2 %v675_v32, %s5840_s19  ;;  %1538 = vrot.lane.b32.xlu0 %v673_v48, %s5840_s19 }
 0x2f9   :  { %v6882_v42 = vpop.permute.xlu1 %1334 }
 0x2fa   :  { %v6878_v8 = vpop.permute.xlu2 %1412  ;;  %v6880_v12 = vpop.permute.xlu0 %1084  ;;  %9867 = vst [vmem:[#allocation146_spill] sm:$0xff] %v6882_v42  ;;  %v703_v42 = vld [vmem:[#allocation2 + $0x230] sm:$0xff] }
 0x2fb   :  { %9866 = vst [vmem:[#allocation145_spill] sm:$0xff] %v6880_v12  ;;  %v2030_v12 = vld [vmem:[%s9718_s3 + $0x38] sm:$0xff] }
 0x2fc   :  { %2141 = vmatpush.msrb.mxu0 %v2030_v12  ;;  %5713 = vmatpush.msra.mxu1 %v2030_v12  ;;  %v683_v12 = vld [vmem:[#allocation2 + $0xf0] sm:$0xff] }
 0x2ff   :  { %1546 = vrot.lane.b32.xlu1 %v677_v50, %s5840_s19 }
 0x300   :  { %1548 = vrot.lane.b32.xlu2 %v678_v35, %s5840_s19  ;;  %1544 = vrot.lane.b32.xlu0 %v676_v4, %s5840_s19  ;;  %v680_v35 = vld [vmem:[#allocation2 + $0xc8] sm:$0xff] }
 0x301   :  { %v6891_v54 = vpop.permute.xlu1 %1086 }
 0x302   :  { %v6887_v32 = vpop.permute.xlu2 %1418  ;;  %v6889_v48 = vpop.permute.xlu0 %1214  ;;  %9869 = vst [vmem:[#allocation148_spill] sm:$0xff] %v6891_v54  ;;  %v684_v54 = vld [vmem:[#allocation2 + $0x108] sm:$0xff] }
 0x303   :  { %9868 = vst [vmem:[#allocation147_spill] sm:$0xff] %v6889_v48 }
 0x307   :  { %1552 = vrot.lane.b32.xlu1 %v680_v35, %s5840_s19 }
 0x308   :  { %1554 = vrot.lane.b32.xlu2 %v681_v10, %s5840_s19  ;;  %1550 = vrot.lane.b32.xlu0 %v679_v46, %s5840_s19 }
 0x309   :  { %v6903_v48 = vpop.permute.xlu1 %1340 }
 0x30a   :  { %v6899_v4 = vpop.permute.xlu2 %1424  ;;  %v6901_v50 = vpop.permute.xlu0 %1338  ;;  %9871 = vst [vmem:[#allocation150_spill] sm:$0xff] %v6903_v48  ;;  %v686_v48 = vld [vmem:[#allocation2 + $0x128] sm:$0xff] }
 0x30b   :  { %9870 = vst [vmem:[#allocation149_spill] sm:$0xff] %v6901_v50  ;;  %v2029_v50 = vld [vmem:[%s9718_s3 + $0x30] sm:$0xff] }
 0x30c   :  { %2142 = vmatpush.msrb.mxu0 %v2029_v50  ;;  %5714 = vmatpush.msra.mxu1 %v2029_v50  ;;  %v702_v50 = vld [vmem:[#allocation2 + $0x228] sm:$0xff] }
 0x30f   :  { %1558 = vrot.lane.b32.xlu1 %v683_v12, %s5840_s19 }
 0x310   :  { %1560 = vrot.lane.b32.xlu2 %v684_v54, %s5840_s19  ;;  %1556 = vrot.lane.b32.xlu0 %v682_v18, %s5840_s19 }
 0x311   :  { %v6912_v35 = vpop.permute.xlu1 %1410 }
 0x312   :  { %v6908_v10 = vpop.permute.xlu2 %1430  ;;  %v6910_v46 = vpop.permute.xlu0 %1408 }
 0x317   :  { %1564 = vrot.lane.b32.xlu1 %v686_v48, %s5840_s19 }
 0x318   :  { %1566 = vrot.lane.b32.xlu2 %v6401_v17, %s5840_s19  ;;  %1562 = vrot.lane.b32.xlu0 %v685_v1, %s5840_s19 }
 0x319   :  { %v6922_v12 = vpop.permute.xlu1 %1416 }
 0x31a   :  { %v6918_v54 = vpop.permute.xlu2 %1436  ;;  %v6920_v18 = vpop.permute.xlu0 %1414 }
 0x31f   :  { %1570 = vrot.lane.b32.xlu1 %v6447_v39, %s5840_s19 }
 0x320   :  { %1572 = vrot.lane.b32.xlu2 %v6474_v25, %s5840_s19  ;;  %1568 = vrot.lane.b32.xlu0 %v6430_v53, %s5840_s19 }
 0x321   :  { %v6934_v48 = vpop.permute.xlu1 %1422 }
 0x322   :  { %v6930_v17 = vpop.permute.xlu2 %1442  ;;  %v6932_v1 = vpop.permute.xlu0 %1420 }
 0x327   :  { %1576 = vrot.lane.b32.xlu1 %v6513_v33, %s5840_s19 }
 0x328   :  { %1578 = vrot.lane.b32.xlu2 %v6538_v9, %s5840_s19  ;;  %1574 = vrot.lane.b32.xlu0 %v6499_v22, %s5840_s19 }
 0x329   :  { %v6949_v39 = vpop.permute.xlu1 %1428 }
 0x32a   :  { %v6945_v25 = vpop.permute.xlu2 %1448  ;;  %v6947_v53 = vpop.permute.xlu0 %1426 }
 0x32f   :  { %1582 = vrot.lane.b32.xlu1 %v6579_v45, %s5840_s19 }
 0x330   :  { %1584 = vrot.lane.b32.xlu2 %v6609_v60, %s5840_s19  ;;  %1580 = vrot.lane.b32.xlu0 %v6563_v26, %s5840_s19 }
 0x331   :  { %v6961_v33 = vpop.permute.xlu1 %1434 }
 0x332   :  { %v6957_v9 = vpop.permute.xlu2 %1454  ;;  %v6959_v22 = vpop.permute.xlu0 %1432 }
 0x333   :  { %9872 = vst [vmem:[#allocation151_spill] sm:$0xff] %v6957_v9 }
 0x337   :  { %1588 = vrot.lane.b32.xlu1 %v6655_v40, %s5840_s19 }
 0x338   :  { %1590 = vrot.lane.b32.xlu2 %v6689_v30, %s5840_s19  ;;  %1586 = vrot.lane.b32.xlu0 %v6641_v57, %s5840_s19  ;;  %v2028_v30 = vld [vmem:[%s9718_s3 + $0x28] sm:$0xff] }
 0x339   :  { %v6973_v45 = vpop.permute.xlu1 %1440  ;;  %2143 = vmatpush.msrb.mxu0 %v2028_v30  ;;  %5715 = vmatpush.msra.mxu1 %v2028_v30  ;;  %v706_v30 = vld [vmem:[#allocation2 + $0x69] sm:$0xff] }
 0x33a   :  { %v6969_v60 = vpop.permute.xlu2 %1460  ;;  %v6971_v26 = vpop.permute.xlu0 %1438 }
 0x33b   :  { %9873 = vst [vmem:[#allocation152_spill] sm:$0xff] %v6969_v60  ;;  %v709_v60 = vld [vmem:[#allocation2 + $0x91] sm:$0xff]  ;;  %2144 = vmatpush.msrb.mxu0 %v2027_v24  ;;  %5716 = vmatpush.msra.mxu1 %v2027_v24  ;;  %v716_v24 = vld [vmem:[#allocation2 + $0x109] sm:$0xff] }
 0x33f   :  { %1594 = vrot.lane.b32.xlu1 %v6719_v63, %s5840_s19 }
 0x340   :  { %1596 = vrot.lane.b32.xlu2 %v702_v50, %s5840_s19  ;;  %1592 = vrot.lane.b32.xlu0 %v6703_v58, %s5840_s19  ;;  %v705_v50 = vld [vmem:[#allocation2 + $0x51] sm:$0xff]  ;;  %v704_v58 = vld [vmem:[#allocation2 + $0x49] sm:$0xff] }
 0x341   :  { %v6987_v49 = vpop.permute.xlu1 %1446 }
 0x342   :  { %v6983_v40 = vpop.permute.xlu2 %1466  ;;  %v6985_v57 = vpop.permute.xlu0 %1444 }
 0x343   :  { %9874 = vst [vmem:[#allocation153_spill] sm:$0xff] %v6983_v40 }
 0x347   :  { %1664 = vrot.lane.b32.xlu1 %v704_v58, %s5841_s26 }
 0x348   :  { %1666 = vrot.lane.b32.xlu2 %v705_v50, %s5841_s26  ;;  %1598 = vrot.lane.b32.xlu0 %v703_v42, %s5840_s19 }
 0x349   :  { %v6996_v40 = vpop.permute.xlu1 %1452 }
 0x34a   :  { %v6992_v63 = vpop.permute.xlu2 %1536  ;;  %v6994_v47 = vpop.permute.xlu0 %1450 }
 0x34f   :  { %1670 = vrot.lane.b32.xlu1 %v707_v3, %s5841_s26 }
 0x350   :  { %1672 = vrot.lane.b32.xlu2 %v708_v38, %s5841_s26  ;;  %1668 = vrot.lane.b32.xlu0 %v706_v30, %s5841_s26 }
 0x351   :  { %v7005_v58 = vpop.permute.xlu1 %1458 }
 0x352   :  { %v7001_v50 = vpop.permute.xlu2 %1542  ;;  %v7003_v42 = vpop.permute.xlu0 %1456  ;;  %9876 = vst [vmem:[#allocation155_spill] sm:$0xff] %v7005_v58  ;;  %v720_v58 = vld [vmem:[#allocation2 + $0x149] sm:$0xff] }
 0x353   :  { %9875 = vst [vmem:[#allocation154_spill] sm:$0xff] %v7003_v42 }
 0x357   :  { %1676 = vrot.lane.b32.xlu1 %v710_v56, %s5841_s26 }
 0x358   :  { %1678 = vrot.lane.b32.xlu2 %v711_v27, %s5841_s26  ;;  %1674 = vrot.lane.b32.xlu0 %v709_v60, %s5841_s26  ;;  %v713_v27 = vld [vmem:[#allocation2 + $0xd1] sm:$0xff] }
 0x359   :  { %v7014_v3 = vpop.permute.xlu1 %1464 }
 0x35a   :  { %v7010_v38 = vpop.permute.xlu2 %1548  ;;  %v7012_v30 = vpop.permute.xlu0 %1462  ;;  %9878 = vst [vmem:[#allocation157_spill] sm:$0xff] %v7014_v3 }
 0x35b   :  { %9877 = vst [vmem:[#allocation156_spill] sm:$0xff] %v7012_v30  ;;  %v717_v30 = vld [vmem:[#allocation2 + $0x111] sm:$0xff] }
 0x35f   :  { %1682 = vrot.lane.b32.xlu1 %v713_v27, %s5841_s26 }
 0x360   :  { %1684 = vrot.lane.b32.xlu2 %v714_v37, %s5841_s26  ;;  %1680 = vrot.lane.b32.xlu0 %v712_v0, %s5841_s26 }
 0x361   :  { %v7026_v3 = vpop.permute.xlu1 %1470 }
 0x362   :  { %v7022_v56 = vpop.permute.xlu2 %1554  ;;  %v7024_v60 = vpop.permute.xlu0 %1468  ;;  %9880 = vst [vmem:[#allocation159_spill] sm:$0xff] %v7026_v3  ;;  %v719_v3 = vld [vmem:[#allocation2 + $0x131] sm:$0xff] }
 0x363   :  { %9879 = vst [vmem:[#allocation158_spill] sm:$0xff] %v7024_v60  ;;  %v723_v60 = vld [vmem:[#allocation2 + $0x171] sm:$0xff] }
 0x367   :  { %1688 = vrot.lane.b32.xlu1 %v716_v24, %s5841_s26 }
 0x368   :  { %1690 = vrot.lane.b32.xlu2 %v717_v30, %s5841_s26  ;;  %1686 = vrot.lane.b32.xlu0 %v715_v16, %s5841_s26 }
 0x369   :  { %v7035_v27 = vpop.permute.xlu1 %1540 }
 0x36a   :  { %v7031_v37 = vpop.permute.xlu2 %1560  ;;  %v7033_v0 = vpop.permute.xlu0 %1538 }
 0x36f   :  { %1694 = vrot.lane.b32.xlu1 %v719_v3, %s5841_s26 }
 0x370   :  { %1696 = vrot.lane.b32.xlu2 %v720_v58, %s5841_s26  ;;  %1692 = vrot.lane.b32.xlu0 %v718_v31, %s5841_s26  ;;  %v2026_v31 = vld [vmem:[%s9718_s3 + $0x18] sm:$0xff] }
 0x371   :  { %v7044_v24 = vpop.permute.xlu1 %1546  ;;  %2145 = vmatpush.msrb.mxu0 %v2026_v31  ;;  %5717 = vmatpush.msra.mxu1 %v2026_v31 }
 0x372   :  { %v7040_v30 = vpop.permute.xlu2 %1566  ;;  %v7042_v16 = vpop.permute.xlu0 %1544 }
 0x377   :  { %1700 = vrot.lane.b32.xlu1 %v722_v11, %s5841_s26  ;;  %v725_v11 = vld [vmem:[#allocation2 + $0x191] sm:$0xff] }
 0x378   :  { %1702 = vrot.lane.b32.xlu2 %v723_v60, %s5841_s26  ;;  %1698 = vrot.lane.b32.xlu0 %v721_v59, %s5841_s26  ;;  %v2025_v60 = vld [vmem:[%s9718_s3 + $0x10] sm:$0xff] }
 0x379   :  { %v7056_v42 = vpop.permute.xlu1 %1552  ;;  %5718 = vmatpush.msra.mxu1 %v2025_v60  ;;  %2146 = vmatpush.msrb.mxu0 %v2025_v60  ;;  %v724_v59 = vld [vmem:[#allocation2 + $0x189] sm:$0xff] }
 0x37a   :  { %v7052_v58 = vpop.permute.xlu2 %1572  ;;  %v7054_v3 = vpop.permute.xlu0 %1550 }
 0x37b   :  { %5719 = vmatpush.msra.mxu1 %v2024_v23  ;;  %2147 = vmatpush.msrb.mxu0 %v2024_v23 }
 0x37f   :  { %1706 = vrot.lane.b32.xlu1 %v725_v11, %s5841_s26  ;;  %v727_v11 = vld [vmem:[#allocation2 + $0x1b1] sm:$0xff] }
 0x380   :  { %1708 = vrot.lane.b32.xlu2 %v6581_v34, %s5841_s26  ;;  %1704 = vrot.lane.b32.xlu0 %v724_v59, %s5841_s26  ;;  %v2023_v34 = vld [vmem:[%s9718_s3] sm:$0xff] }
 0x381   :  { %v7072_v60 = vpop.permute.xlu1 %1558  ;;  %5720 = vmatpush.msra.mxu1 %v2023_v34  ;;  %2148 = vmatpush.msrb.mxu0 %v2023_v34  ;;  %v5735_v59 = vld [vmem:[%s9716_s1] sm:$0xff] }
 0x382   :  { %v7068_v31 = vpop.permute.xlu2 %1578  ;;  %v7070_v51 = vpop.permute.xlu0 %1556 }
 0x383   :  { %2947 = vmatpush.msra.mxu0 %v5735_v59 }
 0x387   :  { %1712 = vrot.lane.b32.xlu1 %v6625_v2, %s5841_s26  ;;  %v448_v2 = vld [vmem:[#allocation2 + $0xf] sm:$0xff] }
 0x388   :  { %1714 = vrot.lane.b32.xlu2 %v6623_v41, %s5841_s26  ;;  %1710 = vrot.lane.b32.xlu0 %v727_v11, %s5841_s26  ;;  %v735_v11 = vld [vmem:[#allocation2 + $0x231] sm:$0xff] }
 0x389   :  { %v7089_v9 = vpop.permute.xlu1 %1564 }
 0x38a   :  { %v7085_v23 = vpop.permute.xlu2 %1584  ;;  %v7087_v36 = vpop.permute.xlu0 %1562 }
 0x38b   :  { %9881 = vst [vmem:[#allocation160_spill] sm:$0xff] %v7085_v23  ;;  %v1761_v23 = vsel %vm29_vm0, %v448_v2, %v6217_v19 }
 0x38f   :  { %1718 = vrot.lane.b32.xlu1 %v6671_v61, %s5841_s26 }
 0x390   :  { %1720 = vrot.lane.b32.xlu2 %v6739_v5, %s5841_s26  ;;  %1716 = vrot.lane.b32.xlu0 %v6675_v14, %s5841_s26  ;;  %v1794_v5 = vsel %vm1792_vm2, %v1761_v23, %v6193_v62  ;;  %v5520_v62 = vld [vmem:[%s9715_s0 + $0x100] sm:$0xff] }
 0x391   :  { %v7101_v59 = vpop.permute.xlu1 %1570  ;;  %v1827_v14 = vsel %vm1825_vm3, %v1794_v5, %v6256_v44 }
 0x392   :  { %v7097_v41 = vpop.permute.xlu2 %1590  ;;  %v7099_v34 = vpop.permute.xlu0 %1568  ;;  %v1860_v2 = vsel %vm1858_vm4, %v1827_v14, %v6254_v43  ;;  %v5523_v14 = vld [vmem:[%s9715_s0 + $0x118] sm:$0xff] }
 0x393   :  { %9882 = vst [vmem:[#allocation161_spill] sm:$0xff] %v7097_v41  ;;  %v1893_v44 = vsel %vm1891_vm5, %v1860_v2, %v6222_v21 }
 0x397   :  { %1724 = vrot.lane.b32.xlu1 %v734_v13, %s5841_s26  ;;  %v1926_v13 = vsel %vm1924_vm6, %v1893_v44, %v6912_v35  ;;  %v5522_v35 = vld [vmem:[%s9715_s0 + $0x110] sm:$0xff] }
 0x398   :  { %1726 = vrot.lane.b32.xlu2 %v735_v11, %s5841_s26  ;;  %1722 = vrot.lane.b32.xlu0 %v6735_v7, %s5841_s26  ;;  %v5521_v7 = vld [vmem:[%s9715_s0 + $0x108] sm:$0xff]  ;;  %v1959_v43 = vsel %vm1957_vm8, %v1926_v13, %v7033_v0  ;;  %v5524_v0 = vld [vmem:[%s9715_s0 + $0x120] sm:$0xff] }
 0x399   :  { %v7117_v19 = vpop.permute.xlu1 %1576  ;;  %v5526_v44 = vld [vmem:[%s9715_s0 + $0x130] sm:$0xff] }
 0x39a   :  { %v7113_v61 = vpop.permute.xlu2 %1596  ;;  %v7115_v41 = vpop.permute.xlu0 %1574 }
 0x39b   :  { %9883 = vst [vmem:[#allocation162_spill] sm:$0xff] %v7113_v61  ;;  %v9884_v61 = vld [vmem:[#allocation6_spill] sm:$0xff] }
 0x39f   :  { %2806 = vrot.lane.b32.xlu1 %v5521_v7, %s5832_s9  ;;  %v447_v7 = vld [vmem:[#allocation2 + $0x7] sm:$0xff] }
 0x3a0   :  { %2804 = vrot.lane.b32.xlu0 %v5520_v62, %s5832_s9  ;;  %2808 = vrot.lane.b32.xlu2 %v5522_v35, %s5832_s9  ;;  %v1760_v13 = vsel %vm29_vm0, %v447_v7, %v6182_v55  ;;  %v5527_v35 = vld [vmem:[%s9715_s0 + $0x138] sm:$0xff] }
 0x3a1   :  { %v7137_v5 = vpop.permute.xlu1 %1582 }
 0x3a2   :  { %v1667_v23 = vpop.permute.xlu2 %1666  ;;  %v7135_v11 = vpop.permute.xlu0 %1580 }
 0x3a3   :  { %v1992_v21 = vsel %vm1990_vm7, %v1959_v43, %v1667_v23  ;;  %v1793_v43 = vsel %vm1792_vm2, %v1760_v13, %v6220_v20  ;;  %v5736_v20 = vld [vmem:[#allocation2 + $0x27] sm:$0xff] }
 0x3a4   :  { %5425 = vmatmul.msk.f32.vlgmr.msra.gmra.mxu1 %vm2036_vm9, %v1992_v21  ;;  %v1762_v7 = vsel %vm29_vm0, %v5736_v20, %v6234_v29  ;;  %v9885_v29 = vld [vmem:[#allocation4_spill] sm:$0xff] }
 0x3a7   :  { %2812 = vrot.lane.b32.xlu1 %v5524_v0, %s5832_s9 }
 0x3a8   :  { %2810 = vrot.lane.b32.xlu0 %v5523_v14, %s5832_s9  ;;  %v1826_v14 = vsel %vm1825_vm3, %v1793_v43, %v6232_v28  ;;  %v1795_v28 = vsel %vm1792_vm2, %v1762_v7, %v9884_v61  ;;  %v5737_v7 = vld [vmem:[#allocation2 + $0x2f] sm:$0xff] }
 0x3a9   :  { %v7155_v62 = vpop.permute.xlu1 %1588  ;;  %v1859_v55 = vsel %vm1858_vm4, %v1826_v14, %v6202_v6 }
 0x3aa   :  { %v7153_v2 = vpop.permute.xlu0 %1586  ;;  %v1892_v0 = vsel %vm1891_vm5, %v1859_v55, %v6270_v52  ;;  %v5525_v52 = vld [vmem:[%s9715_s0 + $0x128] sm:$0xff]  ;;  %v1673_v14 = vpop.permute.xlu2 %1672  ;;  %v9886_v55 = vld [vmem:[#allocation13_spill] sm:$0xff] }
 0x3ab   :  { %2814 = vrot.lane.b32.xlu2 %v5525_v52, %s5832_s9  ;;  %v9889_v52 = vld [vmem:[#allocation7_spill] sm:$0xff] }
 0x3af   :  { %2818 = vrot.lane.b32.xlu1 %v5527_v35, %s5832_s9 }
 0x3b0   :  { %2816 = vrot.lane.b32.xlu0 %v5526_v44, %s5832_s9  ;;  %v1925_v44 = vsel %vm1924_vm6, %v1892_v0, %v6910_v46  ;;  %v1828_v46 = vsel %vm1825_vm3, %v1795_v28, %v9885_v29  ;;  %v9887_v0 = vld [vmem:[#allocation18_spill] sm:$0xff] }
 0x3b1   :  { %v7167_v21 = vpop.permute.xlu1 %1594  ;;  %v1958_v43 = vsel %vm1957_vm8, %v1925_v44, %v6992_v63  ;;  %v1861_v61 = vsel %vm1858_vm4, %v1828_v46, %v9886_v55  ;;  %v9888_v44 = vld [vmem:[#allocation3_spill] sm:$0xff] }
 0x3b2   :  { %v7165_v23 = vpop.permute.xlu0 %1592  ;;  %v1894_v63 = vsel %vm1891_vm5, %v1861_v61, %v9887_v0  ;;  %v9890_v55 = vld [vmem:[#allocation15_spill] sm:$0xff] }
 0x3b3   :  { %v1927_v20 = vsel %vm1924_vm6, %v1894_v63, %v6878_v8  ;;  %v5529_v8 = vld [vmem:[%s9715_s0 + $0x148] sm:$0xff] }
 0x3b4   :  { %v5738_v0 = vld [vmem:[#allocation2 + $0x47] sm:$0xff] }
 0x3b8   :  { %2822 = vrot.lane.b32.xlu0 %v5529_v8, %s5832_s9 }
 0x3b9   :  { %v1665_v35 = vpop.permute.xlu1 %1664 }
 0x3ba   :  { %v7183_v13 = vpop.permute.xlu0 %1598  ;;  %v1991_v6 = vsel %vm1990_vm7, %v1958_v43, %v1665_v35  ;;  %v1763_v43 = vsel %vm29_vm0, %v5737_v7, %v9888_v44  ;;  %v1960_v35 = vsel %vm1957_vm8, %v1927_v20, %v7035_v27  ;;  %v9891_v27 = vld [vmem:[#allocation10_spill] sm:$0xff]  ;;  %v9892_v20 = vld [vmem:[#allocation8_spill] sm:$0xff]  ;;  %v9893_v44 = vld [vmem:[#allocation19_spill] sm:$0xff] }
 0x3bb   :  { %5424 = vmatmul.msk.f32.vlgmr.msrb.gmra.mxu0 %vm2036_vm9, %v1991_v6  ;;  %v1796_v28 = vsel %vm1792_vm2, %v1763_v43, %v9889_v52  ;;  %v1764_v63 = vsel %vm29_vm0, %v5738_v0, %v9891_v27 }
 0x3bc   :  { %v1829_v61 = vsel %vm1825_vm3, %v1796_v28, %v9890_v55 }
 0x3bd   :  { %v1862_v7 = vsel %vm1858_vm4, %v1829_v61, %v9892_v20  ;;  %v5530_v20 = vld [vmem:[%s9715_s0 + $0x150] sm:$0xff] }
 0x3be   :  { %v1895_v43 = vsel %vm1891_vm5, %v1862_v7, %v9893_v44  ;;  %2824 = vrot.lane.b32.xlu1 %v5530_v20, %s5832_s9  ;;  %v9897_v44 = vld [vmem:[#allocation16_spill] sm:$0xff] }
 0x3bf   :  { %v1928_v28 = vsel %vm1924_vm6, %v1895_v43, %v6920_v18  ;;  %v5739_v18 = vld [vmem:[#allocation2 + $0x4f] sm:$0xff] }
 0x3c0   :  { %v1961_v8 = vsel %vm1957_vm8, %v1928_v28, %v7001_v50  ;;  %v1765_v43 = vsel %vm29_vm0, %v5739_v18, %v9897_v44  ;;  %v9898_v50 = vld [vmem:[#allocation17_spill] sm:$0xff] }
 0x3c1   :  { %v1671_v29 = vpop.permute.xlu1 %1670 }
 0x3c2   :  { %v1669_v6 = vpop.permute.xlu0 %1668  ;;  %v1994_v61 = vsel %vm1990_vm7, %v1961_v8, %v1671_v29 }
 0x3c3   :  { %v1993_v46 = vsel %vm1990_vm7, %v1960_v35, %v1669_v6  ;;  %v7223_v35 = vpop.permute.xlu2 %1678  ;;  %v9894_v6 = vld [vmem:[#allocation5_spill] sm:$0xff] }
 0x3c4   :  { %5426 = vmatmul.msk.f32.gmra.mxu1 %vm2036_vm9, %v1993_v46  ;;  %v1797_v52 = vsel %vm1792_vm2, %v1764_v63, %v9894_v6  ;;  %v9895_v46 = vld [vmem:[#allocation22_spill] sm:$0xff]  ;;  %v9896_v63 = vld [vmem:[#allocation21_spill] sm:$0xff] }
 0x3c5   :  { %v1830_v55 = vsel %vm1825_vm3, %v1797_v52, %v9895_v46  ;;  %v9899_v52 = vld [vmem:[#allocation12_spill] sm:$0xff] }
 0x3c6   :  { %v1863_v7 = vsel %vm1858_vm4, %v1830_v55, %v9896_v63  ;;  %v1798_v29 = vsel %vm1792_vm2, %v1765_v43, %v9899_v52  ;;  %v9900_v63 = vld [vmem:[#allocation14_spill] sm:$0xff] }
 0x3c7   :  { %v1896_v6 = vsel %vm1891_vm5, %v1863_v7, %v9898_v50  ;;  %v1831_v18 = vsel %vm1825_vm3, %v1798_v29, %v9900_v63  ;;  %v5528_v7 = vld [vmem:[%s9715_s0 + $0x140] sm:$0xff] }
 0x3c8   :  { %v1929_v28 = vsel %vm1924_vm6, %v1896_v6, %v6922_v12  ;;  %v9901_v12 = vld [vmem:[#allocation28_spill] sm:$0xff]  ;;  %2820 = vrot.lane.b32.xlu2 %v5528_v7, %s5832_s9  ;;  %v9903_v6 = vld [vmem:[#allocation9_spill] sm:$0xff]  ;;  %v9905_v7 = vld [vmem:[#allocation30_spill] sm:$0xff] }
 0x3c9   :  { %v1677_v27 = vpop.permute.xlu1 %1676  ;;  %v1962_v46 = vsel %vm1957_vm8, %v1929_v28, %v7042_v16  ;;  %v1864_v44 = vsel %vm1858_vm4, %v1831_v18, %v9901_v12  ;;  %v9902_v16 = vld [vmem:[#allocation27_spill] sm:$0xff] }
 0x3ca   :  { %v1675_v0 = vpop.permute.xlu0 %1674  ;;  %v1995_v20 = vsel %vm1990_vm7, %v1962_v46, %v1673_v14  ;;  %v1897_v43 = vsel %vm1891_vm5, %v1864_v44, %v9902_v16  ;;  %v5740_v50 = vld [vmem:[#allocation2 + $0x67] sm:$0xff]  ;;  %v9904_v46 = vld [vmem:[#allocation25_spill] sm:$0xff] }
 0x3cb   :  { %v7251_v8 = vpop.permute.xlu2 %1684  ;;  %v1930_v14 = vsel %vm1924_vm6, %v1897_v43, %v6887_v32  ;;  %v1766_v52 = vsel %vm29_vm0, %v5740_v50, %v9903_v6  ;;  %v5741_v44 = vld [vmem:[#allocation2 + $0x6f] sm:$0xff] }
 0x3cc   :  { %5427 = vmatmul.msk.f32.gmra.mxu1 %vm2036_vm9, %v1994_v61  ;;  %v1963_v29 = vsel %vm1957_vm8, %v1930_v14, %v7044_v24  ;;  %v5532_v24 = vld [vmem:[%s9715_s0 + $0x160] sm:$0xff]  ;;  %v9906_v16 = vld [vmem:[#allocation24_spill] sm:$0xff] }
 0x3cd   :  { %v1996_v18 = vsel %vm1990_vm7, %v1963_v29, %v1675_v0  ;;  %2828 = vrot.lane.b32.xlu0 %v5532_v24, %s5832_s9  ;;  %v1767_v43 = vsel %vm29_vm0, %v5741_v44, %v9906_v16  ;;  %v9907_v14 = vld [vmem:[#allocation20_spill] sm:$0xff] }
 0x3ce   :  { %v9908_v50 = vld [vmem:[#allocation40_spill] sm:$0xff] }
 0x3cf   :  { %v5533_v16 = vld [vmem:[%s9715_s0 + $0x168] sm:$0xff] }
 0x3d0   :  { %2830 = vrot.lane.b32.xlu1 %v5533_v16, %s5832_s9  ;;  %v9915_v16 = vld [vmem:[#allocation29_spill] sm:$0xff] }
 0x3d1   :  { %v7253_v61 = vpop.permute.xlu1 %1682 }
 0x3d2   :  { %v1681_v55 = vpop.permute.xlu0 %1680 }
 0x3d3   :  { %v7282_v32 = vpop.permute.xlu2 %1690 }
 0x3d4   :  { %5428 = vmatmul.msk.f32.gmra.mxu1 %vm2036_vm9, %v1995_v20  ;;  %v1799_v20 = vsel %vm1792_vm2, %v1766_v52, %v9904_v46  ;;  %v9909_v52 = vld [vmem:[#allocation11_spill] sm:$0xff] }
 0x3d5   :  { %v1832_v12 = vsel %vm1825_vm3, %v1799_v20, %v9905_v7  ;;  %v1800_v29 = vsel %vm1792_vm2, %v1767_v43, %v9909_v52  ;;  %v9910_v20 = vld [vmem:[#allocation37_spill] sm:$0xff]  ;;  %v9911_v43 = vld [vmem:[#allocation36_spill] sm:$0xff] }
 0x3d6   :  { %v1865_v0 = vsel %vm1858_vm4, %v1832_v12, %v9907_v14 }
 0x3d7   :  { %v1898_v6 = vsel %vm1891_vm5, %v1865_v0, %v9908_v50 }
 0x3d8   :  { %v1931_v46 = vsel %vm1924_vm6, %v1898_v6, %v6932_v1  ;;  %v9913_v6 = vld [vmem:[#allocation31_spill] sm:$0xff] }
 0x3d9   :  { %v7277_v63 = vpop.permute.xlu1 %1688  ;;  %v1964_v7 = vsel %vm1957_vm8, %v1931_v46, %v7010_v38  ;;  %v9912_v38 = vld [vmem:[#allocation26_spill] sm:$0xff] }
 0x3da   :  { %v7273_v28 = vpop.permute.xlu0 %1686  ;;  %v1997_v12 = vsel %vm1990_vm7, %v1964_v7, %v1677_v27  ;;  %v5742_v27 = vld [vmem:[#allocation2 + $0x87] sm:$0xff] }
 0x3db   :  { %v7315_v14 = vpop.permute.xlu2 %1696  ;;  %v1768_v52 = vsel %vm29_vm0, %v5742_v27, %v9913_v6  ;;  %v5743_v27 = vld [vmem:[#allocation2 + $0x8f] sm:$0xff]  ;;  %v9918_v6 = vld [vmem:[#allocation23_spill] sm:$0xff] }
 0x3dc   :  { %5429 = vmatmul.msk.f32.gmra.mxu1 %vm2036_vm9, %v1996_v18  ;;  %v1833_v18 = vsel %vm1825_vm3, %v1800_v29, %v9910_v20  ;;  %v9914_v20 = vld [vmem:[#allocation33_spill] sm:$0xff] }
 0x3dd   :  { %v1866_v1 = vsel %vm1858_vm4, %v1833_v18, %v9911_v43  ;;  %v1801_v18 = vsel %vm1792_vm2, %v1768_v52, %v9914_v20  ;;  %v9916_v43 = vld [vmem:[#allocation43_spill] sm:$0xff]  ;;  %v1769_v52 = vsel %vm29_vm0, %v5743_v27, %v9918_v6  ;;  %v9923_v27 = vld [vmem:[#allocation49_spill] sm:$0xff]  ;;  %v9924_v6 = vld [vmem:[#allocation32_spill] sm:$0xff] }
 0x3de   :  { %v1899_v0 = vsel %vm1891_vm5, %v1866_v1, %v9912_v38  ;;  %v9917_v38 = vld [vmem:[#allocation48_spill] sm:$0xff] }
 0x3df   :  { %v1932_v50 = vsel %vm1924_vm6, %v1899_v0, %v6934_v48  ;;  %v5531_v48 = vld [vmem:[%s9715_s0 + $0x158] sm:$0xff] }
 0x3e0   :  { %v1965_v29 = vsel %vm1957_vm8, %v1932_v50, %v7054_v3  ;;  %2826 = vrot.lane.b32.xlu2 %v5531_v48, %s5832_s9  ;;  %v1834_v3 = vsel %vm1825_vm3, %v1801_v18, %v9915_v16  ;;  %v9919_v18 = vld [vmem:[#allocation34_spill] sm:$0xff] }
 0x3e1   :  { %v7305_v44 = vpop.permute.xlu1 %1694  ;;  %v1867_v1 = vsel %vm1858_vm4, %v1834_v3, %v9916_v43  ;;  %v9920_v3 = vld [vmem:[#allocation45_spill] sm:$0xff] }
 0x3e2   :  { %v7303_v24 = vpop.permute.xlu0 %1692  ;;  %v1900_v0 = vsel %vm1891_vm5, %v1867_v1, %v9917_v38  ;;  %v9921_v1 = vld [vmem:[#allocation39_spill] sm:$0xff] }
 0x3e3   :  { %v7344_v50 = vpop.permute.xlu2 %1702 }
 0x3e4   :  { %5430 = vmatmul.msk.f32.gmra.mxu1 %vm2036_vm9, %v1997_v12  ;;  %v1998_v12 = vsel %vm1990_vm7, %v1965_v29, %v7223_v35  ;;  %v1933_v35 = vsel %vm1924_vm6, %v1900_v0, %v6899_v4  ;;  %v5535_v4 = vld [vmem:[%s9715_s0 + $0x178] sm:$0xff]  ;;  %v9922_v0 = vld [vmem:[#allocation35_spill] sm:$0xff] }
 0x3e5   :  { %v1966_v29 = vsel %vm1957_vm8, %v1933_v35, %v7056_v42  ;;  %2834 = vrot.lane.b32.xlu0 %v5535_v4, %s5832_s9  ;;  %v5744_v42 = vld [vmem:[#allocation2 + $0xa7] sm:$0xff] }
 0x3e6   :  { %v1999_v16 = vsel %vm1990_vm7, %v1966_v29, %v1681_v55  ;;  %v1770_v38 = vsel %vm29_vm0, %v5744_v42, %v9921_v1  ;;  %v9926_v1 = vld [vmem:[#allocation51_spill] sm:$0xff] }
 0x3e9   :  { %v7329_v7 = vpop.permute.xlu1 %1700 }
 0x3ea   :  { %v7325_v46 = vpop.permute.xlu0 %1698 }
 0x3ec   :  { %5431 = vmatmul.msk.f32.gmra.mxu1 %vm2036_vm9, %v1998_v12  ;;  %v1802_v12 = vsel %vm1792_vm2, %v1769_v52, %v9919_v18  ;;  %v1803_v52 = vsel %vm1792_vm2, %v1770_v38, %v9924_v6  ;;  %v9925_v18 = vld [vmem:[#allocation52_spill] sm:$0xff] }
 0x3ed   :  { %v1835_v43 = vsel %vm1825_vm3, %v1802_v12, %v9920_v3  ;;  %v1836_v12 = vsel %vm1825_vm3, %v1803_v52, %v9925_v18  ;;  %v7380_v3 = vpop.permute.xlu2 %1708 }
 0x3ee   :  { %v1868_v35 = vsel %vm1858_vm4, %v1835_v43, %v9922_v0  ;;  %v1869_v38 = vsel %vm1858_vm4, %v1836_v12, %v9926_v1  ;;  %v9927_v0 = vld [vmem:[#allocation46_spill] sm:$0xff]  ;;  %v5534_v1 = vld [vmem:[%s9715_s0 + $0x170] sm:$0xff] }
 0x3ef   :  { %v1901_v55 = vsel %vm1891_vm5, %v1868_v35, %v9923_v27  ;;  %v9928_v27 = vld [vmem:[#allocation47_spill] sm:$0xff]  ;;  %2832 = vrot.lane.b32.xlu2 %v5534_v1, %s5832_s9  ;;  %v9936_v1 = vld [vmem:[#allocation54_spill] sm:$0xff] }
 0x3f0   :  { %v1934_v29 = vsel %vm1924_vm6, %v1901_v55, %v6947_v53  ;;  %v5536_v53 = vld [vmem:[%s9715_s0 + $0x180] sm:$0xff]  ;;  %v9929_v55 = vld [vmem:[#allocation42_spill] sm:$0xff] }
 0x3f1   :  { %v7356_v48 = vpop.permute.xlu1 %1706  ;;  %2836 = vrot.lane.b32.xlu1 %v5536_v53, %s5832_s9 }
 0x3f2   :  { %v7352_v20 = vpop.permute.xlu0 %1704 }
 0x3f4   :  { %5432 = vmatmul.msk.f32.gmra.mxu1 %vm2036_vm9, %v1999_v16  ;;  %v1967_v16 = vsel %vm1957_vm8, %v1934_v29, %v7022_v56  ;;  %v5745_v56 = vld [vmem:[#allocation2 + $0xaf] sm:$0xff] }
 0x3f5   :  { %v2000_v43 = vsel %vm1990_vm7, %v1967_v16, %v7253_v61  ;;  %v1771_v35 = vsel %vm29_vm0, %v5745_v56, %v9927_v0  ;;  %v1902_v61 = vsel %vm1891_vm5, %v1869_v38, %v9928_v27  ;;  %v9930_v16 = vld [vmem:[#allocation44_spill] sm:$0xff]  ;;  %v7411_v53 = vpop.permute.xlu2 %1714  ;;  %v9932_v56 = vld [vmem:[#allocation57_spill] sm:$0xff]  ;;  %v9933_v27 = vld [vmem:[#allocation38_spill] sm:$0xff] }
 0x3f6   :  { %v1804_v6 = vsel %vm1792_vm2, %v1771_v35, %v9929_v55  ;;  %v1935_v52 = vsel %vm1924_vm6, %v1902_v61, %v6949_v39  ;;  %v9931_v39 = vld [vmem:[#allocation58_spill] sm:$0xff]  ;;  %v5746_v35 = vld [vmem:[#allocation2 + $0xc7] sm:$0xff] }
 0x3f7   :  { %v1968_v29 = vsel %vm1957_vm8, %v1935_v52, %v7070_v51  ;;  %v1772_v61 = vsel %vm29_vm0, %v5746_v35, %v9933_v27  ;;  %v9934_v52 = vld [vmem:[#allocation55_spill] sm:$0xff]  ;;  %v9939_v27 = vld [vmem:[#allocation41_spill] sm:$0xff] }
 0x3f8   :  { %v2001_v12 = vsel %vm1990_vm7, %v1968_v29, %v7251_v8  ;;  %v1805_v29 = vsel %vm1792_vm2, %v1772_v61, %v9934_v52  ;;  %v9940_v52 = vld [vmem:[#allocation67_spill] sm:$0xff] }
 0x3f9   :  { %v7386_v42 = vpop.permute.xlu1 %1712 }
 0x3fa   :  { %v7382_v4 = vpop.permute.xlu0 %1710 }
 0x3fc   :  { %5433 = vmatmul.msk.f32.gmra.mxu1 %vm2036_vm9, %v2000_v43  ;;  %v1837_v43 = vsel %vm1825_vm3, %v1804_v6, %v9930_v16  ;;  %v9935_v16 = vld [vmem:[#allocation60_spill] sm:$0xff] }
 0x3fd   :  { %v1870_v38 = vsel %vm1858_vm4, %v1837_v43, %v9931_v39  ;;  %v1838_v43 = vsel %vm1825_vm3, %v1805_v29, %v9935_v16 }
 0x3fe   :  { %v1903_v8 = vsel %vm1891_vm5, %v1870_v38, %v9932_v56  ;;  %v7445_v38 = vpop.permute.xlu2 %1720  ;;  %v9937_v56 = vld [vmem:[#allocation50_spill] sm:$0xff] }
 0x3ff   :  { %v1936_v0 = vsel %vm1924_vm6, %v1903_v8, %v6908_v10  ;;  %v5538_v10 = vld [vmem:[%s9715_s0 + $0x190] sm:$0xff]  ;;  %v9938_v8 = vld [vmem:[#allocation70_spill] sm:$0xff] }
 0x400   :  { %v1969_v55 = vsel %vm1957_vm8, %v1936_v0, %v7072_v60  ;;  %2840 = vrot.lane.b32.xlu0 %v5538_v10, %s5832_s9  ;;  %v5747_v60 = vld [vmem:[#allocation2 + $0xcf] sm:$0xff]  ;;  %v5539_v10 = vld [vmem:[%s9715_s0 + $0x198] sm:$0xff] }
 0x401   :  { %v7420_v51 = vpop.permute.xlu1 %1718  ;;  %v1773_v39 = vsel %vm29_vm0, %v5747_v60, %v9936_v1  ;;  %v9941_v60 = vld [vmem:[#allocation66_spill] sm:$0xff]  ;;  %2842 = vrot.lane.b32.xlu1 %v5539_v10, %s5832_s9  ;;  %v9942_v1 = vld [vmem:[#allocation56_spill] sm:$0xff]  ;;  %v5749_v10 = vld [vmem:[%s9715_s0] sm:$0xff] }
 0x402   :  { %v7405_v18 = vpop.permute.xlu0 %1716  ;;  %v1806_v61 = vsel %vm1792_vm2, %v1773_v39, %v9939_v27 }
 0x403   :  { %v1839_v29 = vsel %vm1825_vm3, %v1806_v61, %v9940_v52  ;;  %v9944_v61 = vld [vmem:[#allocation63_spill] sm:$0xff] }
 0x404   :  { %5434 = vmatmul.msk.f32.gmra.mxu1 %vm2036_vm9, %v2001_v12  ;;  %v2002_v12 = vsel %vm1990_vm7, %v1969_v55, %v7273_v28  ;;  %v1871_v28 = vsel %vm1858_vm4, %v1838_v43, %v9937_v56 }
 0x405   :  { %v1904_v0 = vsel %vm1891_vm5, %v1871_v28, %v9938_v8  ;;  %v5748_v28 = vld [vmem:[#allocation2 + $0xe7] sm:$0xff]  ;;  %v9943_v8 = vld [vmem:[#allocation61_spill] sm:$0xff] }
 0x406   :  { %v1937_v55 = vsel %vm1924_vm6, %v1904_v0, %v6959_v22  ;;  %v1872_v22 = vsel %vm1858_vm4, %v1839_v29, %v9941_v60  ;;  %v7473_v39 = vpop.permute.xlu2 %1726  ;;  %v1774_v0 = vsel %vm29_vm0, %v5748_v28, %v9943_v8  ;;  %v2246_v29 = vld [vmem:[%s9720_s5] sm:$0xff]  ;;  %v9947_v60 = vld [vmem:[#allocation78_spill] sm:$0xff] }
 0x407   :  { %2362 = vmatpush.msra.mxu2 %v2246_v29  ;;  %v5751_v29 = vld [vmem:[#allocation2 + $0x107] sm:$0xff] }
 0x409   :  { %v7451_v35 = vpop.permute.xlu1 %1724 }
 0x40a   :  { %v7430_v6 = vpop.permute.xlu0 %1722 }
 0x40c   :  { %5435 = vmatmul.msk.f32.gmra.mxu1 %vm2036_vm9, %v2002_v12  ;;  %v1970_v12 = vsel %vm1957_vm8, %v1937_v55, %v7031_v37  ;;  %v1905_v37 = vsel %vm1891_vm5, %v1872_v22, %v9942_v1  ;;  %v1807_v55 = vsel %vm1792_vm2, %v1774_v0, %v9944_v61  ;;  %v9949_v0 = vld [vmem:[#allocation64_spill] sm:$0xff] }
 0x40d   :  { %v2003_v43 = vsel %vm1990_vm7, %v1970_v12, %v7277_v63  ;;  %v1938_v63 = vsel %vm1924_vm6, %v1905_v37, %v6961_v33  ;;  %v2492_v33 = vld [vmem:[%s9721_s7] sm:$0xff] }
 0x40e   :  { %v1971_v27 = vsel %vm1957_vm8, %v1938_v63, %v7087_v36  ;;  %v5537_v36 = vld [vmem:[%s9715_s0 + $0x188] sm:$0xff]  ;;  %v9945_v12 = vld [vmem:[#allocation59_spill] sm:$0xff]  ;;  %2572 = vmatpush.msra.mxu3 %v2492_v33  ;;  %v2809_v1 = vpop.permute.xlu2 %2808  ;;  %v9948_v63 = vld [vmem:[#allocation53_spill] sm:$0xff] }
 0x40f   :  { %v2004_v52 = vsel %vm1990_vm7, %v1971_v27, %v7282_v32  ;;  %2838 = vrot.lane.b32.xlu2 %v5537_v36, %s5832_s9  ;;  %v9946_v32 = vld [vmem:[#allocation73_spill] sm:$0xff]  ;;  %5488 = vmatmul.msk.f32.vlgmr.msra.gmra.mxu3 %vm29_vm0, %v5749_v10  ;;  %v9954_v10 = vld [vmem:[#allocation62_spill] sm:$0xff] }
 0x410   :  { %v9951_v33 = vld [vmem:[#allocation69_spill] sm:$0xff] }
 0x411   :  { %v2807_v56 = vpop.permute.xlu1 %2806  ;;  %v9952_v36 = vld [vmem:[#allocation65_spill] sm:$0xff] }
 0x412   :  { %v2805_v16 = vpop.permute.xlu0 %2804 }
 0x413   :  { %5552 = vmatmul.msk.f32.vlgmr.msra.gmra.mxu0 %vm29_vm0, %v2805_v16  ;;  %v1840_v16 = vsel %vm1825_vm3, %v1807_v55, %v9945_v12  ;;  %v9950_v55 = vld [vmem:[#allocation75_spill] sm:$0xff] }
 0x414   :  { %5436 = vmatmul.msk.f32.gmra.mxu1 %vm2036_vm9, %v2003_v43  ;;  %v1873_v43 = vsel %vm1858_vm4, %v1840_v16, %v9946_v32  ;;  %v9953_v16 = vld [vmem:[#allocation79_spill] sm:$0xff] }
 0x415   :  { %v1906_v22 = vsel %vm1891_vm5, %v1873_v43, %v9947_v60 }
 0x416   :  { %v1939_v37 = vsel %vm1924_vm6, %v1906_v22, %v6918_v54  ;;  %v5541_v54 = vld [vmem:[%s9715_s0 + $0x1a8] sm:$0xff] }
 0x417   :  { %v1972_v8 = vsel %vm1957_vm8, %v1939_v37, %v7089_v9  ;;  %v1776_v9 = vsel %vm29_vm0, %v5751_v29, %v9951_v33  ;;  %2846 = vrot.lane.b32.xlu0 %v5541_v54, %s5832_s9  ;;  %v9959_v54 = vld [vmem:[#allocation72_spill] sm:$0xff] }
 0x418   :  { %v2005_v61 = vsel %vm1990_vm7, %v1972_v8, %v7303_v24  ;;  %v5752_v24 = vld [vmem:[%s9715_s0 + $0x8] sm:$0xff]  ;;  %v1809_v60 = vsel %vm1792_vm2, %v1776_v9, %v9954_v10  ;;  %v2815_v10 = vpop.permute.xlu2 %2814 }
 0x419   :  { %5489 = vmatmul.msk.f32.gmra.mxu3 %vm29_vm0, %v5752_v24 }
 0x41a   :  { %v2811_v43 = vpop.permute.xlu0 %2810 }
 0x41b   :  { %5553 = vmatmul.msk.f32.gmra.mxu0 %vm29_vm0, %v2807_v56  ;;  %v5750_v56 = vld [vmem:[#allocation2 + $0xef] sm:$0xff] }
 0x41c   :  { %5437 = vmatmul.msk.f32.gmra.mxu1 %vm2036_vm9, %v2004_v52  ;;  %v1775_v28 = vsel %vm29_vm0, %v5750_v56, %v9948_v63 }
 0x41d   :  { %v1808_v27 = vsel %vm1792_vm2, %v1775_v28, %v9949_v0  ;;  %v9956_v28 = vld [vmem:[#allocation81_spill] sm:$0xff] }
 0x41e   :  { %v1841_v52 = vsel %vm1825_vm3, %v1808_v27, %v9950_v55  ;;  %v5753_v0 = vld [vmem:[#allocation2 + $0x10f] sm:$0xff] }
 0x41f   :  { %v1874_v12 = vsel %vm1858_vm4, %v1841_v52, %v9952_v36  ;;  %v9957_v27 = vld [vmem:[#allocation76_spill] sm:$0xff]  ;;  %v2813_v52 = vpop.permute.xlu1 %2812 }
 0x420   :  { %v1907_v32 = vsel %vm1891_vm5, %v1874_v12, %v9953_v16  ;;  %v9960_v12 = vld [vmem:[#allocation74_spill] sm:$0xff]  ;;  %v9961_v16 = vld [vmem:[#allocation88_spill] sm:$0xff] }
 0x421   :  { %v1940_v22 = vsel %vm1924_vm6, %v1907_v32, %v6971_v26  ;;  %v5542_v26 = vld [vmem:[%s9715_s0 + $0x1b0] sm:$0xff] }
 0x422   :  { %v1973_v56 = vsel %vm1957_vm8, %v1940_v22, %v7040_v30  ;;  %2848 = vrot.lane.b32.xlu1 %v5542_v26, %s5832_s9  ;;  %v5754_v30 = vld [vmem:[%s9715_s0 + $0x10] sm:$0xff]  ;;  %v7590_v22 = vld [vmem:[%s9719_s4] ss:$0 sm:$0xff] }
 0x423   :  { %5554 = vmatmul.msk.f32.gmra.mxu0 %vm29_vm0, %v2809_v1  ;;  %v9955_v1 = vld [vmem:[#allocation82_spill] sm:$0xff]  ;;  %v2006_v63 = vsel %vm1990_vm7, %v1973_v56, %v7305_v44  ;;  %5490 = vmatmul.msk.f32.gmra.mxu3 %vm29_vm0, %v5754_v30  ;;  %v9958_v44 = vld [vmem:[#allocation77_spill] sm:$0xff]  ;;  %v9963_v56 = vld [vmem:[#allocation68_spill] sm:$0xff] }
 0x424   :  { %5438 = vmatmul.msk.f32.gmra.mxu1 %vm2036_vm9, %v2005_v61  ;;  %v1842_v37 = vsel %vm1825_vm3, %v1809_v60, %v9955_v1  ;;  %v1777_v61 = vsel %vm29_vm0, %v5753_v0, %v9957_v27  ;;  %v2153_v1 = vpop.f32.mrf.mxu1  ;;  %v9964_v26 = vld [vmem:[#allocation85_spill] sm:$0xff] }
 0x425   :  { %v1875_v8 = vsel %vm1858_vm4, %v1842_v37, %v9956_v28  ;;  %v1810_v29 = vsel %vm1792_vm2, %v1777_v61, %v9959_v54  ;;  %v5756_v37 = vld [vmem:[#allocation2 + $0x127] sm:$0xff]  ;;  %v9965_v61 = vld [vmem:[#allocation90_spill] sm:$0xff] }
 0x426   :  { %v1908_v55 = vsel %vm1891_vm5, %v1875_v8, %v9958_v44  ;;  %v1843_v24 = vsel %vm1825_vm3, %v1810_v29, %v9960_v12  ;;  %v5757_v44 = vld [vmem:[#allocation2 + $0x12f] sm:$0xff]  ;;  %v5758_v29 = vld [vmem:[%s9715_s0 + $0x20] sm:$0xff] }
 0x427   :  { %v1941_v33 = vsel %vm1924_vm6, %v1908_v55, %v6973_v45  ;;  %v1876_v32 = vsel %vm1858_vm4, %v1843_v24, %v9961_v16  ;;  %v5540_v45 = vld [vmem:[%s9715_s0 + $0x1a0] sm:$0xff]  ;;  %v9966_v55 = vld [vmem:[#allocation84_spill] sm:$0xff] }
 0x428   :  { %v1974_v9 = vsel %vm1957_vm8, %v1941_v33, %v7099_v34  ;;  %2844 = vrot.lane.b32.xlu2 %v5540_v45, %s5832_s9  ;;  %v5755_v34 = vld [vmem:[%s9715_s0 + $0x18] sm:$0xff]  ;;  %v9967_v54 = vld [vmem:[#allocation80_spill] sm:$0xff]  ;;  %v9969_v12 = vld [vmem:[#allocation71_spill] sm:$0xff] }
 0x429   :  { %v2007_v36 = vsel %vm1990_vm7, %v1974_v9, %v7315_v14  ;;  %v9962_v14 = vld [vmem:[#allocation87_spill] sm:$0xff]  ;;  %v9968_v33 = vld [vmem:[#allocation100_spill] sm:$0xff]  ;;  %v9970_v45 = vld [vmem:[#allocation97_spill] sm:$0xff] }
 0x42b   :  { %5555 = vmatmul.msk.f32.gmra.mxu0 %vm29_vm0, %v2811_v43  ;;  %5491 = vmatmul.msk.f32.gmra.mxu3 %vm29_vm0, %v5755_v34  ;;  %v1909_v43 = vsel %vm1891_vm5, %v1876_v32, %v9962_v14 }
 0x42c   :  { %5439 = vmatmul.msk.f32.gmra.mxu1 %vm2036_vm9, %v2006_v63  ;;  %v1942_v60 = vsel %vm1924_vm6, %v1909_v43, %v6930_v17  ;;  %v1778_v63 = vsel %vm29_vm0, %v5756_v37, %v9963_v56  ;;  %v2154_v43 = vadd.f32 %v7590_v22, %v2153_v1  ;;  %v2819_v56 = vpop.permute.xlu1 %2818 }
 0x42d   :  { %v1975_v28 = vsel %vm1957_vm8, %v1942_v60, %v7101_v59  ;;  %v1811_v0 = vsel %vm1792_vm2, %v1778_v63, %v9964_v26  ;;  %v5544_v59 = vld [vmem:[%s9715_s0 + $0x1c0] sm:$0xff]  ;;  %v9971_v60 = vld [vmem:[#allocation96_spill] sm:$0xff] }
 0x42e   :  { %v2008_v17 = vsel %vm1990_vm7, %v1975_v28, %v7325_v46  ;;  %v1844_v30 = vsel %vm1825_vm3, %v1811_v0, %v9965_v61  ;;  %2852 = vrot.lane.b32.xlu0 %v5544_v59, %s5832_s9  ;;  %v9973_v26 = vld [vmem:[#allocation91_spill] sm:$0xff] }
 0x42f   :  { %v1877_v46 = vsel %vm1858_vm4, %v1844_v30, %v9967_v54  ;;  %v9977_v54 = vld [vmem:[#allocation108_spill] sm:$0xff] }
 0x430   :  { %v1910_v9 = vsel %vm1891_vm5, %v1877_v46, %v9968_v33 }
 0x431   :  { %v1943_v16 = vsel %vm1924_vm6, %v1910_v9, %v6985_v57  ;;  %v5545_v57 = vld [vmem:[%s9715_s0 + $0x1c8] sm:$0xff] }
 0x432   :  { %v1976_v14 = vsel %vm1957_vm8, %v1943_v16, %v7052_v58  ;;  %2854 = vrot.lane.b32.xlu1 %v5545_v57, %s5832_s9  ;;  %v5759_v58 = vld [vmem:[%s9715_s0 + $0x28] sm:$0xff]  ;;  %v9982_v57 = vld [vmem:[#allocation95_spill] sm:$0xff] }
 0x433   :  { %5556 = vmatmul.msk.f32.gmra.mxu0 %vm29_vm0, %v2813_v52  ;;  %v1779_v52 = vsel %vm29_vm0, %v5757_v44, %v9966_v55  ;;  %5492 = vmatmul.msk.f32.gmra.mxu3 %vm29_vm0, %v5758_v29  ;;  %v9975_v44 = vld [vmem:[#allocation89_spill] sm:$0xff]  ;;  %v9976_v55 = vld [vmem:[#allocation103_spill] sm:$0xff]  ;;  %v2821_v29 = vpop.permute.xlu2 %2820 }
 0x434   :  { %5440 = vmatmul.msk.f32.gmra.mxu1 %vm2036_vm9, %v2007_v36  ;;  %v2817_v36 = vpop.permute.xlu0 %2816  ;;  %v1812_v24 = vsel %vm1792_vm2, %v1779_v52, %v9969_v12  ;;  %v9978_v12 = vld [vmem:[#allocation83_spill] sm:$0xff] }
 0x435   :  { %v1845_v34 = vsel %vm1825_vm3, %v1812_v24, %v9970_v45 }
 0x436   :  { %v1878_v37 = vsel %vm1858_vm4, %v1845_v34, %v9971_v60  ;;  %v9981_v60 = vld [vmem:[#allocation99_spill] sm:$0xff] }
 0x438   :  { %v2150_v8 = vpop.f32.mrf.mxu0 }
 0x439   :  { %v2151_v27 = vadd.f32 %v7590_v22, %v2150_v8  ;;  %v5760_v8 = vld [vmem:[#allocation2 + $0x147] sm:$0xff] }
 0x43a   :  { %v1780_v0 = vsel %vm29_vm0, %v5760_v8, %v9973_v26 }
 0x43b   :  { %5557 = vmatmul.msk.f32.gmra.mxu0 %vm29_vm0, %v2815_v10  ;;  %5456 = vmatmul.msk.f32.vlgmr.msra.gmra.mxu2 %vm29_vm0, %v2151_v27  ;;  %v2009_v10 = vsel %vm1990_vm7, %v1976_v14, %v7329_v7  ;;  %v9972_v7 = vld [vmem:[#allocation86_spill] sm:$0xff] }
 0x43c   :  { %5441 = vmatmul.msk.f32.gmra.mxu1 %vm2036_vm9, %v2008_v17  ;;  %5493 = vmatmul.msk.f32.gmra.mxu3 %vm29_vm0, %v5759_v58  ;;  %v1911_v1 = vsel %vm1891_vm5, %v1878_v37, %v9972_v7  ;;  %v9974_v17 = vld [vmem:[#allocation93_spill] sm:$0xff]  ;;  %v5764_v58 = vld [vmem:[%s9715_s0 + $0x38] sm:$0xff] }
 0x43d   :  { %v1944_v63 = vsel %vm1924_vm6, %v1911_v1, %v6987_v49  ;;  %v1813_v61 = vsel %vm1792_vm2, %v1780_v0, %v9974_v17  ;;  %v5543_v49 = vld [vmem:[%s9715_s0 + $0x1b8] sm:$0xff]  ;;  %v9983_v7 = vld [vmem:[#allocation109_spill] sm:$0xff]  ;;  %v9985_v0 = vld [vmem:[#allocation112_spill] sm:$0xff] }
 0x43e   :  { %v1977_v27 = vsel %vm1957_vm8, %v1944_v63, %v7115_v41  ;;  %v1846_v41 = vsel %vm1825_vm3, %v1813_v61, %v9975_v44  ;;  %2850 = vrot.lane.b32.xlu2 %v5543_v49, %s5832_s9  ;;  %v9984_v63 = vld [vmem:[#allocation92_spill] sm:$0xff] }
 0x43f   :  { %v2010_v59 = vsel %vm1990_vm7, %v1977_v27, %v7344_v50  ;;  %v1879_v52 = vsel %vm1858_vm4, %v1846_v41, %v9976_v55  ;;  %v5761_v50 = vld [vmem:[%s9715_s0 + $0x30] sm:$0xff]  ;;  %v9988_v55 = vld [vmem:[#allocation107_spill] sm:$0xff] }
 0x440   :  { %v1912_v46 = vsel %vm1891_vm5, %v1879_v52, %v9977_v54  ;;  %v5765_v44 = vld [vmem:[#allocation2 + $0x16f] sm:$0xff]  ;;  %v9989_v54 = vld [vmem:[#allocation102_spill] sm:$0xff] }
 0x441   :  { %v2156_v32 = vpop.f32.mrf.mxu1  ;;  %v1945_v33 = vsel %vm1924_vm6, %v1912_v46, %v6945_v25 }
 0x442   :  { %v2157_v30 = vadd.f32 %v7590_v22, %v2156_v32  ;;  %v1978_v16 = vsel %vm1957_vm8, %v1945_v33, %v7117_v19  ;;  %v9979_v32 = vld [vmem:[#allocation94_spill] sm:$0xff] }
 0x443   :  { %5558 = vmatmul.msk.f32.gmra.mxu0 %vm29_vm0, %v2817_v36  ;;  %5457 = vmatmul.msk.f32.gmra.mxu2 %vm29_vm0, %v2154_v43  ;;  %v5762_v36 = vld [vmem:[#allocation2 + $0x14f] sm:$0xff]  ;;  %v2011_v14 = vsel %vm1990_vm7, %v1978_v16, %v7352_v20  ;;  %v5547_v19 = vld [vmem:[%s9715_s0 + $0x1d8] sm:$0xff] }
 0x444   :  { %5442 = vmatmul.msk.f32.gmra.mxu1 %vm2036_vm9, %v2009_v10  ;;  %5494 = vmatmul.msk.f32.gmra.mxu3 %vm29_vm0, %v5761_v50  ;;  %v1781_v24 = vsel %vm29_vm0, %v5762_v36, %v9978_v12  ;;  %v9980_v43 = vld [vmem:[#allocation105_spill] sm:$0xff]  ;;  %v5763_v10 = vld [vmem:[#allocation2 + $0x167] sm:$0xff]  ;;  %v2825_v50 = vpop.permute.xlu1 %2824 }
 0x445   :  { %v1814_v45 = vsel %vm1792_vm2, %v1781_v24, %v9979_v32  ;;  %v1782_v37 = vsel %vm29_vm0, %v5763_v10, %v9981_v60  ;;  %2858 = vrot.lane.b32.xlu0 %v5547_v19, %s5832_s9  ;;  %v9990_v24 = vld [vmem:[#allocation104_spill] sm:$0xff]  ;;  %v9993_v19 = vld [vmem:[#allocation98_spill] sm:$0xff] }
 0x446   :  { %v1847_v25 = vsel %vm1825_vm3, %v1814_v45, %v9980_v43 }
 0x447   :  { %v1880_v20 = vsel %vm1858_vm4, %v1847_v25, %v9982_v57  ;;  %v5768_v25 = vld [vmem:[#allocation2 + $0x187] sm:$0xff] }
 0x448   :  { %v1913_v1 = vsel %vm1891_vm5, %v1880_v20, %v9983_v7  ;;  %v1784_v10 = vsel %vm29_vm0, %v5768_v25, %v9993_v19  ;;  %v9995_v7 = vld [vmem:[#allocation119_spill] sm:$0xff] }
 0x449   :  { %v2159_v28 = vpop.f32.mrf.mxu1  ;;  %v1946_v8 = vsel %vm1924_vm6, %v1913_v1, %v6994_v47  ;;  %v5548_v47 = vld [vmem:[%s9715_s0 + $0x1e0] sm:$0xff] }
 0x44a   :  { %v2160_v34 = vadd.f32 %v7590_v22, %v2159_v28  ;;  %v1815_v28 = vsel %vm1792_vm2, %v1782_v37, %v9984_v63  ;;  %v1979_v17 = vsel %vm1957_vm8, %v1946_v8, %v7068_v31  ;;  %v9987_v31 = vld [vmem:[#allocation106_spill] sm:$0xff]  ;;  %2860 = vrot.lane.b32.xlu1 %v5548_v47, %s5832_s9  ;;  %v9994_v37 = vld [vmem:[#allocation115_spill] sm:$0xff] }
 0x44b   :  { %5559 = vmatmul.msk.f32.gmra.mxu0 %vm29_vm0, %v2819_v56  ;;  %5458 = vmatmul.msk.f32.gmra.mxu2 %vm29_vm0, %v2157_v30  ;;  %v2823_v56 = vpop.permute.xlu0 %2822  ;;  %v1848_v27 = vsel %vm1825_vm3, %v1815_v28, %v9985_v0  ;;  %v2012_v30 = vsel %vm1990_vm7, %v1979_v17, %v7356_v48  ;;  %v1783_v41 = vsel %vm29_vm0, %v5765_v44, %v9987_v31  ;;  %v5766_v48 = vld [vmem:[%s9715_s0 + $0x40] sm:$0xff]  ;;  %v9996_v63 = vld [vmem:[#allocation114_spill] sm:$0xff]  ;;  %v9999_v17 = vld [vmem:[#allocation101_spill] sm:$0xff] }
 0x44c   :  { %5443 = vmatmul.msk.f32.gmra.mxu1 %vm2036_vm9, %v2010_v59  ;;  %5495 = vmatmul.msk.f32.gmra.mxu3 %vm29_vm0, %v5764_v58  ;;  %v9986_v59 = vld [vmem:[#allocation111_spill] sm:$0xff]  ;;  %v1816_v46 = vsel %vm1792_vm2, %v1783_v41, %v9989_v54  ;;  %v1817_v57 = vsel %vm1792_vm2, %v1784_v10, %v9994_v37  ;;  %v9997_v28 = vld [vmem:[#allocation110_spill] sm:$0xff]  ;;  %v10002_v31 = vld [vmem:[#allocation160_spill] sm:$0xff] }
 0x44d   :  { %v1881_v49 = vsel %vm1858_vm4, %v1848_v27, %v9986_v59  ;;  %v1849_v16 = vsel %vm1825_vm3, %v1816_v46, %v9990_v24  ;;  %v1850_v1 = vsel %vm1825_vm3, %v1817_v57, %v9995_v7  ;;  %v10001_v47 = vld [vmem:[#allocation126_spill] sm:$0xff]  ;;  %v5549_v54 = vld [vmem:[%s9715_s0 + $0x1e8] sm:$0xff]  ;;  %v5773_v10 = vld [vmem:[%s9715_s0 + $0x60] sm:$0xff] }
 0x44e   :  { %v1914_v52 = vsel %vm1891_vm5, %v1881_v49, %v9988_v55  ;;  %v1882_v32 = vsel %vm1858_vm4, %v1849_v16, %v6767_v15  ;;  %v1883_v8 = vsel %vm1858_vm4, %v1850_v1, %v9997_v28  ;;  %v5551_v46 = vld [vmem:[%s9715_s0 + $0x1f8] sm:$0xff]  ;;  %v5772_v16 = vld [vmem:[#allocation2 + $0x1a7] sm:$0xff]  ;;  %v5774_v1 = vld [vmem:[#allocation2 + $0x1af] sm:$0xff] }
 0x44f   :  { %v10013_v28 = vld [vmem:[#allocation123_spill] sm:$0xff] }
 0x451   :  { %v2162_v9 = vpop.f32.mrf.mxu1 }
 0x452   :  { %v2163_v61 = vadd.f32 %v7590_v22, %v2162_v9  ;;  %2866 = vrot.lane.b32.xlu1 %v5551_v46, %s5832_s9  ;;  %v10020_v46 = vld [vmem:[#allocation121_spill] sm:$0xff] }
 0x453   :  { %5560 = vmatmul.msk.f32.gmra.mxu0 %vm29_vm0, %v2821_v29  ;;  %5459 = vmatmul.msk.f32.gmra.mxu2 %vm29_vm0, %v2160_v34  ;;  %v1947_v29 = vsel %vm1924_vm6, %v1914_v52, %v6996_v40  ;;  %v5546_v40 = vld [vmem:[%s9715_s0 + $0x1d0] sm:$0xff]  ;;  %v2827_v34 = vpop.permute.xlu2 %2826  ;;  %v2829_v27 = vpop.permute.xlu0 %2828 }
 0x454   :  { %5444 = vmatmul.msk.f32.gmra.mxu1 %vm2036_vm9, %v2011_v14  ;;  %5496 = vmatmul.msk.f32.gmra.mxu3 %vm29_vm0, %v5766_v48  ;;  %v1980_v9 = vsel %vm1957_vm8, %v1947_v29, %v7135_v11  ;;  %v5767_v11 = vld [vmem:[%s9715_s0 + $0x48] sm:$0xff]  ;;  %v9992_v14 = vld [vmem:[#allocation151_spill] sm:$0xff]  ;;  %v10003_v52 = vld [vmem:[#allocation125_spill] sm:$0xff] }
 0x455   :  { %v2013_v12 = vsel %vm1990_vm7, %v1980_v9, %v7380_v3  ;;  %2856 = vrot.lane.b32.xlu2 %v5546_v40, %s5832_s9  ;;  %v9991_v3 = vld [vmem:[#allocation117_spill] sm:$0xff]  ;;  %v10004_v29 = vld [vmem:[#allocation116_spill] sm:$0xff]  ;;  %v2831_v9 = vpop.permute.xlu1 %2830 }
 0x456   :  { %v1915_v45 = vsel %vm1891_vm5, %v1882_v32, %v9991_v3  ;;  %v10006_v32 = vld [vmem:[#allocation120_spill] sm:$0xff]  ;;  %v10007_v3 = vld [vmem:[#allocation122_spill] sm:$0xff] }
 0x457   :  { %v1948_v15 = vsel %vm1924_vm6, %v1915_v45, %v9992_v14  ;;  %v1786_v40 = vsel %vm29_vm0, %v5772_v16, %v10006_v32  ;;  %v5778_v32 = vld [vmem:[#allocation2 + $0x1cf] sm:$0xff] }
 0x458   :  { %v1981_v60 = vsel %vm1957_vm8, %v1948_v15, %v7137_v5  ;;  %v1819_v45 = vsel %vm1792_vm2, %v1786_v40, %v10007_v3  ;;  %v3141_v15 = vld [vmem:[#allocation2 + $0x8] sm:$0xff]  ;;  %v10023_v40 = vld [vmem:[#allocation135_spill] sm:$0xff] }
 0x459   :  { %v2165_v26 = vpop.f32.mrf.mxu1  ;;  %v2014_v58 = vsel %vm1990_vm7, %v1981_v60, %v7382_v4  ;;  %v9998_v4 = vld [vmem:[#allocation129_spill] sm:$0xff]  ;;  %v10024_v3 = vld [vmem:[#allocation139_spill] sm:$0xff] }
 0x45a   :  { %v2166_v36 = vadd.f32 %v7590_v22, %v2165_v26  ;;  %v5770_v26 = vld [vmem:[%s9715_s0 + $0x50] sm:$0xff]  ;;  %v1916_v0 = vsel %vm1891_vm5, %v1883_v8, %v9998_v4 }
 0x45b   :  { %5561 = vmatmul.msk.f32.gmra.mxu0 %vm29_vm0, %v2823_v56  ;;  %5460 = vmatmul.msk.f32.gmra.mxu2 %vm29_vm0, %v2163_v61  ;;  %v5769_v56 = vld [vmem:[#allocation2 + $0x18f] sm:$0xff]  ;;  %v2833_v57 = vpop.permute.xlu2 %2832 }
 0x45c   :  { %5445 = vmatmul.msk.f32.gmra.mxu1 %vm2036_vm9, %v2012_v30  ;;  %5497 = vmatmul.msk.f32.gmra.mxu3 %vm29_vm0, %v5767_v11  ;;  %v1785_v5 = vsel %vm29_vm0, %v5769_v56, %v9996_v63  ;;  %v10000_v30 = vld [vmem:[#allocation154_spill] sm:$0xff]  ;;  %v10010_v60 = vld [vmem:[#allocation137_spill] sm:$0xff] }
 0x45d   :  { %v1818_v61 = vsel %vm1792_vm2, %v1785_v5, %v9999_v17  ;;  %v1949_v59 = vsel %vm1924_vm6, %v1916_v0, %v10000_v30  ;;  %2862 = vrot.lane.b32.xlu2 %v5549_v54, %s5832_s9  ;;  %v10012_v56 = vld [vmem:[#allocation113_spill] sm:$0xff]  ;;  %v10014_v0 = vld [vmem:[#allocation134_spill] sm:$0xff]  ;;  %v5776_v30 = vld [vmem:[#allocation2 + $0x1c7] sm:$0xff] }
 0x45e   :  { %v1851_v44 = vsel %vm1825_vm3, %v1818_v61, %v10001_v47  ;;  %v1982_v41 = vsel %vm1957_vm8, %v1949_v59, %v10002_v31  ;;  %v1787_v63 = vsel %vm29_vm0, %v5774_v1, %v10012_v56  ;;  %v3142_v17 = vld [vmem:[#allocation2 + $0x10] sm:$0xff]  ;;  %v10016_v59 = vld [vmem:[#allocation128_spill] sm:$0xff]  ;;  %v10017_v47 = vld [vmem:[#allocation146_spill] sm:$0xff]  ;;  %v2835_v31 = vpop.permute.xlu0 %2834 }
 0x45f   :  { %v2015_v55 = vsel %vm1990_vm7, %v1982_v41, %v7386_v42  ;;  %v5771_v42 = vld [vmem:[%s9715_s0 + $0x58] sm:$0xff]  ;;  %v1820_v8 = vsel %vm1792_vm2, %v1787_v63, %v10013_v28  ;;  %v10018_v41 = vld [vmem:[#allocation156_spill] sm:$0xff]  ;;  %v10029_v1 = vld [vmem:[#allocation149_spill] sm:$0xff] }
 0x460   :  { %v10030_v28 = vld [vmem:[#allocation153_spill] sm:$0xff] }
 0x461   :  { %v2168_v33 = vpop.f32.mrf.mxu1 }
 0x462   :  { %v2169_v20 = vadd.f32 %v7590_v22, %v2168_v33 }
 0x463   :  { %5562 = vmatmul.msk.f32.gmra.mxu0 %vm29_vm0, %v2825_v50  ;;  %5461 = vmatmul.msk.f32.gmra.mxu2 %vm29_vm0, %v2166_v36  ;;  %v1884_v50 = vsel %vm1858_vm4, %v1851_v44, %v10003_v52  ;;  %v10005_v36 = vld [vmem:[#allocation155_spill] sm:$0xff] }
 0x464   :  { %5446 = vmatmul.msk.f32.gmra.mxu1 %vm2036_vm9, %v2013_v12  ;;  %5498 = vmatmul.msk.f32.gmra.mxu3 %vm29_vm0, %v5770_v26  ;;  %v1917_v33 = vsel %vm1891_vm5, %v1884_v50, %v10004_v29  ;;  %v2768_v52 = vld [vmem:[%s9717_s2] sm:$0x1]  ;;  %v10019_v50 = vld [vmem:[#allocation161_spill] sm:$0xff] }
 0x465   :  { %v1950_v12 = vsel %vm1924_vm6, %v1917_v33, %v10005_v36  ;;  %3429 = vrot.lane.b32.xlu2 %v3141_v15, %s5834_s30  ;;  %v7889_v16 = vperm.slane %v2768_v52, 0  ;;  %v10025_v15 = vld [vmem:[#allocation157_spill] sm:$0xff]  ;;  %v5782_v52 = vld [vmem:[%s9715_s0 + $0x80] sm:$0xff] }
 0x466   :  { %v1983_v11 = vsel %vm1957_vm8, %v1950_v12, %v7153_v2  ;;  %v10008_v2 = vld [vmem:[#allocation118_spill] sm:$0xff]  ;;  %v10022_v12 = vld [vmem:[#allocation140_spill] sm:$0xff] }
 0x467   :  { %v1852_v25 = vsel %vm1825_vm3, %v1819_v45, %v10008_v2 }
 0x469   :  { %v2171_v43 = vpop.f32.mrf.mxu1 }
 0x46a   :  { %v2172_v48 = vadd.f32 %v7590_v22, %v2171_v43  ;;  %v5550_v43 = vld [vmem:[%s9715_s0 + $0x1f0] sm:$0xff] }
 0x46b   :  { %5563 = vmatmul.msk.f32.gmra.mxu0 %vm29_vm0, %v2827_v34  ;;  %5462 = vmatmul.msk.f32.gmra.mxu2 %vm29_vm0, %v2169_v20  ;;  %v2016_v34 = vsel %vm1990_vm7, %v1983_v11, %v7411_v53  ;;  %v10009_v53 = vld [vmem:[#allocation132_spill] sm:$0xff]  ;;  %v1789_v11 = vsel %vm29_vm0, %v5778_v32, %v10023_v40  ;;  %v10040_v40 = vld [vmem:[#allocation162_spill] sm:$0xff] }
 0x46c   :  { %5447 = vmatmul.msk.f32.gmra.mxu1 %vm2036_vm9, %v2014_v58  ;;  %5499 = vmatmul.msk.f32.gmra.mxu3 %vm29_vm0, %v5771_v42  ;;  %v1885_v19 = vsel %vm1858_vm4, %v1852_v25, %v10009_v53  ;;  %v10011_v20 = vld [vmem:[#allocation152_spill] sm:$0xff] }
 0x46d   :  { %2864 = vrot.lane.b32.xlu0 %v5550_v43, %s5832_s9  ;;  %v1918_v37 = vsel %vm1891_vm5, %v1885_v19, %v10010_v60  ;;  %v10026_v19 = vld [vmem:[#allocation131_spill] sm:$0xff] }
 0x46e   :  { %v1951_v58 = vsel %vm1924_vm6, %v1918_v37, %v10011_v20  ;;  %v10027_v20 = vld [vmem:[#allocation133_spill] sm:$0xff] }
 0x46f   :  { %v1984_v5 = vsel %vm1957_vm8, %v1951_v58, %v7155_v62  ;;  %v10015_v62 = vld [vmem:[#allocation124_spill] sm:$0xff] }
 0x470   :  { %v2017_v26 = vsel %vm1990_vm7, %v1984_v5, %v7405_v18  ;;  %v5775_v18 = vld [vmem:[%s9715_s0 + $0x68] sm:$0xff]  ;;  %v2839_v5 = vpop.permute.xlu2 %2838 }
 0x471   :  { %v2174_v49 = vpop.f32.mrf.mxu1  ;;  %v10028_v58 = vld [vmem:[#allocation144_spill] sm:$0xff] }
 0x472   :  { %v2175_v14 = vadd.f32 %v7590_v22, %v2174_v49  ;;  %v1788_v49 = vsel %vm29_vm0, %v5776_v30, %v10016_v59 }
 0x473   :  { %5564 = vmatmul.msk.f32.gmra.mxu0 %vm29_vm0, %v2829_v27  ;;  %5463 = vmatmul.msk.f32.gmra.mxu2 %vm29_vm0, %v2172_v48  ;;  %v1853_v27 = vsel %vm1825_vm3, %v1820_v8, %v10014_v0  ;;  %v1821_v42 = vsel %vm1792_vm2, %v1788_v49, %v10020_v46  ;;  %v5780_v0 = vld [vmem:[#allocation2 + $0x1e7] sm:$0xff] }
 0x474   :  { %5448 = vmatmul.msk.f32.gmra.mxu1 %vm2036_vm9, %v2015_v55  ;;  %5500 = vmatmul.msk.f32.gmra.mxu3 %vm29_vm0, %v5773_v10  ;;  %v1886_v61 = vsel %vm1858_vm4, %v1853_v27, %v10015_v62  ;;  %v1822_v10 = vsel %vm1792_vm2, %v1789_v11, %v10026_v19  ;;  %v10031_v27 = vld [vmem:[#allocation127_spill] sm:$0xff] }
 0x475   :  { %3431 = vrot.lane.b32.xlu0 %v3142_v17, %s5834_s30  ;;  %v1919_v44 = vsel %vm1891_vm5, %v1886_v61, %v10017_v47  ;;  %v1790_v17 = vsel %vm29_vm0, %v5780_v0, %v10031_v27  ;;  %v10032_v61 = vld [vmem:[#allocation141_spill] sm:$0xff]  ;;  %v5785_v27 = vld [vmem:[%s9715_s0 + $0x98] sm:$0xff] }
 0x476   :  { %v1952_v48 = vsel %vm1924_vm6, %v1919_v44, %v10018_v41  ;;  %v10033_v47 = vld [vmem:[#allocation145_spill] sm:$0xff]  ;;  %v10034_v41 = vld [vmem:[#allocation143_spill] sm:$0xff] }
 0x477   :  { %v1985_v54 = vsel %vm1957_vm8, %v1952_v48, %v10019_v50  ;;  %v10035_v48 = vld [vmem:[#allocation136_spill] sm:$0xff]  ;;  %v10036_v50 = vld [vmem:[#allocation150_spill] sm:$0xff] }
 0x478   :  { %v2018_v29 = vsel %vm1990_vm7, %v1985_v54, %v7420_v51  ;;  %v5777_v51 = vld [vmem:[%s9715_s0 + $0x70] sm:$0xff] }
 0x479   :  { %v2177_v24 = vpop.f32.mrf.mxu1 }
 0x47a   :  { %v2178_v4 = vadd.f32 %v7590_v22, %v2177_v24 }
 0x47b   :  { %5565 = vmatmul.msk.f32.gmra.mxu0 %vm29_vm0, %v2831_v9  ;;  %5464 = vmatmul.msk.f32.gmra.mxu2 %vm29_vm0, %v2175_v14  ;;  %v10021_v9 = vld [vmem:[#allocation138_spill] sm:$0xff]  ;;  %v2837_v14 = vpop.permute.xlu1 %2836 }
 0x47c   :  { %5449 = vmatmul.msk.f32.gmra.mxu1 %vm2036_vm9, %v2016_v34  ;;  %5501 = vmatmul.msk.f32.gmra.mxu3 %vm29_vm0, %v5775_v18  ;;  %v1854_v36 = vsel %vm1825_vm3, %v1821_v42, %v10021_v9  ;;  %v1823_v18 = vsel %vm1792_vm2, %v1790_v17, %v10032_v61  ;;  %v2841_v42 = vpop.permute.xlu0 %2840  ;;  %v10038_v9 = vld [vmem:[#allocation158_spill] sm:$0xff] }
 0x47d   :  { %v1887_v24 = vsel %vm1858_vm4, %v1854_v36, %v10022_v12  ;;  %v1856_v44 = vsel %vm1825_vm3, %v1823_v18, %v10033_v47  ;;  %v8019_v47 = vld [vmem:[%s9722_s6] ss:$0 sm:$0xff] }
 0x47e   :  { %v1920_v45 = vsel %vm1891_vm5, %v1887_v24, %v10024_v3 }
 0x47f   :  { %v1953_v43 = vsel %vm1924_vm6, %v1920_v45, %v10025_v15  ;;  %v10041_v15 = vld [vmem:[#allocation147_spill] sm:$0xff] }
 0x480   :  { %v1986_v53 = vsel %vm1957_vm8, %v1953_v43, %v7165_v23  ;;  %v1855_v23 = vsel %vm1825_vm3, %v1822_v10, %v10027_v20 }
 0x481   :  { %v2180_v7 = vpop.f32.mrf.mxu1  ;;  %v2019_v60 = vsel %vm1990_vm7, %v1986_v53, %v7445_v38  ;;  %v5779_v38 = vld [vmem:[%s9715_s0 + $0x78] sm:$0xff] }
 0x482   :  { %v2181_v33 = vadd.f32 %v7590_v22, %v2180_v7  ;;  %v1888_v7 = vsel %vm1858_vm4, %v1855_v23, %v10028_v58 }
 0x483   :  { %5566 = vmatmul.msk.f32.gmra.mxu0 %vm29_vm0, %v2833_v57  ;;  %5465 = vmatmul.msk.f32.gmra.mxu2 %vm29_vm0, %v2178_v4  ;;  %v1921_v56 = vsel %vm1891_vm5, %v1888_v7, %v10029_v1  ;;  %v2843_v10 = vpop.permute.xlu1 %2842 }
 0x484   :  { %5450 = vmatmul.msk.f32.gmra.mxu1 %vm2036_vm9, %v2017_v26  ;;  %5502 = vmatmul.msk.f32.gmra.mxu3 %vm29_vm0, %v5777_v51  ;;  %v1954_v8 = vsel %vm1924_vm6, %v1921_v56, %v10030_v28  ;;  %v10039_v51 = vld [vmem:[#allocation148_spill] sm:$0xff] }
 0x485   :  { %v1987_v62 = vsel %vm1957_vm8, %v1954_v8, %v7167_v21  ;;  %v5781_v21 = vld [vmem:[#allocation2 + $0x1ef] sm:$0xff] }
 0x486   :  { %v2020_v30 = vsel %vm1990_vm7, %v1987_v62, %v7430_v6  ;;  %v1791_v6 = vsel %vm29_vm0, %v5781_v21, %v10034_v41  ;;  %v5786_v21 = vld [vmem:[%s9715_s0 + $0xa0] sm:$0xff] }
 0x489   :  { %v2183_v55 = vpop.f32.mrf.mxu1  ;;  %v2847_v62 = vpop.permute.xlu0 %2846 }
 0x48a   :  { %v2184_v37 = vadd.f32 %v7590_v22, %v2183_v55  ;;  %v1889_v55 = vsel %vm1858_vm4, %v1856_v44, %v10035_v48 }
 0x48b   :  { %5567 = vmatmul.msk.f32.gmra.mxu0 %vm29_vm0, %v2835_v31  ;;  %5466 = vmatmul.msk.f32.gmra.mxu2 %vm29_vm0, %v2181_v33  ;;  %v1922_v54 = vsel %vm1891_vm5, %v1889_v55, %v10036_v50 }
 0x48c   :  { %5451 = vmatmul.msk.f32.gmra.mxu1 %vm2036_vm9, %v2018_v29  ;;  %5503 = vmatmul.msk.f32.gmra.mxu3 %vm29_vm0, %v5779_v38  ;;  %v10037_v29 = vld [vmem:[#allocation130_spill] sm:$0xff]  ;;  %v1955_v36 = vsel %vm1924_vm6, %v1922_v54, %v10038_v9 }
 0x48d   :  { %v1824_v33 = vsel %vm1792_vm2, %v1791_v6, %v10037_v29  ;;  %v1988_v11 = vsel %vm1957_vm8, %v1955_v36, %v10040_v40  ;;  %v5787_v36 = vld [vmem:[%s9715_s0 + $0xa8] sm:$0xff] }
 0x48e   :  { %v1857_v32 = vsel %vm1825_vm3, %v1824_v33, %v10039_v51  ;;  %v2021_v3 = vsel %vm1990_vm7, %v1988_v11, %v7451_v35  ;;  %v5783_v35 = vld [vmem:[%s9715_s0 + $0x88] sm:$0xff] }
 0x48f   :  { %v1890_v43 = vsel %vm1858_vm4, %v1857_v32, %v10041_v15 }
 0x490   :  { %v2949_v34 = vpop.f32.mrf.mxu0 }
 0x491   :  { %v2950_v2 = vadd.f32 %v2949_v34, %v7889_v16  ;;  %v2186_v25 = vpop.f32.mrf.mxu1 }
 0x492   :  { %v2187_v59 = vadd.f32 %v7590_v22, %v2186_v25  ;;  %v10042_v25 = vld [vmem:[#allocation142_spill] sm:$0xff] }
 0x493   :  { %v3045_v57 = vmax.f32 %v2950_v2, 0.0  ;;  %5568 = vmatmul.msk.f32.gmra.mxu0 %vm29_vm0, %v2837_v14  ;;  %5467 = vmatmul.msk.f32.gmra.mxu2 %vm29_vm0, %v2184_v37  ;;  %v7971_v2 = vpop.f32.mrf.mxu3  ;;  %v1923_v53 = vsel %vm1891_vm5, %v1890_v43, %v10042_v25 }
 0x494   :  { %5452 = vmatmul.msk.f32.gmra.mxu1 %vm2036_vm9, %v2019_v60  ;;  %5504 = vmatmul.msk.f32.gmra.mxu3 %vm29_vm0, %v5782_v52  ;;  %v10043_v60 = vld [vmem:[#allocation159_spill] sm:$0xff] }
 0x495   :  { %3077 = vst.msk [vmem:[#allocation2 + $0x28] sm:$0xff] %vm29_vm0, %v3045_v57  ;;  %v1956_v37 = vsel %vm1924_vm6, %v1923_v53, %v10043_v60 }
 0x496   :  { %v1989_v23 = vsel %vm1957_vm8, %v1956_v37, %v7183_v13  ;;  %v5784_v13 = vld [vmem:[%s9715_s0 + $0x90] sm:$0xff] }
 0x497   :  { %v2022_v58 = vsel %vm1990_vm7, %v1989_v23, %v7473_v39 }
 0x498   :  { %v2952_v63 = vpop.f32.mrf.mxu0 }
 0x499   :  { %v2953_v26 = vadd.f32 %v2952_v63, %v7889_v16  ;;  %v2189_v4 = vpop.f32.mrf.mxu1  ;;  %v2845_v63 = vpop.permute.xlu2 %2844 }
 0x49a   :  { %v2190_v45 = vadd.f32 %v7590_v22, %v2189_v4 }
 0x49b   :  { %v3046_v49 = vmax.f32 %v2953_v26, 0.0  ;;  %5569 = vmatmul.msk.f32.gmra.mxu0 %vm29_vm0, %v2839_v5  ;;  %5468 = vmatmul.msk.f32.gmra.mxu2 %vm29_vm0, %v2187_v59 }
 0x49c   :  { %5453 = vmatmul.msk.f32.gmra.mxu1 %vm2036_vm9, %v2020_v30  ;;  %v3143_v31 = vld [vmem:[#allocation2 + $0x28] sm:$0xff]  ;;  %5505 = vmatmul.msk.f32.gmra.mxu3 %vm29_vm0, %v5783_v35  ;;  %v7992_v56 = vpop.f32.mrf.mxu3 }
 0x49d   :  { %3078 = vst.msk [vmem:[#allocation2 + $0x30] sm:$0xff] %vm29_vm0, %v3046_v49  ;;  %3433 = vrot.lane.b32.xlu1 %v3143_v31, %s5834_s30  ;;  %v2849_v31 = vpop.permute.xlu1 %2848 }
 0x4a0   :  { %v2955_v46 = vpop.f32.mrf.mxu0  ;;  %v2853_v43 = vpop.permute.xlu0 %2852 }
 0x4a1   :  { %v2956_v12 = vadd.f32 %v2955_v46, %v7889_v16  ;;  %v2192_v24 = vpop.f32.mrf.mxu1  ;;  %v2851_v9 = vpop.permute.xlu2 %2850 }
 0x4a2   :  { %v2193_v7 = vadd.f32 %v7590_v22, %v2192_v24 }
 0x4a3   :  { %v3047_v34 = vmax.f32 %v2956_v12, 0.0  ;;  %5570 = vmatmul.msk.f32.gmra.mxu0 %vm29_vm0, %v2841_v42  ;;  %5469 = vmatmul.msk.f32.gmra.mxu2 %vm29_vm0, %v2190_v45 }
 0x4a4   :  { %5454 = vmatmul.msk.f32.gmra.mxu1 %vm2036_vm9, %v2021_v3  ;;  %v3144_v14 = vld [vmem:[#allocation2 + $0x30] sm:$0xff]  ;;  %5506 = vmatmul.msk.f32.gmra.mxu3 %vm29_vm0, %v5784_v13 }
 0x4a5   :  { %3079 = vst.msk [vmem:[#allocation2 + $0x48] sm:$0xff] %vm29_vm0, %v3047_v34  ;;  %3435 = vrot.lane.b32.xlu2 %v3144_v14, %s5834_s30 }
 0x4a6   :  { %v8004_v0 = vpop.f32.mrf.mxu3 }
 0x4a8   :  { %v2958_v19 = vpop.f32.mrf.mxu0 }
 0x4a9   :  { %v2959_v57 = vadd.f32 %v2958_v19, %v7889_v16  ;;  %v2195_v20 = vpop.f32.mrf.mxu1 }
 0x4aa   :  { %v2196_v8 = vadd.f32 %v7590_v22, %v2195_v20 }
 0x4ab   :  { %v3048_v38 = vmax.f32 %v2959_v57, 0.0  ;;  %5571 = vmatmul.msk.f32.gmra.mxu0 %vm29_vm0, %v2843_v10  ;;  %5470 = vmatmul.msk.f32.gmra.mxu2 %vm29_vm0, %v2193_v7  ;;  %v2855_v7 = vpop.permute.xlu1 %2854 }
 0x4ac   :  { %5455 = vmatmul.msk.f32.gmra.mxu1 %vm2036_vm9, %v2022_v58  ;;  %v3145_v1 = vld [vmem:[#allocation2 + $0x48] sm:$0xff]  ;;  %5507 = vmatmul.msk.f32.gmra.mxu3 %vm29_vm0, %v5785_v27 }
 0x4ad   :  { %3080 = vst.msk [vmem:[#allocation2 + $0x50] sm:$0xff] %vm29_vm0, %v3048_v38  ;;  %3437 = vrot.lane.b32.xlu0 %v3145_v1, %s5834_s30  ;;  %v5789_v38 = vld [vmem:[%s9715_s0 + $0xb8] sm:$0xff] }
 0x4ae   :  { %v8021_v44 = vpop.f32.mrf.mxu3 }
 0x4af   :  { %v2857_v27 = vpop.permute.xlu2 %2856 }
 0x4b0   :  { %v2961_v39 = vpop.f32.mrf.mxu0 }
 0x4b1   :  { %v2962_v5 = vadd.f32 %v2961_v39, %v7889_v16  ;;  %v2198_v28 = vpop.f32.mrf.mxu1 }
 0x4b2   :  { %v2199_v30 = vadd.f32 %v7590_v22, %v2198_v28 }
 0x4b3   :  { %v3049_v26 = vmax.f32 %v2962_v5, 0.0  ;;  %5572 = vmatmul.msk.f32.gmra.mxu0 %vm29_vm0, %v2845_v63  ;;  %5471 = vmatmul.msk.f32.gmra.mxu2 %vm29_vm0, %v2196_v8 }
 0x4b4   :  { %v3146_v4 = vld [vmem:[#allocation2 + $0x50] sm:$0xff]  ;;  %5508 = vmatmul.msk.f32.gmra.mxu3 %vm29_vm0, %v5786_v21 }
 0x4b5   :  { %3081 = vst.msk [vmem:[#allocation2 + $0x68] sm:$0xff] %vm29_vm0, %v3049_v26  ;;  %3439 = vrot.lane.b32.xlu1 %v3146_v4, %s5834_s30 }
 0x4b6   :  { %v8035_v33 = vpop.f32.mrf.mxu3 }
 0x4b8   :  { %v2964_v17 = vpop.f32.mrf.mxu0 }
 0x4b9   :  { %v2965_v61 = vadd.f32 %v2964_v17, %v7889_v16  ;;  %v2201_v18 = vpop.f32.mrf.mxu1  ;;  %v5790_v17 = vld [vmem:[%s9715_s0 + $0xc0] sm:$0xff] }
 0x4ba   :  { %v2202_v50 = vadd.f32 %v7590_v22, %v2201_v18 }
 0x4bb   :  { %v3050_v59 = vmax.f32 %v2965_v61, 0.0  ;;  %5573 = vmatmul.msk.f32.gmra.mxu0 %vm29_vm0, %v2847_v62  ;;  %5472 = vmatmul.msk.f32.gmra.mxu2 %vm29_vm0, %v2199_v30 }
 0x4bc   :  { %v3147_v49 = vld [vmem:[#allocation2 + $0x68] sm:$0xff]  ;;  %5509 = vmatmul.msk.f32.gmra.mxu3 %vm29_vm0, %v5787_v36 }
 0x4bd   :  { %3082 = vst.msk [vmem:[#allocation2 + $0x70] sm:$0xff] %vm29_vm0, %v3050_v59  ;;  %3441 = vrot.lane.b32.xlu2 %v3147_v49, %s5834_s30 }
 0x4be   :  { %v2364_v41 = vpop.f32.mrf.mxu2 }
 0x4bf   :  { %v2365_v48 = vadd.f32 %v8019_v47, %v2364_v41  ;;  %v8053_v15 = vpop.f32.mrf.mxu3 }
 0x4c0   :  { %v2967_v6 = vpop.f32.mrf.mxu0 }
 0x4c1   :  { %v2968_v55 = vadd.f32 %v2967_v6, %v7889_v16  ;;  %v2204_v52 = vpop.f32.mrf.mxu1  ;;  %v2460_v54 = vmax.f32 %v2365_v48, 0.0  ;;  %v2859_v48 = vpop.permute.xlu0 %2858 }
 0x4c2   :  { %v2205_v11 = vadd.f32 %v7590_v22, %v2204_v52 }
 0x4c3   :  { %v3051_v46 = vmax.f32 %v2968_v55, 0.0  ;;  %5574 = vmatmul.msk.f32.gmra.mxu0 %vm29_vm0, %v2849_v31  ;;  %v2670_v29 = vadd.f32 %v7971_v2, %v2460_v54  ;;  %5473 = vmatmul.msk.f32.gmra.mxu2 %vm29_vm0, %v2202_v50  ;;  %v5788_v2 = vld [vmem:[%s9715_s0 + $0xb0] sm:$0xff]  ;;  %v5791_v55 = vld [vmem:[%s9715_s0 + $0xc8] sm:$0xff] }
 0x4c4   :  { %v3148_v42 = vld [vmem:[#allocation2 + $0x70] sm:$0xff]  ;;  %5510 = vmatmul.msk.f32.gmra.mxu3 %vm29_vm0, %v5788_v2 }
 0x4c5   :  { %3083 = vst.msk [vmem:[#allocation2 + $0x88] sm:$0xff] %vm29_vm0, %v3051_v46  ;;  %3443 = vrot.lane.b32.xlu0 %v3148_v42, %s5834_s30 }
 0x4c6   :  { %2702 = vst.msk [vmem:[%s9723_s8] sm:$0xff] %vm1792_vm2, %v2670_v29  ;;  %v2367_v12 = vpop.f32.mrf.mxu2 }
 0x4c7   :  { %v2368_v51 = vadd.f32 %v8019_v47, %v2367_v12  ;;  %v8071_v58 = vpop.f32.mrf.mxu3 }
 0x4c8   :  { %v2970_v24 = vpop.f32.mrf.mxu0 }
 0x4c9   :  { %v2971_v32 = vadd.f32 %v2970_v24, %v7889_v16  ;;  %v2207_v40 = vpop.f32.mrf.mxu1  ;;  %v2461_v3 = vmax.f32 %v2368_v51, 0.0  ;;  %v2861_v51 = vpop.permute.xlu1 %2860 }
 0x4ca   :  { %v2208_v60 = vadd.f32 %v7590_v22, %v2207_v40 }
 0x4cb   :  { %v3052_v45 = vmax.f32 %v2971_v32, 0.0  ;;  %5575 = vmatmul.msk.f32.gmra.mxu0 %vm29_vm0, %v2851_v9  ;;  %v2671_v14 = vadd.f32 %v7992_v56, %v2461_v3  ;;  %5474 = vmatmul.msk.f32.gmra.mxu2 %vm29_vm0, %v2205_v11  ;;  %v5792_v32 = vld [vmem:[%s9715_s0 + $0xd0] sm:$0xff] }
 0x4cc   :  { %v3149_v34 = vld [vmem:[#allocation2 + $0x88] sm:$0xff]  ;;  %5511 = vmatmul.msk.f32.gmra.mxu3 %vm29_vm0, %v5789_v38 }
 0x4cd   :  { %3084 = vst.msk [vmem:[#allocation2 + $0x90] sm:$0xff] %vm29_vm0, %v3052_v45  ;;  %3445 = vrot.lane.b32.xlu1 %v3149_v34, %s5834_s30 }
 0x4ce   :  { %2703 = vst.msk [vmem:[%s9723_s8 + $0x8] sm:$0xff] %vm1792_vm2, %v2671_v14  ;;  %v2370_v35 = vpop.f32.mrf.mxu2 }
 0x4cf   :  { %v2371_v53 = vadd.f32 %v8019_v47, %v2370_v35 }
 0x4d0   :  { %v2973_v25 = vpop.f32.mrf.mxu0 }
 0x4d1   :  { %v2974_v19 = vadd.f32 %v2973_v25, %v7889_v16  ;;  %v2210_v10 = vpop.f32.mrf.mxu1  ;;  %v2462_v37 = vmax.f32 %v2371_v53, 0.0  ;;  %v5793_v53 = vld [vmem:[%s9715_s0 + $0xd8] sm:$0xff] }
 0x4d2   :  { %v2211_v5 = vadd.f32 %v7590_v22, %v2210_v10 }
 0x4d3   :  { %v3053_v57 = vmax.f32 %v2974_v19, 0.0  ;;  %5576 = vmatmul.msk.f32.gmra.mxu0 %vm29_vm0, %v2853_v43  ;;  %v2672_v23 = vadd.f32 %v8004_v0, %v2462_v37  ;;  %5475 = vmatmul.msk.f32.gmra.mxu2 %vm29_vm0, %v2208_v60  ;;  %v8089_v0 = vpop.f32.mrf.mxu3 }
 0x4d4   :  { %v3150_v20 = vld [vmem:[#allocation2 + $0x90] sm:$0xff]  ;;  %5512 = vmatmul.msk.f32.gmra.mxu3 %vm29_vm0, %v5790_v17 }
 0x4d5   :  { %3085 = vst.msk [vmem:[#allocation2 + $0xa8] sm:$0xff] %vm29_vm0, %v3053_v57  ;;  %3447 = vrot.lane.b32.xlu2 %v3150_v20, %s5834_s30  ;;  %v2863_v20 = vpop.permute.xlu2 %2862 }
 0x4d6   :  { %2704 = vst.msk [vmem:[%s9723_s8 + $0x10] sm:$0xff] %vm1792_vm2, %v2672_v23  ;;  %v2373_v1 = vpop.f32.mrf.mxu2 }
 0x4d7   :  { %v2374_v13 = vadd.f32 %v8019_v47, %v2373_v1 }
 0x4d8   :  { %v2976_v56 = vpop.f32.mrf.mxu0 }
 0x4d9   :  { %v2977_v39 = vadd.f32 %v2976_v56, %v7889_v16  ;;  %v2213_v63 = vpop.f32.mrf.mxu1  ;;  %v2463_v28 = vmax.f32 %v2374_v13, 0.0  ;;  %v5794_v13 = vld [vmem:[%s9715_s0 + $0xe0] sm:$0xff] }
 0x4da   :  { %v2214_v49 = vadd.f32 %v7590_v22, %v2213_v63 }
 0x4db   :  { %v3054_v8 = vmax.f32 %v2977_v39, 0.0  ;;  %5577 = vmatmul.msk.f32.gmra.mxu0 %vm29_vm0, %v2855_v7  ;;  %v2673_v4 = vadd.f32 %v8021_v44, %v2463_v28  ;;  %5476 = vmatmul.msk.f32.gmra.mxu2 %vm29_vm0, %v2211_v5  ;;  %v8107_v6 = vpop.f32.mrf.mxu3 }
 0x4dc   :  { %v3151_v26 = vld [vmem:[#allocation2 + $0xa8] sm:$0xff]  ;;  %5513 = vmatmul.msk.f32.gmra.mxu3 %vm29_vm0, %v5791_v55 }
 0x4dd   :  { %3086 = vst.msk [vmem:[#allocation2 + $0xb0] sm:$0xff] %vm29_vm0, %v3054_v8  ;;  %3449 = vrot.lane.b32.xlu0 %v3151_v26, %s5834_s30 }
 0x4de   :  { %2705 = vst.msk [vmem:[%s9723_s8 + $0x18] sm:$0xff] %vm1792_vm2, %v2673_v4  ;;  %v2376_v62 = vpop.f32.mrf.mxu2 }
 0x4df   :  { %v2377_v18 = vadd.f32 %v8019_v47, %v2376_v62  ;;  %v2865_v26 = vpop.permute.xlu0 %2864 }
 0x4e0   :  { %v2979_v61 = vpop.f32.mrf.mxu0 }
 0x4e1   :  { %v2980_v30 = vadd.f32 %v2979_v61, %v7889_v16  ;;  %v2216_v59 = vpop.f32.mrf.mxu1  ;;  %v2464_v44 = vmax.f32 %v2377_v18, 0.0  ;;  %v5795_v18 = vld [vmem:[%s9715_s0 + $0xe8] sm:$0xff] }
 0x4e2   :  { %v2217_v29 = vadd.f32 %v7590_v22, %v2216_v59 }
 0x4e3   :  { %v3055_v31 = vmax.f32 %v2980_v30, 0.0  ;;  %5578 = vmatmul.msk.f32.gmra.mxu0 %vm29_vm0, %v2857_v27  ;;  %v2674_v41 = vadd.f32 %v8035_v33, %v2464_v44  ;;  %5477 = vmatmul.msk.f32.gmra.mxu2 %vm29_vm0, %v2214_v49  ;;  %v8125_v24 = vpop.f32.mrf.mxu3 }
 0x4e4   :  { %v3152_v21 = vld [vmem:[#allocation2 + $0xb0] sm:$0xff]  ;;  %5514 = vmatmul.msk.f32.gmra.mxu3 %vm29_vm0, %v5792_v32 }
 0x4e5   :  { %3087 = vst.msk [vmem:[#allocation2 + $0xc8] sm:$0xff] %vm29_vm0, %v3055_v31  ;;  %3451 = vrot.lane.b32.xlu1 %v3152_v21, %s5834_s30  ;;  %v2867_v21 = vpop.permute.xlu1 %2866 }
 0x4e6   :  { %2706 = vst.msk [vmem:[%s9723_s8 + $0x20] sm:$0xff] %vm1792_vm2, %v2674_v41  ;;  %v2379_v52 = vpop.f32.mrf.mxu2 }
 0x4e7   :  { %v2380_v54 = vadd.f32 %v8019_v47, %v2379_v52 }
 0x4e8   :  { %v2982_v50 = vpop.f32.mrf.mxu0 }
 0x4e9   :  { %v2983_v46 = vadd.f32 %v2982_v50, %v7889_v16  ;;  %v2219_v42 = vpop.f32.mrf.mxu1  ;;  %v2465_v33 = vmax.f32 %v2380_v54, 0.0  ;;  %v5796_v54 = vld [vmem:[%s9715_s0 + $0xf0] sm:$0xff] }
 0x4ea   :  { %v2220_v14 = vadd.f32 %v7590_v22, %v2219_v42 }
 0x4eb   :  { %v3056_v9 = vmax.f32 %v2983_v46, 0.0  ;;  %5579 = vmatmul.msk.f32.gmra.mxu0 %vm29_vm0, %v2859_v48  ;;  %v2675_v12 = vadd.f32 %v8053_v15, %v2465_v33  ;;  %5478 = vmatmul.msk.f32.gmra.mxu2 %vm29_vm0, %v2217_v29  ;;  %v8143_v25 = vpop.f32.mrf.mxu3 }
 0x4ec   :  { %v3153_v36 = vld [vmem:[#allocation2 + $0xc8] sm:$0xff]  ;;  %5515 = vmatmul.msk.f32.gmra.mxu3 %vm29_vm0, %v5793_v53 }
 0x4ed   :  { %3088 = vst.msk [vmem:[#allocation2 + $0xd0] sm:$0xff] %vm29_vm0, %v3056_v9  ;;  %3453 = vrot.lane.b32.xlu2 %v3153_v36, %s5834_s30 }
 0x4ee   :  { %2707 = vst.msk [vmem:[%s9723_s8 + $0x28] sm:$0xff] %vm1792_vm2, %v2675_v12  ;;  %v2382_v40 = vpop.f32.mrf.mxu2 }
 0x4ef   :  { %v2383_v3 = vadd.f32 %v8019_v47, %v2382_v40 }
 0x4f0   :  { %v2985_v11 = vpop.f32.mrf.mxu0 }
 0x4f1   :  { %v2986_v45 = vadd.f32 %v2985_v11, %v7889_v16  ;;  %v2222_v34 = vpop.f32.mrf.mxu1  ;;  %v2466_v15 = vmax.f32 %v2383_v3, 0.0  ;;  %v5797_v11 = vld [vmem:[%s9715_s0 + $0xf8] sm:$0xff] }
 0x4f2   :  { %v2223_v23 = vadd.f32 %v7590_v22, %v2222_v34 }
 0x4f3   :  { %v3057_v43 = vmax.f32 %v2986_v45, 0.0  ;;  %5580 = vmatmul.msk.f32.gmra.mxu0 %vm29_vm0, %v2861_v51  ;;  %v2676_v35 = vadd.f32 %v8071_v58, %v2466_v15  ;;  %5479 = vmatmul.msk.f32.gmra.mxu2 %vm29_vm0, %v2220_v14  ;;  %v8161_v56 = vpop.f32.mrf.mxu3 }
 0x4f4   :  { %v3154_v2 = vld [vmem:[#allocation2 + $0xd0] sm:$0xff]  ;;  %5516 = vmatmul.msk.f32.gmra.mxu3 %vm29_vm0, %v5794_v13 }
 0x4f5   :  { %3089 = vst.msk [vmem:[#allocation2 + $0xe8] sm:$0xff] %vm29_vm0, %v3057_v43  ;;  %3455 = vrot.lane.b32.xlu0 %v3154_v2, %s5834_s30 }
 0x4f6   :  { %2708 = vst.msk [vmem:[%s9723_s8 + $0x30] sm:$0xff] %vm1792_vm2, %v2676_v35  ;;  %v2385_v19 = vpop.f32.mrf.mxu2 }
 0x4f7   :  { %v2386_v60 = vadd.f32 %v8019_v47, %v2385_v19 }
 0x4f8   :  { %v2988_v10 = vpop.f32.mrf.mxu0 }
 0x4f9   :  { %v2989_v37 = vadd.f32 %v2988_v10, %v7889_v16  ;;  %v2225_v57 = vpop.f32.mrf.mxu1  ;;  %v2467_v58 = vmax.f32 %v2386_v60, 0.0 }
 0x4fa   :  { %v2226_v4 = vadd.f32 %v7590_v22, %v2225_v57  ;;  %v5798_v57 = vld [vmem:[%s9719_s4] ss:$0 sm:$0xff] }
 0x4fb   :  { %v3058_v7 = vmax.f32 %v2989_v37, 0.0  ;;  %5581 = vmatmul.msk.f32.gmra.mxu0 %vm29_vm0, %v2863_v20  ;;  %v2677_v1 = vadd.f32 %v8089_v0, %v2467_v58  ;;  %5480 = vmatmul.msk.f32.gmra.mxu2 %vm29_vm0, %v2223_v23  ;;  %v8179_v61 = vpop.f32.mrf.mxu3 }
 0x4fc   :  { %v3155_v38 = vld [vmem:[#allocation2 + $0xe8] sm:$0xff]  ;;  %5517 = vmatmul.msk.f32.gmra.mxu3 %vm29_vm0, %v5795_v18 }
 0x4fd   :  { %3090 = vst.msk [vmem:[#allocation2 + $0xf0] sm:$0xff] %vm29_vm0, %v3058_v7  ;;  %3457 = vrot.lane.b32.xlu1 %v3155_v38, %s5834_s30 }
 0x4fe   :  { %2709 = vst.msk [vmem:[%s9723_s8 + $0x38] sm:$0xff] %vm1792_vm2, %v2677_v1  ;;  %v2388_v39 = vpop.f32.mrf.mxu2 }
 0x4ff   :  { %v2389_v5 = vadd.f32 %v8019_v47, %v2388_v39 }
 0x500   :  { %v2991_v63 = vpop.f32.mrf.mxu0 }
 0x501   :  { %v2992_v28 = vadd.f32 %v2991_v63, %v7889_v16  ;;  %v2228_v8 = vpop.f32.mrf.mxu1  ;;  %v2468_v0 = vmax.f32 %v2389_v5, 0.0 }
 0x502   :  { %v2229_v41 = vadd.f32 %v7590_v22, %v2228_v8 }
 0x503   :  { %v3059_v27 = vmax.f32 %v2992_v28, 0.0  ;;  %5582 = vmatmul.msk.f32.gmra.mxu0 %vm29_vm0, %v2865_v26  ;;  %v2678_v62 = vadd.f32 %v8107_v6, %v2468_v0  ;;  %5481 = vmatmul.msk.f32.gmra.mxu2 %vm29_vm0, %v2226_v4  ;;  %v2613_v50 = vpop.f32.mrf.mxu3 }
 0x504   :  { %v3156_v17 = vld [vmem:[#allocation2 + $0xf0] sm:$0xff]  ;;  %5518 = vmatmul.msk.f32.gmra.mxu3 %vm29_vm0, %v5796_v54 }
 0x505   :  { %3091 = vst.msk [vmem:[#allocation2 + $0x108] sm:$0xff] %vm29_vm0, %v3059_v27  ;;  %3459 = vrot.lane.b32.xlu2 %v3156_v17, %s5834_s30 }
 0x506   :  { %2710 = vst.msk [vmem:[%s9723_s8 + $0x40] sm:$0xff] %vm1792_vm2, %v2678_v62  ;;  %v2391_v30 = vpop.f32.mrf.mxu2 }
 0x507   :  { %v2392_v49 = vadd.f32 %v8019_v47, %v2391_v30 }
 0x508   :  { %v2994_v59 = vpop.f32.mrf.mxu0 }
 0x509   :  { %v2995_v44 = vadd.f32 %v2994_v59, %v7889_v16  ;;  %v2231_v31 = vpop.f32.mrf.mxu1  ;;  %v2469_v6 = vmax.f32 %v2392_v49, 0.0 }
 0x50a   :  { %v2232_v36 = vadd.f32 %v7590_v22, %v2231_v31 }
 0x50b   :  { %v3060_v48 = vmax.f32 %v2995_v44, 0.0  ;;  %5583 = vmatmul.msk.f32.gmra.mxu0 %vm29_vm0, %v2867_v21  ;;  %v2679_v52 = vadd.f32 %v8125_v24, %v2469_v6  ;;  %5482 = vmatmul.msk.f32.gmra.mxu2 %vm29_vm0, %v2229_v41  ;;  %v2616_v40 = vpop.f32.mrf.mxu3 }
 0x50c   :  { %v3157_v55 = vld [vmem:[#allocation2 + $0x108] sm:$0xff]  ;;  %5519 = vmatmul.msk.f32.gmra.mxu3 %vm29_vm0, %v5797_v11 }
 0x50d   :  { %3092 = vst.msk [vmem:[#allocation2 + $0x110] sm:$0xff] %vm29_vm0, %v3060_v48  ;;  %3461 = vrot.lane.b32.xlu0 %v3157_v55, %s5834_s30 }
 0x50e   :  { %2711 = vst.msk [vmem:[%s9723_s8 + $0x48] sm:$0xff] %vm1792_vm2, %v2679_v52  ;;  %v2394_v46 = vpop.f32.mrf.mxu2 }
 0x50f   :  { %v2395_v29 = vadd.f32 %v8019_v47, %v2394_v46 }
 0x510   :  { %v2997_v42 = vpop.f32.mrf.mxu0 }
 0x511   :  { %v2998_v33 = vadd.f32 %v2997_v42, %v7889_v16  ;;  %v2234_v9 = vpop.f32.mrf.mxu1  ;;  %v2470_v12 = vmax.f32 %v2395_v29, 0.0 }
 0x512   :  { %v2235_v15 = vadd.f32 %v7590_v22, %v2234_v9 }
 0x513   :  { %v3061_v24 = vmax.f32 %v2998_v33, 0.0  ;;  %v2680_v32 = vadd.f32 %v8143_v25, %v2470_v12  ;;  %5483 = vmatmul.msk.f32.gmra.mxu2 %vm29_vm0, %v2232_v36  ;;  %v2619_v19 = vpop.f32.mrf.mxu3 }
 0x514   :  { %v3158_v51 = vld [vmem:[#allocation2 + $0x110] sm:$0xff] }
 0x515   :  { %3093 = vst.msk [vmem:[#allocation2 + $0x128] sm:$0xff] %vm29_vm0, %v3061_v24  ;;  %3463 = vrot.lane.b32.xlu1 %v3158_v51, %s5834_s30 }
 0x516   :  { %2712 = vst.msk [vmem:[%s9723_s8 + $0x50] sm:$0xff] %vm1792_vm2, %v2680_v32  ;;  %v2397_v3 = vpop.f32.mrf.mxu2 }
 0x517   :  { %v2398_v34 = vadd.f32 %v8019_v47, %v2397_v3 }
 0x518   :  { %v3000_v45 = vpop.f32.mrf.mxu0 }
 0x519   :  { %v3001_v14 = vadd.f32 %v3000_v45, %v7889_v16  ;;  %v2471_v43 = vmax.f32 %v2398_v34, 0.0  ;;  %v2237_v35 = vpop.f32.mrf.mxu1 }
 0x51a   :  { %v2238_v20 = vadd.f32 %v5798_v57, %v2237_v35 }
 0x51b   :  { %v3062_v2 = vmax.f32 %v3001_v14, 0.0  ;;  %v2681_v53 = vadd.f32 %v8161_v56, %v2471_v43  ;;  %5484 = vmatmul.msk.f32.gmra.mxu2 %vm29_vm0, %v2235_v15  ;;  %v2622_v56 = vpop.f32.mrf.mxu3 }
 0x51c   :  { %v3159_v25 = vld [vmem:[#allocation2 + $0x128] sm:$0xff] }
 0x51d   :  { %3094 = vst.msk [vmem:[#allocation2 + $0x130] sm:$0xff] %vm29_vm0, %v3062_v2  ;;  %3465 = vrot.lane.b32.xlu2 %v3159_v25, %s5834_s30 }
 0x51e   :  { %2713 = vst.msk [vmem:[%s9723_s8 + $0x58] sm:$0xff] %vm1792_vm2, %v2681_v53  ;;  %v2400_v10 = vpop.f32.mrf.mxu2 }
 0x51f   :  { %v2401_v60 = vadd.f32 %v8019_v47, %v2400_v10 }
 0x520   :  { %v3003_v22 = vpop.f32.mrf.mxu0 }
 0x521   :  { %v3004_v37 = vadd.f32 %v3003_v22, %v7889_v16  ;;  %v2472_v23 = vmax.f32 %v2401_v60, 0.0  ;;  %v2240_v38 = vpop.f32.mrf.mxu1 }
 0x522   :  { %v2241_v28 = vadd.f32 %v5798_v57, %v2240_v38 }
 0x523   :  { %v3063_v58 = vmax.f32 %v3004_v37, 0.0  ;;  %v2682_v1 = vadd.f32 %v8179_v61, %v2472_v23  ;;  %5485 = vmatmul.msk.f32.gmra.mxu2 %vm29_vm0, %v2238_v20  ;;  %v2625_v27 = vpop.f32.mrf.mxu3 }
 0x524   :  { %v3160_v7 = vld [vmem:[#allocation2 + $0x130] sm:$0xff] }
 0x525   :  { %3095 = vst.msk [vmem:[#allocation2 + $0x148] sm:$0xff] %vm29_vm0, %v3063_v58  ;;  %3467 = vrot.lane.b32.xlu0 %v3160_v7, %s5834_s30 }
 0x526   :  { %2714 = vst.msk [vmem:[%s9723_s8 + $0x60] sm:$0xff] %vm1792_vm2, %v2682_v1  ;;  %v2403_v13 = vpop.f32.mrf.mxu2 }
 0x527   :  { %v2404_v63 = vadd.f32 %v8019_v47, %v2403_v13 }
 0x528   :  { %v3006_v39 = vpop.f32.mrf.mxu0 }
 0x529   :  { %v3007_v5 = vadd.f32 %v3006_v39, %v7889_v16  ;;  %v2473_v8 = vmax.f32 %v2404_v63, 0.0  ;;  %v2243_v17 = vpop.f32.mrf.mxu1 }
 0x52a   :  { %v2244_v59 = vadd.f32 %v5798_v57, %v2243_v17 }
 0x52b   :  { %v3064_v26 = vmax.f32 %v3007_v5, 0.0  ;;  %v2683_v0 = vadd.f32 %v2613_v50, %v2473_v8  ;;  %5486 = vmatmul.msk.f32.gmra.mxu2 %vm29_vm0, %v2241_v28  ;;  %v2628_v41 = vpop.f32.mrf.mxu3 }
 0x52c   :  { %v3161_v4 = vld [vmem:[#allocation2 + $0x148] sm:$0xff] }
 0x52d   :  { %3096 = vst.msk [vmem:[#allocation2 + $0x150] sm:$0xff] %vm29_vm0, %v3064_v26  ;;  %3469 = vrot.lane.b32.xlu1 %v3161_v4, %s5834_s30 }
 0x52e   :  { %2715 = vst.msk [vmem:[%s9723_s8 + $0x68] sm:$0xff] %vm1792_vm2, %v2683_v0  ;;  %v2406_v62 = vpop.f32.mrf.mxu2 }
 0x52f   :  { %v2407_v18 = vadd.f32 %v8019_v47, %v2406_v62 }
 0x530   :  { %v3009_v61 = vpop.f32.mrf.mxu0 }
 0x531   :  { %v3010_v30 = vadd.f32 %v3009_v61, %v7889_v16  ;;  %v2474_v49 = vmax.f32 %v2407_v18, 0.0 }
 0x533   :  { %v3065_v44 = vmax.f32 %v3010_v30, 0.0  ;;  %v2684_v21 = vadd.f32 %v2616_v40, %v2474_v49  ;;  %5487 = vmatmul.msk.f32.gmra.mxu2 %vm29_vm0, %v2244_v59  ;;  %v2631_v12 = vpop.f32.mrf.mxu3 }
 0x534   :  { %v3162_v31 = vld [vmem:[#allocation2 + $0x150] sm:$0xff] }
 0x535   :  { %3097 = vst.msk [vmem:[#allocation2 + $0x168] sm:$0xff] %vm29_vm0, %v3065_v44  ;;  %3471 = vrot.lane.b32.xlu2 %v3162_v31, %s5834_s30 }
 0x536   :  { %2716 = vst.msk [vmem:[%s9723_s8 + $0x70] sm:$0xff] %vm1792_vm2, %v2684_v21  ;;  %v2409_v6 = vpop.f32.mrf.mxu2 }
 0x537   :  { %v2410_v55 = vadd.f32 %v8019_v47, %v2409_v6 }
 0x538   :  { %v3012_v48 = vpop.f32.mrf.mxu0 }
 0x539   :  { %v3013_v52 = vadd.f32 %v3012_v48, %v7889_v16  ;;  %v2475_v50 = vmax.f32 %v2410_v55, 0.0 }
 0x53b   :  { %v3066_v54 = vmax.f32 %v3013_v52, 0.0  ;;  %v2685_v42 = vadd.f32 %v2619_v19, %v2475_v50  ;;  %v2634_v43 = vpop.f32.mrf.mxu3 }
 0x53c   :  { %v3163_v46 = vld [vmem:[#allocation2 + $0x168] sm:$0xff] }
 0x53d   :  { %3098 = vst.msk [vmem:[#allocation2 + $0x170] sm:$0xff] %vm29_vm0, %v3066_v54  ;;  %3473 = vrot.lane.b32.xlu0 %v3163_v46, %s5834_s30 }
 0x53e   :  { %2717 = vst.msk [vmem:[%s9723_s8 + $0x78] sm:$0xff] %vm1792_vm2, %v2685_v42  ;;  %v2412_v29 = vpop.f32.mrf.mxu2 }
 0x53f   :  { %v2413_v9 = vadd.f32 %v8019_v47, %v2412_v29 }
 0x540   :  { %v3015_v33 = vpop.f32.mrf.mxu0 }
 0x541   :  { %v3016_v36 = vadd.f32 %v3015_v33, %v7889_v16  ;;  %v2476_v24 = vmax.f32 %v2413_v9, 0.0 }
 0x543   :  { %v3067_v51 = vmax.f32 %v3016_v36, 0.0  ;;  %v2686_v40 = vadd.f32 %v2622_v56, %v2476_v24  ;;  %v2637_v20 = vpop.f32.mrf.mxu3 }
 0x544   :  { %v3164_v32 = vld [vmem:[#allocation2 + $0x170] sm:$0xff] }
 0x545   :  { %3099 = vst.msk [vmem:[#allocation2 + $0x188] sm:$0xff] %vm29_vm0, %v3067_v51  ;;  %3475 = vrot.lane.b32.xlu1 %v3164_v32, %s5834_s30 }
 0x546   :  { %2718 = vst.msk [vmem:[%s9723_s8 + $0x80] sm:$0xff] %vm1792_vm2, %v2686_v40  ;;  %v2415_v11 = vpop.f32.mrf.mxu2 }
 0x547   :  { %v2416_v45 = vadd.f32 %v8019_v47, %v2415_v11 }
 0x548   :  { %v3018_v3 = vpop.f32.mrf.mxu0 }
 0x549   :  { %v3019_v34 = vadd.f32 %v3018_v3, %v7889_v16  ;;  %v2477_v14 = vmax.f32 %v2416_v45, 0.0 }
 0x54b   :  { %v3068_v15 = vmax.f32 %v3019_v34, 0.0  ;;  %v2687_v35 = vadd.f32 %v2625_v27, %v2477_v14  ;;  %v2640_v63 = vpop.f32.mrf.mxu3  ;;  %v3174_v34 = vld [vmem:[#allocation2 + $0x11] sm:$0xff] }
 0x54c   :  { %v3165_v2 = vld [vmem:[#allocation2 + $0x188] sm:$0xff] }
 0x54d   :  { %3100 = vst.msk [vmem:[#allocation2 + $0x190] sm:$0xff] %vm29_vm0, %v3068_v15  ;;  %3477 = vrot.lane.b32.xlu2 %v3165_v2, %s5834_s30 }
 0x54e   :  { %2719 = vst.msk [vmem:[%s9723_s8 + $0x88] sm:$0xff] %vm1792_vm2, %v2687_v35  ;;  %v2418_v25 = vpop.f32.mrf.mxu2  ;;  %v8340_v35 = vld [vmem:[#allocation2 + $0x31] sm:$0xff] }
 0x54f   :  { %v2419_v19 = vadd.f32 %v8019_v47, %v2418_v25 }
 0x550   :  { %v3021_v53 = vpop.f32.mrf.mxu0 }
 0x551   :  { %v3022_v10 = vadd.f32 %v3021_v53, %v7889_v16  ;;  %v2478_v22 = vmax.f32 %v2419_v19, 0.0 }
 0x553   :  { %v3069_v60 = vmax.f32 %v3022_v10, 0.0  ;;  %v2688_v57 = vadd.f32 %v2628_v41, %v2478_v22  ;;  %v2643_v59 = vpop.f32.mrf.mxu3  ;;  %v8349_v22 = vld [vmem:[#allocation2 + $0x29] sm:$0xff] }
 0x554   :  { %v3166_v37 = vld [vmem:[#allocation2 + $0x190] sm:$0xff] }
 0x555   :  { %3101 = vst.msk [vmem:[#allocation2 + $0x1a8] sm:$0xff] %vm29_vm0, %v3069_v60  ;;  %3479 = vrot.lane.b32.xlu0 %v3166_v37, %s5834_s30  ;;  %v8351_v60 = vld [vmem:[#allocation2 + $0x49] sm:$0xff] }
 0x556   :  { %2720 = vst.msk [vmem:[%s9723_s8 + $0x90] sm:$0xff] %vm1792_vm2, %v2688_v57  ;;  %v2421_v23 = vpop.f32.mrf.mxu2  ;;  %v8357_v57 = vld [vmem:[#allocation2 + $0x69] sm:$0xff] }
 0x557   :  { %v2422_v7 = vadd.f32 %v8019_v47, %v2421_v23 }
 0x558   :  { %v3024_v58 = vpop.f32.mrf.mxu0 }
 0x559   :  { %v3025_v38 = vadd.f32 %v3024_v58, %v7889_v16  ;;  %v2479_v1 = vmax.f32 %v2422_v7, 0.0 }
 0x55b   :  { %v3070_v56 = vmax.f32 %v3025_v38, 0.0  ;;  %v2689_v39 = vadd.f32 %v2631_v12, %v2479_v1  ;;  %v2646_v46 = vpop.f32.mrf.mxu3  ;;  %v3173_v12 = vld [vmem:[#allocation2 + $0x9] sm:$0xff]  ;;  %v8368_v1 = vld [vmem:[#allocation2 + $0x51] sm:$0xff] }
 0x55c   :  { %v3167_v13 = vld [vmem:[#allocation2 + $0x1a8] sm:$0xff] }
 0x55d   :  { %3102 = vst.msk [vmem:[#allocation2 + $0x1b0] sm:$0xff] %vm29_vm0, %v3070_v56  ;;  %3481 = vrot.lane.b32.xlu1 %v3167_v13, %s5834_s30  ;;  %v8370_v56 = vld [vmem:[#allocation2 + $0x71] sm:$0xff] }
 0x55e   :  { %2721 = vst.msk [vmem:[%s9723_s8 + $0x98] sm:$0xff] %vm1792_vm2, %v2689_v39  ;;  %v2424_v5 = vpop.f32.mrf.mxu2  ;;  %v8376_v39 = vld [vmem:[#allocation2 + $0x91] sm:$0xff] }
 0x55f   :  { %v2425_v8 = vadd.f32 %v8019_v47, %v2424_v5 }
 0x560   :  { %v3027_v28 = vpop.f32.mrf.mxu0 }
 0x561   :  { %v3028_v26 = vadd.f32 %v3027_v28, %v7889_v16  ;;  %v2480_v4 = vmax.f32 %v2425_v8, 0.0 }
 0x563   :  { %v3071_v0 = vmax.f32 %v3028_v26, 0.0  ;;  %v2690_v17 = vadd.f32 %v2634_v43, %v2480_v4  ;;  %v2649_v11 = vpop.f32.mrf.mxu3  ;;  %v8336_v43 = vpop.permute.xlu2 %3429  ;;  %v8387_v26 = vld [vmem:[#allocation2 + $0x89] sm:$0xff] }
 0x564   :  { %v3168_v27 = vld [vmem:[#allocation2 + $0x1b0] sm:$0xff] }
 0x565   :  { %3103 = vst.msk [vmem:[#allocation2 + $0x1c8] sm:$0xff] %vm29_vm0, %v3071_v0  ;;  %3483 = vrot.lane.b32.xlu2 %v3168_v27, %s5834_s30  ;;  %v8389_v4 = vld [vmem:[#allocation2 + $0xa9] sm:$0xff] }
 0x566   :  { %2722 = vst.msk [vmem:[%s9723_s8 + $0xa0] sm:$0xff] %vm1792_vm2, %v2690_v17  ;;  %v2427_v62 = vpop.f32.mrf.mxu2  ;;  %v8395_v17 = vld [vmem:[#allocation2 + $0xc9] sm:$0xff] }
 0x567   :  { %v2428_v18 = vadd.f32 %v8019_v47, %v2427_v62  ;;  %v8399_v62 = vpop.permute.xlu1 %3433 }
 0x568   :  { %v3030_v61 = vpop.f32.mrf.mxu0 }
 0x569   :  { %v3031_v30 = vadd.f32 %v3030_v61, %v7889_v16  ;;  %v2481_v49 = vmax.f32 %v2428_v18, 0.0 }
 0x56b   :  { %v3072_v44 = vmax.f32 %v3031_v30, 0.0  ;;  %v2691_v21 = vadd.f32 %v2637_v20, %v2481_v49  ;;  %v2652_v53 = vpop.f32.mrf.mxu3  ;;  %v8361_v20 = vpop.permute.xlu2 %3435 }
 0x56c   :  { %v3169_v31 = vld [vmem:[#allocation2 + $0x1c8] sm:$0xff]  ;;  %v8408_v49 = vpop.permute.xlu0 %3431 }
 0x56d   :  { %3104 = vst.msk [vmem:[#allocation2 + $0x1d0] sm:$0xff] %vm29_vm0, %v3072_v44  ;;  %3485 = vrot.lane.b32.xlu0 %v3169_v31, %s5834_s30  ;;  %v8410_v44 = vld [vmem:[#allocation2 + $0xb1] sm:$0xff] }
 0x56e   :  { %2723 = vst.msk [vmem:[%s9723_s8 + $0xa8] sm:$0xff] %vm1792_vm2, %v2691_v21  ;;  %v2430_v41 = vpop.f32.mrf.mxu2  ;;  %v8412_v31 = vld [vmem:[#allocation2 + $0xd1] sm:$0xff] }
 0x56f   :  { %v2431_v48 = vadd.f32 %v8019_v47, %v2430_v41  ;;  %v8418_v41 = vld [vmem:[#allocation2 + $0xf1] sm:$0xff] }
 0x570   :  { %v3033_v6 = vpop.f32.mrf.mxu0 }
 0x571   :  { %v3034_v55 = vadd.f32 %v3033_v6, %v7889_v16  ;;  %v2482_v52 = vmax.f32 %v2431_v48, 0.0  ;;  %v8422_v48 = vpop.permute.xlu1 %3439 }
 0x573   :  { %v3073_v50 = vmax.f32 %v3034_v55, 0.0  ;;  %v2692_v42 = vadd.f32 %v2640_v63, %v2482_v52  ;;  %v2655_v7 = vpop.f32.mrf.mxu3  ;;  %v8380_v63 = vpop.permute.xlu2 %3441 }
 0x574   :  { %v3170_v54 = vld [vmem:[#allocation2 + $0x1d0] sm:$0xff] }
 0x575   :  { %3105 = vst.msk [vmem:[#allocation2 + $0x1e8] sm:$0xff] %vm29_vm0, %v3073_v50  ;;  %3487 = vrot.lane.b32.xlu1 %v3170_v54, %s5834_s30 }
 0x576   :  { %2724 = vst.msk [vmem:[%s9723_s8 + $0xb0] sm:$0xff] %vm1792_vm2, %v2692_v42  ;;  %v2433_v29 = vpop.f32.mrf.mxu2  ;;  %v8433_v42 = vld [vmem:[#allocation2 + $0x109] sm:$0xff] }
 0x577   :  { %v2434_v9 = vadd.f32 %v8019_v47, %v2433_v29 }
 0x578   :  { %v3036_v33 = vpop.f32.mrf.mxu0 }
 0x579   :  { %v3037_v36 = vadd.f32 %v3036_v33, %v7889_v16  ;;  %v2483_v24 = vmax.f32 %v2434_v9, 0.0  ;;  %v8439_v33 = vld [vmem:[#allocation2 + $0x129] sm:$0xff]  ;;  %v8441_v9 = vpop.permute.xlu0 %3437 }
 0x57b   :  { %v3074_v51 = vmax.f32 %v3037_v36, 0.0  ;;  %v2693_v40 = vadd.f32 %v2643_v59, %v2483_v24  ;;  %v2658_v0 = vpop.f32.mrf.mxu3  ;;  %v8401_v61 = vpop.permute.xlu2 %3447 }
 0x57c   :  { %v3171_v32 = vld [vmem:[#allocation2 + $0x1e8] sm:$0xff]  ;;  %v8445_v36 = vpop.permute.xlu1 %3445 }
 0x57d   :  { %3106 = vst.msk [vmem:[#allocation2 + $0x1f0] sm:$0xff] %vm29_vm0, %v3074_v51  ;;  %3489 = vrot.lane.b32.xlu2 %v3171_v32, %s5834_s30  ;;  %3557 = vrot.lane.b32.xlu1 %v3173_v12, %s5835_s10 }
 0x57e   :  { %2725 = vst.msk [vmem:[%s9723_s8 + $0xb8] sm:$0xff] %vm1792_vm2, %v2693_v40  ;;  %v2436_v3 = vpop.f32.mrf.mxu2 }
 0x57f   :  { %v2437_v45 = vadd.f32 %v8019_v47, %v2436_v3  ;;  %v8456_v3 = vld [vmem:[#allocation2 + $0x131] sm:$0xff] }
 0x581   :  { %v2484_v14 = vmax.f32 %v2437_v45, 0.0 }
 0x583   :  { %v2694_v2 = vadd.f32 %v2646_v46, %v2484_v14  ;;  %v2661_v6 = vpop.f32.mrf.mxu3  ;;  %v8424_v55 = vpop.permute.xlu2 %3453  ;;  %v8431_v46 = vld [vmem:[#allocation2 + $0xe9] sm:$0xff] }
 0x584   :  { %v3172_v15 = vld [vmem:[#allocation2 + $0x1f0] sm:$0xff]  ;;  %10044 = vst [vmem:[#allocation6_spill] sm:$0xff] %v8424_v55  ;;  %v8464_v14 = vpop.permute.xlu0 %3443 }
 0x585   :  { %3491 = vrot.lane.b32.xlu0 %v3172_v15, %s5834_s30  ;;  %3559 = vrot.lane.b32.xlu2 %v3174_v34, %s5835_s10  ;;  %2726 = vst.msk [vmem:[%s9723_s8 + $0xc0] sm:$0xff] %vm1792_vm2, %v2694_v2  ;;  %v8462_v34 = vld [vmem:[#allocation2 + $0x151] sm:$0xff]  ;;  %v8468_v15 = vpop.permute.xlu1 %3451 }
 0x586   :  { %3563 = vrot.lane.b32.xlu1 %v8340_v35, %s5835_s10  ;;  %v2439_v25 = vpop.f32.mrf.mxu2 }
 0x587   :  { %v2440_v19 = vadd.f32 %v8019_v47, %v2439_v25 }
 0x589   :  { %v2485_v10 = vmax.f32 %v2440_v19, 0.0 }
 0x58b   :  { %v2695_v37 = vadd.f32 %v2649_v11, %v2485_v10  ;;  %v8447_v12 = vpop.permute.xlu2 %3459  ;;  %v2664_v51 = vpop.f32.mrf.mxu3  ;;  %v8454_v11 = vld [vmem:[#allocation2 + $0x111] sm:$0xff] }
 0x58c   :  { %10045 = vst [vmem:[#allocation4_spill] sm:$0xff] %v8447_v12  ;;  %v3109_v12 = vld [vmem:[#allocation2 + $0x7] sm:$0xff] }
 0x58d   :  { %3561 = vrot.lane.b32.xlu0 %v8349_v22, %s5835_s10  ;;  %3565 = vrot.lane.b32.xlu2 %v8351_v60, %s5835_s10  ;;  %2727 = vst.msk [vmem:[%s9723_s8 + $0xc8] sm:$0xff] %vm1792_vm2, %v2695_v37  ;;  %v8477_v37 = vld [vmem:[#allocation2 + $0x149] sm:$0xff] }
 0x58e   :  { %3569 = vrot.lane.b32.xlu1 %v8357_v57, %s5835_s10  ;;  %v2442_v23 = vpop.f32.mrf.mxu2 }
 0x58f   :  { %v2443_v58 = vadd.f32 %v8019_v47, %v2442_v23  ;;  %v3195_v23 = vld [vmem:[#allocation2 + $0x169] sm:$0xff] }
 0x591   :  { %v2486_v38 = vmax.f32 %v2443_v58, 0.0 }
 0x593   :  { %v2696_v13 = vadd.f32 %v2652_v53, %v2486_v38  ;;  %v8470_v2 = vpop.permute.xlu2 %3465  ;;  %v2667_v19 = vpop.f32.mrf.mxu3 }
 0x594   :  { %10046 = vst [vmem:[#allocation13_spill] sm:$0xff] %v8470_v2  ;;  %v8482_v38 = vpop.permute.xlu0 %3449 }
 0x595   :  { %3567 = vrot.lane.b32.xlu0 %v8368_v1, %s5835_s10  ;;  %3571 = vrot.lane.b32.xlu2 %v8370_v56, %s5835_s10  ;;  %2728 = vst.msk [vmem:[%s9723_s8 + $0xd0] sm:$0xff] %vm1792_vm2, %v2696_v13  ;;  %v8485_v13 = vpop.permute.xlu1 %3457 }
 0x596   :  { %3575 = vrot.lane.b32.xlu1 %v8376_v39, %s5835_s10  ;;  %v2445_v5 = vpop.f32.mrf.mxu2  ;;  %10047 = vst [vmem:[#allocation18_spill] sm:$0xff] %v8485_v13 }
 0x597   :  { %v2446_v28 = vadd.f32 %v8019_v47, %v2445_v5 }
 0x599   :  { %v2487_v8 = vmax.f32 %v2446_v28, 0.0  ;;  %v3198_v28 = vld [vmem:[#allocation2 + $0x191] sm:$0xff] }
 0x59b   :  { %v2697_v27 = vadd.f32 %v2655_v7, %v2487_v8  ;;  %v3197_v7 = vld [vmem:[#allocation2 + $0x189] sm:$0xff]  ;;  %v8487_v5 = vpop.permute.xlu2 %3471  ;;  %v3200_v8 = vld [vmem:[#allocation2 + $0x1b1] sm:$0xff] }
 0x59c   :  { %10048 = vst [vmem:[#allocation3_spill] sm:$0xff] %v8487_v5  ;;  %v3337_v5 = vld [vmem:[#allocation2 + $0x88] sm:$0xff] }
 0x59d   :  { %3573 = vrot.lane.b32.xlu0 %v8387_v26, %s5835_s10  ;;  %3577 = vrot.lane.b32.xlu2 %v8389_v4, %s5835_s10  ;;  %2729 = vst.msk [vmem:[%s9723_s8 + $0xd8] sm:$0xff] %vm1792_vm2, %v2697_v27  ;;  %v8498_v27 = vpop.permute.xlu1 %3463 }
 0x59e   :  { %3581 = vrot.lane.b32.xlu1 %v8395_v17, %s5835_s10  ;;  %v2448_v18 = vpop.f32.mrf.mxu2  ;;  %10050 = vst [vmem:[#allocation15_spill] sm:$0xff] %v8498_v27 }
 0x59f   :  { %v2449_v30 = vadd.f32 %v8019_v47, %v2448_v18 }
 0x5a1   :  { %v2488_v59 = vmax.f32 %v2449_v30, 0.0  ;;  %v3199_v30 = vld [vmem:[#allocation2 + $0x1a9] sm:$0xff] }
 0x5a3   :  { %v2698_v21 = vadd.f32 %v2658_v0, %v2488_v59  ;;  %v8495_v0 = vpop.permute.xlu0 %3455  ;;  %v3201_v59 = vld [vmem:[#allocation2 + $0x1c9] sm:$0xff] }
 0x5a4   :  { %10049 = vst [vmem:[#allocation7_spill] sm:$0xff] %v8495_v0 }
 0x5a5   :  { %3579 = vrot.lane.b32.xlu0 %v8410_v44, %s5835_s10  ;;  %3583 = vrot.lane.b32.xlu2 %v8412_v31, %s5835_s10  ;;  %2730 = vst.msk [vmem:[%s9723_s8 + $0xe0] sm:$0xff] %vm1792_vm2, %v2698_v21  ;;  %v3203_v21 = vld [vmem:[#allocation2 + $0x1e9] sm:$0xff] }
 0x5a6   :  { %3587 = vrot.lane.b32.xlu1 %v8418_v41, %s5835_s10  ;;  %v2451_v52 = vpop.f32.mrf.mxu2 }
 0x5a7   :  { %v2452_v50 = vadd.f32 %v8019_v47, %v2451_v52  ;;  %v8500_v18 = vpop.permute.xlu2 %3477  ;;  %v8507_v52 = vpop.permute.xlu1 %3469 }
 0x5a8   :  { %10051 = vst [vmem:[#allocation10_spill] sm:$0xff] %v8500_v18 }
 0x5a9   :  { %v2489_v54 = vmax.f32 %v2452_v50, 0.0  ;;  %10053 = vst [vmem:[#allocation19_spill] sm:$0xff] %v8507_v52 }
 0x5ab   :  { %v2699_v29 = vadd.f32 %v2661_v6, %v2489_v54  ;;  %v8504_v6 = vpop.permute.xlu0 %3461  ;;  %v3202_v54 = vld [vmem:[#allocation2 + $0x1d1] sm:$0xff] }
 0x5ac   :  { %10052 = vst [vmem:[#allocation8_spill] sm:$0xff] %v8504_v6 }
 0x5ad   :  { %3585 = vrot.lane.b32.xlu0 %v8431_v46, %s5835_s10  ;;  %3589 = vrot.lane.b32.xlu2 %v8433_v42, %s5835_s10  ;;  %2731 = vst.msk [vmem:[%s9723_s8 + $0xe8] sm:$0xff] %vm1792_vm2, %v2699_v29  ;;  %v3204_v29 = vld [vmem:[#allocation2 + $0x1f1] sm:$0xff] }
 0x5ae   :  { %3593 = vrot.lane.b32.xlu1 %v8439_v33, %s5835_s10  ;;  %v2454_v24 = vpop.f32.mrf.mxu2 }
 0x5af   :  { %v2455_v32 = vadd.f32 %v8019_v47, %v2454_v24  ;;  %v8511_v24 = vld [vmem:[#allocation2 + $0x2f] sm:$0xff] }
 0x5b1   :  { %v2490_v40 = vmax.f32 %v2455_v32, 0.0 }
 0x5b3   :  { %v2700_v45 = vadd.f32 %v2664_v51, %v2490_v40  ;;  %v8515_v51 = vpop.permute.xlu0 %3467 }
 0x5b4   :  { %10055 = vst [vmem:[#allocation22_spill] sm:$0xff] %v8515_v51 }
 0x5b5   :  { %3591 = vrot.lane.b32.xlu0 %v8454_v11, %s5835_s10  ;;  %3595 = vrot.lane.b32.xlu2 %v8456_v3, %s5835_s10  ;;  %2732 = vst.msk [vmem:[%s9723_s8 + $0xf0] sm:$0xff] %vm1792_vm2, %v2700_v45  ;;  %v8523_v45 = vld [vmem:[#allocation2 + $0x27] sm:$0xff] }
 0x5b6   :  { %3599 = vrot.lane.b32.xlu1 %v8462_v34, %s5835_s10  ;;  %v2457_v25 = vpop.f32.mrf.mxu2 }
 0x5b7   :  { %v2458_v53 = vadd.f32 %v8019_v47, %v2457_v25  ;;  %v3196_v47 = vld [vmem:[#allocation2 + $0x171] sm:$0xff]  ;;  %v8519_v32 = vpop.permute.xlu1 %3475  ;;  %v8525_v25 = vld [vmem:[#allocation2 + $0x47] sm:$0xff] }
 0x5b8   :  { %10056 = vst [vmem:[#allocation21_spill] sm:$0xff] %v8519_v32 }
 0x5b9   :  { %v2491_v10 = vmax.f32 %v2458_v53, 0.0  ;;  %v3237_v53 = vld [vmem:[#allocation2 + $0x28] sm:$0xff] }
 0x5bb   :  { %v2701_v58 = vadd.f32 %v2667_v19, %v2491_v10  ;;  %v8531_v19 = vpop.permute.xlu0 %3473 }
 0x5bc   :  { %10058 = vst [vmem:[#allocation17_spill] sm:$0xff] %v8531_v19 }
 0x5bd   :  { %3597 = vrot.lane.b32.xlu0 %v8477_v37, %s5835_s10  ;;  %3601 = vrot.lane.b32.xlu2 %v3195_v23, %s5835_s10  ;;  %2733 = vst.msk [vmem:[%s9723_s8 + $0xf8] sm:$0xff] %vm1792_vm2, %v2701_v58  ;;  %v8538_v58 = vld [vmem:[#allocation2 + $0x4f] sm:$0xff] }
 0x5be   :  { %3605 = vrot.lane.b32.xlu1 %v3197_v7, %s5835_s10  ;;  %v3333_v7 = vld [vmem:[#allocation2 + $0x48] sm:$0xff] }
 0x5bf   :  { %v8509_v50 = vpop.permute.xlu2 %3483 }
 0x5c0   :  { %10054 = vst [vmem:[#allocation5_spill] sm:$0xff] %v8509_v50 }
 0x5c5   :  { %3603 = vrot.lane.b32.xlu0 %v3196_v47, %s5835_s10  ;;  %3607 = vrot.lane.b32.xlu2 %v3198_v28, %s5835_s10 }
 0x5c6   :  { %3611 = vrot.lane.b32.xlu1 %v3200_v8, %s5835_s10 }
 0x5c7   :  { %v8544_v47 = vpop.permute.xlu0 %3479 }
 0x5c8   :  { %10060 = vst [vmem:[#allocation14_spill] sm:$0xff] %v8544_v47  ;;  %v3335_v47 = vld [vmem:[#allocation2 + $0x68] sm:$0xff] }
 0x5cd   :  { %3609 = vrot.lane.b32.xlu0 %v3199_v30, %s5835_s10  ;;  %3613 = vrot.lane.b32.xlu2 %v3201_v59, %s5835_s10 }
 0x5ce   :  { %3617 = vrot.lane.b32.xlu1 %v3203_v21, %s5835_s10  ;;  %v3238_v21 = vld [vmem:[#allocation2 + $0x30] sm:$0xff] }
 0x5cf   :  { %v8534_v10 = vpop.permute.xlu1 %3481 }
 0x5d0   :  { %10059 = vst [vmem:[#allocation12_spill] sm:$0xff] %v8534_v10 }
 0x5d5   :  { %3615 = vrot.lane.b32.xlu0 %v3202_v54, %s5835_s10  ;;  %3619 = vrot.lane.b32.xlu2 %v3204_v29, %s5835_s10  ;;  %v3039_v54 = vpop.f32.mrf.mxu0 }
 0x5d6   :  { %3687 = vrot.lane.b32.xlu1 %v8511_v24, %s5837_s14 }
 0x5d7   :  { %v8521_v40 = vpop.permute.xlu2 %3489 }
 0x5d8   :  { %10057 = vst [vmem:[#allocation16_spill] sm:$0xff] %v8521_v40 }
 0x5dd   :  { %3685 = vrot.lane.b32.xlu0 %v8523_v45, %s5837_s14  ;;  %3689 = vrot.lane.b32.xlu2 %v8525_v25, %s5837_s14  ;;  %v3042_v50 = vpop.f32.mrf.mxu0 }
 0x5de   :  { %3813 = vrot.lane.b32.xlu1 %v3237_v53, %s5836_s13 }
 0x5df   :  { %v8536_v23 = vpop.permute.xlu2 %3559  ;;  %v8555_v30 = vpop.permute.xlu0 %3485 }
 0x5e0   :  { %10062 = vst [vmem:[#allocation27_spill] sm:$0xff] %v8555_v30  ;;  %v3334_v30 = vld [vmem:[#allocation2 + $0x50] sm:$0xff] }
 0x5e5   :  { %3691 = vrot.lane.b32.xlu0 %v8538_v58, %s5837_s14  ;;  %3941 = vrot.lane.b32.xlu2 %v8349_v22, %s5838_s15 }
 0x5e6   :  { %4197 = vrot.lane.b32.xlu1 %v3333_v7, %s5840_s19 }
 0x5e7   :  { %v8547_v28 = vpop.permute.xlu2 %3565  ;;  %v8549_v8 = vpop.permute.xlu1 %3487 }
 0x5e8   :  { %10061 = vst [vmem:[#allocation28_spill] sm:$0xff] %v8549_v8 }
 0x5ed   :  { %4069 = vrot.lane.b32.xlu0 %v8525_v25, %s5839_s16  ;;  %4325 = vrot.lane.b32.xlu2 %v8351_v60, %s5841_s26 }
 0x5ee   :  { %3943 = vrot.lane.b32.xlu1 %v8340_v35, %s5838_s15  ;;  %v3040_v35 = vadd.f32 %v3039_v54, %v7889_v16  ;;  %v3043_v54 = vadd.f32 %v3042_v50, %v7889_v16  ;;  %v3336_v16 = vld [vmem:[#allocation2 + $0x70] sm:$0xff] }
 0x5ef   :  { %v8559_v22 = vpop.permute.xlu2 %3571  ;;  %v8561_v59 = vpop.permute.xlu1 %3557 }
 0x5f0   :  { %v3075_v8 = vmax.f32 %v3040_v35, 0.0 }
 0x5f2   :  { %3107 = vst.msk [vmem:[#allocation2 + $0x208] sm:$0xff] %vm29_vm0, %v3075_v8  ;;  %v3076_v8 = vmax.f32 %v3043_v54, 0.0  ;;  %v8611_v54 = vld [vmem:[#allocation2 + $0x6f] sm:$0xff] }
 0x5f4   :  { %3108 = vst.msk [vmem:[#allocation2 + $0x210] sm:$0xff] %vm29_vm0, %v3076_v8 }
 0x5f5   :  { %3815 = vrot.lane.b32.xlu0 %v3238_v21, %s5836_s13  ;;  %4071 = vrot.lane.b32.xlu2 %v8538_v58, %s5839_s16  ;;  %v8576_v21 = vld [vmem:[#allocation2 + $0x67] sm:$0xff] }
 0x5f6   :  { %4327 = vrot.lane.b32.xlu1 %v8368_v1, %s5841_s26 }
 0x5f7   :  { %v8568_v29 = vpop.permute.xlu2 %3577  ;;  %v8570_v53 = vpop.permute.xlu0 %3491 }
 0x5f8   :  { %10063 = vst [vmem:[#allocation9_spill] sm:$0xff] %v8570_v53  ;;  %v8573_v40 = vpop.permute.xlu1 %3563 }
 0x5fd   :  { %4199 = vrot.lane.b32.xlu0 %v3334_v30, %s5840_s19  ;;  %3817 = vrot.lane.b32.xlu2 %v3333_v7, %s5836_s13 }
 0x5fe   :  { %4073 = vrot.lane.b32.xlu1 %v8576_v21, %s5839_s16 }
 0x5ff   :  { %v8582_v10 = vpop.permute.xlu2 %3583  ;;  %v8584_v53 = vpop.permute.xlu0 %3561 }
 0x600   :  { %10064 = vst [vmem:[#allocation25_spill] sm:$0xff] %v8582_v10  ;;  %v8587_v35 = vpop.permute.xlu1 %3569 }
 0x605   :  { %3945 = vrot.lane.b32.xlu0 %v8351_v60, %s5838_s15  ;;  %4201 = vrot.lane.b32.xlu2 %v3335_v47, %s5840_s19 }
 0x606   :  { %3819 = vrot.lane.b32.xlu1 %v3334_v30, %s5836_s13 }
 0x607   :  { %v8594_v7 = vpop.permute.xlu2 %3589  ;;  %v8596_v18 = vpop.permute.xlu0 %3567 }
 0x608   :  { %10065 = vst [vmem:[#allocation30_spill] sm:$0xff] %v8594_v7  ;;  %v8598_v32 = vpop.permute.xlu1 %3575  ;;  %v4678_v7 = vld [vmem:[%s9718_s3 + $0x8] sm:$0xff] }
 0x60d   :  { %4329 = vrot.lane.b32.xlu0 %v8357_v57, %s5841_s26  ;;  %3947 = vrot.lane.b32.xlu2 %v8368_v1, %s5838_s15 }
 0x60e   :  { %4203 = vrot.lane.b32.xlu1 %v3336_v16, %s5840_s19 }
 0x60f   :  { %v8605_v60 = vpop.permute.xlu2 %3595  ;;  %v8607_v50 = vpop.permute.xlu0 %3573 }
 0x610   :  { %10066 = vst [vmem:[#allocation24_spill] sm:$0xff] %v8605_v60  ;;  %v8609_v30 = vpop.permute.xlu1 %3581 }
 0x611   :  { %10067 = vst [vmem:[#allocation20_spill] sm:$0xff] %v8609_v30 }
 0x615   :  { %4075 = vrot.lane.b32.xlu0 %v8611_v54, %s5839_s16  ;;  %4331 = vrot.lane.b32.xlu2 %v8370_v56, %s5841_s26 }
 0x616   :  { %3821 = vrot.lane.b32.xlu1 %v3335_v47, %s5836_s13 }
 0x617   :  { %v8618_v1 = vpop.permute.xlu2 %3601  ;;  %v8620_v8 = vpop.permute.xlu0 %3579 }
 0x618   :  { %10068 = vst [vmem:[#allocation40_spill] sm:$0xff] %v8618_v1  ;;  %v8622_v19 = vpop.permute.xlu1 %3587  ;;  %v8635_v1 = vld [vmem:[#allocation2 + $0x87] sm:$0xff] }
 0x619   :  { %10069 = vst [vmem:[#allocation11_spill] sm:$0xff] %v8620_v8 }
 0x61a   :  { %10070 = vst [vmem:[#allocation37_spill] sm:$0xff] %v8622_v19 }
 0x61d   :  { %3693 = vrot.lane.b32.xlu0 %v8576_v21, %s5837_s14  ;;  %3949 = vrot.lane.b32.xlu2 %v8357_v57, %s5838_s15 }
 0x61e   :  { %4205 = vrot.lane.b32.xlu1 %v3337_v5, %s5840_s19 }
 0x61f   :  { %v8629_v52 = vpop.permute.xlu2 %3607  ;;  %v8631_v60 = vpop.permute.xlu0 %3585 }
 0x620   :  { %10071 = vst [vmem:[#allocation36_spill] sm:$0xff] %v8629_v52  ;;  %v8633_v47 = vpop.permute.xlu1 %3593  ;;  %v3338_v52 = vld [vmem:[#allocation2 + $0x90] sm:$0xff] }
 0x621   :  { %10072 = vst [vmem:[#allocation26_spill] sm:$0xff] %v8631_v60  ;;  %v8722_v60 = vld [vmem:[#allocation2 + $0xaf] sm:$0xff] }
 0x622   :  { %10073 = vst [vmem:[#allocation31_spill] sm:$0xff] %v8633_v47 }
 0x625   :  { %4077 = vrot.lane.b32.xlu0 %v8635_v1, %s5839_s16  ;;  %4333 = vrot.lane.b32.xlu2 %v8387_v26, %s5841_s26 }
 0x626   :  { %3823 = vrot.lane.b32.xlu1 %v3336_v16, %s5836_s13 }
 0x627   :  { %v8642_v57 = vpop.permute.xlu2 %3613  ;;  %v8644_v51 = vpop.permute.xlu0 %3591 }
 0x628   :  { %10074 = vst [vmem:[#allocation33_spill] sm:$0xff] %v8642_v57  ;;  %v8646_v2 = vpop.permute.xlu1 %3599  ;;  %v4685_v57 = vld [vmem:[%s9718_s3 + $0x40] sm:$0xff] }
 0x629   :  { %10075 = vst [vmem:[#allocation29_spill] sm:$0xff] %v8644_v51  ;;  %4793 = vmatpush.msrb.mxu2 %v4685_v57  ;;  %v8665_v51 = vld [vmem:[#allocation2 + $0x8f] sm:$0xff] }
 0x62a   :  { %10076 = vst [vmem:[#allocation43_spill] sm:$0xff] %v8646_v2  ;;  %v4684_v2 = vld [vmem:[%s9718_s3 + $0x38] sm:$0xff] }
 0x62b   :  { %4794 = vmatpush.msrb.mxu2 %v4684_v2  ;;  %v4682_v2 = vld [vmem:[%s9718_s3 + $0x28] sm:$0xff] }
 0x62d   :  { %3695 = vrot.lane.b32.xlu0 %v8611_v54, %s5837_s14  ;;  %3951 = vrot.lane.b32.xlu2 %v8370_v56, %s5838_s15  ;;  %v4683_v56 = vld [vmem:[%s9718_s3 + $0x30] sm:$0xff] }
 0x62e   :  { %4207 = vrot.lane.b32.xlu1 %v3338_v52, %s5840_s19  ;;  %4795 = vmatpush.msrb.mxu2 %v4683_v56  ;;  %v3339_v56 = vld [vmem:[#allocation2 + $0xa8] sm:$0xff] }
 0x62f   :  { %v8653_v47 = vpop.permute.xlu2 %3619  ;;  %v8655_v27 = vpop.permute.xlu0 %3597 }
 0x630   :  { %10077 = vst [vmem:[#allocation48_spill] sm:$0xff] %v8653_v47  ;;  %v8657_v16 = vpop.permute.xlu1 %3605  ;;  %4796 = vmatpush.msrb.mxu2 %v4682_v2 }
 0x631   :  { %10078 = vst [vmem:[#allocation23_spill] sm:$0xff] %v8655_v27  ;;  %v4681_v27 = vld [vmem:[%s9718_s3 + $0x20] sm:$0xff] }
 0x632   :  { %10079 = vst [vmem:[#allocation34_spill] sm:$0xff] %v8657_v16  ;;  %4797 = vmatpush.msrb.mxu2 %v4681_v27 }
 0x635   :  { %4079 = vrot.lane.b32.xlu0 %v8665_v51, %s5839_s16  ;;  %4335 = vrot.lane.b32.xlu2 %v8376_v39, %s5841_s26 }
 0x636   :  { %3825 = vrot.lane.b32.xlu1 %v3337_v5, %s5836_s13  ;;  %v4680_v5 = vld [vmem:[%s9718_s3 + $0x18] sm:$0xff] }
 0x637   :  { %v8675_v47 = vpop.permute.xlu2 %3689  ;;  %v8677_v16 = vpop.permute.xlu0 %3603  ;;  %4798 = vmatpush.msrb.mxu2 %v4680_v5  ;;  %v8708_v5 = vld [vmem:[#allocation2 + $0xa7] sm:$0xff] }
 0x638   :  { %10080 = vst [vmem:[#allocation45_spill] sm:$0xff] %v8677_v16  ;;  %v8679_v57 = vpop.permute.xlu1 %3611 }
 0x639   :  { %10081 = vst [vmem:[#allocation39_spill] sm:$0xff] %v8679_v57  ;;  %v4679_v57 = vld [vmem:[%s9718_s3 + $0x10] sm:$0xff] }
 0x63a   :  { %4799 = vmatpush.msrb.mxu2 %v4679_v57 }
 0x63c   :  { %4800 = vmatpush.msrb.mxu2 %v4678_v7  ;;  %v3340_v7 = vld [vmem:[#allocation2 + $0xb0] sm:$0xff] }
 0x63d   :  { %3697 = vrot.lane.b32.xlu0 %v8635_v1, %s5837_s14  ;;  %3953 = vrot.lane.b32.xlu2 %v8387_v26, %s5838_s15  ;;  %v4677_v26 = vld [vmem:[%s9718_s3] sm:$0xff] }
 0x63e   :  { %4209 = vrot.lane.b32.xlu1 %v3339_v56, %s5840_s19  ;;  %4801 = vmatpush.msrb.mxu2 %v4677_v26 }
 0x63f   :  { %v3942_v2 = vpop.permute.xlu2 %3941  ;;  %v8698_v27 = vpop.permute.xlu0 %3609 }
 0x640   :  { %10082 = vst [vmem:[#allocation35_spill] sm:$0xff] %v8698_v27  ;;  %v8700_v16 = vpop.permute.xlu1 %3617 }
 0x641   :  { %10083 = vst [vmem:[#allocation49_spill] sm:$0xff] %v8700_v16 }
 0x645   :  { %4081 = vrot.lane.b32.xlu0 %v8708_v5, %s5839_s16  ;;  %4337 = vrot.lane.b32.xlu2 %v8389_v4, %s5841_s26 }
 0x646   :  { %3827 = vrot.lane.b32.xlu1 %v3338_v52, %s5836_s13 }
 0x647   :  { %v4326_v57 = vpop.permute.xlu2 %4325  ;;  %v8715_v16 = vpop.permute.xlu0 %3615 }
 0x648   :  { %10084 = vst [vmem:[#allocation32_spill] sm:$0xff] %v8715_v16  ;;  %v3688_v27 = vpop.permute.xlu1 %3687 }
 0x64d   :  { %3699 = vrot.lane.b32.xlu0 %v8665_v51, %s5837_s14  ;;  %3955 = vrot.lane.b32.xlu2 %v8376_v39, %s5838_s15  ;;  %v4421_v39 = vsel %vm29_vm0, %v3109_v12, %v8336_v43 }
 0x64e   :  { %4211 = vrot.lane.b32.xlu1 %v3340_v7, %s5840_s19  ;;  %v4453_v13 = vsel %vm1792_vm2, %v4421_v39, %v8561_v59 }
 0x64f   :  { %v4072_v26 = vpop.permute.xlu2 %4071  ;;  %v3686_v6 = vpop.permute.xlu0 %3685 }
 0x650   :  { %v3814_v19 = vpop.permute.xlu1 %3813  ;;  %v4485_v0 = vsel %vm1825_vm3, %v4453_v13, %v3686_v6  ;;  %v3110_v6 = vld [vmem:[#allocation2 + $0xf] sm:$0xff] }
 0x651   :  { %v4517_v30 = vsel %vm1858_vm4, %v4485_v0, %v3814_v19  ;;  %v8747_v19 = vld [vmem:[#allocation2 + $0xc7] sm:$0xff] }
 0x652   :  { %v4549_v12 = vsel %vm1891_vm5, %v4517_v30, %v3942_v2 }
 0x655   :  { %4083 = vrot.lane.b32.xlu0 %v8722_v60, %s5839_s16  ;;  %4339 = vrot.lane.b32.xlu2 %v8410_v44, %s5841_s26 }
 0x656   :  { %3829 = vrot.lane.b32.xlu1 %v3339_v56, %s5836_s13  ;;  %v3341_v56 = vld [vmem:[#allocation2 + $0xc8] sm:$0xff] }
 0x657   :  { %v3818_v52 = vpop.permute.xlu2 %3817  ;;  %v8731_v16 = vpop.permute.xlu0 %3691 }
 0x658   :  { %v4198_v10 = vpop.permute.xlu1 %4197 }
 0x65d   :  { %3701 = vrot.lane.b32.xlu0 %v8708_v5, %s5837_s14  ;;  %3957 = vrot.lane.b32.xlu2 %v8389_v4, %s5838_s15  ;;  %v4422_v4 = vsel %vm29_vm0, %v3110_v6, %v8408_v49  ;;  %v3342_v49 = vld [vmem:[#allocation2 + $0xd0] sm:$0xff] }
 0x65e   :  { %4213 = vrot.lane.b32.xlu1 %v3341_v56, %s5840_s19 }
 0x65f   :  { %v4202_v43 = vpop.permute.xlu2 %4201  ;;  %v4070_v55 = vpop.permute.xlu0 %4069 }
 0x660   :  { %v3944_v8 = vpop.permute.xlu1 %3943  ;;  %v4581_v59 = vsel %vm1924_vm6, %v4549_v12, %v4070_v55  ;;  %v4454_v55 = vsel %vm1792_vm2, %v4422_v4, %v8536_v23 }
 0x661   :  { %v4613_v13 = vsel %vm1957_vm8, %v4581_v59, %v4198_v10  ;;  %v4486_v2 = vsel %vm1825_vm3, %v4454_v55, %v3688_v27 }
 0x662   :  { %v4645_v0 = vsel %vm1990_vm7, %v4613_v13, %v4326_v57 }
 0x663   :  { %5584 = vmatmul.msk.f32.vlgmr.msrb.gmra.mxu2 %vm2036_vm9, %v4645_v0 }
 0x665   :  { %4085 = vrot.lane.b32.xlu0 %v8747_v19, %s5839_s16  ;;  %4341 = vrot.lane.b32.xlu2 %v8395_v17, %s5841_s26 }
 0x666   :  { %3831 = vrot.lane.b32.xlu1 %v3340_v7, %s5836_s13 }
 0x667   :  { %v3948_v10 = vpop.permute.xlu2 %3947  ;;  %v3816_v30 = vpop.permute.xlu0 %3815 }
 0x668   :  { %v4328_v57 = vpop.permute.xlu1 %4327  ;;  %v4518_v39 = vsel %vm1858_vm4, %v4486_v2, %v3816_v30 }
 0x669   :  { %v4550_v12 = vsel %vm1891_vm5, %v4518_v39, %v3944_v8  ;;  %v8770_v8 = vld [vmem:[#allocation2 + $0xcf] sm:$0xff] }
 0x66a   :  { %v4582_v23 = vsel %vm1924_vm6, %v4550_v12, %v4072_v26 }
 0x66d   :  { %3703 = vrot.lane.b32.xlu0 %v8722_v60, %s5837_s14  ;;  %3959 = vrot.lane.b32.xlu2 %v8410_v44, %s5838_s15  ;;  %v4423_v44 = vsel %vm29_vm0, %v8523_v45, %v8399_v62 }
 0x66e   :  { %4215 = vrot.lane.b32.xlu1 %v3342_v49, %s5840_s19  ;;  %v4455_v26 = vsel %vm1792_vm2, %v4423_v44, %v8584_v53  ;;  %v3343_v53 = vld [vmem:[#allocation2 + $0xe8] sm:$0xff] }
 0x66f   :  { %v4332_v7 = vpop.permute.xlu2 %4331  ;;  %v4200_v59 = vpop.permute.xlu0 %4199  ;;  %v4487_v6 = vsel %vm1825_vm3, %v4455_v26, %v8675_v47 }
 0x670   :  { %v4074_v13 = vpop.permute.xlu1 %4073  ;;  %v4614_v27 = vsel %vm1957_vm8, %v4582_v23, %v4200_v59  ;;  %v4519_v30 = vsel %vm1858_vm4, %v4487_v6, %v3818_v52  ;;  %v4424_v23 = vsel %vm29_vm0, %v8511_v24, %v8361_v20 }
 0x671   :  { %v4646_v0 = vsel %vm1990_vm7, %v4614_v27, %v4328_v57  ;;  %v3215_v57 = vld [vmem:[#allocation2 + $0xc7] sm:$0xff]  ;;  %v4456_v59 = vsel %vm1792_vm2, %v4424_v23, %v8573_v40 }
 0x672   :  { %5585 = vmatmul.msk.f32.gmra.mxu2 %vm2036_vm9, %v4646_v0 }
 0x675   :  { %4087 = vrot.lane.b32.xlu0 %v8770_v8, %s5839_s16  ;;  %4343 = vrot.lane.b32.xlu2 %v8412_v31, %s5841_s26 }
 0x676   :  { %3833 = vrot.lane.b32.xlu1 %v3341_v56, %s5836_s13 }
 0x677   :  { %v3950_v4 = vpop.permute.xlu2 %3949  ;;  %v3946_v55 = vpop.permute.xlu0 %3945 }
 0x678   :  { %v3820_v2 = vpop.permute.xlu1 %3819  ;;  %v4551_v62 = vsel %vm1891_vm5, %v4519_v30, %v3946_v55 }
 0x679   :  { %v4583_v45 = vsel %vm1924_vm6, %v4551_v62, %v4074_v13  ;;  %v8801_v13 = vld [vmem:[#allocation2 + $0xe7] sm:$0xff] }
 0x67a   :  { %v4615_v47 = vsel %vm1957_vm8, %v4583_v45, %v4202_v43 }
 0x67d   :  { %3705 = vrot.lane.b32.xlu0 %v3215_v57, %s5837_s14  ;;  %3961 = vrot.lane.b32.xlu2 %v8395_v17, %s5838_s15  ;;  %v4488_v17 = vsel %vm1825_vm3, %v4456_v59, %v8731_v16  ;;  %v8849_v59 = vld [vmem:[#allocation2 + $0x107] sm:$0xff] }
 0x67e   :  { %4217 = vrot.lane.b32.xlu1 %v3343_v53, %s5840_s19  ;;  %v4520_v43 = vsel %vm1858_vm4, %v4488_v17, %v3820_v2  ;;  %v8825_v2 = vld [vmem:[#allocation2 + $0xef] sm:$0xff] }
 0x67f   :  { %v4334_v56 = vpop.permute.xlu2 %4333  ;;  %v4330_v39 = vpop.permute.xlu0 %4329  ;;  %v4552_v24 = vsel %vm1891_vm5, %v4520_v43, %v3948_v10  ;;  %v4425_v10 = vsel %vm29_vm0, %v8525_v25, %v8441_v9 }
 0x680   :  { %v4204_v12 = vpop.permute.xlu1 %4203  ;;  %v4647_v52 = vsel %vm1990_vm7, %v4615_v47, %v4330_v39 }
 0x681   :  { %5586 = vmatmul.msk.f32.gmra.mxu2 %vm2036_vm9, %v4647_v52 }
 0x685   :  { %4089 = vrot.lane.b32.xlu0 %v8801_v13, %s5839_s16  ;;  %4345 = vrot.lane.b32.xlu2 %v8431_v46, %s5841_s26 }
 0x686   :  { %3835 = vrot.lane.b32.xlu1 %v3342_v49, %s5836_s13  ;;  %v3344_v49 = vld [vmem:[#allocation2 + $0xf0] sm:$0xff] }
 0x687   :  { %v3952_v20 = vpop.permute.xlu2 %3951  ;;  %v4076_v27 = vpop.permute.xlu0 %4075 }
 0x688   :  { %v3822_v40 = vpop.permute.xlu1 %3821  ;;  %v4584_v0 = vsel %vm1924_vm6, %v4552_v24, %v4076_v27 }
 0x689   :  { %v4616_v16 = vsel %vm1957_vm8, %v4584_v0, %v4204_v12  ;;  %v3346_v0 = vld [vmem:[#allocation2 + $0x110] sm:$0xff] }
 0x68a   :  { %v4648_v44 = vsel %vm1990_vm7, %v4616_v16, %v4332_v7  ;;  %v4457_v7 = vsel %vm1792_vm2, %v4425_v10, %v8547_v28 }
 0x68b   :  { %5587 = vmatmul.msk.f32.gmra.mxu2 %vm2036_vm9, %v4648_v44 }
 0x68d   :  { %3707 = vrot.lane.b32.xlu0 %v8770_v8, %s5837_s14  ;;  %3963 = vrot.lane.b32.xlu2 %v8412_v31, %s5838_s15 }
 0x68e   :  { %4219 = vrot.lane.b32.xlu1 %v3344_v49, %s5840_s19 }
 0x68f   :  { %v4336_v26 = vpop.permute.xlu2 %4335  ;;  %v3694_v6 = vpop.permute.xlu0 %3693 }
 0x690   :  { %v4206_v55 = vpop.permute.xlu1 %4205  ;;  %v4489_v30 = vsel %vm1825_vm3, %v4457_v7, %v3694_v6  ;;  %v8872_v6 = vld [vmem:[#allocation2 + $0x10f] sm:$0xff] }
 0x691   :  { %v4521_v62 = vsel %vm1858_vm4, %v4489_v30, %v3822_v40  ;;  %v3218_v40 = vld [vmem:[#allocation2 + $0xef] sm:$0xff] }
 0x692   :  { %v4553_v9 = vsel %vm1891_vm5, %v4521_v62, %v3950_v4  ;;  %v4426_v4 = vsel %vm29_vm0, %v8538_v58, %v8422_v48  ;;  %v4899_v62 = vld [vmem:[%s9720_s5] sm:$0xff] }
 0x693   :  { %5015 = vmatpush.msrb.mxu3 %v4899_v62 }
 0x695   :  { %4091 = vrot.lane.b32.xlu0 %v8825_v2, %s5839_s16  ;;  %4347 = vrot.lane.b32.xlu2 %v8418_v41, %s5841_s26 }
 0x696   :  { %3837 = vrot.lane.b32.xlu1 %v3343_v53, %s5836_s13  ;;  %v3345_v53 = vld [vmem:[#allocation2 + $0x108] sm:$0xff] }
 0x697   :  { %v3954_v31 = vpop.permute.xlu2 %3953  ;;  %v4078_v25 = vpop.permute.xlu0 %4077 }
 0x698   :  { %v3824_v28 = vpop.permute.xlu1 %3823  ;;  %v4585_v45 = vsel %vm1924_vm6, %v4553_v9, %v4078_v25  ;;  %v3219_v25 = vld [vmem:[#allocation2 + $0x107] sm:$0xff] }
 0x699   :  { %v4617_v57 = vsel %vm1957_vm8, %v4585_v45, %v4206_v55 }
 0x69a   :  { %v4649_v47 = vsel %vm1990_vm7, %v4617_v57, %v4334_v56  ;;  %v4458_v56 = vsel %vm1792_vm2, %v4426_v4, %v8596_v18 }
 0x69b   :  { %5588 = vmatmul.msk.f32.gmra.mxu2 %vm2036_vm9, %v4649_v47 }
 0x69d   :  { %3709 = vrot.lane.b32.xlu0 %v8801_v13, %s5837_s14  ;;  %3965 = vrot.lane.b32.xlu2 %v8431_v46, %s5838_s15 }
 0x69e   :  { %4221 = vrot.lane.b32.xlu1 %v3345_v53, %s5840_s19 }
 0x69f   :  { %v4338_v39 = vpop.permute.xlu2 %4337  ;;  %v3696_v12 = vpop.permute.xlu0 %3695 }
 0x6a0   :  { %v4208_v52 = vpop.permute.xlu1 %4207  ;;  %v4490_v23 = vsel %vm1825_vm3, %v4458_v56, %v3696_v12 }
 0x6a1   :  { %v4522_v17 = vsel %vm1858_vm4, %v4490_v23, %v3824_v28  ;;  %v4428_v28 = vsel %vm29_vm0, %v8611_v54, %v8464_v14 }
 0x6a2   :  { %v4554_v46 = vsel %vm1891_vm5, %v4522_v17, %v3952_v20  ;;  %v4427_v20 = vsel %vm29_vm0, %v8576_v21, %v8380_v63  ;;  %v4460_v47 = vsel %vm1792_vm2, %v4428_v28, %v8559_v22  ;;  %v5145_v17 = vld [vmem:[%s9721_s7] sm:$0xff] }
 0x6a3   :  { %5225 = vmatpush.msrb.mxu1 %v5145_v17 }
 0x6a5   :  { %4093 = vrot.lane.b32.xlu0 %v8849_v59, %s5839_s16  ;;  %4349 = vrot.lane.b32.xlu2 %v8433_v42, %s5841_s26 }
 0x6a6   :  { %3839 = vrot.lane.b32.xlu1 %v3344_v49, %s5836_s13  ;;  %v4459_v49 = vsel %vm1792_vm2, %v4427_v20, %v8587_v35 }
 0x6a7   :  { %v3956_v48 = vpop.permute.xlu2 %3955  ;;  %v4080_v58 = vpop.permute.xlu0 %4079 }
 0x6a8   :  { %v3826_v18 = vpop.permute.xlu1 %3825  ;;  %v4586_v43 = vsel %vm1924_vm6, %v4554_v46, %v4080_v58  ;;  %v3220_v46 = vld [vmem:[#allocation2 + $0x10f] sm:$0xff]  ;;  %v5799_v58 = vld [vmem:[%s9715_s0 + $0x100] sm:$0xff] }
 0x6a9   :  { %v4618_v24 = vsel %vm1957_vm8, %v4586_v43, %v4208_v52  ;;  %5648 = vmatmul.msk.f32.vlgmr.msrb.gmra.mxu1 %vm29_vm0, %v5799_v58 }
 0x6aa   :  { %v4650_v27 = vsel %vm1990_vm7, %v4618_v24, %v4336_v26 }
 0x6ab   :  { %5589 = vmatmul.msk.f32.gmra.mxu2 %vm2036_vm9, %v4650_v27 }
 0x6ad   :  { %3711 = vrot.lane.b32.xlu0 %v3218_v40, %s5837_s14  ;;  %3967 = vrot.lane.b32.xlu2 %v8418_v41, %s5838_s15 }
 0x6ae   :  { %4223 = vrot.lane.b32.xlu1 %v3346_v0, %s5840_s19 }
 0x6af   :  { %v4340_v16 = vpop.permute.xlu2 %4339  ;;  %v3698_v44 = vpop.permute.xlu0 %3697 }
 0x6b0   :  { %v4210_v10 = vpop.permute.xlu1 %4209  ;;  %v4491_v26 = vsel %vm1825_vm3, %v4459_v49, %v3698_v44 }
 0x6b1   :  { %v4523_v7 = vsel %vm1858_vm4, %v4491_v26, %v3826_v18  ;;  %v4429_v18 = vsel %vm29_vm0, %v8635_v1, %v8445_v36  ;;  %v5800_v36 = vld [vmem:[%s9715_s0 + $0x108] sm:$0xff] }
 0x6b2   :  { %v4555_v41 = vsel %vm1891_vm5, %v4523_v7, %v3954_v31  ;;  %v3347_v31 = vld [vmem:[#allocation2 + $0x128] sm:$0xff]  ;;  %5649 = vmatmul.msk.f32.gmra.mxu1 %vm29_vm0, %v5800_v36 }
 0x6b3   :  { %v3349_v7 = vld [vmem:[#allocation2 + $0x148] sm:$0xff] }
 0x6b5   :  { %4351 = vrot.lane.b32.xlu2 %v8454_v11, %s5841_s26  ;;  %4095 = vrot.lane.b32.xlu0 %v8872_v6, %s5839_s16 }
 0x6b6   :  { %3841 = vrot.lane.b32.xlu1 %v3345_v53, %s5836_s13 }
 0x6b7   :  { %v3958_v63 = vpop.permute.xlu2 %3957  ;;  %v4082_v21 = vpop.permute.xlu0 %4081 }
 0x6b8   :  { %v3828_v35 = vpop.permute.xlu1 %3827  ;;  %v4587_v55 = vsel %vm1924_vm6, %v4555_v41, %v4082_v21  ;;  %v4430_v41 = vsel %vm29_vm0, %v8665_v51, %v8401_v61  ;;  %v5802_v51 = vld [vmem:[%s9715_s0 + $0x118] sm:$0xff] }
 0x6b9   :  { %v4619_v30 = vsel %vm1957_vm8, %v4587_v55, %v4210_v10  ;;  %v4462_v55 = vsel %vm1792_vm2, %v4430_v41, %v8598_v32 }
 0x6ba   :  { %v4651_v9 = vsel %vm1990_vm7, %v4619_v30, %v4338_v39 }
 0x6bb   :  { %5590 = vmatmul.msk.f32.gmra.mxu2 %vm2036_vm9, %v4651_v9 }
 0x6bd   :  { %3969 = vrot.lane.b32.xlu2 %v8433_v42, %s5838_s15  ;;  %3713 = vrot.lane.b32.xlu0 %v3219_v25, %s5837_s14  ;;  %v3315_v42 = vld [vmem:[#allocation2 + $0x127] sm:$0xff] }
 0x6be   :  { %4225 = vrot.lane.b32.xlu1 %v3347_v31, %s5840_s19 }
 0x6bf   :  { %v4342_v45 = vpop.permute.xlu2 %4341  ;;  %v3700_v57 = vpop.permute.xlu0 %3699 }
 0x6c0   :  { %v4212_v53 = vpop.permute.xlu1 %4211  ;;  %v4492_v4 = vsel %vm1825_vm3, %v4460_v47, %v3700_v57 }
 0x6c1   :  { %v4524_v39 = vsel %vm1858_vm4, %v4492_v4, %v3828_v35 }
 0x6c2   :  { %v4556_v14 = vsel %vm1891_vm5, %v4524_v39, %v3956_v48  ;;  %v3348_v48 = vld [vmem:[#allocation2 + $0x130] sm:$0xff] }
 0x6c5   :  { %4353 = vrot.lane.b32.xlu2 %v8439_v33, %s5841_s26  ;;  %4097 = vrot.lane.b32.xlu0 %v3315_v42, %s5839_s16 }
 0x6c6   :  { %3843 = vrot.lane.b32.xlu1 %v3346_v0, %s5836_s13  ;;  %v8927_v0 = vld [vmem:[#allocation2 + $0x12f] sm:$0xff] }
 0x6c7   :  { %v8903_v12 = vpop.permute.xlu2 %3959  ;;  %v4084_v54 = vpop.permute.xlu0 %4083 }
 0x6c8   :  { %v3830_v56 = vpop.permute.xlu1 %3829  ;;  %v4588_v22 = vsel %vm1924_vm6, %v4556_v14, %v4084_v54  ;;  %v3350_v14 = vld [vmem:[#allocation2 + $0x150] sm:$0xff]  ;;  %v4431_v54 = vsel %vm29_vm0, %v8708_v5, %v8482_v38 }
 0x6c9   :  { %v4620_v52 = vsel %vm1957_vm8, %v4588_v22, %v4212_v53 }
 0x6ca   :  { %v4652_v23 = vsel %vm1990_vm7, %v4620_v52, %v4340_v16 }
 0x6cb   :  { %5591 = vmatmul.msk.f32.gmra.mxu2 %vm2036_vm9, %v4652_v23 }
 0x6cd   :  { %3971 = vrot.lane.b32.xlu2 %v8454_v11, %s5838_s15  ;;  %3715 = vrot.lane.b32.xlu0 %v3220_v46, %s5837_s14  ;;  %v4461_v11 = vsel %vm1792_vm2, %v4429_v18, %v8607_v50  ;;  %v3318_v46 = vld [vmem:[#allocation2 + $0x14f] sm:$0xff] }
 0x6ce   :  { %4227 = vrot.lane.b32.xlu1 %v3348_v48, %s5840_s19 }
 0x6cf   :  { %v4344_v43 = vpop.permute.xlu2 %4343  ;;  %v3702_v24 = vpop.permute.xlu0 %3701 }
 0x6d0   :  { %v4214_v27 = vpop.permute.xlu1 %4213  ;;  %v4493_v40 = vsel %vm1825_vm3, %v4461_v11, %v3702_v24 }
 0x6d1   :  { %v4525_v20 = vsel %vm1858_vm4, %v4493_v40, %v3830_v56  ;;  %v5805_v40 = vld [vmem:[%s9715_s0 + $0x130] sm:$0xff] }
 0x6d2   :  { %v4557_v1 = vsel %vm1891_vm5, %v4525_v20, %v3958_v63  ;;  %v5801_v63 = vld [vmem:[%s9715_s0 + $0x110] sm:$0xff]  ;;  %v4432_v20 = vsel %vm29_vm0, %v8722_v60, %v8468_v15  ;;  %v5806_v15 = vld [vmem:[%s9715_s0 + $0x138] sm:$0xff] }
 0x6d3   :  { %5650 = vmatmul.msk.f32.gmra.mxu1 %vm29_vm0, %v5801_v63 }
 0x6d5   :  { %4355 = vrot.lane.b32.xlu2 %v8456_v3, %s5841_s26  ;;  %4099 = vrot.lane.b32.xlu0 %v8927_v0, %s5839_s16 }
 0x6d6   :  { %3845 = vrot.lane.b32.xlu1 %v3347_v31, %s5836_s13  ;;  %v3317_v31 = vld [vmem:[#allocation2 + $0x147] sm:$0xff] }
 0x6d7   :  { %v8939_v50 = vpop.permute.xlu2 %3961  ;;  %v4086_v16 = vpop.permute.xlu0 %4085 }
 0x6d8   :  { %v3832_v44 = vpop.permute.xlu1 %3831  ;;  %v4589_v49 = vsel %vm1924_vm6, %v4557_v1, %v4086_v16  ;;  %v10085_v1 = vld [vmem:[#allocation11_spill] sm:$0xff] }
 0x6d9   :  { %v4621_v10 = vsel %vm1957_vm8, %v4589_v49, %v4214_v27  ;;  %v3351_v27 = vld [vmem:[#allocation2 + $0x168] sm:$0xff] }
 0x6da   :  { %v4653_v26 = vsel %vm1990_vm7, %v4621_v10, %v4342_v45 }
 0x6db   :  { %5592 = vmatmul.msk.f32.gmra.mxu2 %vm2036_vm9, %v4653_v26  ;;  %5651 = vmatmul.msk.f32.gmra.mxu1 %vm29_vm0, %v5802_v51  ;;  %v3383_v26 = vld [vmem:[#allocation2 + $0x169] sm:$0xff]  ;;  %v10086_v51 = vld [vmem:[#allocation6_spill] sm:$0xff] }
 0x6dd   :  { %3973 = vrot.lane.b32.xlu2 %v8439_v33, %s5838_s15  ;;  %3717 = vrot.lane.b32.xlu0 %v3315_v42, %s5837_s14  ;;  %v4686_v33 = vld [vmem:[%s9719_s4] sm:$0x1]  ;;  %v3222_v42 = vld [vmem:[#allocation2 + $0x12f] sm:$0xff] }
 0x6de   :  { %4229 = vrot.lane.b32.xlu1 %v3349_v7, %s5840_s19  ;;  %v8963_v9 = vperm.slane %v4686_v33, 0 }
 0x6df   :  { %v4346_v21 = vpop.permute.xlu2 %4345  ;;  %v3704_v35 = vpop.permute.xlu0 %3703 }
 0x6e0   :  { %v4216_v30 = vpop.permute.xlu1 %4215  ;;  %v4494_v62 = vsel %vm1825_vm3, %v4462_v55, %v3704_v35 }
 0x6e1   :  { %v4526_v25 = vsel %vm1858_vm4, %v4494_v62, %v3832_v44  ;;  %v3288_v62 = vld [vmem:[#allocation2 + $0x151] sm:$0xff] }
 0x6e2   :  { %v4558_v45 = vsel %vm1891_vm5, %v4526_v25, %v8903_v12  ;;  %v5803_v12 = vld [vmem:[%s9715_s0 + $0x120] sm:$0xff]  ;;  %v3352_v25 = vld [vmem:[#allocation2 + $0x170] sm:$0xff] }
 0x6e3   :  { %5652 = vmatmul.msk.f32.gmra.mxu1 %vm29_vm0, %v5803_v12  ;;  %v3320_v12 = vld [vmem:[#allocation2 + $0x16f] sm:$0xff] }
 0x6e5   :  { %4357 = vrot.lane.b32.xlu2 %v8477_v37, %s5841_s26  ;;  %4101 = vrot.lane.b32.xlu0 %v3317_v31, %s5839_s16 }
 0x6e6   :  { %3847 = vrot.lane.b32.xlu1 %v3348_v48, %s5836_s13  ;;  %v4803_v61 = vpop.f32.mrf.mxu2 }
 0x6e7   :  { %v4804_v32 = vadd.f32 %v4803_v61, %v8963_v9  ;;  %v8975_v28 = vpop.permute.xlu2 %3963  ;;  %v4088_v57 = vpop.permute.xlu0 %4087  ;;  %v5807_v61 = vld [vmem:[%s9715_s0 + $0x140] sm:$0xff] }
 0x6e8   :  { %v3834_v47 = vpop.permute.xlu1 %3833  ;;  %v4590_v53 = vsel %vm1924_vm6, %v4558_v45, %v4088_v57 }
 0x6e9   :  { %v4622_v4 = vsel %vm1957_vm8, %v4590_v53, %v4216_v30  ;;  %5616 = vmatmul.msk.f32.vlgmr.msrb.gmra.mxu3 %vm29_vm0, %v4804_v32  ;;  %v4433_v32 = vsel %vm29_vm0, %v8747_v19, %v10086_v51  ;;  %v5808_v19 = vld [vmem:[%s9715_s0 + $0x148] sm:$0xff] }
 0x6ea   :  { %v4654_v39 = vsel %vm1990_vm7, %v4622_v4, %v4344_v43 }
 0x6eb   :  { %5593 = vmatmul.msk.f32.gmra.mxu2 %vm2036_vm9, %v4654_v39 }
 0x6ed   :  { %3975 = vrot.lane.b32.xlu2 %v8456_v3, %s5838_s15  ;;  %3719 = vrot.lane.b32.xlu0 %v3222_v42, %s5837_s14  ;;  %v4463_v3 = vsel %vm1792_vm2, %v4431_v54, %v8568_v29  ;;  %v5804_v29 = vld [vmem:[%s9715_s0 + $0x128] sm:$0xff] }
 0x6ee   :  { %4231 = vrot.lane.b32.xlu1 %v3350_v14, %s5840_s19  ;;  %5653 = vmatmul.msk.f32.gmra.mxu1 %vm29_vm0, %v5804_v29  ;;  %v10088_v29 = vld [vmem:[#allocation7_spill] sm:$0xff] }
 0x6ef   :  { %v4348_v56 = vpop.permute.xlu2 %4347  ;;  %v3706_v22 = vpop.permute.xlu0 %3705 }
 0x6f0   :  { %v4218_v52 = vpop.permute.xlu1 %4217  ;;  %v4495_v23 = vsel %vm1825_vm3, %v4463_v3, %v3706_v22 }
 0x6f1   :  { %v4527_v17 = vsel %vm1858_vm4, %v4495_v23, %v3834_v47  ;;  %v10087_v47 = vld [vmem:[#allocation20_spill] sm:$0xff] }
 0x6f2   :  { %v4559_v58 = vsel %vm1891_vm5, %v4527_v17, %v8939_v50  ;;  %v4465_v53 = vsel %vm1792_vm2, %v4433_v32, %v10087_v47 }
 0x6f5   :  { %4359 = vrot.lane.b32.xlu2 %v8462_v34, %s5841_s26  ;;  %4103 = vrot.lane.b32.xlu0 %v3318_v46, %s5839_s16  ;;  %v4806_v48 = vpop.f32.mrf.mxu2 }
 0x6f6   :  { %3849 = vrot.lane.b32.xlu1 %v3349_v7, %s5836_s13  ;;  %v4807_v38 = vadd.f32 %v4806_v48, %v8963_v9  ;;  %5654 = vmatmul.msk.f32.gmra.mxu1 %vm29_vm0, %v5805_v40  ;;  %v3319_v7 = vld [vmem:[#allocation2 + $0x167] sm:$0xff] }
 0x6f7   :  { %v9008_v5 = vpop.permute.xlu2 %3965  ;;  %v4090_v18 = vpop.permute.xlu0 %4089 }
 0x6f8   :  { %v3836_v34 = vpop.permute.xlu1 %3835  ;;  %v4591_v43 = vsel %vm1924_vm6, %v4559_v58, %v4090_v18  ;;  %5617 = vmatmul.msk.f32.gmra.mxu3 %vm29_vm0, %v4807_v38  ;;  %v5809_v38 = vld [vmem:[%s9715_s0 + $0x150] sm:$0xff] }
 0x6f9   :  { %v4623_v24 = vsel %vm1957_vm8, %v4591_v43, %v4218_v52  ;;  %v10089_v43 = vld [vmem:[#allocation25_spill] sm:$0xff] }
 0x6fa   :  { %v4655_v11 = vsel %vm1990_vm7, %v4623_v24, %v4346_v21 }
 0x6fb   :  { %5594 = vmatmul.msk.f32.gmra.mxu2 %vm2036_vm9, %v4655_v11 }
 0x6fd   :  { %3977 = vrot.lane.b32.xlu2 %v8477_v37, %s5838_s15  ;;  %3721 = vrot.lane.b32.xlu0 %v3317_v31, %s5837_s14  ;;  %v4464_v37 = vsel %vm1792_vm2, %v4432_v20, %v10085_v1  ;;  %v3385_v20 = vld [vmem:[#allocation2 + $0x189] sm:$0xff] }
 0x6fe   :  { %4233 = vrot.lane.b32.xlu1 %v3351_v27, %s5840_s19  ;;  %5655 = vmatmul.msk.f32.gmra.mxu1 %vm29_vm0, %v5806_v15  ;;  %v10090_v15 = vld [vmem:[#allocation18_spill] sm:$0xff] }
 0x6ff   :  { %v4350_v36 = vpop.permute.xlu2 %4349  ;;  %v3708_v50 = vpop.permute.xlu0 %3707 }
 0x700   :  { %v4220_v16 = vpop.permute.xlu1 %4219  ;;  %v4496_v44 = vsel %vm1825_vm3, %v4464_v37, %v3708_v50 }
 0x701   :  { %v4528_v49 = vsel %vm1858_vm4, %v4496_v44, %v3836_v34 }
 0x702   :  { %v4560_v41 = vsel %vm1891_vm5, %v4528_v49, %v8975_v28 }
 0x704   :  { %v4809_v10 = vpop.f32.mrf.mxu2 }
 0x705   :  { %v4810_v63 = vadd.f32 %v4809_v10, %v8963_v9  ;;  %4361 = vrot.lane.b32.xlu2 %v3383_v26, %s5841_s26  ;;  %4105 = vrot.lane.b32.xlu0 %v3319_v7, %s5839_s16 }
 0x706   :  { %3851 = vrot.lane.b32.xlu1 %v3350_v14, %s5836_s13  ;;  %5656 = vmatmul.msk.f32.gmra.mxu1 %vm29_vm0, %v5807_v61  ;;  %v3384_v14 = vld [vmem:[#allocation2 + $0x171] sm:$0xff] }
 0x707   :  { %v9040_v60 = vpop.permute.xlu2 %3967  ;;  %v4092_v21 = vpop.permute.xlu0 %4091  ;;  %5618 = vmatmul.msk.f32.gmra.mxu3 %vm29_vm0, %v4810_v63  ;;  %v5811_v63 = vld [vmem:[%s9715_s0 + $0x160] sm:$0xff]  ;;  %v3322_v61 = vld [vmem:[#allocation2 + $0x18f] sm:$0xff] }
 0x708   :  { %v3838_v35 = vpop.permute.xlu1 %3837  ;;  %v4592_v33 = vsel %vm1924_vm6, %v4560_v41, %v4092_v21 }
 0x709   :  { %v4624_v55 = vsel %vm1957_vm8, %v4592_v33, %v4220_v16  ;;  %v10091_v33 = vld [vmem:[#allocation26_spill] sm:$0xff] }
 0x70a   :  { %v4656_v30 = vsel %vm1990_vm7, %v4624_v55, %v4348_v56 }
 0x70b   :  { %5595 = vmatmul.msk.f32.gmra.mxu2 %vm2036_vm9, %v4656_v30 }
 0x70d   :  { %3979 = vrot.lane.b32.xlu2 %v3288_v62, %s5838_s15  ;;  %3723 = vrot.lane.b32.xlu0 %v3318_v46, %s5837_s14  ;;  %v3353_v46 = vld [vmem:[#allocation2 + $0x188] sm:$0xff] }
 0x70e   :  { %4235 = vrot.lane.b32.xlu1 %v3352_v25, %s5840_s19  ;;  %v4812_v31 = vpop.f32.mrf.mxu2  ;;  %5657 = vmatmul.msk.f32.gmra.mxu1 %vm29_vm0, %v5808_v19 }
 0x70f   :  { %v4813_v28 = vadd.f32 %v4812_v31, %v8963_v9  ;;  %v4352_v45 = vpop.permute.xlu2 %4351  ;;  %v3710_v57 = vpop.permute.xlu0 %3709  ;;  %v3386_v31 = vld [vmem:[#allocation2 + $0x191] sm:$0xff] }
 0x710   :  { %v4222_v4 = vpop.permute.xlu1 %4221  ;;  %v4497_v39 = vsel %vm1825_vm3, %v4465_v53, %v3710_v57 }
 0x711   :  { %5619 = vmatmul.msk.f32.gmra.mxu3 %vm29_vm0, %v4813_v28  ;;  %v4529_v42 = vsel %vm1858_vm4, %v4497_v39, %v3838_v35 }
 0x712   :  { %v4561_v56 = vsel %vm1891_vm5, %v4529_v42, %v9008_v5  ;;  %v4434_v5 = vsel %vm29_vm0, %v8770_v8, %v10088_v29  ;;  %v5810_v8 = vld [vmem:[%s9715_s0 + $0x158] sm:$0xff]  ;;  %v5813_v42 = vld [vmem:[%s9715_s0 + $0x170] sm:$0xff] }
 0x713   :  { %v4466_v24 = vsel %vm1792_vm2, %v4434_v5, %v10089_v43 }
 0x715   :  { %4363 = vrot.lane.b32.xlu2 %v3384_v14, %s5841_s26  ;;  %4107 = vrot.lane.b32.xlu0 %v3320_v12, %s5839_s16 }
 0x716   :  { %3853 = vrot.lane.b32.xlu1 %v3351_v27, %s5836_s13  ;;  %5658 = vmatmul.msk.f32.gmra.mxu1 %vm29_vm0, %v5809_v38 }
 0x717   :  { %v9072_v54 = vpop.permute.xlu2 %3969  ;;  %v4094_v22 = vpop.permute.xlu0 %4093 }
 0x718   :  { %v3840_v3 = vpop.permute.xlu1 %3839  ;;  %v4593_v52 = vsel %vm1924_vm6, %v4561_v56, %v4094_v22  ;;  %v10093_v22 = vld [vmem:[#allocation37_spill] sm:$0xff] }
 0x719   :  { %v4625_v23 = vsel %vm1957_vm8, %v4593_v52, %v4222_v4  ;;  %v3355_v4 = vld [vmem:[#allocation2 + $0x1a8] sm:$0xff] }
 0x71a   :  { %v4657_v17 = vsel %vm1990_vm7, %v4625_v23, %v4350_v36  ;;  %v3321_v36 = vld [vmem:[#allocation2 + $0x187] sm:$0xff] }
 0x71b   :  { %5596 = vmatmul.msk.f32.gmra.mxu2 %vm2036_vm9, %v4657_v17 }
 0x71d   :  { %3981 = vrot.lane.b32.xlu2 %v3383_v26, %s5838_s15  ;;  %3725 = vrot.lane.b32.xlu0 %v3319_v7, %s5837_s14  ;;  %v3354_v26 = vld [vmem:[#allocation2 + $0x190] sm:$0xff] }
 0x71e   :  { %4237 = vrot.lane.b32.xlu1 %v3353_v46, %s5840_s19  ;;  %v4815_v48 = vpop.f32.mrf.mxu2  ;;  %5659 = vmatmul.msk.f32.gmra.mxu1 %vm29_vm0, %v5810_v8 }
 0x71f   :  { %v4816_v58 = vadd.f32 %v4815_v48, %v8963_v9  ;;  %v4354_v18 = vpop.permute.xlu2 %4353  ;;  %v3712_v34 = vpop.permute.xlu0 %3711  ;;  %v3323_v48 = vld [vmem:[#allocation2 + $0x1a7] sm:$0xff] }
 0x720   :  { %v4224_v11 = vpop.permute.xlu1 %4223  ;;  %v4498_v27 = vsel %vm1825_vm3, %v4466_v24, %v3712_v34  ;;  %v3356_v24 = vld [vmem:[#allocation2 + $0x1b0] sm:$0xff] }
 0x721   :  { %5620 = vmatmul.msk.f32.gmra.mxu3 %vm29_vm0, %v4816_v58  ;;  %v4530_v40 = vsel %vm1858_vm4, %v4498_v27, %v3840_v3  ;;  %v5815_v27 = vld [vmem:[%s9715_s0 + $0x180] sm:$0xff] }
 0x722   :  { %v4562_v1 = vsel %vm1891_vm5, %v4530_v40, %v9040_v60  ;;  %v4435_v60 = vsel %vm29_vm0, %v8801_v13, %v10090_v15  ;;  %v5812_v13 = vld [vmem:[%s9715_s0 + $0x168] sm:$0xff] }
 0x723   :  { %v4467_v55 = vsel %vm1792_vm2, %v4435_v60, %v10091_v33  ;;  %v10094_v40 = vld [vmem:[#allocation8_spill] sm:$0xff] }
 0x724   :  { %v3357_v33 = vld [vmem:[#allocation2 + $0x1c8] sm:$0xff] }
 0x725   :  { %4365 = vrot.lane.b32.xlu2 %v3385_v20, %s5841_s26  ;;  %4109 = vrot.lane.b32.xlu0 %v3321_v36, %s5839_s16 }
 0x726   :  { %3855 = vrot.lane.b32.xlu1 %v3352_v25, %s5836_s13  ;;  %5660 = vmatmul.msk.f32.gmra.mxu1 %vm29_vm0, %v5811_v63 }
 0x727   :  { %v9103_v50 = vpop.permute.xlu2 %3971  ;;  %v4096_v37 = vpop.permute.xlu0 %4095 }
 0x728   :  { %v3842_v16 = vpop.permute.xlu1 %3841  ;;  %v4594_v44 = vsel %vm1924_vm6, %v4562_v1, %v4096_v37  ;;  %v10095_v1 = vld [vmem:[#allocation30_spill] sm:$0xff] }
 0x729   :  { %v4626_v49 = vsel %vm1957_vm8, %v4594_v44, %v4224_v11 }
 0x72a   :  { %v4658_v10 = vsel %vm1990_vm7, %v4626_v49, %v4352_v45 }
 0x72b   :  { %5597 = vmatmul.msk.f32.gmra.mxu2 %vm2036_vm9, %v4658_v10  ;;  %v3388_v10 = vld [vmem:[#allocation2 + $0x1b1] sm:$0xff] }
 0x72d   :  { %3983 = vrot.lane.b32.xlu2 %v3384_v14, %s5838_s15  ;;  %3727 = vrot.lane.b32.xlu0 %v3320_v12, %s5837_s14  ;;  %v10092_v14 = vld [vmem:[#allocation4_spill] sm:$0xff] }
 0x72e   :  { %4239 = vrot.lane.b32.xlu1 %v3354_v26, %s5840_s19  ;;  %v4818_v7 = vpop.f32.mrf.mxu2  ;;  %5661 = vmatmul.msk.f32.gmra.mxu1 %vm29_vm0, %v5812_v13  ;;  %v4436_v12 = vsel %vm29_vm0, %v8825_v2, %v10092_v14  ;;  %v5814_v2 = vld [vmem:[%s9715_s0 + $0x178] sm:$0xff] }
 0x72f   :  { %v4819_v41 = vadd.f32 %v4818_v7, %v8963_v9  ;;  %v4356_v21 = vpop.permute.xlu2 %4355  ;;  %v3714_v35 = vpop.permute.xlu0 %3713  ;;  %v4468_v3 = vsel %vm1792_vm2, %v4436_v12, %v10093_v22 }
 0x730   :  { %v4226_v30 = vpop.permute.xlu1 %4225  ;;  %v4499_v62 = vsel %vm1825_vm3, %v4467_v55, %v3714_v35 }
 0x731   :  { %5621 = vmatmul.msk.f32.gmra.mxu3 %vm29_vm0, %v4819_v41  ;;  %v4531_v25 = vsel %vm1858_vm4, %v4499_v62, %v3842_v16  ;;  %v10096_v62 = vld [vmem:[#allocation15_spill] sm:$0xff] }
 0x732   :  { %v4563_v32 = vsel %vm1891_vm5, %v4531_v25, %v9072_v54  ;;  %v4438_v25 = vsel %vm29_vm0, %v8872_v6, %v10096_v62  ;;  %v5818_v6 = vld [vmem:[%s9715_s0 + $0x198] sm:$0xff]  ;;  %v10101_v62 = vld [vmem:[#allocation24_spill] sm:$0xff] }
 0x735   :  { %4367 = vrot.lane.b32.xlu2 %v3386_v31, %s5841_s26  ;;  %4111 = vrot.lane.b32.xlu0 %v3322_v61, %s5839_s16 }
 0x736   :  { %3857 = vrot.lane.b32.xlu1 %v3353_v46, %s5836_s13  ;;  %5662 = vmatmul.msk.f32.gmra.mxu1 %vm29_vm0, %v5813_v42  ;;  %v3387_v46 = vld [vmem:[#allocation2 + $0x1a9] sm:$0xff] }
 0x737   :  { %v9134_v51 = vpop.permute.xlu2 %3973  ;;  %v4098_v28 = vpop.permute.xlu0 %4097 }
 0x738   :  { %v3844_v45 = vpop.permute.xlu1 %3843  ;;  %v4595_v57 = vsel %vm1924_vm6, %v4563_v32, %v4098_v28 }
 0x739   :  { %v4627_v47 = vsel %vm1957_vm8, %v4595_v57, %v4226_v30  ;;  %v5817_v30 = vld [vmem:[%s9715_s0 + $0x190] sm:$0xff] }
 0x73a   :  { %v4659_v53 = vsel %vm1990_vm7, %v4627_v47, %v4354_v18  ;;  %v3389_v47 = vld [vmem:[#allocation2 + $0x1c9] sm:$0xff] }
 0x73b   :  { %5598 = vmatmul.msk.f32.gmra.mxu2 %vm2036_vm9, %v4659_v53  ;;  %v3325_v53 = vld [vmem:[#allocation2 + $0x1c7] sm:$0xff] }
 0x73d   :  { %3985 = vrot.lane.b32.xlu2 %v3385_v20, %s5838_s15  ;;  %3729 = vrot.lane.b32.xlu0 %v3321_v36, %s5837_s14  ;;  %v4437_v20 = vsel %vm29_vm0, %v8849_v59, %v10094_v40  ;;  %v5816_v59 = vld [vmem:[%s9715_s0 + $0x188] sm:$0xff] }
 0x73e   :  { %4241 = vrot.lane.b32.xlu1 %v3355_v4, %s5840_s19  ;;  %v4821_v39 = vpop.f32.mrf.mxu2  ;;  %5663 = vmatmul.msk.f32.gmra.mxu1 %vm29_vm0, %v5814_v2  ;;  %v4469_v37 = vsel %vm1792_vm2, %v4437_v20, %v10095_v1  ;;  %v10098_v2 = vld [vmem:[#allocation13_spill] sm:$0xff] }
 0x73f   :  { %v4822_v19 = vadd.f32 %v4821_v39, %v8963_v9  ;;  %v4358_v54 = vpop.permute.xlu2 %4357  ;;  %v3716_v56 = vpop.permute.xlu0 %3715  ;;  %v3390_v20 = vld [vmem:[#allocation2 + $0x1d1] sm:$0xff] }
 0x740   :  { %v4228_v52 = vpop.permute.xlu1 %4227  ;;  %v4500_v23 = vsel %vm1825_vm3, %v4468_v3, %v3716_v56 }
 0x741   :  { %5622 = vmatmul.msk.f32.gmra.mxu3 %vm29_vm0, %v4822_v19  ;;  %v4532_v17 = vsel %vm1858_vm4, %v4500_v23, %v3844_v45  ;;  %v3127_v23 = vld [vmem:[#allocation2 + $0x127] sm:$0xff] }
 0x742   :  { %v4564_v29 = vsel %vm1891_vm5, %v4532_v17, %v9103_v50 }
 0x745   :  { %4369 = vrot.lane.b32.xlu2 %v3387_v46, %s5841_s26  ;;  %4113 = vrot.lane.b32.xlu0 %v3323_v48, %s5839_s16 }
 0x746   :  { %3859 = vrot.lane.b32.xlu1 %v3354_v26, %s5836_s13  ;;  %5664 = vmatmul.msk.f32.gmra.mxu1 %vm29_vm0, %v5815_v27  ;;  %v3324_v26 = vld [vmem:[#allocation2 + $0x1af] sm:$0xff] }
 0x747   :  { %v9165_v38 = vpop.permute.xlu2 %3975  ;;  %v4100_v5 = vpop.permute.xlu0 %4099 }
 0x748   :  { %v3846_v58 = vpop.permute.xlu1 %3845  ;;  %v4596_v18 = vsel %vm1924_vm6, %v4564_v29, %v4100_v5 }
 0x749   :  { %v4628_v34 = vsel %vm1957_vm8, %v4596_v18, %v4228_v52  ;;  %v3358_v52 = vld [vmem:[#allocation2 + $0x1d0] sm:$0xff] }
 0x74a   :  { %v4660_v43 = vsel %vm1990_vm7, %v4628_v34, %v4356_v21  ;;  %v10099_v34 = vld [vmem:[#allocation31_spill] sm:$0xff] }
 0x74b   :  { %5599 = vmatmul.msk.f32.gmra.mxu2 %vm2036_vm9, %v4660_v43 }
 0x74d   :  { %3987 = vrot.lane.b32.xlu2 %v3386_v31, %s5838_s15  ;;  %3731 = vrot.lane.b32.xlu0 %v3322_v61, %s5837_s14 }
 0x74e   :  { %4243 = vrot.lane.b32.xlu1 %v3356_v24, %s5840_s19  ;;  %v4824_v11 = vpop.f32.mrf.mxu2  ;;  %5665 = vmatmul.msk.f32.gmra.mxu1 %vm29_vm0, %v5816_v59 }
 0x74f   :  { %v4825_v36 = vadd.f32 %v4824_v11, %v8963_v9  ;;  %v4360_v8 = vpop.permute.xlu2 %4359  ;;  %v3718_v50 = vpop.permute.xlu0 %3717 }
 0x750   :  { %v4230_v16 = vpop.permute.xlu1 %4229  ;;  %v4501_v44 = vsel %vm1825_vm3, %v4469_v37, %v3718_v50 }
 0x751   :  { %5623 = vmatmul.msk.f32.gmra.mxu3 %vm29_vm0, %v4825_v36  ;;  %v4533_v49 = vsel %vm1858_vm4, %v4501_v44, %v3846_v58  ;;  %v3326_v36 = vld [vmem:[#allocation2 + $0x1cf] sm:$0xff] }
 0x752   :  { %v4565_v63 = vsel %vm1891_vm5, %v4533_v49, %v9134_v51  ;;  %v10097_v51 = vld [vmem:[#allocation29_spill] sm:$0xff] }
 0x753   :  { %v4470_v32 = vsel %vm1792_vm2, %v4438_v25, %v10097_v51  ;;  %v3391_v51 = vld [vmem:[#allocation2 + $0x1e9] sm:$0xff] }
 0x755   :  { %4371 = vrot.lane.b32.xlu2 %v3388_v10, %s5841_s26  ;;  %4115 = vrot.lane.b32.xlu0 %v3324_v26, %s5839_s16 }
 0x756   :  { %3861 = vrot.lane.b32.xlu1 %v3355_v4, %s5836_s13  ;;  %5666 = vmatmul.msk.f32.gmra.mxu1 %vm29_vm0, %v5817_v30 }
 0x757   :  { %v9196_v7 = vpop.permute.xlu2 %3977  ;;  %v4102_v15 = vpop.permute.xlu0 %4101 }
 0x758   :  { %v3848_v60 = vpop.permute.xlu1 %3847  ;;  %v4597_v41 = vsel %vm1924_vm6, %v4565_v63, %v4102_v15  ;;  %v3359_v63 = vld [vmem:[#allocation2 + $0x1e8] sm:$0xff] }
 0x759   :  { %v4629_v21 = vsel %vm1957_vm8, %v4597_v41, %v4230_v16  ;;  %v5821_v41 = vld [vmem:[%s9715_s0 + $0x1b0] sm:$0xff] }
 0x75a   :  { %v4661_v35 = vsel %vm1990_vm7, %v4629_v21, %v4358_v54  ;;  %v9236_v54 = vld [vmem:[%s9722_s6] ss:$0 sm:$0xff]  ;;  %v10100_v21 = vld [vmem:[#allocation22_spill] sm:$0xff] }
 0x75b   :  { %5600 = vmatmul.msk.f32.gmra.mxu2 %vm2036_vm9, %v4661_v35  ;;  %v4440_v35 = vsel %vm29_vm0, %v8927_v0, %v10100_v21 }
 0x75c   :  { %v4472_v25 = vsel %vm1792_vm2, %v4440_v35, %v10101_v62 }
 0x75d   :  { %3989 = vrot.lane.b32.xlu2 %v3387_v46, %s5838_s15  ;;  %3733 = vrot.lane.b32.xlu0 %v3323_v48, %s5837_s14  ;;  %v5227_v46 = vpop.f32.mrf.mxu1  ;;  %v5819_v48 = vld [vmem:[%s9715_s0 + $0x1a0] sm:$0xff] }
 0x75e   :  { %4245 = vrot.lane.b32.xlu1 %v3357_v33, %s5840_s19  ;;  %v4827_v55 = vpop.f32.mrf.mxu2  ;;  %5667 = vmatmul.msk.f32.gmra.mxu1 %vm29_vm0, %v5818_v6 }
 0x75f   :  { %v4828_v31 = vadd.f32 %v4827_v55, %v8963_v9  ;;  %v4362_v61 = vpop.permute.xlu2 %4361  ;;  %v3720_v13 = vpop.permute.xlu0 %3719 }
 0x760   :  { %v4232_v28 = vpop.permute.xlu1 %4231  ;;  %v4502_v45 = vsel %vm1825_vm3, %v4470_v32, %v3720_v13  ;;  %v3327_v32 = vld [vmem:[#allocation2 + $0x1e7] sm:$0xff] }
 0x761   :  { %5624 = vmatmul.msk.f32.gmra.mxu3 %vm29_vm0, %v4828_v31  ;;  %v4534_v57 = vsel %vm1858_vm4, %v4502_v45, %v3848_v60 }
 0x762   :  { %v4566_v39 = vsel %vm1891_vm5, %v4534_v57, %v9165_v38  ;;  %v4439_v38 = vsel %vm29_vm0, %v3127_v23, %v10098_v2  ;;  %v10102_v23 = vld [vmem:[#allocation19_spill] sm:$0xff] }
 0x763   :  { %v4471_v43 = vsel %vm1792_vm2, %v4439_v38, %v10099_v34 }
 0x765   :  { %4373 = vrot.lane.b32.xlu2 %v3389_v47, %s5841_s26  ;;  %4117 = vrot.lane.b32.xlu0 %v3325_v53, %s5839_s16  ;;  %v5230_v15 = vpop.f32.mrf.mxu1 }
 0x766   :  { %3863 = vrot.lane.b32.xlu1 %v3356_v24, %s5836_s13  ;;  %5668 = vmatmul.msk.f32.gmra.mxu1 %vm29_vm0, %v5819_v48 }
 0x767   :  { %v9227_v4 = vpop.permute.xlu2 %3979  ;;  %v4104_v42 = vpop.permute.xlu0 %4103 }
 0x768   :  { %v3850_v14 = vpop.permute.xlu1 %3849  ;;  %v4598_v12 = vsel %vm1924_vm6, %v4566_v39, %v4104_v42 }
 0x769   :  { %v4630_v19 = vsel %vm1957_vm8, %v4598_v12, %v4232_v28  ;;  %v5822_v28 = vld [vmem:[%s9715_s0 + $0x1b8] sm:$0xff] }
 0x76a   :  { %v4662_v56 = vsel %vm1990_vm7, %v4630_v19, %v4360_v8  ;;  %v5820_v8 = vld [vmem:[%s9715_s0 + $0x1a8] sm:$0xff] }
 0x76b   :  { %5601 = vmatmul.msk.f32.gmra.mxu2 %vm2036_vm9, %v4662_v56 }
 0x76c   :  { %v5017_v22 = vpop.f32.mrf.mxu3 }
 0x76d   :  { %v5018_v3 = vadd.f32 %v9236_v54, %v5017_v22  ;;  %3991 = vrot.lane.b32.xlu2 %v3388_v10, %s5838_s15  ;;  %3735 = vrot.lane.b32.xlu0 %v3324_v26, %s5837_s14  ;;  %v5233_v19 = vpop.f32.mrf.mxu1  ;;  %v3360_v22 = vld [vmem:[#allocation2 + $0x1f0] sm:$0xff] }
 0x76e   :  { %4247 = vrot.lane.b32.xlu1 %v3358_v52, %s5840_s19  ;;  %v4830_v17 = vpop.f32.mrf.mxu2  ;;  %5669 = vmatmul.msk.f32.gmra.mxu1 %vm29_vm0, %v5820_v8 }
 0x76f   :  { %v5113_v29 = vmax.f32 %v5018_v3, 0.0  ;;  %v4831_v5 = vadd.f32 %v4830_v17, %v8963_v9  ;;  %v4364_v58 = vpop.permute.xlu2 %4363  ;;  %v3722_v18 = vpop.permute.xlu0 %3721 }
 0x770   :  { %v4234_v24 = vpop.permute.xlu1 %4233  ;;  %v4503_v11 = vsel %vm1825_vm3, %v4471_v43, %v3722_v18 }
 0x771   :  { %v5323_v27 = vadd.f32 %v5227_v46, %v5113_v29  ;;  %5625 = vmatmul.msk.f32.gmra.mxu3 %vm29_vm0, %v4831_v5  ;;  %v4535_v40 = vsel %vm1858_vm4, %v4503_v11, %v3850_v14  ;;  %v10103_v29 = vld [vmem:[#allocation23_spill] sm:$0xff]  ;;  %v3328_v11 = vld [vmem:[#allocation2 + $0x1ef] sm:$0xff] }
 0x772   :  { %v4567_v1 = vsel %vm1891_vm5, %v4535_v40, %v9196_v7 }
 0x773   :  { %5680 = vst.msk [vmem:[%s9723_s8 + $0x100] sm:$0xff] %vm1792_vm2, %v5323_v27 }
 0x775   :  { %4375 = vrot.lane.b32.xlu2 %v3390_v20, %s5841_s26  ;;  %4119 = vrot.lane.b32.xlu0 %v3326_v36, %s5839_s16  ;;  %v5236_v40 = vpop.f32.mrf.mxu1 }
 0x776   :  { %3865 = vrot.lane.b32.xlu1 %v3357_v33, %s5836_s13  ;;  %5670 = vmatmul.msk.f32.gmra.mxu1 %vm29_vm0, %v5821_v41 }
 0x777   :  { %v9267_v50 = vpop.permute.xlu2 %3981  ;;  %v4106_v37 = vpop.permute.xlu0 %4105 }
 0x778   :  { %v3852_v16 = vpop.permute.xlu1 %3851  ;;  %v4599_v44 = vsel %vm1924_vm6, %v4567_v1, %v4106_v37 }
 0x779   :  { %v4631_v49 = vsel %vm1957_vm8, %v4599_v44, %v4234_v24  ;;  %v3392_v24 = vld [vmem:[#allocation2 + $0x1f1] sm:$0xff] }
 0x77a   :  { %v4663_v10 = vsel %vm1990_vm7, %v4631_v49, %v4362_v61 }
 0x77b   :  { %5602 = vmatmul.msk.f32.gmra.mxu2 %vm2036_vm9, %v4663_v10  ;;  %v5020_v26 = vpop.f32.mrf.mxu3 }
 0x77c   :  { %v5021_v59 = vadd.f32 %v9236_v54, %v5020_v26 }
 0x77d   :  { %3993 = vrot.lane.b32.xlu2 %v3389_v47, %s5838_s15  ;;  %3737 = vrot.lane.b32.xlu0 %v3325_v53, %s5837_s14 }
 0x77e   :  { %v5114_v7 = vmax.f32 %v5021_v59, 0.0  ;;  %4249 = vrot.lane.b32.xlu1 %v3359_v63, %s5840_s19  ;;  %v4833_v60 = vpop.f32.mrf.mxu2  ;;  %5671 = vmatmul.msk.f32.gmra.mxu1 %vm29_vm0, %v5822_v28  ;;  %v3130_v59 = vld [vmem:[#allocation2 + $0x14f] sm:$0xff] }
 0x77f   :  { %v4834_v33 = vadd.f32 %v4833_v60, %v8963_v9  ;;  %v9287_v55 = vpop.permute.xlu2 %4365  ;;  %v3724_v30 = vpop.permute.xlu0 %3723 }
 0x780   :  { %v5324_v31 = vadd.f32 %v5230_v15, %v5114_v7  ;;  %v4236_v61 = vpop.permute.xlu1 %4235  ;;  %v4504_v13 = vsel %vm1825_vm3, %v4472_v25, %v3724_v30  ;;  %v5825_v15 = vld [vmem:[%s9715_s0 + $0x1d0] sm:$0xff]  ;;  %v10104_v7 = vld [vmem:[#allocation3_spill] sm:$0xff] }
 0x781   :  { %5626 = vmatmul.msk.f32.gmra.mxu3 %vm29_vm0, %v4834_v33  ;;  %v4536_v0 = vsel %vm1858_vm4, %v4504_v13, %v3852_v16  ;;  %v4442_v60 = vsel %vm29_vm0, %v3130_v59, %v10104_v7  ;;  %v10105_v33 = vld [vmem:[#allocation43_spill] sm:$0xff]  ;;  %v10108_v59 = vld [vmem:[#allocation21_spill] sm:$0xff] }
 0x782   :  { %5681 = vst.msk [vmem:[%s9723_s8 + $0x108] sm:$0xff] %vm1792_vm2, %v5324_v31  ;;  %v4568_v57 = vsel %vm1891_vm5, %v4536_v0, %v9227_v4  ;;  %v3129_v4 = vld [vmem:[#allocation2 + $0x147] sm:$0xff] }
 0x783   :  { %v4441_v17 = vsel %vm29_vm0, %v3129_v4, %v10102_v23  ;;  %v3329_v13 = vld [vmem:[#allocation2 + $0x207] sm:$0xff]  ;;  %v10106_v4 = vld [vmem:[#allocation17_spill] sm:$0xff] }
 0x784   :  { %v4473_v5 = vsel %vm1792_vm2, %v4441_v17, %v10103_v29 }
 0x785   :  { %4377 = vrot.lane.b32.xlu2 %v3391_v51, %s5841_s26  ;;  %4121 = vrot.lane.b32.xlu0 %v3327_v32, %s5839_s16 }
 0x786   :  { %3867 = vrot.lane.b32.xlu1 %v3358_v52, %s5836_s13  ;;  %v5823_v52 = vld [vmem:[%s9715_s0 + $0x1c0] sm:$0xff] }
 0x787   :  { %v9305_v45 = vpop.permute.xlu2 %3983  ;;  %v4108_v47 = vpop.permute.xlu0 %4107  ;;  %5672 = vmatmul.msk.f32.gmra.mxu1 %vm29_vm0, %v5823_v52 }
 0x788   :  { %v3854_v53 = vpop.permute.xlu1 %3853  ;;  %v4600_v6 = vsel %vm1924_vm6, %v4568_v57, %v4108_v47 }
 0x789   :  { %v4632_v39 = vsel %vm1957_vm8, %v4600_v6, %v4236_v61  ;;  %v3393_v61 = vld [vmem:[#allocation2 + $0x209] sm:$0xff] }
 0x78a   :  { %v5023_v42 = vpop.f32.mrf.mxu3  ;;  %v4664_v14 = vsel %vm1990_vm7, %v4632_v39, %v4364_v58 }
 0x78b   :  { %v5024_v12 = vadd.f32 %v9236_v54, %v5023_v42  ;;  %5603 = vmatmul.msk.f32.gmra.mxu2 %vm2036_vm9, %v4664_v14 }
 0x78d   :  { %v5115_v56 = vmax.f32 %v5024_v12, 0.0  ;;  %3995 = vrot.lane.b32.xlu2 %v3390_v20, %s5838_s15  ;;  %3739 = vrot.lane.b32.xlu0 %v3326_v36, %s5837_s14  ;;  %v5824_v20 = vld [vmem:[%s9715_s0 + $0x1c8] sm:$0xff] }
 0x78e   :  { %4251 = vrot.lane.b32.xlu1 %v3360_v22, %s5840_s19  ;;  %v4836_v3 = vpop.f32.mrf.mxu2 }
 0x78f   :  { %v4837_v46 = vadd.f32 %v4836_v3, %v8963_v9  ;;  %v5325_v48 = vadd.f32 %v5233_v19, %v5115_v56  ;;  %v9324_v2 = vpop.permute.xlu2 %4367  ;;  %v3726_v38 = vpop.permute.xlu0 %3725  ;;  %5673 = vmatmul.msk.f32.gmra.mxu1 %vm29_vm0, %v5824_v20  ;;  %v3131_v19 = vld [vmem:[#allocation2 + $0x167] sm:$0xff] }
 0x790   :  { %v4238_v58 = vpop.permute.xlu1 %4237  ;;  %v4505_v18 = vsel %vm1825_vm3, %v4473_v5, %v3726_v38  ;;  %v4443_v3 = vsel %vm29_vm0, %v3131_v19, %v10106_v4  ;;  %v10111_v4 = vld [vmem:[#allocation34_spill] sm:$0xff] }
 0x791   :  { %5682 = vst.msk [vmem:[%s9723_s8 + $0x110] sm:$0xff] %vm1792_vm2, %v5325_v48  ;;  %5627 = vmatmul.msk.f32.gmra.mxu3 %vm29_vm0, %v4837_v46  ;;  %v4537_v34 = vsel %vm1858_vm4, %v4505_v18, %v3854_v53  ;;  %v10107_v46 = vld [vmem:[#allocation40_spill] sm:$0xff] }
 0x792   :  { %v4569_v1 = vsel %vm1891_vm5, %v4537_v34, %v9267_v50  ;;  %v3361_v50 = vld [vmem:[#allocation2 + $0x208] sm:$0xff]  ;;  %v4475_v48 = vsel %vm1792_vm2, %v4443_v3, %v10107_v46 }
 0x793   :  { %v3330_v18 = vld [vmem:[#allocation2 + $0x20f] sm:$0xff] }
 0x794   :  { %v5026_v43 = vpop.f32.mrf.mxu3  ;;  %v3332_v46 = vld [vmem:[#allocation2 + $0x22f] sm:$0xff] }
 0x795   :  { %v5027_v27 = vadd.f32 %v9236_v54, %v5026_v43  ;;  %4379 = vrot.lane.b32.xlu2 %v3392_v24, %s5841_s26  ;;  %4123 = vrot.lane.b32.xlu0 %v3328_v11, %s5839_s16 }
 0x796   :  { %3869 = vrot.lane.b32.xlu1 %v3359_v63, %s5836_s13 }
 0x797   :  { %v5116_v36 = vmax.f32 %v5027_v27, 0.0  ;;  %v9343_v8 = vpop.permute.xlu2 %3985  ;;  %v4110_v37 = vpop.permute.xlu0 %4109  ;;  %5674 = vmatmul.msk.f32.gmra.mxu1 %vm29_vm0, %v5825_v15 }
 0x798   :  { %v3856_v16 = vpop.permute.xlu1 %3855  ;;  %v4601_v44 = vsel %vm1924_vm6, %v4569_v1, %v4110_v37 }
 0x799   :  { %v4633_v49 = vsel %vm1957_vm8, %v4601_v44, %v4238_v58  ;;  %v5326_v10 = vadd.f32 %v5236_v40, %v5116_v36  ;;  %v3394_v58 = vld [vmem:[#allocation2 + $0x211] sm:$0xff] }
 0x79a   :  { %v4665_v26 = vsel %vm1990_vm7, %v4633_v49, %v9287_v55  ;;  %v4474_v55 = vsel %vm1792_vm2, %v4442_v60, %v10105_v33  ;;  %v3363_v49 = vld [vmem:[#allocation2 + $0x228] sm:$0xff] }
 0x79b   :  { %5683 = vst.msk [vmem:[%s9723_s8 + $0x118] sm:$0xff] %vm1792_vm2, %v5326_v10  ;;  %5604 = vmatmul.msk.f32.gmra.mxu2 %vm2036_vm9, %v4665_v26 }
 0x79d   :  { %3997 = vrot.lane.b32.xlu2 %v3391_v51, %s5838_s15  ;;  %3741 = vrot.lane.b32.xlu0 %v3327_v32, %s5837_s14  ;;  %v5239_v51 = vpop.f32.mrf.mxu1  ;;  %v5826_v32 = vld [vmem:[%s9715_s0 + $0x1d8] sm:$0xff] }
 0x79e   :  { %4253 = vrot.lane.b32.xlu1 %v3361_v50, %s5840_s19  ;;  %v4839_v63 = vpop.f32.mrf.mxu2 }
 0x79f   :  { %v4840_v41 = vadd.f32 %v4839_v63, %v8963_v9  ;;  %v9366_v21 = vpop.permute.xlu2 %4369  ;;  %v3728_v35 = vpop.permute.xlu0 %3727  ;;  %5675 = vmatmul.msk.f32.gmra.mxu1 %vm29_vm0, %v5826_v32 }
 0x7a0   :  { %v4240_v30 = vpop.permute.xlu1 %4239  ;;  %v4506_v62 = vsel %vm1825_vm3, %v4474_v55, %v3728_v35  ;;  %v3395_v55 = vld [vmem:[#allocation2 + $0x229] sm:$0xff] }
 0x7a1   :  { %5628 = vmatmul.msk.f32.gmra.mxu3 %vm29_vm0, %v4840_v41  ;;  %v4538_v25 = vsel %vm1858_vm4, %v4506_v62, %v3856_v16  ;;  %v10109_v41 = vld [vmem:[#allocation45_spill] sm:$0xff] }
 0x7a2   :  { %v4570_v47 = vsel %vm1891_vm5, %v4538_v25, %v9305_v45  ;;  %v3362_v45 = vld [vmem:[#allocation2 + $0x210] sm:$0xff] }
 0x7a4   :  { %v5029_v31 = vpop.f32.mrf.mxu3 }
 0x7a5   :  { %v5030_v0 = vadd.f32 %v9236_v54, %v5029_v31  ;;  %4381 = vrot.lane.b32.xlu2 %v3393_v61, %s5841_s26  ;;  %4125 = vrot.lane.b32.xlu0 %v3329_v13, %s5839_s16  ;;  %v5242_v43 = vpop.f32.mrf.mxu1 }
 0x7a6   :  { %3871 = vrot.lane.b32.xlu1 %v3360_v22, %s5836_s13  ;;  %v5827_v22 = vld [vmem:[%s9715_s0 + $0x1e0] sm:$0xff] }
 0x7a7   :  { %v5117_v28 = vmax.f32 %v5030_v0, 0.0  ;;  %v9381_v57 = vpop.permute.xlu2 %3987  ;;  %v4112_v53 = vpop.permute.xlu0 %4111  ;;  %5676 = vmatmul.msk.f32.gmra.mxu1 %vm29_vm0, %v5827_v22 }
 0x7a8   :  { %v3858_v6 = vpop.permute.xlu1 %3857  ;;  %v4602_v39 = vsel %vm1924_vm6, %v4570_v47, %v4112_v53 }
 0x7a9   :  { %v4634_v42 = vsel %vm1957_vm8, %v4602_v39, %v4240_v30  ;;  %v5327_v14 = vadd.f32 %v5239_v51, %v5117_v28  ;;  %v3331_v30 = vld [vmem:[#allocation2 + $0x227] sm:$0xff] }
 0x7aa   :  { %v4666_v12 = vsel %vm1990_vm7, %v4634_v42, %v9324_v2 }
 0x7ab   :  { %5684 = vst.msk [vmem:[%s9723_s8 + $0x120] sm:$0xff] %vm1792_vm2, %v5327_v14  ;;  %5605 = vmatmul.msk.f32.gmra.mxu2 %vm2036_vm9, %v4666_v12  ;;  %v3364_v14 = vld [vmem:[#allocation2 + $0x230] sm:$0xff] }
 0x7ad   :  { %3999 = vrot.lane.b32.xlu2 %v3392_v24, %s5838_s15  ;;  %3743 = vrot.lane.b32.xlu0 %v3328_v11, %s5837_s14  ;;  %v5828_v24 = vld [vmem:[%s9715_s0 + $0x1e8] sm:$0xff]  ;;  %v5245_v26 = vpop.f32.mrf.mxu1 }
 0x7ae   :  { %4255 = vrot.lane.b32.xlu1 %v3362_v45, %s5840_s19  ;;  %v4842_v56 = vpop.f32.mrf.mxu2 }
 0x7af   :  { %v4843_v52 = vadd.f32 %v4842_v56, %v8963_v9  ;;  %v9404_v23 = vpop.permute.xlu2 %4371  ;;  %v3730_v17 = vpop.permute.xlu0 %3729  ;;  %5677 = vmatmul.msk.f32.gmra.mxu1 %vm29_vm0, %v5828_v24 }
 0x7b0   :  { %v4242_v2 = vpop.permute.xlu1 %4241  ;;  %v4507_v38 = vsel %vm1825_vm3, %v4475_v48, %v3730_v17  ;;  %v3396_v48 = vld [vmem:[#allocation2 + $0x231] sm:$0xff] }
 0x7b1   :  { %5629 = vmatmul.msk.f32.gmra.mxu3 %vm29_vm0, %v4843_v52  ;;  %v4539_v29 = vsel %vm1858_vm4, %v4507_v38, %v3858_v6 }
 0x7b2   :  { %v4571_v40 = vsel %vm1891_vm5, %v4539_v29, %v9343_v8  ;;  %v3132_v8 = vld [vmem:[#allocation2 + $0x16f] sm:$0xff] }
 0x7b3   :  { %v4444_v63 = vsel %vm29_vm0, %v3132_v8, %v10108_v59 }
 0x7b4   :  { %v5032_v5 = vpop.f32.mrf.mxu3 }
 0x7b5   :  { %v5033_v34 = vadd.f32 %v9236_v54, %v5032_v5  ;;  %4383 = vrot.lane.b32.xlu2 %v3394_v58, %s5841_s26  ;;  %4127 = vrot.lane.b32.xlu0 %v3330_v18, %s5839_s16 }
 0x7b6   :  { %3873 = vrot.lane.b32.xlu1 %v3361_v50, %s5836_s13  ;;  %v5829_v50 = vld [vmem:[%s9715_s0 + $0x1f0] sm:$0xff] }
 0x7b7   :  { %v5118_v11 = vmax.f32 %v5033_v34, 0.0  ;;  %v9419_v27 = vpop.permute.xlu2 %3989  ;;  %v4114_v20 = vpop.permute.xlu0 %4113  ;;  %5678 = vmatmul.msk.f32.gmra.mxu1 %vm29_vm0, %v5829_v50 }
 0x7b8   :  { %v3860_v36 = vpop.permute.xlu1 %3859  ;;  %v4603_v1 = vsel %vm1924_vm6, %v4571_v40, %v4114_v20 }
 0x7b9   :  { %v4635_v37 = vsel %vm1957_vm8, %v4603_v1, %v4242_v2  ;;  %v5328_v16 = vadd.f32 %v5242_v43, %v5118_v11 }
 0x7ba   :  { %v4667_v44 = vsel %vm1990_vm7, %v4635_v37, %v9366_v21  ;;  %v4476_v21 = vsel %vm1792_vm2, %v4444_v63, %v10109_v41 }
 0x7bb   :  { %5685 = vst.msk [vmem:[%s9723_s8 + $0x128] sm:$0xff] %vm1792_vm2, %v5328_v16  ;;  %5606 = vmatmul.msk.f32.gmra.mxu2 %vm2036_vm9, %v4667_v44 }
 0x7bd   :  { %4001 = vrot.lane.b32.xlu2 %v3393_v61, %s5838_s15  ;;  %3745 = vrot.lane.b32.xlu0 %v3329_v13, %s5837_s14  ;;  %v5248_v61 = vpop.f32.mrf.mxu1  ;;  %v5830_v13 = vld [vmem:[%s9715_s0 + $0x1f8] sm:$0xff] }
 0x7be   :  { %4257 = vrot.lane.b32.xlu1 %v3363_v49, %s5840_s19  ;;  %v4845_v10 = vpop.f32.mrf.mxu2  ;;  %v10113_v49 = vld [vmem:[#allocation36_spill] sm:$0xff] }
 0x7bf   :  { %v4846_v15 = vadd.f32 %v4845_v10, %v8963_v9  ;;  %v4374_v7 = vpop.permute.xlu2 %4373  ;;  %v3732_v60 = vpop.permute.xlu0 %3731  ;;  %5679 = vmatmul.msk.f32.gmra.mxu1 %vm29_vm0, %v5830_v13 }
 0x7c0   :  { %v4244_v35 = vpop.permute.xlu1 %4243  ;;  %v4508_v33 = vsel %vm1825_vm3, %v4476_v21, %v3732_v60 }
 0x7c1   :  { %5630 = vmatmul.msk.f32.gmra.mxu3 %vm29_vm0, %v4846_v15  ;;  %v4540_v62 = vsel %vm1858_vm4, %v4508_v33, %v3860_v36  ;;  %v3134_v36 = vld [vmem:[#allocation2 + $0x18f] sm:$0xff] }
 0x7c2   :  { %v4572_v32 = vsel %vm1891_vm5, %v4540_v62, %v9381_v57  ;;  %v3133_v57 = vld [vmem:[#allocation2 + $0x187] sm:$0xff] }
 0x7c4   :  { %v5035_v25 = vpop.f32.mrf.mxu3 }
 0x7c5   :  { %v5036_v31 = vadd.f32 %v9236_v54, %v5035_v25  ;;  %4385 = vrot.lane.b32.xlu2 %v3395_v55, %s5841_s26  ;;  %4129 = vrot.lane.b32.xlu0 %v3331_v30, %s5839_s16  ;;  %v3135_v25 = vld [vmem:[#allocation2 + $0x1a7] sm:$0xff] }
 0x7c6   :  { %3875 = vrot.lane.b32.xlu1 %v3362_v45, %s5836_s13  ;;  %v10110_v45 = vld [vmem:[#allocation10_spill] sm:$0xff] }
 0x7c7   :  { %v5119_v0 = vmax.f32 %v5036_v31, 0.0  ;;  %v3992_v51 = vpop.permute.xlu2 %3991  ;;  %v4116_v28 = vpop.permute.xlu0 %4115  ;;  %v4445_v19 = vsel %vm29_vm0, %v3133_v57, %v10110_v45 }
 0x7c8   :  { %v3862_v47 = vpop.permute.xlu1 %3861  ;;  %v4604_v53 = vsel %vm1924_vm6, %v4572_v32, %v4116_v28  ;;  %v4477_v3 = vsel %vm1792_vm2, %v4445_v19, %v10111_v4  ;;  %v10115_v28 = vld [vmem:[#allocation35_spill] sm:$0xff] }
 0x7c9   :  { %v4636_v6 = vsel %vm1957_vm8, %v4604_v53, %v4244_v35  ;;  %v5329_v39 = vadd.f32 %v5245_v26, %v5119_v0 }
 0x7ca   :  { %v4668_v42 = vsel %vm1990_vm7, %v4636_v6, %v9404_v23 }
 0x7cb   :  { %5686 = vst.msk [vmem:[%s9723_s8 + $0x130] sm:$0xff] %vm1792_vm2, %v5329_v39  ;;  %5607 = vmatmul.msk.f32.gmra.mxu2 %vm2036_vm9, %v4668_v42 }
 0x7cd   :  { %4003 = vrot.lane.b32.xlu2 %v3394_v58, %s5838_s15  ;;  %3747 = vrot.lane.b32.xlu0 %v3330_v18, %s5837_s14 }
 0x7ce   :  { %v4848_v12 = vpop.f32.mrf.mxu2  ;;  %4259 = vrot.lane.b32.xlu1 %v3364_v14, %s5840_s19 }
 0x7cf   :  { %v4849_v56 = vadd.f32 %v4848_v12, %v8963_v9  ;;  %v3734_v22 = vpop.permute.xlu0 %3733  ;;  %v4376_v23 = vpop.permute.xlu2 %4375 }
 0x7d0   :  { %v4246_v52 = vpop.permute.xlu1 %4245  ;;  %v4509_v17 = vsel %vm1825_vm3, %v4477_v3, %v3734_v22 }
 0x7d1   :  { %5631 = vmatmul.msk.f32.gmra.mxu3 %vm29_vm0, %v4849_v56  ;;  %v4541_v2 = vsel %vm1858_vm4, %v4509_v17, %v3862_v47  ;;  %v3136_v17 = vld [vmem:[#allocation2 + $0x1af] sm:$0xff] }
 0x7d2   :  { %v4573_v58 = vsel %vm1891_vm5, %v4541_v2, %v9419_v27  ;;  %v10112_v27 = vld [vmem:[#allocation14_spill] sm:$0xff] }
 0x7d3   :  { %v4446_v37 = vsel %vm29_vm0, %v3134_v36, %v10112_v27 }
 0x7d4   :  { %v5038_v38 = vpop.f32.mrf.mxu3  ;;  %v4478_v8 = vsel %vm1792_vm2, %v4446_v37, %v10113_v49 }
 0x7d5   :  { %v5039_v29 = vadd.f32 %v9236_v54, %v5038_v38  ;;  %4131 = vrot.lane.b32.xlu0 %v3332_v46, %s5839_s16  ;;  %4387 = vrot.lane.b32.xlu2 %v3396_v48, %s5841_s26  ;;  %v10116_v48 = vld [vmem:[#allocation5_spill] sm:$0xff] }
 0x7d6   :  { %v4448_v2 = vsel %vm29_vm0, %v3136_v17, %v10116_v48 }
 0x7d7   :  { %v5120_v5 = vmax.f32 %v5039_v29, 0.0  ;;  %v4118_v18 = vpop.permute.xlu0 %4117  ;;  %v3994_v20 = vpop.permute.xlu2 %3993 }
 0x7d8   :  { %v3864_v34 = vpop.permute.xlu1 %3863  ;;  %v4605_v43 = vsel %vm1924_vm6, %v4573_v58, %v4118_v18 }
 0x7d9   :  { %v4637_v24 = vsel %vm1957_vm8, %v4605_v43, %v4246_v52  ;;  %v5330_v11 = vadd.f32 %v5248_v61, %v5120_v5  ;;  %v10114_v61 = vld [vmem:[#allocation12_spill] sm:$0xff]  ;;  %v10117_v5 = vld [vmem:[#allocation39_spill] sm:$0xff] }
 0x7da   :  { %v4669_v40 = vsel %vm1990_vm7, %v4637_v24, %v4374_v7  ;;  %v5251_v7 = vpop.f32.mrf.mxu1  ;;  %v4447_v13 = vsel %vm29_vm0, %v3135_v25, %v10114_v61  ;;  %v4480_v58 = vsel %vm1792_vm2, %v4448_v2, %v10117_v5 }
 0x7db   :  { %5687 = vst.msk [vmem:[%s9723_s8 + $0x138] sm:$0xff] %vm1792_vm2, %v5330_v11  ;;  %5608 = vmatmul.msk.f32.gmra.mxu2 %vm2036_vm9, %v4669_v40  ;;  %v4479_v47 = vsel %vm1792_vm2, %v4447_v13, %v10115_v28 }
 0x7de   :  { %v4851_v1 = vpop.f32.mrf.mxu2 }
 0x7df   :  { %v4852_v16 = vadd.f32 %v4851_v1, %v8963_v9  ;;  %v3736_v44 = vpop.permute.xlu0 %3735  ;;  %v4378_v63 = vpop.permute.xlu2 %4377 }
 0x7e0   :  { %v4248_v10 = vpop.permute.xlu1 %4247  ;;  %v4510_v26 = vsel %vm1825_vm3, %v4478_v8, %v3736_v44 }
 0x7e1   :  { %5632 = vmatmul.msk.f32.gmra.mxu3 %vm29_vm0, %v4852_v16  ;;  %v4542_v50 = vsel %vm1858_vm4, %v4510_v26, %v3864_v34  ;;  %v3137_v26 = vld [vmem:[#allocation2 + $0x1c7] sm:$0xff] }
 0x7e2   :  { %v4574_v41 = vsel %vm1891_vm5, %v4542_v50, %v3992_v51  ;;  %v5254_v57 = vpop.f32.mrf.mxu1 }
 0x7e4   :  { %v5041_v59 = vpop.f32.mrf.mxu3 }
 0x7e5   :  { %v5042_v15 = vadd.f32 %v9236_v54, %v5041_v59  ;;  %v10118_v59 = vld [vmem:[#allocation27_spill] sm:$0xff] }
 0x7e7   :  { %v5121_v60 = vmax.f32 %v5042_v15, 0.0  ;;  %v4120_v21 = vpop.permute.xlu0 %4119  ;;  %v3996_v0 = vpop.permute.xlu2 %3995 }
 0x7e8   :  { %v3866_v35 = vpop.permute.xlu1 %3865  ;;  %v4606_v33 = vsel %vm1924_vm6, %v4574_v41, %v4120_v21 }
 0x7e9   :  { %v4638_v55 = vsel %vm1957_vm8, %v4606_v33, %v4248_v10  ;;  %v5331_v30 = vadd.f32 %v5251_v7, %v5121_v60  ;;  %v10119_v60 = vld [vmem:[#allocation33_spill] sm:$0xff] }
 0x7ea   :  { %v4670_v62 = vsel %vm1990_vm7, %v4638_v55, %v4376_v23 }
 0x7eb   :  { %5688 = vst.msk [vmem:[%s9723_s8 + $0x140] sm:$0xff] %vm1792_vm2, %v5331_v30  ;;  %5609 = vmatmul.msk.f32.gmra.mxu2 %vm2036_vm9, %v4670_v62 }
 0x7ee   :  { %v4854_v31 = vpop.f32.mrf.mxu2 }
 0x7ef   :  { %v4855_v51 = vadd.f32 %v4854_v31, %v8963_v9  ;;  %v3738_v32 = vpop.permute.xlu0 %3737  ;;  %v4380_v4 = vpop.permute.xlu2 %4379 }
 0x7f0   :  { %v4250_v53 = vpop.permute.xlu1 %4249  ;;  %v4511_v6 = vsel %vm1825_vm3, %v4479_v47, %v3738_v32 }
 0x7f1   :  { %5633 = vmatmul.msk.f32.gmra.mxu3 %vm29_vm0, %v4855_v51  ;;  %v4543_v39 = vsel %vm1858_vm4, %v4511_v6, %v3866_v35 }
 0x7f2   :  { %v4575_v45 = vsel %vm1891_vm5, %v4543_v39, %v3994_v20  ;;  %v5257_v20 = vpop.f32.mrf.mxu1  ;;  %v10120_v39 = vld [vmem:[#allocation28_spill] sm:$0xff] }
 0x7f4   :  { %v5044_v42 = vpop.f32.mrf.mxu3 }
 0x7f5   :  { %v5045_v14 = vadd.f32 %v9236_v54, %v5044_v42 }
 0x7f7   :  { %v5122_v12 = vmax.f32 %v5045_v14, 0.0  ;;  %v4122_v19 = vpop.permute.xlu0 %4121  ;;  %v3998_v43 = vpop.permute.xlu2 %3997 }
 0x7f8   :  { %v3868_v56 = vpop.permute.xlu1 %3867  ;;  %v4607_v22 = vsel %vm1924_vm6, %v4575_v45, %v4122_v19 }
 0x7f9   :  { %v4639_v3 = vsel %vm1957_vm8, %v4607_v22, %v4250_v53  ;;  %v5332_v52 = vadd.f32 %v5254_v57, %v5122_v12  ;;  %v3138_v53 = vld [vmem:[#allocation2 + $0x1cf] sm:$0xff] }
 0x7fa   :  { %v4671_v23 = vsel %vm1990_vm7, %v4639_v3, %v4378_v63  ;;  %v4449_v63 = vsel %vm29_vm0, %v3137_v26, %v10118_v59  ;;  %v5260_v62 = vpop.f32.mrf.mxu1  ;;  %v4450_v42 = vsel %vm29_vm0, %v3138_v53, %v10120_v39  ;;  %v10121_v12 = vld [vmem:[#allocation32_spill] sm:$0xff] }
 0x7fb   :  { %5689 = vst.msk [vmem:[%s9723_s8 + $0x148] sm:$0xff] %vm1792_vm2, %v5332_v52  ;;  %5610 = vmatmul.msk.f32.gmra.mxu2 %vm2036_vm9, %v4671_v23  ;;  %v4481_v41 = vsel %vm1792_vm2, %v4449_v63, %v10119_v60  ;;  %v4482_v45 = vsel %vm1792_vm2, %v4450_v42, %v10121_v12 }
 0x7fe   :  { %v4857_v46 = vpop.f32.mrf.mxu2 }
 0x7ff   :  { %v4858_v38 = vadd.f32 %v4857_v46, %v8963_v9  ;;  %v3740_v29 = vpop.permute.xlu0 %3739  ;;  %v4382_v10 = vpop.permute.xlu2 %4381 }
 0x800   :  { %v4252_v18 = vpop.permute.xlu1 %4251  ;;  %v4512_v34 = vsel %vm1825_vm3, %v4480_v58, %v3740_v29 }
 0x801   :  { %5634 = vmatmul.msk.f32.gmra.mxu3 %vm29_vm0, %v4858_v38  ;;  %v4544_v24 = vsel %vm1858_vm4, %v4512_v34, %v3868_v56  ;;  %v3139_v34 = vld [vmem:[#allocation2 + $0x1e7] sm:$0xff] }
 0x802   :  { %v4576_v1 = vsel %vm1891_vm5, %v4544_v24, %v3996_v0  ;;  %v5263_v23 = vpop.f32.mrf.mxu1  ;;  %v10122_v24 = vld [vmem:[#allocation16_spill] sm:$0xff] }
 0x804   :  { %v5047_v11 = vpop.f32.mrf.mxu3 }
 0x805   :  { %v5048_v40 = vadd.f32 %v9236_v54, %v5047_v11  ;;  %v4451_v11 = vsel %vm29_vm0, %v3139_v34, %v10122_v24 }
 0x807   :  { %v5123_v36 = vmax.f32 %v5048_v40, 0.0  ;;  %v4124_v27 = vpop.permute.xlu0 %4123  ;;  %v4000_v25 = vpop.permute.xlu2 %3999 }
 0x808   :  { %v3870_v37 = vpop.permute.xlu1 %3869  ;;  %v4608_v16 = vsel %vm1924_vm6, %v4576_v1, %v4124_v27 }
 0x809   :  { %v4640_v44 = vsel %vm1957_vm8, %v4608_v16, %v4252_v18  ;;  %v5333_v49 = vadd.f32 %v5257_v20, %v5123_v36  ;;  %v10123_v36 = vld [vmem:[#allocation49_spill] sm:$0xff] }
 0x80a   :  { %v4672_v8 = vsel %vm1990_vm7, %v4640_v44, %v4380_v4  ;;  %v4483_v1 = vsel %vm1792_vm2, %v4451_v11, %v10123_v36 }
 0x80b   :  { %5690 = vst.msk [vmem:[%s9723_s8 + $0x150] sm:$0xff] %vm1792_vm2, %v5333_v49  ;;  %5611 = vmatmul.msk.f32.gmra.mxu2 %vm2036_vm9, %v4672_v8 }
 0x80e   :  { %v4860_v50 = vpop.f32.mrf.mxu2 }
 0x80f   :  { %v4861_v15 = vadd.f32 %v4860_v50, %v8963_v9  ;;  %v3742_v7 = vpop.permute.xlu0 %3741  ;;  %v4384_v56 = vpop.permute.xlu2 %4383 }
 0x810   :  { %v4254_v21 = vpop.permute.xlu1 %4253  ;;  %v4513_v35 = vsel %vm1825_vm3, %v4481_v41, %v3742_v7  ;;  %v3140_v41 = vld [vmem:[#allocation2 + $0x1ef] sm:$0xff] }
 0x811   :  { %5635 = vmatmul.msk.f32.gmra.mxu3 %vm29_vm0, %v4861_v15  ;;  %v4545_v33 = vsel %vm1858_vm4, %v4513_v35, %v3870_v37 }
 0x812   :  { %v4577_v61 = vsel %vm1891_vm5, %v4545_v33, %v3998_v43  ;;  %v10124_v33 = vld [vmem:[#allocation9_spill] sm:$0xff] }
 0x814   :  { %v5050_v55 = vpop.f32.mrf.mxu3 }
 0x815   :  { %v5051_v30 = vadd.f32 %v9236_v54, %v5050_v55  ;;  %v4452_v55 = vsel %vm29_vm0, %v3140_v41, %v10124_v33 }
 0x817   :  { %v5124_v31 = vmax.f32 %v5051_v30, 0.0  ;;  %v4126_v13 = vpop.permute.xlu0 %4125  ;;  %v4002_v18 = vpop.permute.xlu2 %4001 }
 0x818   :  { %v3872_v0 = vpop.permute.xlu1 %3871  ;;  %v4609_v51 = vsel %vm1924_vm6, %v4577_v61, %v4126_v13 }
 0x819   :  { %v4641_v32 = vsel %vm1957_vm8, %v4609_v51, %v4254_v21  ;;  %v5334_v28 = vadd.f32 %v5260_v62, %v5124_v31  ;;  %v10125_v31 = vld [vmem:[#allocation48_spill] sm:$0xff] }
 0x81a   :  { %v4673_v47 = vsel %vm1990_vm7, %v4641_v32, %v4382_v10  ;;  %v5266_v10 = vpop.f32.mrf.mxu1  ;;  %v4484_v61 = vsel %vm1792_vm2, %v4452_v55, %v10125_v31 }
 0x81b   :  { %5691 = vst.msk [vmem:[%s9723_s8 + $0x158] sm:$0xff] %vm1792_vm2, %v5334_v28  ;;  %5612 = vmatmul.msk.f32.gmra.mxu2 %vm2036_vm9, %v4673_v47 }
 0x81e   :  { %v4863_v6 = vpop.f32.mrf.mxu2 }
 0x81f   :  { %v4864_v14 = vadd.f32 %v4863_v6, %v8963_v9  ;;  %v3744_v57 = vpop.permute.xlu0 %3743  ;;  %v4386_v49 = vpop.permute.xlu2 %4385 }
 0x820   :  { %v4256_v19 = vpop.permute.xlu1 %4255  ;;  %v4514_v22 = vsel %vm1825_vm3, %v4482_v45, %v3744_v57 }
 0x821   :  { %5636 = vmatmul.msk.f32.gmra.mxu3 %vm29_vm0, %v4864_v14  ;;  %v4546_v4 = vsel %vm1858_vm4, %v4514_v22, %v3872_v0 }
 0x822   :  { %v4578_v46 = vsel %vm1891_vm5, %v4546_v4, %v4000_v25  ;;  %v5269_v28 = vpop.f32.mrf.mxu1 }
 0x824   :  { %v5053_v3 = vpop.f32.mrf.mxu3 }
 0x825   :  { %v5054_v52 = vadd.f32 %v9236_v54, %v5053_v3 }
 0x827   :  { %v5125_v17 = vmax.f32 %v5054_v52, 0.0  ;;  %v4128_v48 = vpop.permute.xlu0 %4127  ;;  %v4004_v30 = vpop.permute.xlu2 %4003 }
 0x828   :  { %v4610_v2 = vsel %vm1924_vm6, %v4578_v46, %v4128_v48  ;;  %v3874_v5 = vpop.permute.xlu1 %3873 }
 0x829   :  { %v4642_v38 = vsel %vm1957_vm8, %v4610_v2, %v4256_v19  ;;  %v5335_v29 = vadd.f32 %v5263_v23, %v5125_v17 }
 0x82a   :  { %v4674_v58 = vsel %vm1990_vm7, %v4642_v38, %v4384_v56  ;;  %v5272_v3 = vpop.f32.mrf.mxu1 }
 0x82b   :  { %5692 = vst.msk [vmem:[%s9723_s8 + $0x160] sm:$0xff] %vm1792_vm2, %v5335_v29  ;;  %5613 = vmatmul.msk.f32.gmra.mxu2 %vm2036_vm9, %v4674_v58 }
 0x82e   :  { %v4866_v43 = vpop.f32.mrf.mxu2 }
 0x82f   :  { %v4867_v40 = vadd.f32 %v4866_v43, %v8963_v9  ;;  %v3746_v20 = vpop.permute.xlu0 %3745  ;;  %v4388_v42 = vpop.permute.xlu2 %4387 }
 0x830   :  { %v4515_v27 = vsel %vm1825_vm3, %v4483_v1, %v3746_v20  ;;  %v4258_v37 = vpop.permute.xlu1 %4257 }
 0x831   :  { %5637 = vmatmul.msk.f32.gmra.mxu3 %vm29_vm0, %v4867_v40  ;;  %v4547_v16 = vsel %vm1858_vm4, %v4515_v27, %v3874_v5 }
 0x832   :  { %v4579_v50 = vsel %vm1891_vm5, %v4547_v16, %v4002_v18  ;;  %v5275_v38 = vpop.f32.mrf.mxu1 }
 0x834   :  { %v5056_v44 = vpop.f32.mrf.mxu3 }
 0x835   :  { %v5057_v8 = vadd.f32 %v9236_v54, %v5056_v44 }
 0x837   :  { %v5126_v26 = vmax.f32 %v5057_v8, 0.0  ;;  %v4130_v59 = vpop.permute.xlu0 %4129 }
 0x838   :  { %v4611_v63 = vsel %vm1924_vm6, %v4579_v50, %v4130_v59  ;;  %v3876_v21 = vpop.permute.xlu1 %3875 }
 0x839   :  { %v4643_v15 = vsel %vm1957_vm8, %v4611_v63, %v4258_v37  ;;  %v5336_v7 = vadd.f32 %v5266_v10, %v5126_v26 }
 0x83a   :  { %v4675_v60 = vsel %vm1990_vm7, %v4643_v15, %v4386_v49  ;;  %v5278_v24 = vpop.f32.mrf.mxu1 }
 0x83b   :  { %5693 = vst.msk [vmem:[%s9723_s8 + $0x168] sm:$0xff] %vm1792_vm2, %v5336_v7  ;;  %5614 = vmatmul.msk.f32.gmra.mxu2 %vm2036_vm9, %v4675_v60 }
 0x83e   :  { %v4869_v35 = vpop.f32.mrf.mxu2 }
 0x83f   :  { %v4870_v62 = vadd.f32 %v4869_v35, %v8963_v9  ;;  %v3748_v25 = vpop.permute.xlu0 %3747 }
 0x840   :  { %v4516_v13 = vsel %vm1825_vm3, %v4484_v61, %v3748_v25  ;;  %v4260_v47 = vpop.permute.xlu1 %4259 }
 0x841   :  { %5638 = vmatmul.msk.f32.gmra.mxu3 %vm29_vm0, %v4870_v62  ;;  %v4548_v0 = vsel %vm1858_vm4, %v4516_v13, %v3876_v21 }
 0x842   :  { %v4580_v6 = vsel %vm1891_vm5, %v4548_v0, %v4004_v30  ;;  %v5281_v37 = vpop.f32.mrf.mxu1 }
 0x844   :  { %v5059_v51 = vpop.f32.mrf.mxu3 }
 0x845   :  { %v5060_v32 = vadd.f32 %v9236_v54, %v5059_v51 }
 0x847   :  { %v5127_v53 = vmax.f32 %v5060_v32, 0.0  ;;  %v4132_v39 = vpop.permute.xlu0 %4131 }
 0x848   :  { %v4612_v14 = vsel %vm1924_vm6, %v4580_v6, %v4132_v39 }
 0x849   :  { %v5337_v57 = vadd.f32 %v5269_v28, %v5127_v53  ;;  %v4644_v12 = vsel %vm1957_vm8, %v4612_v14, %v4260_v47 }
 0x84a   :  { %v4676_v45 = vsel %vm1990_vm7, %v4644_v12, %v4388_v42  ;;  %v5284_v50 = vpop.f32.mrf.mxu1 }
 0x84b   :  { %5694 = vst.msk [vmem:[%s9723_s8 + $0x170] sm:$0xff] %vm1792_vm2, %v5337_v57  ;;  %5615 = vmatmul.msk.f32.gmra.mxu2 %vm2036_vm9, %v4676_v45 }
 0x84e   :  { %v4872_v19 = vpop.f32.mrf.mxu2 }
 0x84f   :  { %v4873_v56 = vadd.f32 %v4872_v19, %v8963_v9 }
 0x851   :  { %5639 = vmatmul.msk.f32.gmra.mxu3 %vm29_vm0, %v4873_v56 }
 0x852   :  { %v5287_v21 = vpop.f32.mrf.mxu1 }
 0x854   :  { %v5062_v22 = vpop.f32.mrf.mxu3 }
 0x855   :  { %v5063_v4 = vadd.f32 %v9236_v54, %v5062_v22 }
 0x857   :  { %v5128_v52 = vmax.f32 %v5063_v4, 0.0 }
 0x859   :  { %v5338_v23 = vadd.f32 %v5272_v3, %v5128_v52 }
 0x85a   :  { %v5290_v31 = vpop.f32.mrf.mxu1 }
 0x85b   :  { %5695 = vst.msk [vmem:[%s9723_s8 + $0x178] sm:$0xff] %vm1792_vm2, %v5338_v23  ;;  %v5831_v23 = vld [vmem:[%s9722_s6] ss:$0 sm:$0xff] }
 0x85e   :  { %v4875_v17 = vpop.f32.mrf.mxu2 }
 0x85f   :  { %v4876_v46 = vadd.f32 %v4875_v17, %v8963_v9 }
 0x861   :  { %5640 = vmatmul.msk.f32.gmra.mxu3 %vm29_vm0, %v4876_v46 }
 0x862   :  { %v5293_v47 = vpop.f32.mrf.mxu1 }
 0x864   :  { %v5065_v48 = vpop.f32.mrf.mxu3 }
 0x865   :  { %v5066_v2 = vadd.f32 %v9236_v54, %v5065_v48 }
 0x867   :  { %v5129_v29 = vmax.f32 %v5066_v2, 0.0 }
 0x869   :  { %v5339_v5 = vadd.f32 %v5275_v38, %v5129_v29 }
 0x86a   :  { %v5296_v12 = vpop.f32.mrf.mxu1 }
 0x86b   :  { %5696 = vst.msk [vmem:[%s9723_s8 + $0x180] sm:$0xff] %vm1792_vm2, %v5339_v5 }
 0x86e   :  { %v4878_v58 = vpop.f32.mrf.mxu2 }
 0x86f   :  { %v4879_v18 = vadd.f32 %v4878_v58, %v8963_v9 }
 0x871   :  { %5641 = vmatmul.msk.f32.gmra.mxu3 %vm29_vm0, %v4879_v18 }
 0x872   :  { %v5299_v4 = vpop.f32.mrf.mxu1 }
 0x874   :  { %v5068_v34 = vpop.f32.mrf.mxu3 }
 0x875   :  { %v5069_v43 = vadd.f32 %v9236_v54, %v5068_v34 }
 0x877   :  { %v5130_v11 = vmax.f32 %v5069_v43, 0.0 }
 0x879   :  { %v5340_v40 = vadd.f32 %v5278_v24, %v5130_v11 }
 0x87a   :  { %v5302_v46 = vpop.f32.mrf.mxu1 }
 0x87b   :  { %5697 = vst.msk [vmem:[%s9723_s8 + $0x188] sm:$0xff] %vm1792_vm2, %v5340_v40 }
 0x87e   :  { %v4881_v20 = vpop.f32.mrf.mxu2 }
 0x87f   :  { %v4882_v36 = vadd.f32 %v4881_v20, %v8963_v9 }
 0x881   :  { %5642 = vmatmul.msk.f32.gmra.mxu3 %vm29_vm0, %v4882_v36 }
 0x882   :  { %v5305_v29 = vpop.f32.mrf.mxu1 }
 0x884   :  { %v5071_v1 = vpop.f32.mrf.mxu3 }
 0x885   :  { %v5072_v27 = vadd.f32 %v9236_v54, %v5071_v1 }
 0x887   :  { %v5131_v16 = vmax.f32 %v5072_v27, 0.0 }
 0x889   :  { %v5341_v44 = vadd.f32 %v5281_v37, %v5131_v16 }
 0x88a   :  { %v5308_v43 = vpop.f32.mrf.mxu1 }
 0x88b   :  { %5698 = vst.msk [vmem:[%s9723_s8 + $0x190] sm:$0xff] %vm1792_vm2, %v5341_v44 }
 0x88e   :  { %v4884_v49 = vpop.f32.mrf.mxu2 }
 0x88f   :  { %v4885_v8 = vadd.f32 %v4884_v49, %v8963_v9 }
 0x891   :  { %5643 = vmatmul.msk.f32.gmra.mxu3 %vm29_vm0, %v4885_v8 }
 0x892   :  { %v5311_v36 = vpop.f32.mrf.mxu1 }
 0x894   :  { %v5074_v10 = vpop.f32.mrf.mxu3 }
 0x895   :  { %v5075_v26 = vadd.f32 %v9236_v54, %v5074_v10 }
 0x897   :  { %v5132_v59 = vmax.f32 %v5075_v26, 0.0 }
 0x899   :  { %v5342_v63 = vadd.f32 %v5284_v50, %v5132_v59 }
 0x89a   :  { %v5314_v44 = vpop.f32.mrf.mxu1 }
 0x89b   :  { %5699 = vst.msk [vmem:[%s9723_s8 + $0x198] sm:$0xff] %vm1792_vm2, %v5342_v63 }
 0x89e   :  { %v4887_v15 = vpop.f32.mrf.mxu2 }
 0x89f   :  { %v4888_v7 = vadd.f32 %v4887_v15, %v8963_v9 }
 0x8a1   :  { %5644 = vmatmul.msk.f32.gmra.mxu3 %vm29_vm0, %v4888_v7 }
 0x8a2   :  { %v5317_v50 = vpop.f32.mrf.mxu1 }
 0x8a4   :  { %v5077_v60 = vpop.f32.mrf.mxu3 }
 0x8a5   :  { %v5078_v41 = vadd.f32 %v9236_v54, %v5077_v60 }
 0x8a7   :  { %v5133_v35 = vmax.f32 %v5078_v41, 0.0 }
 0x8a9   :  { %v5343_v33 = vadd.f32 %v5287_v21, %v5133_v35 }
 0x8aa   :  { %v5320_v60 = vpop.f32.mrf.mxu1 }
 0x8ab   :  { %5700 = vst.msk [vmem:[%s9723_s8 + $0x1a0] sm:$0xff] %vm1792_vm2, %v5343_v33 }
 0x8ae   :  { %v4890_v55 = vpop.f32.mrf.mxu2 }
 0x8af   :  { %v4891_v30 = vadd.f32 %v4890_v55, %v8963_v9 }
 0x8b1   :  { %5645 = vmatmul.msk.f32.gmra.mxu3 %vm29_vm0, %v4891_v30 }
 0x8b4   :  { %v5080_v62 = vpop.f32.mrf.mxu3 }
 0x8b5   :  { %v5081_v25 = vadd.f32 %v9236_v54, %v5080_v62 }
 0x8b7   :  { %v5134_v61 = vmax.f32 %v5081_v25, 0.0 }
 0x8b9   :  { %v5344_v13 = vadd.f32 %v5290_v31, %v5134_v61 }
 0x8bb   :  { %5701 = vst.msk [vmem:[%s9723_s8 + $0x1a8] sm:$0xff] %vm1792_vm2, %v5344_v13 }
 0x8be   :  { %v4893_v0 = vpop.f32.mrf.mxu2 }
 0x8bf   :  { %v4894_v51 = vadd.f32 %v4893_v0, %v8963_v9 }
 0x8c1   :  { %5646 = vmatmul.msk.f32.gmra.mxu3 %vm29_vm0, %v4894_v51 }
 0x8c4   :  { %v5083_v32 = vpop.f32.mrf.mxu3 }
 0x8c5   :  { %v5084_v28 = vadd.f32 %v9236_v54, %v5083_v32 }
 0x8c7   :  { %v5135_v53 = vmax.f32 %v5084_v28, 0.0 }
 0x8c9   :  { %v5345_v6 = vadd.f32 %v5293_v47, %v5135_v53 }
 0x8cb   :  { %5702 = vst.msk [vmem:[%s9723_s8 + $0x1b0] sm:$0xff] %vm1792_vm2, %v5345_v6 }
 0x8ce   :  { %v4896_v39 = vpop.f32.mrf.mxu2 }
 0x8cf   :  { %v4897_v42 = vadd.f32 %v4896_v39, %v8963_v9 }
 0x8d1   :  { %5647 = vmatmul.msk.f32.gmra.mxu3 %vm29_vm0, %v4897_v42 }
 0x8d4   :  { %v5086_v14 = vpop.f32.mrf.mxu3 }
 0x8d5   :  { %v5087_v57 = vadd.f32 %v9236_v54, %v5086_v14 }
 0x8d7   :  { %v5136_v45 = vmax.f32 %v5087_v57, 0.0 }
 0x8d9   :  { %v5346_v19 = vadd.f32 %v5296_v12, %v5136_v45 }
 0x8db   :  { %5703 = vst.msk [vmem:[%s9723_s8 + $0x1b8] sm:$0xff] %vm1792_vm2, %v5346_v19 }
 0x8e4   :  { %v5089_v56 = vpop.f32.mrf.mxu3 }
 0x8e5   :  { %v5090_v22 = vadd.f32 %v9236_v54, %v5089_v56 }
 0x8e7   :  { %v5137_v3 = vmax.f32 %v5090_v22, 0.0 }
 0x8e9   :  { %v5347_v52 = vadd.f32 %v5299_v4, %v5137_v3 }
 0x8eb   :  { %5704 = vst.msk [vmem:[%s9723_s8 + $0x1c0] sm:$0xff] %vm1792_vm2, %v5347_v52 }
 0x8f4   :  { %v5092_v9 = vpop.f32.mrf.mxu3 }
 0x8f5   :  { %v5093_v17 = vadd.f32 %v5831_v23, %v5092_v9 }
 0x8f7   :  { %v5138_v48 = vmax.f32 %v5093_v17, 0.0 }
 0x8f9   :  { %v5348_v2 = vadd.f32 %v5302_v46, %v5138_v48 }
 0x8fb   :  { %5705 = vst.msk [vmem:[%s9723_s8 + $0x1c8] sm:$0xff] %vm1792_vm2, %v5348_v2 }
 0x904   :  { %v5095_v54 = vpop.f32.mrf.mxu3 }
 0x905   :  { %v5096_v38 = vadd.f32 %v5831_v23, %v5095_v54 }
 0x907   :  { %v5139_v5 = vmax.f32 %v5096_v38, 0.0 }
 0x909   :  { %v5349_v58 = vadd.f32 %v5305_v29, %v5139_v5 }
 0x90b   :  { %5706 = vst.msk [vmem:[%s9723_s8 + $0x1d0] sm:$0xff] %vm1792_vm2, %v5349_v58 }
 0x914   :  { %v5098_v18 = vpop.f32.mrf.mxu3 }
 0x915   :  { %v5099_v34 = vadd.f32 %v5831_v23, %v5098_v18 }
 0x917   :  { %v5140_v24 = vmax.f32 %v5099_v34, 0.0 }
 0x919   :  { %v5350_v11 = vadd.f32 %v5308_v43, %v5140_v24 }
 0x91b   :  { %5707 = vst.msk [vmem:[%s9723_s8 + $0x1d8] sm:$0xff] %vm1792_vm2, %v5350_v11 }
 0x924   :  { %v5101_v40 = vpop.f32.mrf.mxu3 }
 0x925   :  { %v5102_v20 = vadd.f32 %v5831_v23, %v5101_v40 }
 0x927   :  { %v5141_v1 = vmax.f32 %v5102_v20, 0.0 }
 0x929   :  { %v5351_v27 = vadd.f32 %v5311_v36, %v5141_v1 }
 0x92b   :  { %5708 = vst.msk [vmem:[%s9723_s8 + $0x1e0] sm:$0xff] %vm1792_vm2, %v5351_v27 }
 0x934   :  { %v5104_v37 = vpop.f32.mrf.mxu3 }
 0x935   :  { %v5105_v16 = vadd.f32 %v5831_v23, %v5104_v37 }
 0x937   :  { %v5142_v49 = vmax.f32 %v5105_v16, 0.0 }
 0x939   :  { %v5352_v8 = vadd.f32 %v5314_v44, %v5142_v49 }
 0x93b   :  { %5709 = vst.msk [vmem:[%s9723_s8 + $0x1e8] sm:$0xff] %vm1792_vm2, %v5352_v8 }
 0x944   :  { %v5107_v10 = vpop.f32.mrf.mxu3 }
 0x945   :  { %v5108_v26 = vadd.f32 %v5831_v23, %v5107_v10 }
 0x947   :  { %v5143_v59 = vmax.f32 %v5108_v26, 0.0 }
 0x949   :  { %v5353_v63 = vadd.f32 %v5317_v50, %v5143_v59 }
 0x94b   :  { %5710 = vst.msk [vmem:[%s9723_s8 + $0x1f0] sm:$0xff] %vm1792_vm2, %v5353_v63 }
 0x954   :  { %v5110_v15 = vpop.f32.mrf.mxu3 }
 0x955   :  { %v5111_v7 = vadd.f32 %v5831_v23, %v5110_v15 }
 0x957   :  { %v5144_v41 = vmax.f32 %v5111_v7, 0.0 }
 0x959   :  { %v5354_v21 = vadd.f32 %v5320_v60, %v5144_v41 }
 0x95b   :  { %5711 = vst.msk [vmem:[%s9723_s8 + $0x1f8] sm:$0xff] %vm1792_vm2, %v5354_v21 }

</bundles_post_ra>
